<compile_context>
chip_gen: v6e
topology: v6e:2x2x1
jax: 0.10.0
libtpu: 0.0.40
codegen_flags: <defaults>
</compile_context>

<pallas_src>
import jax
import jax.numpy as jnp
from jax import lax
from jax.experimental import pallas as pl
from jax.experimental.pallas import tpu as pltpu
import functools

# `n_classes` is a free symbol in the reference module; fix it deterministically here.
N_CLASSES = 10

IN_FEATURES = 4113   # fc1 input
H1 = 1024            # fc1 output
H2 = 128             # fc2 output

# Padded / tiled sizes (lane/sublane friendly).
K_PAD = 4352         # 34 * 128, zero-padded contraction dim for fc1
N_PAD = 128          # padded class dim (>= N_CLASSES, multiple of 128)
B_TILE = 16          # batch tile (multiple of 16 sublanes for bf16 x)


def _wavnet_kernel(x_ref, w1_ref, s1_ref, b1_ref, w2_ref, b2_ref, w3_ref, b3_ref,
                   o_ref, *, n_classes):
    # fc1: int8 W1 dequantized to bf16 (VPU), full-K contraction on the MXU with f32
    # accumulation; per-column quant scale folded into the bias+ReLU epilogue.
    acc = jnp.dot(x_ref[...], w1_ref[...].astype(jnp.bfloat16),
                  preferred_element_type=jnp.float32)
    h1 = jnp.maximum(acc * s1_ref[...] + b1_ref[...], 0.0)

    # fc2 + ReLU (bf16 x bf16 -> f32 accumulate, single MXU pass).
    h2 = jnp.dot(h1.astype(jnp.bfloat16), w2_ref[...],
                 preferred_element_type=jnp.float32) + b2_ref[...]
    h2 = jnp.maximum(h2, 0.0)

    # fc3 (tiny, keep f32 for logit precision).
    logits = jnp.dot(h2, w3_ref[...], preferred_element_type=jnp.float32) + b3_ref[...]

    # Mask padded class columns so they don't participate in the softmax.
    col = lax.broadcasted_iota(jnp.int32, logits.shape, 1)
    logits = jnp.where(col < n_classes, logits, jnp.finfo(logits.dtype).min)

    # Softmax over dim=1 (exact normalization: rows sum to 1 within f32 rounding).
    m = jnp.max(logits, axis=-1, keepdims=True)
    e = jnp.exp(logits - m)
    s = jnp.sum(e, axis=-1, keepdims=True)
    o_ref[...] = (e / s).astype(o_ref.dtype)


def prepare_params(params):
    """One-time weight prep: layout check, zero-pad, int8-quantize W1, bf16 W2.

    Call once at init; the per-call forward path only pads/casts the (small) input.
    """
    w1, b1, w2, b2, w3, b3 = params
    assert w1.shape == (IN_FEATURES, H1), "w1 must be (in, out) = (4113, 1024)"
    assert w2.shape == (H1, H2)
    assert w3.shape == (H2, N_CLASSES)

    # Symmetric per-output-column int8 quantization of W1.
    amax = jnp.max(jnp.abs(w1.astype(jnp.float32)), axis=0)          # (H1,)
    scale = jnp.where(amax > 0, amax / 127.0, 1.0)                   # (H1,)
    q = jnp.clip(jnp.round(w1.astype(jnp.float32) / scale), -127, 127).astype(jnp.int8)
    w1q = jnp.zeros((K_PAD, H1), jnp.int8).at[:IN_FEATURES, :].set(q)
    s1 = scale.reshape(1, H1).astype(jnp.float32)

    b1p = b1.reshape(1, H1).astype(jnp.float32)
    w2p = w2.astype(jnp.bfloat16)
    b2p = b2.reshape(1, H2).astype(jnp.float32)
    w3p = (jnp.zeros((H2, N_PAD), jnp.float32)
           .at[:, :N_CLASSES].set(w3.astype(jnp.float32)))
    b3p = (jnp.zeros((1, N_PAD), jnp.float32)
           .at[:, :N_CLASSES].set(b3.astype(jnp.float32)))
    return (w1q, s1, b1p, w2p, b2p, w3p, b3p)


@jax.jit
def _wavnet_forward_padded(xp, prepared):
    w1q, s1, b1p, w2p, b2p, w3p, b3p = prepared
    n_b = xp.shape[0] // B_TILE
    return pl.pallas_call(
        functools.partial(_wavnet_kernel, n_classes=N_CLASSES),
        out_shape=jax.ShapeDtypeStruct((xp.shape[0], N_PAD), jnp.float32),
        grid_spec=pltpu.PrefetchScalarGridSpec(
            num_scalar_prefetch=0,
            grid=(n_b,),
            in_specs=[
                pl.BlockSpec((B_TILE, K_PAD), lambda b: (b, 0)),   # x tile (bf16)
                pl.BlockSpec((K_PAD, H1), lambda b: (0, 0)),       # W1 (int8, resident)
                pl.BlockSpec((1, H1), lambda b: (0, 0)),           # W1 column scales
                pl.BlockSpec((1, H1), lambda b: (0, 0)),           # b1
                pl.BlockSpec((H1, H2), lambda b: (0, 0)),          # W2 (bf16, resident)
                pl.BlockSpec((1, H2), lambda b: (0, 0)),           # b2
                pl.BlockSpec((H2, N_PAD), lambda b: (0, 0)),       # W3 (resident)
                pl.BlockSpec((1, N_PAD), lambda b: (0, 0)),        # b3
            ],
            out_specs=pl.BlockSpec((B_TILE, N_PAD), lambda b: (b, 0)),
        ),
        compiler_params=pltpu.CompilerParams(
            dimension_semantics=("parallel",),     # batch tiles shard across TCs on v7x
            vmem_limit_bytes=40 << 20,             # real footprint ~18 MiB (incl. bf16
        ),                                         # dequant temp); safe on v5e/v6e/v7x
    )(xp, w1q, s1, b1p, w2p, b2p, w3p, b3p)


def wavnet_forward(x, prepared):
    """x: (B, ...) (or [transformed_x, x] like the PyTorch forward) -> (B, N_CLASSES)."""
    if isinstance(x, (list, tuple)):
        x = x[0]
    B = x.shape[0]
    x2d = x.reshape(B, -1)
    assert x2d.shape[1] == IN_FEATURES
    n_b = -(-B // B_TILE)
    xp = jnp.pad(x2d.astype(jnp.bfloat16),
                 ((0, n_b * B_TILE - B), (0, K_PAD - IN_FEATURES)))
    out = _wavnet_forward_padded(xp, prepared)
    return out[:B, :N_CLASSES]


def init_params(key):
    """Deterministic init mimicking nn.Linear's uniform(-1/sqrt(fan_in), +1/sqrt(fan_in))."""
    def linear(key, fan_in, fan_out):
        kw, kb = jax.random.split(key)
        bound = 1.0 / jnp.sqrt(jnp.float32(fan_in))
        w = jax.random.uniform(kw, (fan_in, fan_out), jnp.float32, -bound, bound)
        b = jax.random.uniform(kb, (fan_out,), jnp.float32, -bound, bound)
        return w, b

    k1, k2, k3 = jax.random.split(key, 3)
    w1, b1 = linear(k1, IN_FEATURES, H1)
    w2, b2 = linear(k2, H1, H2)
    w3, b3 = linear(k3, H2, N_CLASSES)
    return (w1, b1, w2, b2, w3, b3)


def wavnet_reference(x, params):
    """Plain-JAX f32 reference of the PyTorch forward."""
    w1, b1, w2, b2, w3, b3 = params
    h = x.reshape(x.shape[0], -1).astype(jnp.float32)
    h = jax.nn.relu(h @ w1 + b1)
    h = jax.nn.relu(h @ w2 + b2)
    return jax.nn.softmax(h @ w3 + b3, axis=1)


if __name__ == "__main__":
    key = jax.random.PRNGKey(0)
    kp, kx = jax.random.split(key)
    params = init_params(kp)
    prepared = prepare_params(params)   # one-time pad + int8/bf16 cast (outside hot path)

    # Raw input shaped like a small "transformed" feature tensor; forward flattens
    # everything past the batch dim: 3 * 1371 = 4113 features.
    x = jax.random.normal(kx, (2, 3, 1371), jnp.float32)

    out = jax.block_until_ready(wavnet_forward(x, prepared))
    ref = jax.block_until_ready(wavnet_reference(x, params))

    assert out.shape == (2, N_CLASSES)
    # Exact softmax normalization -> row sums are 1 to f32 rounding.
    assert jnp.allclose(jnp.sum(out, axis=1), 1.0, atol=1e-3)
    # int8 W1 + bf16 x/W2 storage -> relaxed tolerance vs. the f32 reference.
    assert jnp.allclose(out, ref, atol=2e-2)
    print("KERNEL_OK")
</pallas_src>

<mosaic_0001>
module attributes {stable_mosaic.version = 11 : i64} {
  func.func @_wavnet_kernel(%arg0: i32, %arg1: memref<16x4352xbf16, #tpu.memory_space<vmem>>, %arg2: memref<4352x1024xi8, #tpu.memory_space<vmem>>, %arg3: memref<1x1024xf32, #tpu.memory_space<vmem>>, %arg4: memref<1x1024xf32, #tpu.memory_space<vmem>>, %arg5: memref<1024x128xbf16, #tpu.memory_space<vmem>>, %arg6: memref<1x128xf32, #tpu.memory_space<vmem>>, %arg7: memref<128x128xf32, #tpu.memory_space<vmem>>, %arg8: memref<1x128xf32, #tpu.memory_space<vmem>>, %arg9: memref<16x128xf32, #tpu.memory_space<vmem>>) attributes {dimension_semantics = [#tpu.dimension_semantics<parallel>], iteration_bounds = array<i64: 1>, scalar_prefetch = 0 : i64, scratch_operands = 0 : i64, tpu.core_type = #tpu.core_type<tc>, window_params = [{transform_indices = @transform_0, window_bounds = array<i64: 16, 4352>}, {pipeline_mode = #tpu.pipeline_mode<synchronous>, transform_indices = @transform_1, window_bounds = array<i64: 4352, 1024>}, {pipeline_mode = #tpu.pipeline_mode<synchronous>, transform_indices = @transform_2, window_bounds = array<i64: 1, 1024>}, {pipeline_mode = #tpu.pipeline_mode<synchronous>, transform_indices = @transform_3, window_bounds = array<i64: 1, 1024>}, {pipeline_mode = #tpu.pipeline_mode<synchronous>, transform_indices = @transform_4, window_bounds = array<i64: 1024, 128>}, {pipeline_mode = #tpu.pipeline_mode<synchronous>, transform_indices = @transform_5, window_bounds = array<i64: 1, 128>}, {pipeline_mode = #tpu.pipeline_mode<synchronous>, transform_indices = @transform_6, window_bounds = array<i64: 128, 128>}, {pipeline_mode = #tpu.pipeline_mode<synchronous>, transform_indices = @transform_7, window_bounds = array<i64: 1, 128>}, {transform_indices = @transform_8, window_bounds = array<i64: 16, 128>}]} {
    %c0 = arith.constant 0 : index
    %c0_0 = arith.constant 0 : index
    %0 = vector.load %arg1[%c0, %c0_0] : memref<16x4352xbf16, #tpu.memory_space<vmem>>, vector<16x4352xbf16>
    %c0_1 = arith.constant 0 : index
    %c0_2 = arith.constant 0 : index
    %1 = vector.load %arg2[%c0_1, %c0_2] : memref<4352x1024xi8, #tpu.memory_space<vmem>>, vector<4352x1024xi8>
    %2 = arith.sitofp %1 : vector<4352x1024xi8> to vector<4352x1024xbf16>
    %cst = arith.constant dense<0.000000e+00> : vector<16x1024xf32>
    %3 = tpu.matmul %0, %2, %cst {dimension_numbers = #tpu.dot_dimension_numbers<[1], [0], [0], [1], [0, 0, 1, 1], [], []>} : vector<16x4352xbf16>, vector<4352x1024xbf16>, vector<16x1024xf32> -> vector<16x1024xf32>
    %c0_3 = arith.constant 0 : index
    %c0_4 = arith.constant 0 : index
    %4 = vector.load %arg3[%c0_3, %c0_4] : memref<1x1024xf32, #tpu.memory_space<vmem>>, vector<1x1024xf32>
    %5 = vector.broadcast %4 : vector<1x1024xf32> to vector<16x1024xf32>
    %6 = arith.mulf %3, %5 : vector<16x1024xf32>
    %c0_5 = arith.constant 0 : index
    %c0_6 = arith.constant 0 : index
    %7 = vector.load %arg4[%c0_5, %c0_6] : memref<1x1024xf32, #tpu.memory_space<vmem>>, vector<1x1024xf32>
    %8 = vector.broadcast %7 : vector<1x1024xf32> to vector<16x1024xf32>
    %9 = arith.addf %6, %8 : vector<16x1024xf32>
    %cst_7 = arith.constant 0.000000e+00 : f32
    %10 = vector.broadcast %cst_7 : f32 to vector<16x1024xf32>
    %11 = arith.maximumf %9, %10 : vector<16x1024xf32>
    %12 = arith.truncf %11 : vector<16x1024xf32> to vector<16x1024xbf16>
    %c0_8 = arith.constant 0 : index
    %c0_9 = arith.constant 0 : index
    %13 = vector.load %arg5[%c0_8, %c0_9] : memref<1024x128xbf16, #tpu.memory_space<vmem>>, vector<1024x128xbf16>
    %cst_10 = arith.constant dense<0.000000e+00> : vector<16x128xf32>
    %14 = tpu.matmul %12, %13, %cst_10 {dimension_numbers = #tpu.dot_dimension_numbers<[1], [0], [0], [1], [0, 0, 1, 1], [], []>} : vector<16x1024xbf16>, vector<1024x128xbf16>, vector<16x128xf32> -> vector<16x128xf32>
    %c0_11 = arith.constant 0 : index
    %c0_12 = arith.constant 0 : index
    %15 = vector.load %arg6[%c0_11, %c0_12] : memref<1x128xf32, #tpu.memory_space<vmem>>, vector<1x128xf32>
    %16 = vector.broadcast %15 : vector<1x128xf32> to vector<16x128xf32>
    %17 = arith.addf %14, %16 : vector<16x128xf32>
    %cst_13 = arith.constant 0.000000e+00 : f32
    %18 = vector.broadcast %cst_13 : f32 to vector<16x128xf32>
    %19 = arith.maximumf %17, %18 : vector<16x128xf32>
    %c0_14 = arith.constant 0 : index
    %c0_15 = arith.constant 0 : index
    %20 = vector.load %arg7[%c0_14, %c0_15] : memref<128x128xf32, #tpu.memory_space<vmem>>, vector<128x128xf32>
    %cst_16 = arith.constant dense<0.000000e+00> : vector<16x128xf32>
    %21 = tpu.matmul %19, %20, %cst_16 {dimension_numbers = #tpu.dot_dimension_numbers<[1], [0], [0], [1], [0, 0, 1, 1], [], []>} : vector<16x128xf32>, vector<128x128xf32>, vector<16x128xf32> -> vector<16x128xf32>
    %c0_17 = arith.constant 0 : index
    %c0_18 = arith.constant 0 : index
    %22 = vector.load %arg8[%c0_17, %c0_18] : memref<1x128xf32, #tpu.memory_space<vmem>>, vector<1x128xf32>
    %23 = vector.broadcast %22 : vector<1x128xf32> to vector<16x128xf32>
    %24 = arith.addf %21, %23 : vector<16x128xf32>
    %25 = tpu.iota {dimensions = array<i32: 1>} : vector<16x128xi32>
    %c10_i32 = arith.constant 10 : i32
    %26 = vector.broadcast %c10_i32 : i32 to vector<16x128xi32>
    %27 = arith.cmpi slt, %25, %26 : vector<16x128xi32>
    %cst_19 = arith.constant -3.40282347E+38 : f32
    %28 = vector.broadcast %cst_19 : f32 to vector<16x128xf32>
    %29 = arith.select %27, %24, %28 : vector<16x128xi1>, vector<16x128xf32>
    %cst_20 = arith.constant dense<0xFF800000> : vector<16xf32>
    %30 = vector.multi_reduction <maximumf>, %29, %cst_20 [1] : vector<16x128xf32> to vector<16xf32>
    %31 = vector.shape_cast %30 : vector<16xf32> to vector<16x1xf32>
    %32 = vector.broadcast %31 : vector<16x1xf32> to vector<16x128xf32>
    %33 = arith.subf %29, %32 : vector<16x128xf32>
    %34 = math.exp %33 : vector<16x128xf32>
    %cst_21 = arith.constant dense<0.000000e+00> : vector<16xf32>
    %35 = vector.multi_reduction <add>, %34, %cst_21 [1] : vector<16x128xf32> to vector<16xf32>
    %36 = vector.shape_cast %35 : vector<16xf32> to vector<16x1xf32>
    %37 = vector.broadcast %36 : vector<16x1xf32> to vector<16x128xf32>
    %38 = arith.divf %34, %37 : vector<16x128xf32>
    %c0_22 = arith.constant 0 : index
    %c0_23 = arith.constant 0 : index
    %39 = vector.load %arg9[%c0_22, %c0_23] : memref<16x128xf32, #tpu.memory_space<vmem>>, vector<16x128xf32>
    tpu.vector_store %arg9[%c0_22, %c0_23], %38 {strides = array<i32>} : memref<16x128xf32, #tpu.memory_space<vmem>>, vector<16x128xf32>,
    return
  }
  func.func @transform_0(%arg0: i32) -> (i32, i32) {
    %c0_i32 = arith.constant 0 : i32
    %c0_i32_0 = arith.constant 0 : i32
    return %arg0, %c0_i32 : i32, i32
  }
  func.func @transform_1(%arg0: i32) -> (i32, i32) {
    %c0_i32 = arith.constant 0 : i32
    %c0_i32_0 = arith.constant 0 : i32
    %c0_i32_1 = arith.constant 0 : i32
    return %c0_i32, %c0_i32_0 : i32, i32
  }
  func.func @transform_2(%arg0: i32) -> (i32, i32) {
    %c0_i32 = arith.constant 0 : i32
    %c0_i32_0 = arith.constant 0 : i32
    %c0_i32_1 = arith.constant 0 : i32
    return %c0_i32, %c0_i32_0 : i32, i32
  }
  func.func @transform_3(%arg0: i32) -> (i32, i32) {
    %c0_i32 = arith.constant 0 : i32
    %c0_i32_0 = arith.constant 0 : i32
    %c0_i32_1 = arith.constant 0 : i32
    return %c0_i32, %c0_i32_0 : i32, i32
  }
  func.func @transform_4(%arg0: i32) -> (i32, i32) {
    %c0_i32 = arith.constant 0 : i32
    %c0_i32_0 = arith.constant 0 : i32
    %c0_i32_1 = arith.constant 0 : i32
    return %c0_i32, %c0_i32_0 : i32, i32
  }
  func.func @transform_5(%arg0: i32) -> (i32, i32) {
    %c0_i32 = arith.constant 0 : i32
    %c0_i32_0 = arith.constant 0 : i32
    %c0_i32_1 = arith.constant 0 : i32
    return %c0_i32, %c0_i32_0 : i32, i32
  }
  func.func @transform_6(%arg0: i32) -> (i32, i32) {
    %c0_i32 = arith.constant 0 : i32
    %c0_i32_0 = arith.constant 0 : i32
    %c0_i32_1 = arith.constant 0 : i32
    return %c0_i32, %c0_i32_0 : i32, i32
  }
  func.func @transform_7(%arg0: i32) -> (i32, i32) {
    %c0_i32 = arith.constant 0 : i32
    %c0_i32_0 = arith.constant 0 : i32
    %c0_i32_1 = arith.constant 0 : i32
    return %c0_i32, %c0_i32_0 : i32, i32
  }
  func.func @transform_8(%arg0: i32) -> (i32, i32) {
    %c0_i32 = arith.constant 0 : i32
    %c0_i32_0 = arith.constant 0 : i32
    return %arg0, %c0_i32 : i32, i32
  }
}

</mosaic_0001>

<bundles_post_ra>
// kernel: _wavnet_forward_padded.1
= control target key start
LH: loop header
LB: loop body
LE: loop exit
PB: predicated region body
PF: predicated region fallthrough
CT: control target
= control target key end

     0   :  { %13 = vsyncpa [#allocation3], 0  ;;  %s8801_s0 = inlined_call_operand.hbm [shape: bf16[16,4352], index: 0, kind: input, shape index: {}]   ;;  %s8802_s1 = inlined_call_operand.hbm [shape: s8[4352,1024], index: 1, kind: input, shape index: {}]   ;;  %s8803_s2 = inlined_call_operand.hbm [shape: f32[1,1024], index: 2, kind: input, shape index: {}]   ;;  %s8804_s3 = inlined_call_operand.hbm [shape: f32[1,1024], index: 3, kind: input, shape index: {}]   ;;  %s8805_s4 = inlined_call_operand.hbm [shape: bf16[1024,128], index: 4, kind: input, shape index: {}]   ;;  %s8806_s5 = inlined_call_operand.hbm [shape: f32[1,128], index: 5, kind: input, shape index: {}]   ;;  %s8807_s6 = inlined_call_operand.hbm [shape: f32[128,128], index: 6, kind: input, shape index: {}]   ;;  %s8808_s7 = inlined_call_operand.hbm [shape: f32[1,128], index: 7, kind: input, shape index: {}]   ;;  %s8809_s8 = inlined_call_operand.hbm [shape: f32[16,128], index: 8, kind: output, shape index: {}]  }
   0x1   :  { %14 = vsyncpa [#allocation6], 0 }
   0x2   :  { %15 = vsyncpa [#allocation9], 0 }
   0x3   :  { %16 = vsyncpa [#allocation12], 0 }
   0x4   :  { %17 = vsyncpa [#allocation15], 0 }
   0x5   :  { %18 = vsyncpa [#allocation4], 0  ;;  %s8173_s27 = smov [#allocation5]  }
   0x6   :  { %s36_s28 = sshll.u32 %s8173_s27, 4  ;;  %s37_s28 = int_to_ptr.vmem [resolvable:$true] %s36_s28 }
   0x7   :  { %s7989_s29 = scalar_lea.vmem %s37_s28, 139264  ;;  %p7994_p1 = scmp.lt.s32.totalorder %s37_s28, %s37_s28 }
   0x8   :  { %p7990_p0 = scmp.ne.s32.totalorder %s37_s28, %s7989_s29  ;;  %p7995_p2 = scmp.lt.s32.totalorder %s7989_s29, %s7989_s29 }
   0xa   :  { %p7996_p3 = por %p7995_p2, %p7994_p1 }
   0xc   :  { %p7997_p4 = pnand %p7996_p3, %p7990_p0 }
   0xe   :  { %8000 = shalt.err (!%p7997_p4)
}
   0xf   :  { %s8174_s30 = smov 1024   ;;  %s8175_s9 = smov 64  }
  0x10   :  { %42 = dma.hbm_to_vmem [thread:$0]  %s8802_s1, 139264, %s37_s28, [#allocation6], %s8174_s30, %s8174_s30, %s8175_s9  }
  0x11   :  { %s8176_s12 = smov [#allocation8]   ;;  %s8177_s14 = smov [#allocation11]  }
  0x12   :  { %s59_s13 = sshll.u32 %s8176_s12, 4  ;;  %s81_s15 = sshll.u32 %s8177_s14, 4  ;;  %s60_s13 = int_to_ptr.vmem [resolvable:$true] %s59_s13  ;;  %s82_s15 = int_to_ptr.vmem [resolvable:$true] %s81_s15 }
  0x13   :  { %s8009_s16 = scalar_lea.vmem %s60_s13, 128  ;;  %p8014_p6 = scmp.lt.s32.totalorder %s60_s13, %s60_s13 }
  0x14   :  { %p8010_p5 = scmp.ne.s32.totalorder %s60_s13, %s8009_s16  ;;  %p8015_p7 = scmp.lt.s32.totalorder %s8009_s16, %s8009_s16 }
  0x16   :  { %p8016_p8 = por %p8015_p7, %p8014_p6 }
  0x18   :  { %p8017_p9 = pnand %p8016_p8, %p8010_p5 }
  0x1a   :  { %8020 = shalt.err (!%p8017_p9)
}
  0x1b   :  { %62 = dma.hbm_to_vmem [thread:$0]  %s8804_s3, 128, %s60_s13, [#allocation9]  }
  0x1c   :  { %s8029_s19 = scalar_lea.vmem %s82_s15, 16  ;;  %s8033_s1 = scalar_lea.vmem %s82_s15, 32 }
  0x1d   :  { %p8030_p10 = scmp.ne.s32.totalorder %s82_s15, %s8029_s19  ;;  %p8034_p11 = scmp.lt.s32.totalorder %s82_s15, %s82_s15 }
  0x1e   :  { %p8035_p12 = scmp.lt.s32.totalorder %s8033_s1, %s8029_s19 }
  0x20   :  { %p8036_p13 = por %p8035_p12, %p8034_p11 }
  0x22   :  { %p8037_p0 = pnand %p8036_p13, %p8030_p10 }
  0x24   :  { %8040 = shalt.err (!%p8037_p0)
}
  0x25   :  { %84 = dma.hbm_to_vmem [thread:$0]  %s8806_s5, 16, %s82_s15, [#allocation12]  }
  0x26   :  { %s8178_s22 = smov [#allocation2]  }
  0x27   :  { %s24_s23 = sshll.u32 %s8178_s22, 4  ;;  %s25_s23 = int_to_ptr.vmem [resolvable:$true] %s24_s23 }
  0x28   :  { %s8049_s24 = scalar_lea.vmem %s25_s23, 4352  ;;  %p8054_p2 = scmp.lt.s32.totalorder %s25_s23, %s25_s23 }
  0x29   :  { %p8050_p1 = scmp.ne.s32.totalorder %s25_s23, %s8049_s24  ;;  %p8055_p3 = scmp.lt.s32.totalorder %s8049_s24, %s8049_s24 }
  0x2b   :  { %p8056_p4 = por %p8055_p3, %p8054_p2 }
  0x2d   :  { %p8057_p5 = pnand %p8056_p4, %p8050_p1 }
  0x2f   :  { %8060 = shalt.err (!%p8057_p5)
}
  0x30   :  { %s8179_s3 = smov 2176   ;;  %s8180_s25 = smov 136  }
  0x31   :  { %30 = dma.hbm_to_vmem [thread:$0]  %s8801_s0, 4352, %s25_s23, [#allocation3], %s8179_s3, %s8179_s3, %s8180_s25  }
  0x32   :  { %s8181_s28 = smov [#allocation7]   ;;  %s8182_s30 = smov [#allocation10]  }
  0x33   :  { %s49_s29 = sshll.u32 %s8181_s28, 4  ;;  %s68_s5 = sshll.u32 %s8182_s30, 4  ;;  %s50_s29 = int_to_ptr.vmem [resolvable:$true] %s49_s29  ;;  %s69_s5 = int_to_ptr.vmem [resolvable:$true] %s68_s5 }
  0x34   :  { %s8069_s10 = scalar_lea.vmem %s50_s29, 128  ;;  %p8074_p7 = scmp.lt.s32.totalorder %s50_s29, %s50_s29 }
  0x35   :  { %p8070_p6 = scmp.ne.s32.totalorder %s50_s29, %s8069_s10  ;;  %p8075_p8 = scmp.lt.s32.totalorder %s8069_s10, %s8069_s10 }
  0x37   :  { %p8076_p9 = por %p8075_p8, %p8074_p7 }
  0x39   :  { %p8077_p10 = pnand %p8076_p9, %p8070_p6 }
  0x3b   :  { %8080 = shalt.err (!%p8077_p10)
}
  0x3c   :  { %52 = dma.hbm_to_vmem [thread:$0]  %s8803_s2, 128, %s50_s29, [#allocation6]  }
  0x3d   :  { %s8089_s13 = scalar_lea.vmem %s69_s5, 8192  ;;  %p8094_p12 = scmp.lt.s32.totalorder %s69_s5, %s69_s5 }
  0x3e   :  { %p8090_p11 = scmp.ne.s32.totalorder %s69_s5, %s8089_s13  ;;  %p8095_p13 = scmp.lt.s32.totalorder %s8089_s13, %s8089_s13 }
  0x40   :  { %p8096_p0 = por %p8095_p13, %p8094_p12 }
  0x42   :  { %p8097_p1 = pnand %p8096_p0, %p8090_p11 }
  0x44   :  { %8100 = shalt.err (!%p8097_p1)
}
  0x45   :  { %s8183_s0 = smov 4   ;;  %s8184_s16 = smov [#allocation13]  }
  0x46   :  { %74 = dma.hbm_to_vmem [thread:$0]  %s8805_s4, 8192, %s69_s5, [#allocation9], %s8175_s9, %s8175_s9, %s8183_s0  }
  0x47   :  { %s90_s17 = sshll.u32 %s8184_s16, 4  ;;  %s91_s17 = int_to_ptr.vmem [resolvable:$true] %s90_s17 }
  0x48   :  { %s8109_s18 = scalar_lea.vmem %s91_s17, 2048  ;;  %p8114_p3 = scmp.lt.s32.totalorder %s91_s17, %s91_s17 }
  0x49   :  { %p8110_p2 = scmp.ne.s32.totalorder %s91_s17, %s8109_s18  ;;  %p8115_p4 = scmp.lt.s32.totalorder %s8109_s18, %s8109_s18 }
  0x4b   :  { %p8116_p5 = por %p8115_p4, %p8114_p3 }
  0x4d   :  { %p8117_p6 = pnand %p8116_p5, %p8110_p2 }
  0x4f   :  { %8120 = shalt.err (!%p8117_p6)
}
  0x50   :  { %s8185_s2 = smov 128   ;;  %s8186_s19 = smov 8  }
  0x51   :  { %96 = dma.hbm_to_vmem [thread:$0]  %s8807_s6, 2048, %s91_s17, [#allocation12], %s8185_s2, %s8185_s2, %s8186_s19  }
  0x52   :  { %s8187_s4 = smov [#allocation14]  }
  0x53   :  { %s103_s9 = sshll.u32 %s8187_s4, 4  ;;  %s104_s9 = int_to_ptr.vmem [resolvable:$true] %s103_s9 }
  0x54   :  { %s8129_s21 = scalar_lea.vmem %s104_s9, 16  ;;  %s8133_s22 = scalar_lea.vmem %s104_s9, 32 }
  0x55   :  { %p8130_p7 = scmp.ne.s32.totalorder %s104_s9, %s8129_s21  ;;  %p8134_p8 = scmp.lt.s32.totalorder %s104_s9, %s104_s9 }
  0x56   :  { %p8135_p9 = scmp.lt.s32.totalorder %s8133_s22, %s8129_s21 }
  0x58   :  { %p8136_p10 = por %p8135_p9, %p8134_p8 }
  0x5a   :  { %p8137_p11 = pnand %p8136_p10, %p8130_p7 }
  0x5c   :  { %8140 = shalt.err (!%p8137_p11)
}
  0x5d   :  { %106 = dma.hbm_to_vmem [thread:$0]  %s8808_s7, 16, %s104_s9, [#allocation15]  }
  0x5e   :  { %8161 = dma.done.wait [#allocation3], 4352  }
  0x5f   :  { %8162 = vsyncadd [#allocation3], 4294962944 }
  0x60   :  { %8163 = dma.done.wait [#allocation6], 139392  }
  0x61   :  { %8164 = vsyncadd [#allocation6], 4294827904 }
  0x62   :  { %8165 = dma.done.wait [#allocation9], 8320  }
  0x63   :  { %8166 = vsyncadd [#allocation9], 4294958976 }
  0x64   :  { %8167 = dma.done.wait [#allocation12], 2064  }
  0x65   :  { %8168 = vsyncadd [#allocation12], 4294965232 }
  0x66   :  { %8169 = dma.done.wait [#allocation15], 16  }
  0x67   :  { %8170 = vsyncadd [#allocation15], 4294967280  ;;  %v191_v0 = vld [vmem:[#allocation5 + $0xc8] sm:$0xff]  ;;  %v190_v2 = vld [vmem:[#allocation5 + $0xc0] sm:$0xff]  ;;  %s8188_s6 = smov [#allocation16]  }
  0x68   :  { %v255_v1 = vld [vmem:[#allocation5 + $0x2c8] sm:$0xff]  ;;  %v1303_v3 = vunpack.c.l.s8.bf16 %v191_v0  ;;  %v1311_v4 = vunpack.c.h.s8.bf16 %v191_v0  ;;  %v254_v7 = vld [vmem:[#allocation5 + $0x2c0] sm:$0xff]  ;;  %v1310_v8 = vunpack.c.h.s8.bf16 %v190_v2  ;;  %v1302_v12 = vunpack.c.l.s8.bf16 %v190_v2  ;;  %v7750_v24 = vld [vmem:[#allocation2 + $0x4] ss:$136 sps:$4 sm:$0xff]   ;;  %s7477_s7 = sshll.u32 %s8188_s6, 4  ;;  %s7478_s7 = int_to_ptr.vmem [resolvable:$true] %s7477_s7 }
  0x69   :  { %v1431_v5 = vunpack.c.l.s8.bf16 %v255_v1  ;;  %v1439_v6 = vunpack.c.h.s8.bf16 %v255_v1  ;;  %v1438_v9 = vunpack.c.h.s8.bf16 %v254_v7  ;;  %v183_v10 = vld [vmem:[#allocation5 + $0x88] sm:$0xff]  ;;  %v1430_v13 = vunpack.c.l.s8.bf16 %v254_v7  ;;  %v182_v16 = vld [vmem:[#allocation5 + $0x80] sm:$0xff]  ;;  %3632 = vmatprep.mubr.bf16.mxu0 %v7750_v24  ;;  %s8141_s3 = scalar_lea.vmem %s7478_s7, 256  ;;  %p8146_p13 = scmp.lt.s32.totalorder %s7478_s7, %s7478_s7 }
  0x6a   :  { %v247_v11 = vld [vmem:[#allocation5 + $0x288] sm:$0xff]  ;;  %3600 = vmatprep.subr.bf16.mxu0 %v1311_v4  ;;  %v1295_v14 = vunpack.c.h.s8.bf16 %v183_v10  ;;  %v246_v17 = vld [vmem:[#allocation5 + $0x280] sm:$0xff]  ;;  %v1294_v18 = vunpack.c.h.s8.bf16 %v182_v16  ;;  %v1287_v20 = vunpack.c.l.s8.bf16 %v183_v10  ;;  %v1286_v25 = vunpack.c.l.s8.bf16 %v182_v16  ;;  %p8142_p12 = scmp.ne.s32.totalorder %s7478_s7, %s8141_s3  ;;  %p8147_p0 = scmp.lt.s32.totalorder %s8141_s3, %s8141_s3 }
  0x6b   :  { %3643 = vmatprep.subr.bf16.mxu1 %v1439_v6  ;;  %3601 = vmatpush1.bf16.msra.mxu0 %v1310_v8  ;;  %v1423_v15 = vunpack.c.h.s8.bf16 %v247_v11  ;;  %v1422_v19 = vunpack.c.h.s8.bf16 %v246_v17  ;;  %v1415_v21 = vunpack.c.l.s8.bf16 %v247_v11  ;;  %v175_v22 = vld [vmem:[#allocation5 + $0x48] sm:$0xff]  ;;  %v1414_v26 = vunpack.c.l.s8.bf16 %v246_v17  ;;  %v7752_v27 = vld [vmem:[#allocation2 + $0xc] ss:$136 sps:$4 sm:$0xff]  }
  0x6c   :  { %3644 = vmatpush1.bf16.msra.mxu1 %v1438_v9  ;;  %3602 = vmatprep.subr.bf16.mxu0 %v1303_v3  ;;  %v239_v23 = vld [vmem:[#allocation5 + $0x248] sm:$0xff]  ;;  %v1279_v28 = vunpack.c.h.s8.bf16 %v175_v22  ;;  %v174_v30 = vld [vmem:[#allocation5 + $0x40] sm:$0xff]  ;;  %v1271_v34 = vunpack.c.l.s8.bf16 %v175_v22  ;;  %p8148_p1 = por %p8147_p0, %p8146_p13 }
  0x6d   :  { %3645 = vmatprep.subr.bf16.mxu1 %v1431_v5  ;;  %v1407_v29 = vunpack.c.h.s8.bf16 %v239_v23  ;;  %v238_v31 = vld [vmem:[#allocation5 + $0x240] sm:$0xff]  ;;  %3675 = vmatprep.mubr.bf16.mxu1 %v7752_v27  ;;  %v1278_v32 = vunpack.c.h.s8.bf16 %v174_v30  ;;  %v1399_v35 = vunpack.c.l.s8.bf16 %v239_v23  ;;  %v167_v36 = vld [vmem:[#allocation5 + $0x8] sm:$0xff]  ;;  %v1270_v38 = vunpack.c.l.s8.bf16 %v174_v30 }
  0x6e   :  { %v1406_v33 = vunpack.c.h.s8.bf16 %v238_v31  ;;  %v231_v37 = vld [vmem:[#allocation5 + $0x208] sm:$0xff]  ;;  %v1398_v39 = vunpack.c.l.s8.bf16 %v238_v31  ;;  %v1263_v40 = vunpack.c.h.s8.bf16 %v167_v36  ;;  %v166_v42 = vld [vmem:[#allocation5] sm:$0xff]  ;;  %v1255_v46 = vunpack.c.l.s8.bf16 %v167_v36  ;;  %p8149_p2 = pnand %p8148_p1, %p8142_p12 }
  0x6f   :  { %3603 = vmatpush1.bf16.msra.mxu0 %v1302_v12  ;;  %v1391_v41 = vunpack.c.h.s8.bf16 %v231_v37  ;;  %v230_v43 = vld [vmem:[#allocation5 + $0x200] sm:$0xff]  ;;  %v1262_v44 = vunpack.c.h.s8.bf16 %v166_v42  ;;  %v1383_v47 = vunpack.c.l.s8.bf16 %v231_v37  ;;  %v223_v48 = vld [vmem:[#allocation5 + $0x1c8] sm:$0xff]  ;;  %v1254_v50 = vunpack.c.l.s8.bf16 %v166_v42 }
  0x70   :  { %3646 = vmatpush1.bf16.msra.mxu1 %v1430_v13  ;;  %3604 = vmatprep.subr.bf16.mxu0 %v1295_v14  ;;  %v1390_v45 = vunpack.c.h.s8.bf16 %v230_v43  ;;  %v287_v49 = vld [vmem:[#allocation5 + $0x3c8] sm:$0xff]  ;;  %v1382_v51 = vunpack.c.l.s8.bf16 %v230_v43  ;;  %v1375_v52 = vunpack.c.h.s8.bf16 %v223_v48  ;;  %v222_v54 = vld [vmem:[#allocation5 + $0x1c0] sm:$0xff]  ;;  %v1367_v58 = vunpack.c.l.s8.bf16 %v223_v48 }
  0x71   :  { %3647 = vmatprep.subr.bf16.mxu1 %v1423_v15  ;;  %v1503_v53 = vunpack.c.h.s8.bf16 %v287_v49  ;;  %v286_v55 = vld [vmem:[#allocation5 + $0x3c0] sm:$0xff]  ;;  %v1374_v56 = vunpack.c.h.s8.bf16 %v222_v54  ;;  %v1495_v59 = vunpack.c.l.s8.bf16 %v287_v49  ;;  %v215_v60 = vld [vmem:[#allocation5 + $0x188] sm:$0xff]  ;;  %v1366_v0 = vunpack.c.l.s8.bf16 %v222_v54 }
  0x72   :  { %v1502_v57 = vunpack.c.h.s8.bf16 %v286_v55  ;;  %v279_v61 = vld [vmem:[#allocation5 + $0x388] sm:$0xff]  ;;  %v214_v62 = vld [vmem:[#allocation5 + $0x180] sm:$0xff]  ;;  %v1494_v1 = vunpack.c.l.s8.bf16 %v286_v55  ;;  %v1359_v2 = vunpack.c.h.s8.bf16 %v215_v60  ;;  %v1351_v6 = vunpack.c.l.s8.bf16 %v215_v60 }
  0x73   :  { %3605 = vmatpush1.bf16.msra.mxu0 %v1294_v18  ;;  %v278_v63 = vld [vmem:[#allocation5 + $0x380] sm:$0xff]  ;;  %v1487_v3 = vunpack.c.h.s8.bf16 %v279_v61  ;;  %v1358_v4 = vunpack.c.h.s8.bf16 %v214_v62  ;;  %v1479_v7 = vunpack.c.l.s8.bf16 %v279_v61  ;;  %v207_v8 = vld [vmem:[#allocation5 + $0x148] sm:$0xff]  ;;  %v1350_v12 = vunpack.c.l.s8.bf16 %v214_v62 }
  0x74   :  { %3648 = vmatpush1.bf16.msra.mxu1 %v1422_v19  ;;  %3606 = vmatprep.subr.bf16.mxu0 %v1287_v20  ;;  %v1486_v5 = vunpack.c.h.s8.bf16 %v278_v63  ;;  %v271_v9 = vld [vmem:[#allocation5 + $0x348] sm:$0xff]  ;;  %v206_v10 = vld [vmem:[#allocation5 + $0x140] sm:$0xff]  ;;  %v1478_v13 = vunpack.c.l.s8.bf16 %v278_v63  ;;  %v1343_v14 = vunpack.c.h.s8.bf16 %v207_v8  ;;  %v1335_v18 = vunpack.c.l.s8.bf16 %v207_v8 }
  0x75   :  { %3649 = vmatprep.subr.bf16.mxu1 %v1415_v21  ;;  %v270_v11 = vld [vmem:[#allocation5 + $0x340] sm:$0xff]  ;;  %v1471_v15 = vunpack.c.h.s8.bf16 %v271_v9  ;;  %v1342_v16 = vunpack.c.h.s8.bf16 %v206_v10  ;;  %v1463_v19 = vunpack.c.l.s8.bf16 %v271_v9  ;;  %v199_v20 = vld [vmem:[#allocation5 + $0x108] sm:$0xff]  ;;  %v1334_v24 = vunpack.c.l.s8.bf16 %v206_v10 }
  0x76   :  { %v1470_v17 = vunpack.c.h.s8.bf16 %v270_v11  ;;  %v263_v21 = vld [vmem:[#allocation5 + $0x308] sm:$0xff]  ;;  %v198_v22 = vld [vmem:[#allocation5 + $0x100] sm:$0xff]  ;;  %v1319_v30 = vunpack.c.l.s8.bf16 %v199_v20 }
  0x77   :  { %3607 = vmatpush1.bf16.msra.mxu0 %v1286_v25  ;;  %v262_v23 = vld [vmem:[#allocation5 + $0x300] sm:$0xff]  ;;  %v1462_v25 = vunpack.c.l.s8.bf16 %v270_v11  ;;  %v1455_v27 = vunpack.c.h.s8.bf16 %v263_v21  ;;  %v1447_v31 = vunpack.c.l.s8.bf16 %v263_v21  ;;  %v1318_v36 = vunpack.c.l.s8.bf16 %v198_v22  ;;  %v7758_v49 = vld [vmem:[#allocation2 + $0x1c] ss:$136 sps:$4 sm:$0xff]  }
  0x78   :  { %3650 = vmatpush1.bf16.msra.mxu1 %v1414_v26  ;;  %3608 = vmatprep.subr.bf16.mxu0 %v1279_v28  ;;  %v1327_v26 = vunpack.c.h.s8.bf16 %v199_v20  ;;  %v1326_v28 = vunpack.c.h.s8.bf16 %v198_v22  ;;  %v1446_v37 = vunpack.c.l.s8.bf16 %v262_v23  ;;  %v7756_v48 = vld [vmem:[#allocation2 + $0x14] ss:$136 sps:$4 sm:$0xff]  }
  0x79   :  { %3651 = vmatprep.subr.bf16.mxu1 %v1407_v29  ;;  %v1454_v29 = vunpack.c.h.s8.bf16 %v262_v23  ;;  %v303_v60 = vld [vmem:[#allocation5 + $0x448] sm:$0xff]  ;;  %v302_v62 = vld [vmem:[#allocation5 + $0x440] sm:$0xff] }
  0x7a   :  { %v367_v61 = vld [vmem:[#allocation5 + $0x648] sm:$0xff]  ;;  %v366_v63 = vld [vmem:[#allocation5 + $0x640] sm:$0xff] }
  0x7b   :  { %3609 = vmatpush1.bf16.msra.mxu0 %v1278_v32  ;;  %v319_v32 = vld [vmem:[#allocation5 + $0x4c8] sm:$0xff]  ;;  %v294_v10 = vld [vmem:[#allocation5 + $0x400] sm:$0xff] }
  0x7c   :  { %3652 = vmatpush1.bf16.msra.mxu1 %v1406_v33  ;;  %3610 = vmatprep.subr.bf16.mxu0 %v1271_v34  ;;  %v383_v33 = vld [vmem:[#allocation5 + $0x6c8] sm:$0xff]  ;;  %v318_v34 = vld [vmem:[#allocation5 + $0x4c0] sm:$0xff] }
  0x7d   :  { %3653 = vmatprep.subr.bf16.mxu1 %v1399_v35  ;;  %v382_v35 = vld [vmem:[#allocation5 + $0x6c0] sm:$0xff]  ;;  %v1566_v42 = vunpack.c.h.s8.bf16 %v318_v34  ;;  %v295_v8 = vld [vmem:[#allocation5 + $0x408] sm:$0xff] }
  0x7e   :  { %v1694_v43 = vunpack.c.h.s8.bf16 %v382_v35  ;;  %v359_v9 = vld [vmem:[#allocation5 + $0x608] sm:$0xff]  ;;  %v358_v11 = vld [vmem:[#allocation5 + $0x600] sm:$0xff] }
  0x7f   :  { %3611 = vmatpush1.bf16.msra.mxu0 %v1270_v38  ;;  %v7754_v38 = vld [vmem:[#allocation2] ss:$136 sps:$4 sm:$0xff]   ;;  %v351_v20 = vld [vmem:[#allocation5 + $0x5c8] sm:$0xff]  ;;  %v350_v22 = vld [vmem:[#allocation5 + $0x5c0] sm:$0xff] }
  0x80   :  { %3654 = vmatpush1.bf16.msra.mxu1 %v1398_v39  ;;  %3612 = vmatprep.subr.bf16.mxu0 %v1263_v40  ;;  %v7755_v39 = vld [vmem:[#allocation2 + $0x8] ss:$136 sps:$4 sm:$0xff]   ;;  %v1567_v40 = vunpack.c.h.s8.bf16 %v319_v32  ;;  %v415_v21 = vld [vmem:[#allocation5 + $0x7c8] sm:$0xff] }
  0x81   :  { %3655 = vmatprep.subr.bf16.mxu1 %v1391_v41  ;;  %v1695_v41 = vunpack.c.h.s8.bf16 %v383_v33  ;;  %v414_v23 = vld [vmem:[#allocation5 + $0x7c0] sm:$0xff] }
  0x83   :  { %3613 = vmatpush1.bf16.msra.mxu0 %v1262_v44  ;;  %v1559_v44 = vunpack.c.l.s8.bf16 %v319_v32  ;;  %v343_v32 = vld [vmem:[#allocation5 + $0x588] sm:$0xff] }
  0x84   :  { %3656 = vmatpush1.bf16.msra.mxu1 %v1390_v45  ;;  %3614 = vmatprep.subr.bf16.mxu0 %v1255_v46  ;;  %v1687_v45 = vunpack.c.l.s8.bf16 %v383_v33  ;;  %v311_v46 = vld [vmem:[#allocation5 + $0x488] sm:$0xff] }
  0x85   :  { %3657 = vmatprep.subr.bf16.mxu1 %v1383_v47  ;;  %v375_v47 = vld [vmem:[#allocation5 + $0x688] sm:$0xff]  ;;  %v1551_v54 = vunpack.c.h.s8.bf16 %v311_v46 }
  0x86   :  { %v1679_v55 = vunpack.c.h.s8.bf16 %v375_v47  ;;  %v407_v33 = vld [vmem:[#allocation5 + $0x788] sm:$0xff] }
  0x87   :  { %3615 = vmatpush1.bf16.msra.mxu0 %v1254_v50  ;;  %v310_v50 = vld [vmem:[#allocation5 + $0x480] sm:$0xff] }
  0x88   :  { %3658 = vmatpush1.bf16.msra.mxu1 %v1382_v51  ;;  %3616 = vmatprep.subr.bf16.mxu0 %v1375_v52  ;;  %v374_v51 = vld [vmem:[#allocation5 + $0x680] sm:$0xff]  ;;  %v1558_v52 = vunpack.c.l.s8.bf16 %v318_v34  ;;  %v1622_v34 = vunpack.c.l.s8.bf16 %v350_v22 }
  0x89   :  { %3659 = vmatprep.subr.bf16.mxu1 %v1503_v53  ;;  %v1686_v53 = vunpack.c.l.s8.bf16 %v382_v35  ;;  %v1750_v35 = vunpack.c.l.s8.bf16 %v414_v23 }
  0x8b   :  { %3617 = vmatpush2.bf16.msra.mxu0 %v1374_v56  ;;  %v1550_v56 = vunpack.c.h.s8.bf16 %v310_v50 }
  0x8c   :  { %3660 = vmatpush2.bf16.msra.mxu1 %v1502_v57  ;;  %3618 = vmatprep.subr.bf16.mxu0 %v1367_v58  ;;  %v1678_v57 = vunpack.c.h.s8.bf16 %v374_v51  ;;  %v1543_v58 = vunpack.c.l.s8.bf16 %v311_v46 }
  0x8d   :  { %3661 = vmatprep.subr.bf16.mxu1 %v1495_v59  ;;  %v1671_v59 = vunpack.c.l.s8.bf16 %v375_v47 }
  0x8f   :  { %3619 = vmatpush2.bf16.msra.mxu0 %v1366_v0  ;;  %v1542_v0 = vunpack.c.l.s8.bf16 %v310_v50  ;;  %v334_v50 = vld [vmem:[#allocation5 + $0x540] sm:$0xff] }
  0x90   :  { %3662 = vmatpush2.bf16.msra.mxu1 %v1494_v1  ;;  %3620 = vmatprep.subr.bf16.mxu0 %v1359_v2  ;;  %v1670_v1 = vunpack.c.l.s8.bf16 %v374_v51  ;;  %v1535_v2 = vunpack.c.h.s8.bf16 %v303_v60  ;;  %v398_v51 = vld [vmem:[#allocation5 + $0x740] sm:$0xff] }
  0x91   :  { %3663 = vmatprep.subr.bf16.mxu1 %v1487_v3  ;;  %v1663_v3 = vunpack.c.h.s8.bf16 %v367_v61 }
  0x93   :  { %3621 = vmatpush2.bf16.msra.mxu0 %v1358_v4  ;;  %v1534_v4 = vunpack.c.h.s8.bf16 %v302_v62 }
  0x94   :  { %3664 = vmatpush2.bf16.msra.mxu1 %v1486_v5  ;;  %3622 = vmatprep.subr.bf16.mxu0 %v1351_v6  ;;  %v1662_v5 = vunpack.c.h.s8.bf16 %v366_v63  ;;  %v1527_v6 = vunpack.c.l.s8.bf16 %v303_v60 }
  0x95   :  { %3665 = vmatprep.subr.bf16.mxu1 %v1479_v7  ;;  %v1655_v7 = vunpack.c.l.s8.bf16 %v367_v61 }
  0x97   :  { %3623 = vmatpush2.bf16.msra.mxu0 %v1350_v12  ;;  %v1526_v12 = vunpack.c.l.s8.bf16 %v302_v62  ;;  %v326_v62 = vld [vmem:[#allocation5 + $0x500] sm:$0xff] }
  0x98   :  { %3666 = vmatpush2.bf16.msra.mxu1 %v1478_v13  ;;  %3624 = vmatprep.subr.bf16.mxu0 %v1343_v14  ;;  %v1654_v13 = vunpack.c.l.s8.bf16 %v366_v63  ;;  %v1519_v14 = vunpack.c.h.s8.bf16 %v295_v8  ;;  %v390_v63 = vld [vmem:[#allocation5 + $0x700] sm:$0xff] }
  0x99   :  { %3667 = vmatprep.subr.bf16.mxu1 %v1471_v15  ;;  %v1647_v15 = vunpack.c.h.s8.bf16 %v359_v9 }
  0x9b   :  { %3625 = vmatpush2.bf16.msra.mxu0 %v1342_v16  ;;  %v1518_v16 = vunpack.c.h.s8.bf16 %v294_v10 }
  0x9c   :  { %3668 = vmatpush2.bf16.msra.mxu1 %v1470_v17  ;;  %3626 = vmatprep.subr.bf16.mxu0 %v1335_v18  ;;  %v1646_v17 = vunpack.c.h.s8.bf16 %v358_v11  ;;  %v1511_v18 = vunpack.c.l.s8.bf16 %v295_v8 }
  0x9d   :  { %3669 = vmatprep.subr.bf16.mxu1 %v1463_v19  ;;  %v1639_v19 = vunpack.c.l.s8.bf16 %v359_v9 }
  0x9f   :  { %3627 = vmatpush2.bf16.msra.mxu0 %v1334_v24  ;;  %v1510_v24 = vunpack.c.l.s8.bf16 %v294_v10  ;;  %v446_v10 = vld [vmem:[#allocation5 + $0x8c0] sm:$0xff] }
  0xa0   :  { %3670 = vmatpush2.bf16.msra.mxu1 %v1462_v25  ;;  %3628 = vmatprep.subr.bf16.mxu0 %v1327_v26  ;;  %v1638_v25 = vunpack.c.l.s8.bf16 %v358_v11  ;;  %v1631_v26 = vunpack.c.h.s8.bf16 %v351_v20  ;;  %v510_v11 = vld [vmem:[#allocation5 + $0xac0] sm:$0xff] }
  0xa1   :  { %3671 = vmatprep.subr.bf16.mxu1 %v1455_v27  ;;  %v1759_v27 = vunpack.c.h.s8.bf16 %v415_v21 }
  0xa3   :  { %3629 = vmatpush2.bf16.msra.mxu0 %v1326_v28  ;;  %v1630_v28 = vunpack.c.h.s8.bf16 %v350_v22  ;;  %v1814_v22 = vunpack.c.l.s8.bf16 %v446_v10 }
  0xa4   :  { %3672 = vmatpush2.bf16.msra.mxu1 %v1454_v29  ;;  %3630 = vmatprep.subr.bf16.mxu0 %v1319_v30  ;;  %v1758_v29 = vunpack.c.h.s8.bf16 %v414_v23  ;;  %v1623_v30 = vunpack.c.l.s8.bf16 %v351_v20  ;;  %v7762_v20 = vld [vmem:[#allocation2 + $0x24] ss:$136 sps:$4 sm:$0xff]   ;;  %v1942_v23 = vunpack.c.l.s8.bf16 %v510_v11 }
  0xa5   :  { %3673 = vmatprep.subr.bf16.mxu1 %v1447_v31  ;;  %v1751_v31 = vunpack.c.l.s8.bf16 %v415_v21  ;;  %v7764_v21 = vld [vmem:[#allocation2 + $0x2c] ss:$136 sps:$4 sm:$0xff]  }
  0xa7   :  { %3631 = vmatpush2.bf16.msra.mxu0 %v1318_v36  ;;  %v1615_v36 = vunpack.c.h.s8.bf16 %v343_v32 }
  0xa8   :  { %3674 = vmatpush2.bf16.msra.mxu1 %v1446_v37  ;;  %3686 = vmatprep.subr.bf16.mxu0 %v1567_v40  ;;  %v1743_v37 = vunpack.c.h.s8.bf16 %v407_v33 }
  0xa9   :  { %3729 = vmatprep.subr.bf16.mxu1 %v1695_v41 }
  0xaa   :  { %3633 = vmatmul.mubr.bf16.vlgmr.msra.gmra.mxu0 %v7754_v38  ;;  %v342_v38 = vld [vmem:[#allocation5 + $0x580] sm:$0xff] }
  0xab   :  { %3676 = vmatmul.mubr.bf16.vlgmr.msra.gmra.mxu1 %v7755_v39  ;;  %3687 = vmatpush1.bf16.msra.mxu0 %v1566_v42  ;;  %v406_v39 = vld [vmem:[#allocation5 + $0x780] sm:$0xff]  ;;  %v1614_v40 = vunpack.c.h.s8.bf16 %v342_v38  ;;  %v1607_v42 = vunpack.c.l.s8.bf16 %v343_v32  ;;  %v1606_v46 = vunpack.c.l.s8.bf16 %v342_v38  ;;  %v431_v32 = vld [vmem:[#allocation5 + $0x848] sm:$0xff] }
  0xac   :  { %3730 = vmatpush1.bf16.msra.mxu1 %v1694_v43  ;;  %3688 = vmatprep.subr.bf16.mxu0 %v1559_v44  ;;  %v1742_v41 = vunpack.c.h.s8.bf16 %v406_v39  ;;  %v1735_v43 = vunpack.c.l.s8.bf16 %v407_v33  ;;  %v335_v44 = vld [vmem:[#allocation5 + $0x548] sm:$0xff]  ;;  %v1734_v47 = vunpack.c.l.s8.bf16 %v406_v39  ;;  %v430_v38 = vld [vmem:[#allocation5 + $0x840] sm:$0xff] }
  0xad   :  { %3731 = vmatprep.subr.bf16.mxu1 %v1687_v45  ;;  %3718 = vmatprep.mubr.bf16.mxu0 %v7756_v48  ;;  %v399_v45 = vld [vmem:[#allocation5 + $0x748] sm:$0xff]  ;;  %v1599_v48 = vunpack.c.h.s8.bf16 %v335_v44  ;;  %v494_v39 = vld [vmem:[#allocation5 + $0xa40] sm:$0xff] }
  0xae   :  { %3761 = vmatprep.mubr.bf16.mxu1 %v7758_v49  ;;  %v1727_v49 = vunpack.c.h.s8.bf16 %v399_v45  ;;  %v495_v33 = vld [vmem:[#allocation5 + $0xa48] sm:$0xff] }
  0xaf   :  { %3689 = vmatpush1.bf16.msra.mxu0 %v1558_v52  ;;  %v1598_v52 = vunpack.c.h.s8.bf16 %v334_v50 }
  0xb0   :  { %3732 = vmatpush1.bf16.msra.mxu1 %v1686_v53  ;;  %3690 = vmatprep.subr.bf16.mxu0 %v1551_v54  ;;  %v1726_v53 = vunpack.c.h.s8.bf16 %v398_v51  ;;  %v1591_v54 = vunpack.c.l.s8.bf16 %v335_v44  ;;  %v423_v44 = vld [vmem:[#allocation5 + $0x808] sm:$0xff] }
  0xb1   :  { %3733 = vmatprep.subr.bf16.mxu1 %v1679_v55  ;;  %v1719_v55 = vunpack.c.l.s8.bf16 %v399_v45  ;;  %v487_v45 = vld [vmem:[#allocation5 + $0xa08] sm:$0xff] }
  0xb3   :  { %3691 = vmatpush1.bf16.msra.mxu0 %v1550_v56  ;;  %v327_v56 = vld [vmem:[#allocation5 + $0x508] sm:$0xff] }
  0xb4   :  { %3734 = vmatpush1.bf16.msra.mxu1 %v1678_v57  ;;  %3692 = vmatprep.subr.bf16.mxu0 %v1543_v58  ;;  %v391_v57 = vld [vmem:[#allocation5 + $0x708] sm:$0xff]  ;;  %v1590_v58 = vunpack.c.l.s8.bf16 %v334_v50  ;;  %v1583_v60 = vunpack.c.h.s8.bf16 %v327_v56  ;;  %v422_v50 = vld [vmem:[#allocation5 + $0x800] sm:$0xff] }
  0xb5   :  { %3735 = vmatprep.subr.bf16.mxu1 %v1671_v59  ;;  %v1718_v59 = vunpack.c.l.s8.bf16 %v398_v51  ;;  %v1711_v61 = vunpack.c.h.s8.bf16 %v391_v57  ;;  %v486_v51 = vld [vmem:[#allocation5 + $0xa00] sm:$0xff] }
  0xb7   :  { %3693 = vmatpush1.bf16.msra.mxu0 %v1542_v0  ;;  %v1582_v0 = vunpack.c.h.s8.bf16 %v326_v62 }
  0xb8   :  { %3736 = vmatpush1.bf16.msra.mxu1 %v1670_v1  ;;  %3694 = vmatprep.subr.bf16.mxu0 %v1535_v2  ;;  %v1710_v1 = vunpack.c.h.s8.bf16 %v390_v63  ;;  %v1575_v2 = vunpack.c.l.s8.bf16 %v327_v56  ;;  %v479_v56 = vld [vmem:[#allocation5 + $0x9c8] sm:$0xff] }
  0xb9   :  { %3737 = vmatprep.subr.bf16.mxu1 %v1663_v3  ;;  %v1703_v3 = vunpack.c.l.s8.bf16 %v391_v57  ;;  %v543_v57 = vld [vmem:[#allocation5 + $0xbc8] sm:$0xff] }
  0xbb   :  { %3695 = vmatpush1.bf16.msra.mxu0 %v1534_v4  ;;  %v447_v4 = vld [vmem:[#allocation5 + $0x8c8] sm:$0xff] }
  0xbc   :  { %3738 = vmatpush1.bf16.msra.mxu1 %v1662_v5  ;;  %3696 = vmatprep.subr.bf16.mxu0 %v1527_v6  ;;  %v511_v5 = vld [vmem:[#allocation5 + $0xac8] sm:$0xff]  ;;  %v1574_v6 = vunpack.c.l.s8.bf16 %v326_v62  ;;  %v1823_v8 = vunpack.c.h.s8.bf16 %v447_v4  ;;  %v478_v62 = vld [vmem:[#allocation5 + $0x9c0] sm:$0xff] }
  0xbd   :  { %3739 = vmatprep.subr.bf16.mxu1 %v1655_v7  ;;  %v1702_v7 = vunpack.c.l.s8.bf16 %v390_v63  ;;  %v1951_v9 = vunpack.c.h.s8.bf16 %v511_v5  ;;  %v542_v63 = vld [vmem:[#allocation5 + $0xbc0] sm:$0xff] }
  0xbf   :  { %3697 = vmatpush1.bf16.msra.mxu0 %v1526_v12  ;;  %v7760_v12 = vld [vmem:[#allocation2 + $0x10] ss:$136 sps:$4 sm:$0xff]  }
  0xc0   :  { %3740 = vmatpush1.bf16.msra.mxu1 %v1654_v13  ;;  %3698 = vmatprep.subr.bf16.mxu0 %v1519_v14  ;;  %v7761_v13 = vld [vmem:[#allocation2 + $0x18] ss:$136 sps:$4 sm:$0xff]   ;;  %v1822_v14 = vunpack.c.h.s8.bf16 %v446_v10  ;;  %v470_v10 = vld [vmem:[#allocation5 + $0x980] sm:$0xff] }
  0xc1   :  { %3741 = vmatprep.subr.bf16.mxu1 %v1647_v15  ;;  %v1950_v15 = vunpack.c.h.s8.bf16 %v510_v11  ;;  %v534_v11 = vld [vmem:[#allocation5 + $0xb80] sm:$0xff] }
  0xc3   :  { %3699 = vmatpush1.bf16.msra.mxu0 %v1518_v16  ;;  %v1815_v16 = vunpack.c.l.s8.bf16 %v447_v4  ;;  %v471_v4 = vld [vmem:[#allocation5 + $0x988] sm:$0xff] }
  0xc4   :  { %3742 = vmatpush1.bf16.msra.mxu1 %v1646_v17  ;;  %3700 = vmatprep.subr.bf16.mxu0 %v1511_v18  ;;  %v1943_v17 = vunpack.c.l.s8.bf16 %v511_v5  ;;  %v439_v18 = vld [vmem:[#allocation5 + $0x888] sm:$0xff] }
  0xc5   :  { %3743 = vmatprep.subr.bf16.mxu1 %v1639_v19  ;;  %v503_v19 = vld [vmem:[#allocation5 + $0xa88] sm:$0xff] }
  0xc6   :  { %v535_v5 = vld [vmem:[#allocation5 + $0xb88] sm:$0xff] }
  0xc7   :  { %3701 = vmatpush1.bf16.msra.mxu0 %v1510_v24  ;;  %v1807_v24 = vunpack.c.h.s8.bf16 %v439_v18 }
  0xc8   :  { %3744 = vmatpush1.bf16.msra.mxu1 %v1638_v25  ;;  %3702 = vmatprep.subr.bf16.mxu0 %v1631_v26  ;;  %v1935_v25 = vunpack.c.h.s8.bf16 %v503_v19  ;;  %v438_v26 = vld [vmem:[#allocation5 + $0x880] sm:$0xff] }
  0xc9   :  { %3745 = vmatprep.subr.bf16.mxu1 %v1759_v27  ;;  %v502_v27 = vld [vmem:[#allocation5 + $0xa80] sm:$0xff] }
  0xcb   :  { %3703 = vmatpush2.bf16.msra.mxu0 %v1630_v28  ;;  %v1806_v28 = vunpack.c.h.s8.bf16 %v438_v26 }
  0xcc   :  { %3746 = vmatpush2.bf16.msra.mxu1 %v1758_v29  ;;  %3704 = vmatprep.subr.bf16.mxu0 %v1623_v30  ;;  %v1934_v29 = vunpack.c.h.s8.bf16 %v502_v27  ;;  %v1799_v30 = vunpack.c.l.s8.bf16 %v439_v18  ;;  %v1862_v18 = vunpack.c.l.s8.bf16 %v470_v10 }
  0xcd   :  { %3747 = vmatprep.subr.bf16.mxu1 %v1751_v31  ;;  %v1927_v31 = vunpack.c.l.s8.bf16 %v503_v19  ;;  %v1990_v19 = vunpack.c.l.s8.bf16 %v534_v11 }
  0xcf   :  { %3705 = vmatpush2.bf16.msra.mxu0 %v1622_v34  ;;  %v1798_v34 = vunpack.c.l.s8.bf16 %v438_v26 }
  0xd0   :  { %3748 = vmatpush2.bf16.msra.mxu1 %v1750_v35  ;;  %3706 = vmatprep.subr.bf16.mxu0 %v1615_v36  ;;  %v1926_v35 = vunpack.c.l.s8.bf16 %v502_v27  ;;  %v1791_v36 = vunpack.c.h.s8.bf16 %v431_v32 }
  0xd1   :  { %3749 = vmatprep.subr.bf16.mxu1 %v1743_v37  ;;  %v1919_v37 = vunpack.c.h.s8.bf16 %v495_v33 }
  0xd3   :  { %3707 = vmatpush2.bf16.msra.mxu0 %v1614_v40  ;;  %v1790_v40 = vunpack.c.h.s8.bf16 %v430_v38 }
  0xd4   :  { %3750 = vmatpush2.bf16.msra.mxu1 %v1742_v41  ;;  %3708 = vmatprep.subr.bf16.mxu0 %v1607_v42  ;;  %v1918_v41 = vunpack.c.h.s8.bf16 %v494_v39  ;;  %v1783_v42 = vunpack.c.l.s8.bf16 %v431_v32 }
  0xd5   :  { %3751 = vmatprep.subr.bf16.mxu1 %v1735_v43  ;;  %v1911_v43 = vunpack.c.l.s8.bf16 %v495_v33 }
  0xd7   :  { %3709 = vmatpush2.bf16.msra.mxu0 %v1606_v46  ;;  %v1782_v46 = vunpack.c.l.s8.bf16 %v430_v38 }
  0xd8   :  { %3752 = vmatpush2.bf16.msra.mxu1 %v1734_v47  ;;  %3710 = vmatprep.subr.bf16.mxu0 %v1599_v48  ;;  %v1910_v47 = vunpack.c.l.s8.bf16 %v494_v39  ;;  %v1775_v48 = vunpack.c.h.s8.bf16 %v423_v44 }
  0xd9   :  { %3753 = vmatprep.subr.bf16.mxu1 %v1727_v49  ;;  %v1903_v49 = vunpack.c.h.s8.bf16 %v487_v45 }
  0xdb   :  { %3711 = vmatpush2.bf16.msra.mxu0 %v1598_v52  ;;  %v1774_v52 = vunpack.c.h.s8.bf16 %v422_v50 }
  0xdc   :  { %3754 = vmatpush2.bf16.msra.mxu1 %v1726_v53  ;;  %3712 = vmatprep.subr.bf16.mxu0 %v1591_v54  ;;  %v1902_v53 = vunpack.c.h.s8.bf16 %v486_v51  ;;  %v1767_v54 = vunpack.c.l.s8.bf16 %v423_v44 }
  0xdd   :  { %3755 = vmatprep.subr.bf16.mxu1 %v1719_v55  ;;  %v1895_v55 = vunpack.c.l.s8.bf16 %v487_v45 }
  0xdf   :  { %3713 = vmatpush2.bf16.msra.mxu0 %v1590_v58  ;;  %v1766_v58 = vunpack.c.l.s8.bf16 %v422_v50 }
  0xe0   :  { %3756 = vmatpush2.bf16.msra.mxu1 %v1718_v59  ;;  %3714 = vmatprep.subr.bf16.mxu0 %v1583_v60  ;;  %v1894_v59 = vunpack.c.l.s8.bf16 %v486_v51  ;;  %v1887_v60 = vunpack.c.h.s8.bf16 %v479_v56 }
  0xe1   :  { %3757 = vmatprep.subr.bf16.mxu1 %v1711_v61  ;;  %v2015_v61 = vunpack.c.h.s8.bf16 %v543_v57 }
  0xe3   :  { %3715 = vmatpush2.bf16.msra.mxu0 %v1582_v0  ;;  %v1886_v0 = vunpack.c.h.s8.bf16 %v478_v62 }
  0xe4   :  { %3758 = vmatpush2.bf16.msra.mxu1 %v1710_v1  ;;  %3716 = vmatprep.subr.bf16.mxu0 %v1575_v2  ;;  %v2014_v1 = vunpack.c.h.s8.bf16 %v542_v63  ;;  %v1879_v2 = vunpack.c.l.s8.bf16 %v479_v56  ;;  %v7768_v56 = vld [vmem:[#allocation2 + $0x34] ss:$136 sps:$4 sm:$0xff]  }
  0xe5   :  { %3759 = vmatprep.subr.bf16.mxu1 %v1703_v3  ;;  %v2007_v3 = vunpack.c.l.s8.bf16 %v543_v57  ;;  %v7770_v57 = vld [vmem:[#allocation2 + $0x3c] ss:$136 sps:$4 sm:$0xff]  }
  0xe7   :  { %3717 = vmatpush2.bf16.msra.mxu0 %v1574_v6  ;;  %v1878_v6 = vunpack.c.l.s8.bf16 %v478_v62  ;;  %v566_v62 = vld [vmem:[#allocation5 + $0xc80] sm:$0xff] }
  0xe8   :  { %3760 = vmatpush2.bf16.msra.mxu1 %v1702_v7  ;;  %3772 = vmatprep.subr.bf16.mxu0 %v1823_v8  ;;  %v2006_v7 = vunpack.c.l.s8.bf16 %v542_v63  ;;  %v1871_v8 = vunpack.c.h.s8.bf16 %v471_v4  ;;  %v630_v63 = vld [vmem:[#allocation5 + $0xe80] sm:$0xff] }
  0xe9   :  { %3815 = vmatprep.subr.bf16.mxu1 %v1951_v9  ;;  %v1999_v9 = vunpack.c.h.s8.bf16 %v535_v5 }
  0xea   :  { %3719 = vmatmul.mubr.bf16.vlgmr.msra.gmra.mxu0 %v7760_v12  ;;  %v1870_v12 = vunpack.c.h.s8.bf16 %v470_v10  ;;  %v558_v10 = vld [vmem:[#allocation5 + $0xc40] sm:$0xff] }
  0xeb   :  { %3762 = vmatmul.mubr.bf16.vlgmr.msra.gmra.mxu1 %v7761_v13  ;;  %3773 = vmatpush1.bf16.msra.mxu0 %v1822_v14  ;;  %v1998_v13 = vunpack.c.h.s8.bf16 %v534_v11  ;;  %v1863_v14 = vunpack.c.l.s8.bf16 %v471_v4  ;;  %v559_v4 = vld [vmem:[#allocation5 + $0xc48] sm:$0xff]  ;;  %v622_v11 = vld [vmem:[#allocation5 + $0xe40] sm:$0xff] }
  0xec   :  { %3816 = vmatpush1.bf16.msra.mxu1 %v1950_v15  ;;  %3774 = vmatprep.subr.bf16.mxu0 %v1815_v16  ;;  %v1991_v15 = vunpack.c.l.s8.bf16 %v535_v5  ;;  %v463_v16 = vld [vmem:[#allocation5 + $0x948] sm:$0xff] }
  0xed   :  { %3817 = vmatprep.subr.bf16.mxu1 %v1943_v17  ;;  %3804 = vmatprep.mubr.bf16.mxu0 %v7762_v20  ;;  %v527_v17 = vld [vmem:[#allocation5 + $0xb48] sm:$0xff]  ;;  %v1855_v20 = vunpack.c.h.s8.bf16 %v463_v16  ;;  %v1847_v26 = vunpack.c.l.s8.bf16 %v463_v16 }
  0xee   :  { %3847 = vmatprep.mubr.bf16.mxu1 %v7764_v21  ;;  %v1983_v21 = vunpack.c.h.s8.bf16 %v527_v17  ;;  %v1975_v27 = vunpack.c.l.s8.bf16 %v527_v17  ;;  %v623_v5 = vld [vmem:[#allocation5 + $0xe48] sm:$0xff] }
  0xef   :  { %3775 = vmatpush1.bf16.msra.mxu0 %v1814_v22  ;;  %v462_v22 = vld [vmem:[#allocation5 + $0x940] sm:$0xff]  ;;  %v551_v16 = vld [vmem:[#allocation5 + $0xc08] sm:$0xff] }
  0xf0   :  { %3818 = vmatpush1.bf16.msra.mxu1 %v1942_v23  ;;  %3776 = vmatprep.subr.bf16.mxu0 %v1807_v24  ;;  %v526_v23 = vld [vmem:[#allocation5 + $0xb40] sm:$0xff]  ;;  %v1854_v24 = vunpack.c.h.s8.bf16 %v462_v22  ;;  %v615_v17 = vld [vmem:[#allocation5 + $0xe08] sm:$0xff] }
  0xf1   :  { %3819 = vmatprep.subr.bf16.mxu1 %v1935_v25  ;;  %v1982_v25 = vunpack.c.h.s8.bf16 %v526_v23 }
  0xf3   :  { %3777 = vmatpush1.bf16.msra.mxu0 %v1806_v28  ;;  %v455_v28 = vld [vmem:[#allocation5 + $0x908] sm:$0xff] }
  0xf4   :  { %3820 = vmatpush1.bf16.msra.mxu1 %v1934_v29  ;;  %3778 = vmatprep.subr.bf16.mxu0 %v1799_v30  ;;  %v519_v29 = vld [vmem:[#allocation5 + $0xb08] sm:$0xff]  ;;  %v1846_v30 = vunpack.c.l.s8.bf16 %v462_v22  ;;  %v1839_v32 = vunpack.c.h.s8.bf16 %v455_v28  ;;  %v1831_v38 = vunpack.c.l.s8.bf16 %v455_v28  ;;  %v550_v22 = vld [vmem:[#allocation5 + $0xc00] sm:$0xff] }
  0xf5   :  { %3821 = vmatprep.subr.bf16.mxu1 %v1927_v31  ;;  %v1974_v31 = vunpack.c.l.s8.bf16 %v526_v23  ;;  %v1967_v33 = vunpack.c.h.s8.bf16 %v519_v29  ;;  %v1959_v39 = vunpack.c.l.s8.bf16 %v519_v29  ;;  %v614_v23 = vld [vmem:[#allocation5 + $0xe00] sm:$0xff]  ;;  %v607_v28 = vld [vmem:[#allocation5 + $0xdc8] sm:$0xff] }
  0xf6   :  { %v671_v29 = vld [vmem:[#allocation5 + $0xfc8] sm:$0xff] }
  0xf7   :  { %3779 = vmatpush1.bf16.msra.mxu0 %v1798_v34  ;;  %v454_v34 = vld [vmem:[#allocation5 + $0x900] sm:$0xff] }
  0xf8   :  { %3822 = vmatpush1.bf16.msra.mxu1 %v1926_v35  ;;  %3780 = vmatprep.subr.bf16.mxu0 %v1791_v36  ;;  %v518_v35 = vld [vmem:[#allocation5 + $0xb00] sm:$0xff]  ;;  %v1838_v36 = vunpack.c.h.s8.bf16 %v454_v34 }
  0xf9   :  { %3823 = vmatprep.subr.bf16.mxu1 %v1919_v37  ;;  %v1966_v37 = vunpack.c.h.s8.bf16 %v518_v35 }
  0xfb   :  { %3781 = vmatpush1.bf16.msra.mxu0 %v1790_v40  ;;  %v575_v40 = vld [vmem:[#allocation5 + $0xcc8] sm:$0xff] }
  0xfc   :  { %3824 = vmatpush1.bf16.msra.mxu1 %v1918_v41  ;;  %3782 = vmatprep.subr.bf16.mxu0 %v1783_v42  ;;  %v639_v41 = vld [vmem:[#allocation5 + $0xec8] sm:$0xff]  ;;  %v1830_v42 = vunpack.c.l.s8.bf16 %v454_v34  ;;  %v2079_v44 = vunpack.c.h.s8.bf16 %v575_v40  ;;  %v606_v34 = vld [vmem:[#allocation5 + $0xdc0] sm:$0xff] }
  0xfd   :  { %3825 = vmatprep.subr.bf16.mxu1 %v1911_v43  ;;  %v1958_v43 = vunpack.c.l.s8.bf16 %v518_v35  ;;  %v2207_v45 = vunpack.c.h.s8.bf16 %v639_v41  ;;  %v670_v35 = vld [vmem:[#allocation5 + $0xfc0] sm:$0xff] }
  0xff   :  { %3783 = vmatpush1.bf16.msra.mxu0 %v1782_v46  ;;  %v574_v46 = vld [vmem:[#allocation5 + $0xcc0] sm:$0xff] }
 0x100   :  { %3826 = vmatpush1.bf16.msra.mxu1 %v1910_v47  ;;  %3784 = vmatprep.subr.bf16.mxu0 %v1775_v48  ;;  %v638_v47 = vld [vmem:[#allocation5 + $0xec0] sm:$0xff]  ;;  %v7766_v48 = vld [vmem:[#allocation2 + $0x20] ss:$136 sps:$4 sm:$0xff]   ;;  %v2078_v50 = vunpack.c.h.s8.bf16 %v574_v46 }
 0x101   :  { %3827 = vmatprep.subr.bf16.mxu1 %v1903_v49  ;;  %v7767_v49 = vld [vmem:[#allocation2 + $0x28] ss:$136 sps:$4 sm:$0xff]   ;;  %v2206_v51 = vunpack.c.h.s8.bf16 %v638_v47 }
 0x103   :  { %3785 = vmatpush1.bf16.msra.mxu0 %v1774_v52  ;;  %v2071_v52 = vunpack.c.l.s8.bf16 %v575_v40  ;;  %v599_v40 = vld [vmem:[#allocation5 + $0xd88] sm:$0xff] }
 0x104   :  { %3828 = vmatpush1.bf16.msra.mxu1 %v1902_v53  ;;  %3786 = vmatprep.subr.bf16.mxu0 %v1767_v54  ;;  %v2199_v53 = vunpack.c.l.s8.bf16 %v639_v41  ;;  %v567_v54 = vld [vmem:[#allocation5 + $0xc88] sm:$0xff] }
 0x105   :  { %3829 = vmatprep.subr.bf16.mxu1 %v1895_v55  ;;  %v631_v55 = vld [vmem:[#allocation5 + $0xe88] sm:$0xff] }
 0x106   :  { %v663_v41 = vld [vmem:[#allocation5 + $0xf88] sm:$0xff] }
 0x107   :  { %3787 = vmatpush1.bf16.msra.mxu0 %v1766_v58  ;;  %v2070_v58 = vunpack.c.l.s8.bf16 %v574_v46  ;;  %v598_v46 = vld [vmem:[#allocation5 + $0xd80] sm:$0xff] }
 0x108   :  { %3830 = vmatpush1.bf16.msra.mxu1 %v1894_v59  ;;  %3788 = vmatprep.subr.bf16.mxu0 %v1887_v60  ;;  %v2198_v59 = vunpack.c.l.s8.bf16 %v638_v47  ;;  %v2063_v60 = vunpack.c.h.s8.bf16 %v567_v54  ;;  %v662_v47 = vld [vmem:[#allocation5 + $0xf80] sm:$0xff] }
 0x109   :  { %3831 = vmatprep.subr.bf16.mxu1 %v2015_v61  ;;  %v2191_v61 = vunpack.c.h.s8.bf16 %v631_v55 }
 0x10b   :  { %3789 = vmatpush2.bf16.msra.mxu0 %v1886_v0  ;;  %v2062_v0 = vunpack.c.h.s8.bf16 %v566_v62 }
 0x10c   :  { %3832 = vmatpush2.bf16.msra.mxu1 %v2014_v1  ;;  %3790 = vmatprep.subr.bf16.mxu0 %v1879_v2  ;;  %v2190_v1 = vunpack.c.h.s8.bf16 %v630_v63  ;;  %v2055_v2 = vunpack.c.l.s8.bf16 %v567_v54  ;;  %v2118_v54 = vunpack.c.l.s8.bf16 %v598_v46 }
 0x10d   :  { %3833 = vmatprep.subr.bf16.mxu1 %v2007_v3  ;;  %v2183_v3 = vunpack.c.l.s8.bf16 %v631_v55  ;;  %v2246_v55 = vunpack.c.l.s8.bf16 %v662_v47 }
 0x10f   :  { %3791 = vmatpush2.bf16.msra.mxu0 %v1878_v6  ;;  %v2054_v6 = vunpack.c.l.s8.bf16 %v566_v62 }
 0x110   :  { %3834 = vmatpush2.bf16.msra.mxu1 %v2006_v7  ;;  %3792 = vmatprep.subr.bf16.mxu0 %v1871_v8  ;;  %v2182_v7 = vunpack.c.l.s8.bf16 %v630_v63  ;;  %v2047_v8 = vunpack.c.h.s8.bf16 %v559_v4 }
 0x111   :  { %3835 = vmatprep.subr.bf16.mxu1 %v1999_v9  ;;  %v2175_v9 = vunpack.c.h.s8.bf16 %v623_v5 }
 0x113   :  { %3793 = vmatpush2.bf16.msra.mxu0 %v1870_v12  ;;  %v2046_v12 = vunpack.c.h.s8.bf16 %v558_v10 }
 0x114   :  { %3836 = vmatpush2.bf16.msra.mxu1 %v1998_v13  ;;  %3794 = vmatprep.subr.bf16.mxu0 %v1863_v14  ;;  %v2174_v13 = vunpack.c.h.s8.bf16 %v622_v11  ;;  %v2039_v14 = vunpack.c.l.s8.bf16 %v559_v4 }
 0x115   :  { %3837 = vmatprep.subr.bf16.mxu1 %v1991_v15  ;;  %v2167_v15 = vunpack.c.l.s8.bf16 %v623_v5 }
 0x117   :  { %3795 = vmatpush2.bf16.msra.mxu0 %v1862_v18  ;;  %v2038_v18 = vunpack.c.l.s8.bf16 %v558_v10 }
 0x118   :  { %3838 = vmatpush2.bf16.msra.mxu1 %v1990_v19  ;;  %3796 = vmatprep.subr.bf16.mxu0 %v1855_v20  ;;  %v2166_v19 = vunpack.c.l.s8.bf16 %v622_v11  ;;  %v2031_v20 = vunpack.c.h.s8.bf16 %v551_v16 }
 0x119   :  { %3839 = vmatprep.subr.bf16.mxu1 %v1983_v21  ;;  %v2159_v21 = vunpack.c.h.s8.bf16 %v615_v17 }
 0x11b   :  { %3797 = vmatpush2.bf16.msra.mxu0 %v1854_v24  ;;  %v2030_v24 = vunpack.c.h.s8.bf16 %v550_v22 }
 0x11c   :  { %3840 = vmatpush2.bf16.msra.mxu1 %v1982_v25  ;;  %3798 = vmatprep.subr.bf16.mxu0 %v1847_v26  ;;  %v2158_v25 = vunpack.c.h.s8.bf16 %v614_v23  ;;  %v2023_v26 = vunpack.c.l.s8.bf16 %v551_v16 }
 0x11d   :  { %3841 = vmatprep.subr.bf16.mxu1 %v1975_v27  ;;  %v2151_v27 = vunpack.c.l.s8.bf16 %v615_v17 }
 0x11f   :  { %3799 = vmatpush2.bf16.msra.mxu0 %v1846_v30  ;;  %v2022_v30 = vunpack.c.l.s8.bf16 %v550_v22 }
 0x120   :  { %3842 = vmatpush2.bf16.msra.mxu1 %v1974_v31  ;;  %3800 = vmatprep.subr.bf16.mxu0 %v1839_v32  ;;  %v2150_v31 = vunpack.c.l.s8.bf16 %v614_v23  ;;  %v2143_v32 = vunpack.c.h.s8.bf16 %v607_v28 }
 0x121   :  { %3843 = vmatprep.subr.bf16.mxu1 %v1967_v33  ;;  %v2271_v33 = vunpack.c.h.s8.bf16 %v671_v29 }
 0x123   :  { %3801 = vmatpush2.bf16.msra.mxu0 %v1838_v36  ;;  %v2142_v36 = vunpack.c.h.s8.bf16 %v606_v34 }
 0x124   :  { %3844 = vmatpush2.bf16.msra.mxu1 %v1966_v37  ;;  %3802 = vmatprep.subr.bf16.mxu0 %v1831_v38  ;;  %v2270_v37 = vunpack.c.h.s8.bf16 %v670_v35  ;;  %v2135_v38 = vunpack.c.l.s8.bf16 %v607_v28  ;;  %v7774_v28 = vld [vmem:[#allocation2 + $0x44] ss:$136 sps:$4 sm:$0xff]  }
 0x125   :  { %3845 = vmatprep.subr.bf16.mxu1 %v1959_v39  ;;  %v2263_v39 = vunpack.c.l.s8.bf16 %v671_v29  ;;  %v7776_v29 = vld [vmem:[#allocation2 + $0x4c] ss:$136 sps:$4 sm:$0xff]  }
 0x127   :  { %3803 = vmatpush2.bf16.msra.mxu0 %v1830_v42  ;;  %v2134_v42 = vunpack.c.l.s8.bf16 %v606_v34 }
 0x128   :  { %3846 = vmatpush2.bf16.msra.mxu1 %v1958_v43  ;;  %3858 = vmatprep.subr.bf16.mxu0 %v2079_v44  ;;  %v2262_v43 = vunpack.c.l.s8.bf16 %v670_v35  ;;  %v2127_v44 = vunpack.c.h.s8.bf16 %v599_v40 }
 0x129   :  { %3901 = vmatprep.subr.bf16.mxu1 %v2207_v45  ;;  %v2255_v45 = vunpack.c.h.s8.bf16 %v663_v41 }
 0x12a   :  { %3805 = vmatmul.mubr.bf16.vlgmr.msra.gmra.mxu0 %v7766_v48  ;;  %v2126_v48 = vunpack.c.h.s8.bf16 %v598_v46 }
 0x12b   :  { %3848 = vmatmul.mubr.bf16.vlgmr.msra.gmra.mxu1 %v7767_v49  ;;  %3859 = vmatpush1.bf16.msra.mxu0 %v2078_v50  ;;  %v2254_v49 = vunpack.c.h.s8.bf16 %v662_v47  ;;  %v2119_v50 = vunpack.c.l.s8.bf16 %v599_v40  ;;  %v758_v40 = vld [vmem:[#allocation5 + $0x1280] sm:$0xff] }
 0x12c   :  { %3902 = vmatpush1.bf16.msra.mxu1 %v2206_v51  ;;  %3860 = vmatprep.subr.bf16.mxu0 %v2071_v52  ;;  %v2247_v51 = vunpack.c.l.s8.bf16 %v663_v41  ;;  %v591_v52 = vld [vmem:[#allocation5 + $0xd48] sm:$0xff]  ;;  %v2446_v46 = vunpack.c.h.s8.bf16 %v758_v40 }
 0x12d   :  { %3903 = vmatprep.subr.bf16.mxu1 %v2199_v53  ;;  %3890 = vmatprep.mubr.bf16.mxu0 %v7768_v56  ;;  %v655_v53 = vld [vmem:[#allocation5 + $0xf48] sm:$0xff]  ;;  %v2111_v56 = vunpack.c.h.s8.bf16 %v591_v52  ;;  %v2103_v62 = vunpack.c.l.s8.bf16 %v591_v52  ;;  %v2438_v52 = vunpack.c.l.s8.bf16 %v758_v40  ;;  %v718_v40 = vld [vmem:[#allocation5 + $0x1140] sm:$0xff] }
 0x12e   :  { %3933 = vmatprep.mubr.bf16.mxu1 %v7770_v57  ;;  %v2239_v57 = vunpack.c.h.s8.bf16 %v655_v53  ;;  %v2231_v63 = vunpack.c.l.s8.bf16 %v655_v53 }
 0x12f   :  { %3861 = vmatpush1.bf16.msra.mxu0 %v2070_v58  ;;  %v590_v58 = vld [vmem:[#allocation5 + $0xd40] sm:$0xff] }
 0x130   :  { %3904 = vmatpush1.bf16.msra.mxu1 %v2198_v59  ;;  %3862 = vmatprep.subr.bf16.mxu0 %v2063_v60  ;;  %v654_v59 = vld [vmem:[#allocation5 + $0xf40] sm:$0xff]  ;;  %v2110_v60 = vunpack.c.h.s8.bf16 %v590_v58 }
 0x131   :  { %3905 = vmatprep.subr.bf16.mxu1 %v2191_v61  ;;  %v2238_v61 = vunpack.c.h.s8.bf16 %v654_v59 }
 0x133   :  { %3863 = vmatpush1.bf16.msra.mxu0 %v2062_v0  ;;  %v583_v0 = vld [vmem:[#allocation5 + $0xd08] sm:$0xff] }
 0x134   :  { %3906 = vmatpush1.bf16.msra.mxu1 %v2190_v1  ;;  %3864 = vmatprep.subr.bf16.mxu0 %v2055_v2  ;;  %v647_v1 = vld [vmem:[#allocation5 + $0xf08] sm:$0xff]  ;;  %v2102_v2 = vunpack.c.l.s8.bf16 %v590_v58  ;;  %v2095_v4 = vunpack.c.h.s8.bf16 %v583_v0  ;;  %v2087_v10 = vunpack.c.l.s8.bf16 %v583_v0 }
 0x135   :  { %3907 = vmatprep.subr.bf16.mxu1 %v2183_v3  ;;  %v2230_v3 = vunpack.c.l.s8.bf16 %v654_v59  ;;  %v2223_v5 = vunpack.c.h.s8.bf16 %v647_v1  ;;  %v2215_v11 = vunpack.c.l.s8.bf16 %v647_v1 }
 0x137   :  { %3865 = vmatpush1.bf16.msra.mxu0 %v2054_v6  ;;  %v582_v6 = vld [vmem:[#allocation5 + $0xd00] sm:$0xff] }
 0x138   :  { %3908 = vmatpush1.bf16.msra.mxu1 %v2182_v7  ;;  %3866 = vmatprep.subr.bf16.mxu0 %v2047_v8  ;;  %v646_v7 = vld [vmem:[#allocation5 + $0xf00] sm:$0xff]  ;;  %v2094_v8 = vunpack.c.h.s8.bf16 %v582_v6 }
 0x139   :  { %3909 = vmatprep.subr.bf16.mxu1 %v2175_v9  ;;  %v2222_v9 = vunpack.c.h.s8.bf16 %v646_v7 }
 0x13b   :  { %3867 = vmatpush1.bf16.msra.mxu0 %v2046_v12  ;;  %v703_v12 = vld [vmem:[#allocation5 + $0x10c8] sm:$0xff] }
 0x13c   :  { %3910 = vmatpush1.bf16.msra.mxu1 %v2174_v13  ;;  %3868 = vmatprep.subr.bf16.mxu0 %v2039_v14  ;;  %v767_v13 = vld [vmem:[#allocation5 + $0x12c8] sm:$0xff]  ;;  %v2086_v14 = vunpack.c.l.s8.bf16 %v582_v6  ;;  %v2335_v16 = vunpack.c.h.s8.bf16 %v703_v12 }
 0x13d   :  { %3911 = vmatprep.subr.bf16.mxu1 %v2167_v15  ;;  %v2214_v15 = vunpack.c.l.s8.bf16 %v646_v7  ;;  %v2463_v17 = vunpack.c.h.s8.bf16 %v767_v13 }
 0x13f   :  { %3869 = vmatpush1.bf16.msra.mxu0 %v2038_v18  ;;  %v702_v18 = vld [vmem:[#allocation5 + $0x10c0] sm:$0xff] }
 0x140   :  { %3912 = vmatpush1.bf16.msra.mxu1 %v2166_v19  ;;  %3870 = vmatprep.subr.bf16.mxu0 %v2031_v20  ;;  %v766_v19 = vld [vmem:[#allocation5 + $0x12c0] sm:$0xff]  ;;  %v2334_v22 = vunpack.c.h.s8.bf16 %v702_v18 }
 0x141   :  { %3913 = vmatprep.subr.bf16.mxu1 %v2159_v21  ;;  %v7772_v20 = vld [vmem:[#allocation2 + $0x30] ss:$136 sps:$4 sm:$0xff]   ;;  %v2462_v23 = vunpack.c.h.s8.bf16 %v766_v19  ;;  %v2454_v34 = vunpack.c.l.s8.bf16 %v766_v19 }
 0x142   :  { %v7773_v21 = vld [vmem:[#allocation2 + $0x38] ss:$136 sps:$4 sm:$0xff]  }
 0x143   :  { %3871 = vmatpush1.bf16.msra.mxu0 %v2030_v24  ;;  %v2327_v24 = vunpack.c.l.s8.bf16 %v703_v12 }
 0x144   :  { %3914 = vmatpush1.bf16.msra.mxu1 %v2158_v25  ;;  %3872 = vmatprep.subr.bf16.mxu0 %v2023_v26  ;;  %v2455_v25 = vunpack.c.l.s8.bf16 %v767_v13  ;;  %v695_v26 = vld [vmem:[#allocation5 + $0x1088] sm:$0xff] }
 0x145   :  { %3915 = vmatprep.subr.bf16.mxu1 %v2151_v27  ;;  %v759_v27 = vld [vmem:[#allocation5 + $0x1288] sm:$0xff]  ;;  %v2311_v47 = vunpack.c.l.s8.bf16 %v695_v26 }
 0x147   :  { %3873 = vmatpush1.bf16.msra.mxu0 %v2022_v30 }
 0x148   :  { %3916 = vmatpush1.bf16.msra.mxu1 %v2150_v31  ;;  %3874 = vmatprep.subr.bf16.mxu0 %v2143_v32 }
 0x149   :  { %3917 = vmatprep.subr.bf16.mxu1 %v2271_v33  ;;  %v2326_v33 = vunpack.c.l.s8.bf16 %v702_v18 }
 0x14b   :  { %3875 = vmatpush2.bf16.msra.mxu0 %v2142_v36 }
 0x14c   :  { %3918 = vmatpush2.bf16.msra.mxu1 %v2270_v37  ;;  %3876 = vmatprep.subr.bf16.mxu0 %v2135_v38  ;;  %v2319_v37 = vunpack.c.h.s8.bf16 %v695_v26  ;;  %v2447_v38 = vunpack.c.h.s8.bf16 %v759_v27 }
 0x14d   :  { %3919 = vmatprep.subr.bf16.mxu1 %v2263_v39  ;;  %v694_v39 = vld [vmem:[#allocation5 + $0x1080] sm:$0xff] }
 0x14f   :  { %3877 = vmatpush2.bf16.msra.mxu0 %v2134_v42 }
 0x150   :  { %3920 = vmatpush2.bf16.msra.mxu1 %v2262_v43  ;;  %3878 = vmatprep.subr.bf16.mxu0 %v2127_v44 }
 0x151   :  { %3921 = vmatprep.subr.bf16.mxu1 %v2255_v45  ;;  %v2318_v45 = vunpack.c.h.s8.bf16 %v694_v39 }
 0x153   :  { %3879 = vmatpush2.bf16.msra.mxu0 %v2126_v48  ;;  %v2439_v48 = vunpack.c.l.s8.bf16 %v759_v27  ;;  %v726_v27 = vld [vmem:[#allocation5 + $0x1180] sm:$0xff] }
 0x154   :  { %3922 = vmatpush2.bf16.msra.mxu1 %v2254_v49  ;;  %3880 = vmatprep.subr.bf16.mxu0 %v2119_v50  ;;  %v687_v49 = vld [vmem:[#allocation5 + $0x1048] sm:$0xff] }
 0x155   :  { %3923 = vmatprep.subr.bf16.mxu1 %v2247_v51  ;;  %v751_v50 = vld [vmem:[#allocation5 + $0x1248] sm:$0xff]  ;;  %v2310_v51 = vunpack.c.l.s8.bf16 %v694_v39  ;;  %v2303_v53 = vunpack.c.h.s8.bf16 %v687_v49  ;;  %v2295_v59 = vunpack.c.l.s8.bf16 %v687_v49 }
 0x156   :  { %v775_v49 = vld [vmem:[#allocation5 + $0x1308] sm:$0xff] }
 0x157   :  { %3881 = vmatpush2.bf16.msra.mxu0 %v2118_v54  ;;  %v2431_v54 = vunpack.c.h.s8.bf16 %v751_v50 }
 0x158   :  { %3924 = vmatpush2.bf16.msra.mxu1 %v2246_v55  ;;  %3882 = vmatprep.subr.bf16.mxu0 %v2111_v56  ;;  %v686_v55 = vld [vmem:[#allocation5 + $0x1040] sm:$0xff] }
 0x159   :  { %3925 = vmatprep.subr.bf16.mxu1 %v2239_v57  ;;  %v750_v56 = vld [vmem:[#allocation5 + $0x1240] sm:$0xff]  ;;  %v2302_v57 = vunpack.c.h.s8.bf16 %v686_v55 }
 0x15a   :  { %v2430_v58 = vunpack.c.h.s8.bf16 %v750_v56  ;;  %v2422_v0 = vunpack.c.l.s8.bf16 %v750_v56 }
 0x15b   :  { %3883 = vmatpush2.bf16.msra.mxu0 %v2110_v60  ;;  %v2423_v60 = vunpack.c.l.s8.bf16 %v751_v50  ;;  %v2358_v50 = vunpack.c.l.s8.bf16 %v718_v40 }
 0x15c   :  { %3926 = vmatpush2.bf16.msra.mxu1 %v2238_v61  ;;  %3884 = vmatprep.subr.bf16.mxu0 %v2103_v62  ;;  %v679_v61 = vld [vmem:[#allocation5 + $0x1008] sm:$0xff] }
 0x15d   :  { %3927 = vmatprep.subr.bf16.mxu1 %v2231_v63  ;;  %v743_v62 = vld [vmem:[#allocation5 + $0x1208] sm:$0xff]  ;;  %v2294_v63 = vunpack.c.l.s8.bf16 %v686_v55  ;;  %v2287_v1 = vunpack.c.h.s8.bf16 %v679_v61  ;;  %v2279_v7 = vunpack.c.l.s8.bf16 %v679_v61  ;;  %v774_v55 = vld [vmem:[#allocation5 + $0x1300] sm:$0xff] }
 0x15e   :  { %v895_v61 = vld [vmem:[#allocation5 + $0x16c8] sm:$0xff] }
 0x15f   :  { %3885 = vmatpush2.bf16.msra.mxu0 %v2102_v2  ;;  %v2415_v2 = vunpack.c.h.s8.bf16 %v743_v62 }
 0x160   :  { %3928 = vmatpush2.bf16.msra.mxu1 %v2230_v3  ;;  %3886 = vmatprep.subr.bf16.mxu0 %v2095_v4  ;;  %v678_v3 = vld [vmem:[#allocation5 + $0x1000] sm:$0xff] }
 0x161   :  { %3929 = vmatprep.subr.bf16.mxu1 %v2223_v5  ;;  %v742_v4 = vld [vmem:[#allocation5 + $0x1200] sm:$0xff]  ;;  %v2286_v5 = vunpack.c.h.s8.bf16 %v678_v3 }
 0x162   :  { %v2414_v6 = vunpack.c.h.s8.bf16 %v742_v4  ;;  %v2406_v12 = vunpack.c.l.s8.bf16 %v742_v4  ;;  %v7778_v4 = vld [vmem:[#allocation2 + $0x40] ss:$136 sps:$4 sm:$0xff]  }
 0x163   :  { %3887 = vmatpush2.bf16.msra.mxu0 %v2094_v8  ;;  %v2407_v8 = vunpack.c.l.s8.bf16 %v743_v62 }
 0x164   :  { %3930 = vmatpush2.bf16.msra.mxu1 %v2222_v9  ;;  %3888 = vmatprep.subr.bf16.mxu0 %v2087_v10  ;;  %v735_v9 = vld [vmem:[#allocation5 + $0x11c8] sm:$0xff] }
 0x165   :  { %3931 = vmatprep.subr.bf16.mxu1 %v2215_v11  ;;  %v799_v10 = vld [vmem:[#allocation5 + $0x13c8] sm:$0xff]  ;;  %v2278_v11 = vunpack.c.l.s8.bf16 %v678_v3  ;;  %v2399_v13 = vunpack.c.h.s8.bf16 %v735_v9  ;;  %v2391_v19 = vunpack.c.l.s8.bf16 %v735_v9  ;;  %v894_v3 = vld [vmem:[#allocation5 + $0x16c0] sm:$0xff] }
 0x167   :  { %3889 = vmatpush2.bf16.msra.mxu0 %v2086_v14  ;;  %v2527_v14 = vunpack.c.h.s8.bf16 %v799_v10 }
 0x168   :  { %3932 = vmatpush2.bf16.msra.mxu1 %v2214_v15  ;;  %3944 = vmatprep.subr.bf16.mxu0 %v2335_v16  ;;  %v734_v15 = vld [vmem:[#allocation5 + $0x11c0] sm:$0xff] }
 0x169   :  { %3987 = vmatprep.subr.bf16.mxu1 %v2463_v17  ;;  %v798_v16 = vld [vmem:[#allocation5 + $0x13c0] sm:$0xff]  ;;  %v2398_v17 = vunpack.c.h.s8.bf16 %v734_v15 }
 0x16a   :  { %v3634_v30 = vpop.f32.mrf.mxu0  ;;  %3891 = vmatmul.mubr.bf16.vlgmr.msra.gmra.mxu0 %v7772_v20  ;;  %v2526_v18 = vunpack.c.h.s8.bf16 %v798_v16  ;;  %v2519_v20 = vunpack.c.l.s8.bf16 %v799_v10 }
 0x16b   :  { %v3677_v31 = vpop.f32.mrf.mxu1  ;;  %3934 = vmatmul.mubr.bf16.vlgmr.msra.gmra.mxu1 %v7773_v21  ;;  %3945 = vmatpush1.bf16.msra.mxu0 %v2334_v22  ;;  %v727_v21 = vld [vmem:[#allocation5 + $0x1188] sm:$0xff] }
 0x16c   :  { %v8264_v32 = vadd.f32 %v3677_v31, %v3634_v30  ;;  %3988 = vmatpush1.bf16.msra.mxu1 %v2462_v23  ;;  %v3636_v35 = vpop.f32.mrf.mxu0  ;;  %3946 = vmatprep.subr.bf16.mxu0 %v2327_v24  ;;  %v791_v22 = vld [vmem:[#allocation5 + $0x1388] sm:$0xff]  ;;  %v2390_v23 = vunpack.c.l.s8.bf16 %v734_v15  ;;  %v2518_v24 = vunpack.c.l.s8.bf16 %v798_v16  ;;  %v2375_v31 = vunpack.c.l.s8.bf16 %v727_v21 }
 0x16d   :  { %v3679_v36 = vpop.f32.mrf.mxu1  ;;  %3989 = vmatprep.subr.bf16.mxu1 %v2455_v25  ;;  %3976 = vmatprep.mubr.bf16.mxu0 %v7774_v28  ;;  %v2383_v25 = vunpack.c.h.s8.bf16 %v727_v21  ;;  %v2511_v26 = vunpack.c.h.s8.bf16 %v791_v22  ;;  %v790_v28 = vld [vmem:[#allocation5 + $0x1380] sm:$0xff]  ;;  %v7782_v15 = vld [vmem:[#allocation2 + $0x5c] ss:$136 sps:$4 sm:$0xff]  }
 0x16e   :  { %v8266_v41 = vadd.f32 %v3679_v36, %v3636_v35  ;;  %4019 = vmatprep.mubr.bf16.mxu1 %v7776_v29  ;;  %v3638_v42 = vpop.f32.mrf.mxu0  ;;  %v2382_v29 = vunpack.c.h.s8.bf16 %v726_v27  ;;  %v2510_v30 = vunpack.c.h.s8.bf16 %v790_v28  ;;  %v783_v35 = vld [vmem:[#allocation5 + $0x1348] sm:$0xff]  ;;  %v2374_v36 = vunpack.c.l.s8.bf16 %v726_v27 }
 0x16f   :  { %v3681_v43 = vpop.f32.mrf.mxu1  ;;  %3947 = vmatpush1.bf16.msra.mxu0 %v2326_v33  ;;  %v2503_v33 = vunpack.c.l.s8.bf16 %v791_v22  ;;  %v2495_v39 = vunpack.c.h.s8.bf16 %v783_v35 }
 0x170   :  { %v8268_v44 = vadd.f32 %v3681_v43, %v3638_v42  ;;  %3990 = vmatpush1.bf16.msra.mxu1 %v2454_v34  ;;  %3948 = vmatprep.subr.bf16.mxu0 %v2319_v37  ;;  %v719_v34 = vld [vmem:[#allocation5 + $0x1148] sm:$0xff]  ;;  %v2502_v37 = vunpack.c.l.s8.bf16 %v790_v28  ;;  %v782_v42 = vld [vmem:[#allocation5 + $0x1340] sm:$0xff]  ;;  %v2366_v43 = vunpack.c.h.s8.bf16 %v718_v40 }
 0x171   :  { %3991 = vmatprep.subr.bf16.mxu1 %v2447_v38  ;;  %v2367_v38 = vunpack.c.h.s8.bf16 %v719_v34  ;;  %v8272_v9 = vpop.f32.mrf.mxu1 }
 0x173   :  { %3949 = vmatpush1.bf16.msra.mxu0 %v2318_v45  ;;  %v2494_v45 = vunpack.c.h.s8.bf16 %v782_v42 }
 0x174   :  { %3992 = vmatpush1.bf16.msra.mxu1 %v2446_v46  ;;  %3950 = vmatprep.subr.bf16.mxu0 %v2311_v47  ;;  %v2359_v46 = vunpack.c.l.s8.bf16 %v719_v34  ;;  %v2487_v47 = vunpack.c.l.s8.bf16 %v783_v35 }
 0x175   :  { %3993 = vmatprep.subr.bf16.mxu1 %v2439_v48  ;;  %v711_v48 = vld [vmem:[#allocation5 + $0x1108] sm:$0xff] }
 0x177   :  { %3951 = vmatpush1.bf16.msra.mxu0 %v2310_v51  ;;  %v2486_v51 = vunpack.c.l.s8.bf16 %v782_v42 }
 0x178   :  { %3994 = vmatpush1.bf16.msra.mxu1 %v2438_v52  ;;  %3952 = vmatprep.subr.bf16.mxu0 %v2303_v53  ;;  %v2351_v52 = vunpack.c.h.s8.bf16 %v711_v48  ;;  %v2479_v53 = vunpack.c.h.s8.bf16 %v775_v49 }
 0x179   :  { %3995 = vmatprep.subr.bf16.mxu1 %v2431_v54  ;;  %v710_v54 = vld [vmem:[#allocation5 + $0x1100] sm:$0xff] }
 0x17a   :  { %v2350_v56 = vunpack.c.h.s8.bf16 %v710_v54  ;;  %v2342_v62 = vunpack.c.l.s8.bf16 %v710_v54 }
 0x17b   :  { %3953 = vmatpush1.bf16.msra.mxu0 %v2302_v57  ;;  %v2478_v57 = vunpack.c.h.s8.bf16 %v774_v55 }
 0x17c   :  { %3996 = vmatpush1.bf16.msra.mxu1 %v2430_v58  ;;  %3954 = vmatprep.subr.bf16.mxu0 %v2295_v59  ;;  %v2343_v58 = vunpack.c.l.s8.bf16 %v711_v48  ;;  %v2471_v59 = vunpack.c.l.s8.bf16 %v775_v49 }
 0x17d   :  { %3997 = vmatprep.subr.bf16.mxu1 %v2423_v60  ;;  %v831_v60 = vld [vmem:[#allocation5 + $0x14c8] sm:$0xff] }
 0x17e   :  { %v2583_v10 = vunpack.c.l.s8.bf16 %v831_v60 }
 0x17f   :  { %3955 = vmatpush1.bf16.msra.mxu0 %v2294_v63  ;;  %v2470_v63 = vunpack.c.l.s8.bf16 %v774_v55 }
 0x180   :  { %3998 = vmatpush1.bf16.msra.mxu1 %v2422_v0  ;;  %3956 = vmatprep.subr.bf16.mxu0 %v2287_v1  ;;  %v2591_v0 = vunpack.c.h.s8.bf16 %v831_v60  ;;  %v2719_v1 = vunpack.c.h.s8.bf16 %v895_v61 }
 0x181   :  { %3999 = vmatprep.subr.bf16.mxu1 %v2415_v2  ;;  %v830_v2 = vld [vmem:[#allocation5 + $0x14c0] sm:$0xff] }
 0x183   :  { %3957 = vmatpush1.bf16.msra.mxu0 %v2286_v5  ;;  %v7779_v5 = vld [vmem:[#allocation2 + $0x48] ss:$136 sps:$4 sm:$0xff]  }
 0x184   :  { %4000 = vmatpush1.bf16.msra.mxu1 %v2414_v6  ;;  %3958 = vmatprep.subr.bf16.mxu0 %v2279_v7  ;;  %v2590_v6 = vunpack.c.h.s8.bf16 %v830_v2  ;;  %v2718_v7 = vunpack.c.h.s8.bf16 %v894_v3 }
 0x185   :  { %4001 = vmatprep.subr.bf16.mxu1 %v2407_v8  ;;  %v8270_v8 = vpop.f32.mrf.mxu0 }
 0x187   :  { %3959 = vmatpush1.bf16.msra.mxu0 %v2278_v11  ;;  %v2711_v11 = vunpack.c.l.s8.bf16 %v895_v61 }
 0x188   :  { %4002 = vmatpush1.bf16.msra.mxu1 %v2406_v12  ;;  %3960 = vmatprep.subr.bf16.mxu0 %v2399_v13  ;;  %v823_v12 = vld [vmem:[#allocation5 + $0x1488] sm:$0xff] }
 0x189   :  { %4003 = vmatprep.subr.bf16.mxu1 %v2527_v14  ;;  %v887_v13 = vld [vmem:[#allocation5 + $0x1688] sm:$0xff]  ;;  %v2567_v35 = vunpack.c.l.s8.bf16 %v823_v12 }
 0x18a   :  { %v7780_v14 = vld [vmem:[#allocation2 + $0x54] ss:$136 sps:$4 sm:$0xff]  }
 0x18b   :  { %3961 = vmatpush2.bf16.msra.mxu0 %v2398_v17 }
 0x18c   :  { %4004 = vmatpush2.bf16.msra.mxu1 %v2526_v18  ;;  %3962 = vmatprep.subr.bf16.mxu0 %v2391_v19  ;;  %v2582_v19 = vunpack.c.l.s8.bf16 %v830_v2 }
 0x18d   :  { %4005 = vmatprep.subr.bf16.mxu1 %v2519_v20  ;;  %v2710_v20 = vunpack.c.l.s8.bf16 %v894_v3 }
 0x18f   :  { %3963 = vmatpush2.bf16.msra.mxu0 %v2390_v23  ;;  %v2575_v23 = vunpack.c.h.s8.bf16 %v823_v12  ;;  %v855_v12 = vld [vmem:[#allocation5 + $0x1588] sm:$0xff] }
 0x190   :  { %4006 = vmatpush2.bf16.msra.mxu1 %v2518_v24  ;;  %3964 = vmatprep.subr.bf16.mxu0 %v2383_v25  ;;  %v2703_v24 = vunpack.c.h.s8.bf16 %v887_v13  ;;  %v822_v25 = vld [vmem:[#allocation5 + $0x1480] sm:$0xff] }
 0x191   :  { %4007 = vmatprep.subr.bf16.mxu1 %v2511_v26  ;;  %v886_v26 = vld [vmem:[#allocation5 + $0x1680] sm:$0xff] }
 0x192   :  { %v2694_v40 = vunpack.c.l.s8.bf16 %v886_v26 }
 0x193   :  { %3965 = vmatpush2.bf16.msra.mxu0 %v2382_v29 }
 0x194   :  { %4008 = vmatpush2.bf16.msra.mxu1 %v2510_v30  ;;  %3966 = vmatprep.subr.bf16.mxu0 %v2375_v31  ;;  %v2574_v31 = vunpack.c.h.s8.bf16 %v822_v25 }
 0x195   :  { %4009 = vmatprep.subr.bf16.mxu1 %v2503_v33  ;;  %v2702_v33 = vunpack.c.h.s8.bf16 %v886_v26 }
 0x197   :  { %3967 = vmatpush2.bf16.msra.mxu0 %v2374_v36  ;;  %v2695_v36 = vunpack.c.l.s8.bf16 %v887_v13  ;;  %v919_v13 = vld [vmem:[#allocation5 + $0x1788] sm:$0xff] }
 0x198   :  { %4010 = vmatpush2.bf16.msra.mxu1 %v2502_v37  ;;  %3968 = vmatprep.subr.bf16.mxu0 %v2367_v38  ;;  %v815_v38 = vld [vmem:[#allocation5 + $0x1448] sm:$0xff] }
 0x199   :  { %4011 = vmatprep.subr.bf16.mxu1 %v2495_v39  ;;  %v2566_v39 = vunpack.c.l.s8.bf16 %v822_v25  ;;  %v2551_v48 = vunpack.c.l.s8.bf16 %v815_v38  ;;  %v911_v25 = vld [vmem:[#allocation5 + $0x1748] sm:$0xff] }
 0x19b   :  { %3969 = vmatpush2.bf16.msra.mxu0 %v2366_v43  ;;  %v814_v43 = vld [vmem:[#allocation5 + $0x1440] sm:$0xff] }
 0x19c   :  { %4012 = vmatpush2.bf16.msra.mxu1 %v2494_v45  ;;  %3970 = vmatprep.subr.bf16.mxu0 %v2359_v46  ;;  %v878_v45 = vld [vmem:[#allocation5 + $0x1640] sm:$0xff]  ;;  %v2558_v46 = vunpack.c.h.s8.bf16 %v814_v43 }
 0x19d   :  { %4013 = vmatprep.subr.bf16.mxu1 %v2487_v47  ;;  %v2686_v47 = vunpack.c.h.s8.bf16 %v878_v45 }
 0x19f   :  { %3971 = vmatpush2.bf16.msra.mxu0 %v2358_v50  ;;  %v807_v50 = vld [vmem:[#allocation5 + $0x1408] sm:$0xff] }
 0x1a0   :  { %4014 = vmatpush2.bf16.msra.mxu1 %v2486_v51  ;;  %3972 = vmatprep.subr.bf16.mxu0 %v2351_v52  ;;  %v871_v51 = vld [vmem:[#allocation5 + $0x1608] sm:$0xff]  ;;  %v2550_v52 = vunpack.c.l.s8.bf16 %v814_v43  ;;  %v2543_v54 = vunpack.c.h.s8.bf16 %v807_v50  ;;  %v2535_v60 = vunpack.c.l.s8.bf16 %v807_v50 }
 0x1a1   :  { %4015 = vmatprep.subr.bf16.mxu1 %v2479_v53  ;;  %v2678_v53 = vunpack.c.l.s8.bf16 %v878_v45  ;;  %v2671_v55 = vunpack.c.h.s8.bf16 %v871_v51  ;;  %v2663_v61 = vunpack.c.l.s8.bf16 %v871_v51  ;;  %v838_v45 = vld [vmem:[#allocation5 + $0x1500] sm:$0xff]  ;;  %v959_v51 = vld [vmem:[#allocation5 + $0x18c8] sm:$0xff] }
 0x1a3   :  { %3973 = vmatpush2.bf16.msra.mxu0 %v2350_v56  ;;  %v806_v56 = vld [vmem:[#allocation5 + $0x1400] sm:$0xff] }
 0x1a4   :  { %4016 = vmatpush2.bf16.msra.mxu1 %v2478_v57  ;;  %3974 = vmatprep.subr.bf16.mxu0 %v2343_v58  ;;  %v870_v57 = vld [vmem:[#allocation5 + $0x1600] sm:$0xff]  ;;  %v2542_v58 = vunpack.c.h.s8.bf16 %v806_v56 }
 0x1a5   :  { %4017 = vmatprep.subr.bf16.mxu1 %v2471_v59  ;;  %v2670_v59 = vunpack.c.h.s8.bf16 %v870_v57 }
 0x1a7   :  { %3975 = vmatpush2.bf16.msra.mxu0 %v2342_v62  ;;  %v863_v62 = vld [vmem:[#allocation5 + $0x15c8] sm:$0xff] }
 0x1a8   :  { %4018 = vmatpush2.bf16.msra.mxu1 %v2470_v63  ;;  %4030 = vmatprep.subr.bf16.mxu0 %v2591_v0  ;;  %v927_v63 = vld [vmem:[#allocation5 + $0x17c8] sm:$0xff]  ;;  %v2534_v0 = vunpack.c.l.s8.bf16 %v806_v56  ;;  %v2655_v2 = vunpack.c.h.s8.bf16 %v863_v62 }
 0x1a9   :  { %4073 = vmatprep.subr.bf16.mxu1 %v2719_v1  ;;  %v2662_v1 = vunpack.c.l.s8.bf16 %v870_v57  ;;  %v2783_v3 = vunpack.c.h.s8.bf16 %v927_v63  ;;  %v958_v57 = vld [vmem:[#allocation5 + $0x18c0] sm:$0xff] }
 0x1aa   :  { %v3720_v16 = vpop.f32.mrf.mxu0  ;;  %3977 = vmatmul.mubr.bf16.vlgmr.msra.gmra.mxu0 %v7778_v4  ;;  %v862_v4 = vld [vmem:[#allocation5 + $0x15c0] sm:$0xff] }
 0x1ab   :  { %v3763_v17 = vpop.f32.mrf.mxu1  ;;  %4020 = vmatmul.mubr.bf16.vlgmr.msra.gmra.mxu1 %v7779_v5  ;;  %v3721_v18 = vadd.f32 %v3720_v16, %v8264_v32  ;;  %4031 = vmatpush1.bf16.msra.mxu0 %v2590_v6  ;;  %v926_v5 = vld [vmem:[#allocation5 + $0x17c0] sm:$0xff]  ;;  %v2654_v6 = vunpack.c.h.s8.bf16 %v862_v4  ;;  %v2639_v16 = vunpack.c.h.s8.bf16 %v855_v12 }
 0x1ac   :  { %4074 = vmatpush1.bf16.msra.mxu1 %v2718_v7  ;;  %v3722_v21 = vpop.f32.mrf.mxu0  ;;  %4032 = vmatprep.subr.bf16.mxu0 %v2583_v10  ;;  %v2782_v7 = vunpack.c.h.s8.bf16 %v926_v5  ;;  %v2647_v10 = vunpack.c.l.s8.bf16 %v863_v62 }
 0x1ad   :  { %v3765_v22 = vpop.f32.mrf.mxu1  ;;  %4075 = vmatprep.subr.bf16.mxu1 %v2711_v11  ;;  %v8275_v27 = vadd.f32 %v3763_v17, %v3721_v18  ;;  %v3723_v28 = vadd.f32 %v3722_v21, %v8266_v41  ;;  %4062 = vmatprep.mubr.bf16.mxu0 %v7780_v14  ;;  %v879_v41 = vld [vmem:[#allocation5 + $0x1648] sm:$0xff]  ;;  %v2775_v11 = vunpack.c.l.s8.bf16 %v927_v63  ;;  %v2646_v14 = vunpack.c.l.s8.bf16 %v862_v4  ;;  %v854_v18 = vld [vmem:[#allocation5 + $0x1580] sm:$0xff] }
 0x1ae   :  { %4105 = vmatprep.mubr.bf16.mxu1 %v7782_v15  ;;  %v3724_v29 = vpop.f32.mrf.mxu0  ;;  %v2687_v42 = vunpack.c.h.s8.bf16 %v879_v41  ;;  %v2679_v49 = vunpack.c.l.s8.bf16 %v879_v41  ;;  %v2774_v15 = vunpack.c.l.s8.bf16 %v926_v5  ;;  %v2767_v17 = vunpack.c.h.s8.bf16 %v919_v13  ;;  %v839_v41 = vld [vmem:[#allocation5 + $0x1508] sm:$0xff]  ;;  %v7786_v5 = vld [vmem:[#allocation2 + $0x64] ss:$136 sps:$4 sm:$0xff]  }
 0x1af   :  { %v8278_v32 = vadd.f32 %v3765_v22, %v3723_v28  ;;  %v3725_v30 = vadd.f32 %v3724_v29, %v8268_v44  ;;  %4033 = vmatpush1.bf16.msra.mxu0 %v2582_v19  ;;  %v3767_v34 = vpop.f32.mrf.mxu1  ;;  %v2559_v44 = vunpack.c.h.s8.bf16 %v815_v38  ;;  %v918_v19 = vld [vmem:[#allocation5 + $0x1780] sm:$0xff]  ;;  %v2631_v22 = vunpack.c.l.s8.bf16 %v855_v12  ;;  %v1015_v4 = vld [vmem:[#allocation5 + $0x1a88] sm:$0xff] }
 0x1b0   :  { %4076 = vmatpush1.bf16.msra.mxu1 %v2710_v20  ;;  %4034 = vmatprep.subr.bf16.mxu0 %v2575_v23  ;;  %v2638_v20 = vunpack.c.h.s8.bf16 %v854_v18  ;;  %v2766_v21 = vunpack.c.h.s8.bf16 %v918_v19  ;;  %v2759_v23 = vunpack.c.l.s8.bf16 %v919_v13  ;;  %v2630_v26 = vunpack.c.l.s8.bf16 %v854_v18  ;;  %v8283_v63 = vpop.f32.mrf.mxu0  ;;  %v950_v18 = vld [vmem:[#allocation5 + $0x1880] sm:$0xff] }
 0x1b1   :  { %4077 = vmatprep.subr.bf16.mxu1 %v2703_v24  ;;  %v8281_v37 = vadd.f32 %v3767_v34, %v3725_v30  ;;  %v847_v24 = vld [vmem:[#allocation5 + $0x1548] sm:$0xff]  ;;  %v2758_v28 = vunpack.c.l.s8.bf16 %v918_v19  ;;  %v2751_v30 = vunpack.c.h.s8.bf16 %v911_v25  ;;  %v2743_v38 = vunpack.c.l.s8.bf16 %v911_v25  ;;  %v1014_v19 = vld [vmem:[#allocation5 + $0x1a80] sm:$0xff] }
 0x1b2   :  { %v2623_v29 = vunpack.c.h.s8.bf16 %v847_v24  ;;  %v2838_v12 = vunpack.c.l.s8.bf16 %v958_v57  ;;  %v2958_v25 = vunpack.c.h.s8.bf16 %v1014_v19 }
 0x1b3   :  { %4035 = vmatpush1.bf16.msra.mxu0 %v2574_v31  ;;  %v846_v31 = vld [vmem:[#allocation5 + $0x1540] sm:$0xff] }
 0x1b4   :  { %4078 = vmatpush1.bf16.msra.mxu1 %v2702_v33  ;;  %4036 = vmatprep.subr.bf16.mxu0 %v2567_v35  ;;  %v910_v33 = vld [vmem:[#allocation5 + $0x1740] sm:$0xff]  ;;  %v2622_v34 = vunpack.c.h.s8.bf16 %v846_v31 }
 0x1b5   :  { %4079 = vmatprep.subr.bf16.mxu1 %v2695_v36  ;;  %v2750_v35 = vunpack.c.h.s8.bf16 %v910_v33  ;;  %v2615_v36 = vunpack.c.l.s8.bf16 %v847_v24  ;;  %v2830_v24 = vunpack.c.h.s8.bf16 %v950_v18 }
 0x1b7   :  { %4037 = vmatpush1.bf16.msra.mxu0 %v2566_v39  ;;  %v903_v39 = vld [vmem:[#allocation5 + $0x1708] sm:$0xff] }
 0x1b8   :  { %4080 = vmatpush1.bf16.msra.mxu1 %v2694_v40  ;;  %4038 = vmatprep.subr.bf16.mxu0 %v2559_v44  ;;  %v2614_v40 = vunpack.c.l.s8.bf16 %v846_v31  ;;  %v2742_v44 = vunpack.c.l.s8.bf16 %v910_v33  ;;  %v2735_v43 = vunpack.c.h.s8.bf16 %v903_v39  ;;  %v2727_v50 = vunpack.c.l.s8.bf16 %v903_v39  ;;  %v943_v31 = vld [vmem:[#allocation5 + $0x1848] sm:$0xff] }
 0x1b9   :  { %4081 = vmatprep.subr.bf16.mxu1 %v2687_v42  ;;  %v2607_v42 = vunpack.c.h.s8.bf16 %v839_v41  ;;  %v2822_v33 = vunpack.c.l.s8.bf16 %v950_v18 }
 0x1bb   :  { %4039 = vmatpush1.bf16.msra.mxu0 %v2558_v46  ;;  %v902_v46 = vld [vmem:[#allocation5 + $0x1700] sm:$0xff] }
 0x1bc   :  { %4082 = vmatpush1.bf16.msra.mxu1 %v2686_v47  ;;  %4040 = vmatprep.subr.bf16.mxu0 %v2551_v48  ;;  %v2606_v47 = vunpack.c.h.s8.bf16 %v838_v45  ;;  %v2734_v48 = vunpack.c.h.s8.bf16 %v902_v46 }
 0x1bd   :  { %4083 = vmatprep.subr.bf16.mxu1 %v2679_v49  ;;  %v2599_v49 = vunpack.c.l.s8.bf16 %v839_v41 }
 0x1bf   :  { %4041 = vmatpush1.bf16.msra.mxu0 %v2550_v52  ;;  %v1023_v52 = vld [vmem:[#allocation5 + $0x1ac8] sm:$0xff] }
 0x1c0   :  { %4084 = vmatpush1.bf16.msra.mxu1 %v2678_v53  ;;  %4042 = vmatprep.subr.bf16.mxu0 %v2543_v54  ;;  %v2598_v53 = vunpack.c.l.s8.bf16 %v838_v45  ;;  %v2726_v54 = vunpack.c.l.s8.bf16 %v902_v46  ;;  %v2975_v56 = vunpack.c.h.s8.bf16 %v1023_v52 }
 0x1c1   :  { %4085 = vmatprep.subr.bf16.mxu1 %v2671_v55  ;;  %v2847_v55 = vunpack.c.h.s8.bf16 %v959_v51 }
 0x1c3   :  { %4043 = vmatpush1.bf16.msra.mxu0 %v2542_v58  ;;  %v1022_v58 = vld [vmem:[#allocation5 + $0x1ac0] sm:$0xff] }
 0x1c4   :  { %4086 = vmatpush1.bf16.msra.mxu1 %v2670_v59  ;;  %4044 = vmatprep.subr.bf16.mxu0 %v2535_v60  ;;  %v7784_v59 = vld [vmem:[#allocation2 + $0x50] ss:$136 sps:$4 sm:$0xff]   ;;  %v2974_v62 = vunpack.c.h.s8.bf16 %v1022_v58  ;;  %v2966_v13 = vunpack.c.l.s8.bf16 %v1022_v58 }
 0x1c5   :  { %4087 = vmatprep.subr.bf16.mxu1 %v2663_v61  ;;  %v7785_v60 = vld [vmem:[#allocation2 + $0x58] ss:$136 sps:$4 sm:$0xff]   ;;  %v2846_v61 = vunpack.c.h.s8.bf16 %v958_v57 }
 0x1c7   :  { %4045 = vmatpush1.bf16.msra.mxu0 %v2534_v0  ;;  %v8285_v0 = vpop.f32.mrf.mxu1 }
 0x1c8   :  { %4088 = vmatpush1.bf16.msra.mxu1 %v2662_v1  ;;  %4046 = vmatprep.subr.bf16.mxu0 %v2655_v2  ;;  %v2839_v1 = vunpack.c.l.s8.bf16 %v959_v51  ;;  %v2967_v2 = vunpack.c.l.s8.bf16 %v1023_v52 }
 0x1c9   :  { %4089 = vmatprep.subr.bf16.mxu1 %v2783_v3  ;;  %v951_v3 = vld [vmem:[#allocation5 + $0x1888] sm:$0xff] }
 0x1cb   :  { %4047 = vmatpush2.bf16.msra.mxu0 %v2654_v6  ;;  %v7788_v6 = vld [vmem:[#allocation2 + $0x6c] ss:$136 sps:$4 sm:$0xff]  }
 0x1cc   :  { %4090 = vmatpush2.bf16.msra.mxu1 %v2782_v7  ;;  %4048 = vmatprep.subr.bf16.mxu0 %v2647_v10 }
 0x1cd   :  { %4091 = vmatprep.subr.bf16.mxu1 %v2775_v11 }
 0x1cf   :  { %4049 = vmatpush2.bf16.msra.mxu0 %v2646_v14 }
 0x1d0   :  { %4092 = vmatpush2.bf16.msra.mxu1 %v2774_v15  ;;  %4050 = vmatprep.subr.bf16.mxu0 %v2639_v16  ;;  %v2831_v16 = vunpack.c.h.s8.bf16 %v951_v3 }
 0x1d1   :  { %4093 = vmatprep.subr.bf16.mxu1 %v2767_v17  ;;  %v2959_v17 = vunpack.c.h.s8.bf16 %v1015_v4 }
 0x1d3   :  { %4051 = vmatpush2.bf16.msra.mxu0 %v2638_v20 }
 0x1d4   :  { %4094 = vmatpush2.bf16.msra.mxu1 %v2766_v21  ;;  %4052 = vmatprep.subr.bf16.mxu0 %v2631_v22 }
 0x1d5   :  { %4095 = vmatprep.subr.bf16.mxu1 %v2759_v23 }
 0x1d7   :  { %4053 = vmatpush2.bf16.msra.mxu0 %v2630_v26 }
 0x1d8   :  { %4096 = vmatpush2.bf16.msra.mxu1 %v2758_v28  ;;  %4054 = vmatprep.subr.bf16.mxu0 %v2623_v29  ;;  %v2823_v28 = vunpack.c.l.s8.bf16 %v951_v3  ;;  %v2951_v29 = vunpack.c.l.s8.bf16 %v1015_v4 }
 0x1d9   :  { %4097 = vmatprep.subr.bf16.mxu1 %v2751_v30 }
 0x1db   :  { %4055 = vmatpush2.bf16.msra.mxu0 %v2622_v34  ;;  %v2950_v34 = vunpack.c.l.s8.bf16 %v1014_v19  ;;  %v975_v19 = vld [vmem:[#allocation5 + $0x1948] sm:$0xff] }
 0x1dc   :  { %4098 = vmatpush2.bf16.msra.mxu1 %v2750_v35  ;;  %4056 = vmatprep.subr.bf16.mxu0 %v2615_v36  ;;  %v942_v36 = vld [vmem:[#allocation5 + $0x1840] sm:$0xff] }
 0x1dd   :  { %4099 = vmatprep.subr.bf16.mxu1 %v2743_v38  ;;  %v1006_v38 = vld [vmem:[#allocation5 + $0x1a40] sm:$0xff]  ;;  %v2814_v41 = vunpack.c.h.s8.bf16 %v942_v36  ;;  %v2806_v45 = vunpack.c.l.s8.bf16 %v942_v36 }
 0x1de   :  { %v2942_v39 = vunpack.c.h.s8.bf16 %v1006_v38  ;;  %v2934_v46 = vunpack.c.l.s8.bf16 %v1006_v38 }
 0x1df   :  { %4057 = vmatpush2.bf16.msra.mxu0 %v2614_v40  ;;  %v2807_v40 = vunpack.c.l.s8.bf16 %v943_v31 }
 0x1e0   :  { %4100 = vmatpush2.bf16.msra.mxu1 %v2742_v44  ;;  %4058 = vmatprep.subr.bf16.mxu0 %v2607_v42  ;;  %v935_v42 = vld [vmem:[#allocation5 + $0x1808] sm:$0xff] }
 0x1e1   :  { %4101 = vmatprep.subr.bf16.mxu1 %v2735_v43  ;;  %v999_v43 = vld [vmem:[#allocation5 + $0x1a08] sm:$0xff] }
 0x1e3   :  { %4059 = vmatpush2.bf16.msra.mxu0 %v2606_v47  ;;  %v2799_v47 = vunpack.c.h.s8.bf16 %v935_v42 }
 0x1e4   :  { %4102 = vmatpush2.bf16.msra.mxu1 %v2734_v48  ;;  %4060 = vmatprep.subr.bf16.mxu0 %v2599_v49  ;;  %v2927_v48 = vunpack.c.h.s8.bf16 %v999_v43  ;;  %v934_v49 = vld [vmem:[#allocation5 + $0x1800] sm:$0xff] }
 0x1e5   :  { %4103 = vmatprep.subr.bf16.mxu1 %v2727_v50  ;;  %v998_v50 = vld [vmem:[#allocation5 + $0x1a00] sm:$0xff]  ;;  %v2798_v51 = vunpack.c.h.s8.bf16 %v934_v49  ;;  %v2790_v57 = vunpack.c.l.s8.bf16 %v934_v49 }
 0x1e6   :  { %v2926_v52 = vunpack.c.h.s8.bf16 %v998_v50  ;;  %v2918_v58 = vunpack.c.l.s8.bf16 %v998_v50 }
 0x1e7   :  { %4061 = vmatpush2.bf16.msra.mxu0 %v2598_v53  ;;  %v2791_v53 = vunpack.c.l.s8.bf16 %v935_v42 }
 0x1e8   :  { %4104 = vmatpush2.bf16.msra.mxu1 %v2726_v54  ;;  %4116 = vmatprep.subr.bf16.mxu0 %v2847_v55  ;;  %v2919_v54 = vunpack.c.l.s8.bf16 %v999_v43  ;;  %v991_v55 = vld [vmem:[#allocation5 + $0x19c8] sm:$0xff] }
 0x1e9   :  { %4159 = vmatprep.subr.bf16.mxu1 %v2975_v56  ;;  %v1055_v56 = vld [vmem:[#allocation5 + $0x1bc8] sm:$0xff]  ;;  %v2903_v3 = vunpack.c.l.s8.bf16 %v991_v55 }
 0x1ea   :  { %v3806_v7 = vpop.f32.mrf.mxu0  ;;  %4063 = vmatmul.mubr.bf16.vlgmr.msra.gmra.mxu0 %v7784_v59  ;;  %v2911_v59 = vunpack.c.h.s8.bf16 %v991_v55  ;;  %v3031_v4 = vunpack.c.l.s8.bf16 %v1055_v56  ;;  %v7791_v55 = vld [vmem:[#allocation2 + $0x68] ss:$136 sps:$4 sm:$0xff]  }
 0x1eb   :  { %v3849_v10 = vpop.f32.mrf.mxu1  ;;  %4106 = vmatmul.mubr.bf16.vlgmr.msra.gmra.mxu1 %v7785_v60  ;;  %v3807_v11 = vadd.f32 %v3806_v7, %v8275_v27  ;;  %4117 = vmatpush1.bf16.msra.mxu0 %v2846_v61  ;;  %v3039_v60 = vunpack.c.h.s8.bf16 %v1055_v56  ;;  %v990_v61 = vld [vmem:[#allocation5 + $0x19c0] sm:$0xff] }
 0x1ec   :  { %4160 = vmatpush1.bf16.msra.mxu1 %v2974_v62  ;;  %v3808_v14 = vpop.f32.mrf.mxu0  ;;  %4118 = vmatprep.subr.bf16.mxu0 %v2839_v1  ;;  %v1054_v62 = vld [vmem:[#allocation5 + $0x1bc0] sm:$0xff]  ;;  %v2910_v1 = vunpack.c.h.s8.bf16 %v990_v61  ;;  %v2902_v7 = vunpack.c.l.s8.bf16 %v990_v61 }
 0x1ed   :  { %v3851_v15 = vpop.f32.mrf.mxu1  ;;  %4161 = vmatprep.subr.bf16.mxu1 %v2967_v2  ;;  %v8288_v20 = vadd.f32 %v3849_v10, %v3807_v11  ;;  %v3809_v21 = vadd.f32 %v3808_v14, %v8278_v32  ;;  %4148 = vmatprep.mubr.bf16.mxu0 %v7786_v5  ;;  %v1007_v32 = vld [vmem:[#allocation5 + $0x1a48] sm:$0xff]  ;;  %v3038_v2 = vunpack.c.h.s8.bf16 %v1054_v62  ;;  %v3030_v10 = vunpack.c.l.s8.bf16 %v1054_v62  ;;  %v1046_v14 = vld [vmem:[#allocation5 + $0x1b80] sm:$0xff] }
 0x1ee   :  { %4191 = vmatprep.mubr.bf16.mxu1 %v7788_v6  ;;  %v3810_v22 = vpop.f32.mrf.mxu0  ;;  %v2943_v35 = vunpack.c.h.s8.bf16 %v1007_v32  ;;  %v2935_v44 = vunpack.c.l.s8.bf16 %v1007_v32  ;;  %v983_v5 = vld [vmem:[#allocation5 + $0x1988] sm:$0xff]  ;;  %v2871_v32 = vunpack.c.l.s8.bf16 %v975_v19 }
 0x1ef   :  { %v8291_v27 = vadd.f32 %v3851_v15, %v3809_v21  ;;  %v3811_v23 = vadd.f32 %v3810_v22, %v8281_v37  ;;  %4119 = vmatpush1.bf16.msra.mxu0 %v2838_v12  ;;  %v3853_v26 = vpop.f32.mrf.mxu1  ;;  %v2815_v37 = vunpack.c.h.s8.bf16 %v943_v31  ;;  %v1047_v6 = vld [vmem:[#allocation5 + $0x1b88] sm:$0xff]  ;;  %v2895_v11 = vunpack.c.h.s8.bf16 %v983_v5 }
 0x1f0   :  { %4162 = vmatpush1.bf16.msra.mxu1 %v2966_v13  ;;  %4120 = vmatprep.subr.bf16.mxu0 %v2831_v16  ;;  %v3023_v12 = vunpack.c.h.s8.bf16 %v1047_v6  ;;  %v982_v13 = vld [vmem:[#allocation5 + $0x1980] sm:$0xff]  ;;  %v3022_v16 = vunpack.c.h.s8.bf16 %v1046_v14  ;;  %v3015_v18 = vunpack.c.l.s8.bf16 %v1047_v6  ;;  %v1039_v21 = vld [vmem:[#allocation5 + $0x1b48] sm:$0xff] }
 0x1f1   :  { %4163 = vmatprep.subr.bf16.mxu1 %v2959_v17  ;;  %v8294_v30 = vadd.f32 %v3853_v26, %v3811_v23  ;;  %v2894_v15 = vunpack.c.h.s8.bf16 %v982_v13  ;;  %v2887_v17 = vunpack.c.l.s8.bf16 %v983_v5  ;;  %v2886_v22 = vunpack.c.l.s8.bf16 %v982_v13  ;;  %v974_v26 = vld [vmem:[#allocation5 + $0x1940] sm:$0xff]  ;;  %v1079_v62 = vld [vmem:[#allocation5 + $0x1c88] sm:$0xff] }
 0x1f2   :  { %v3014_v23 = vunpack.c.l.s8.bf16 %v1046_v14  ;;  %v3087_v13 = vunpack.c.h.s8.bf16 %v1079_v62 }
 0x1f3   :  { %4121 = vmatpush1.bf16.msra.mxu0 %v2830_v24  ;;  %v2879_v24 = vunpack.c.h.s8.bf16 %v975_v19 }
 0x1f4   :  { %4164 = vmatpush1.bf16.msra.mxu1 %v2958_v25  ;;  %4122 = vmatprep.subr.bf16.mxu0 %v2823_v28  ;;  %v3007_v25 = vunpack.c.h.s8.bf16 %v1039_v21  ;;  %v1038_v28 = vld [vmem:[#allocation5 + $0x1b40] sm:$0xff] }
 0x1f5   :  { %4165 = vmatprep.subr.bf16.mxu1 %v2951_v29  ;;  %v2878_v29 = vunpack.c.h.s8.bf16 %v974_v26  ;;  %v3006_v31 = vunpack.c.h.s8.bf16 %v1038_v28  ;;  %v2998_v36 = vunpack.c.l.s8.bf16 %v1038_v28 }
 0x1f7   :  { %4123 = vmatpush1.bf16.msra.mxu0 %v2822_v33  ;;  %v2999_v33 = vunpack.c.l.s8.bf16 %v1039_v21 }
 0x1f8   :  { %4166 = vmatpush1.bf16.msra.mxu1 %v2950_v34  ;;  %4124 = vmatprep.subr.bf16.mxu0 %v2815_v37  ;;  %v967_v34 = vld [vmem:[#allocation5 + $0x1908] sm:$0xff] }
 0x1f9   :  { %4167 = vmatprep.subr.bf16.mxu1 %v2943_v35  ;;  %v1031_v37 = vld [vmem:[#allocation5 + $0x1b08] sm:$0xff]  ;;  %v2870_v35 = vunpack.c.l.s8.bf16 %v974_v26  ;;  %v2863_v38 = vunpack.c.h.s8.bf16 %v967_v34  ;;  %v2855_v43 = vunpack.c.l.s8.bf16 %v967_v34  ;;  %v1070_v34 = vld [vmem:[#allocation5 + $0x1c40] sm:$0xff] }
 0x1fb   :  { %4125 = vmatpush1.bf16.msra.mxu0 %v2814_v41  ;;  %v2991_v41 = vunpack.c.h.s8.bf16 %v1031_v37 }
 0x1fc   :  { %4168 = vmatpush1.bf16.msra.mxu1 %v2942_v39  ;;  %4126 = vmatprep.subr.bf16.mxu0 %v2807_v40  ;;  %v966_v39 = vld [vmem:[#allocation5 + $0x1900] sm:$0xff] }
 0x1fd   :  { %4169 = vmatprep.subr.bf16.mxu1 %v2935_v44  ;;  %v1030_v40 = vld [vmem:[#allocation5 + $0x1b00] sm:$0xff]  ;;  %v2862_v44 = vunpack.c.h.s8.bf16 %v966_v39 }
 0x1fe   :  { %v2990_v42 = vunpack.c.h.s8.bf16 %v1030_v40  ;;  %v2982_v49 = vunpack.c.l.s8.bf16 %v1030_v40  ;;  %v1127_v40 = vld [vmem:[#allocation5 + $0x1e08] sm:$0xff] }
 0x1ff   :  { %4127 = vmatpush1.bf16.msra.mxu0 %v2806_v45  ;;  %v2983_v45 = vunpack.c.l.s8.bf16 %v1031_v37  ;;  %v1134_v37 = vld [vmem:[#allocation5 + $0x1e40] sm:$0xff] }
 0x200   :  { %4170 = vmatpush1.bf16.msra.mxu1 %v2934_v46  ;;  %4128 = vmatprep.subr.bf16.mxu0 %v2799_v47  ;;  %v1087_v46 = vld [vmem:[#allocation5 + $0x1cc8] sm:$0xff] }
 0x201   :  { %4171 = vmatprep.subr.bf16.mxu1 %v2927_v48  ;;  %v1151_v47 = vld [vmem:[#allocation5 + $0x1ec8] sm:$0xff]  ;;  %v2854_v48 = vunpack.c.l.s8.bf16 %v966_v39  ;;  %v3103_v50 = vunpack.c.h.s8.bf16 %v1087_v46 }
 0x202   :  { %v3223_v61 = vunpack.c.l.s8.bf16 %v1151_v47  ;;  %v1063_v39 = vld [vmem:[#allocation5 + $0x1c08] sm:$0xff] }
 0x203   :  { %4129 = vmatpush1.bf16.msra.mxu0 %v2798_v51  ;;  %v3231_v51 = vunpack.c.h.s8.bf16 %v1151_v47  ;;  %v1126_v47 = vld [vmem:[#allocation5 + $0x1e00] sm:$0xff] }
 0x204   :  { %4172 = vmatpush1.bf16.msra.mxu1 %v2926_v52  ;;  %4130 = vmatprep.subr.bf16.mxu0 %v2791_v53  ;;  %v1086_v52 = vld [vmem:[#allocation5 + $0x1cc0] sm:$0xff] }
 0x205   :  { %4173 = vmatprep.subr.bf16.mxu1 %v2919_v54  ;;  %v1150_v53 = vld [vmem:[#allocation5 + $0x1ec0] sm:$0xff]  ;;  %v7790_v54 = vld [vmem:[#allocation2 + $0x60] ss:$136 sps:$4 sm:$0xff]   ;;  %v3102_v56 = vunpack.c.h.s8.bf16 %v1086_v52 }
 0x207   :  { %4131 = vmatpush1.bf16.msra.mxu0 %v2790_v57  ;;  %v3230_v57 = vunpack.c.h.s8.bf16 %v1150_v53 }
 0x208   :  { %4174 = vmatpush1.bf16.msra.mxu1 %v2918_v58  ;;  %4132 = vmatprep.subr.bf16.mxu0 %v2911_v59  ;;  %v8296_v58 = vpop.f32.mrf.mxu0  ;;  %v8298_v59 = vpop.f32.mrf.mxu1 }
 0x209   :  { %4175 = vmatprep.subr.bf16.mxu1 %v3039_v60  ;;  %v3095_v60 = vunpack.c.l.s8.bf16 %v1087_v46  ;;  %v1062_v46 = vld [vmem:[#allocation5 + $0x1c00] sm:$0xff] }
 0x20b   :  { %4133 = vmatpush2.bf16.msra.mxu0 %v2910_v1  ;;  %v1143_v1 = vld [vmem:[#allocation5 + $0x1e88] sm:$0xff] }
 0x20c   :  { %4176 = vmatpush2.bf16.msra.mxu1 %v3038_v2  ;;  %4134 = vmatprep.subr.bf16.mxu0 %v2903_v3  ;;  %v7792_v2 = vld [vmem:[#allocation2 + $0x74] ss:$136 sps:$4 sm:$0xff]   ;;  %v3215_v14 = vunpack.c.h.s8.bf16 %v1143_v1  ;;  %v3207_v26 = vunpack.c.l.s8.bf16 %v1143_v1 }
 0x20d   :  { %4177 = vmatprep.subr.bf16.mxu1 %v3031_v4  ;;  %v7794_v3 = vld [vmem:[#allocation2 + $0x7c] ss:$136 sps:$4 sm:$0xff]  }
 0x20f   :  { %4135 = vmatpush2.bf16.msra.mxu0 %v2902_v7  ;;  %v3094_v7 = vunpack.c.l.s8.bf16 %v1086_v52  ;;  %v1119_v52 = vld [vmem:[#allocation5 + $0x1dc8] sm:$0xff] }
 0x210   :  { %4178 = vmatpush2.bf16.msra.mxu1 %v3030_v10  ;;  %4136 = vmatprep.subr.bf16.mxu0 %v2895_v11  ;;  %v3222_v10 = vunpack.c.l.s8.bf16 %v1150_v53  ;;  %v1183_v53 = vld [vmem:[#allocation5 + $0x1fc8] sm:$0xff] }
 0x211   :  { %4179 = vmatprep.subr.bf16.mxu1 %v3023_v12 }
 0x213   :  { %4137 = vmatpush2.bf16.msra.mxu0 %v2894_v15  ;;  %v1078_v15 = vld [vmem:[#allocation5 + $0x1c80] sm:$0xff] }
 0x214   :  { %4180 = vmatpush2.bf16.msra.mxu1 %v3022_v16  ;;  %4138 = vmatprep.subr.bf16.mxu0 %v2887_v17  ;;  %v1142_v16 = vld [vmem:[#allocation5 + $0x1e80] sm:$0xff] }
 0x215   :  { %4181 = vmatprep.subr.bf16.mxu1 %v3015_v18 }
 0x217   :  { %4139 = vmatpush2.bf16.msra.mxu0 %v2886_v22  ;;  %v3086_v22 = vunpack.c.h.s8.bf16 %v1078_v15 }
 0x218   :  { %4182 = vmatpush2.bf16.msra.mxu1 %v3014_v23  ;;  %4140 = vmatprep.subr.bf16.mxu0 %v2879_v24  ;;  %v3214_v23 = vunpack.c.h.s8.bf16 %v1142_v16 }
 0x219   :  { %4183 = vmatprep.subr.bf16.mxu1 %v3007_v25  ;;  %v3079_v25 = vunpack.c.l.s8.bf16 %v1079_v62 }
 0x21b   :  { %4141 = vmatpush2.bf16.msra.mxu0 %v2878_v29  ;;  %v1071_v29 = vld [vmem:[#allocation5 + $0x1c48] sm:$0xff] }
 0x21c   :  { %4184 = vmatpush2.bf16.msra.mxu1 %v3006_v31  ;;  %4142 = vmatprep.subr.bf16.mxu0 %v2871_v32  ;;  %v3078_v31 = vunpack.c.l.s8.bf16 %v1078_v15  ;;  %v3206_v32 = vunpack.c.l.s8.bf16 %v1142_v16 }
 0x21d   :  { %4185 = vmatprep.subr.bf16.mxu1 %v2999_v33 }
 0x21f   :  { %4143 = vmatpush2.bf16.msra.mxu0 %v2870_v35  ;;  %v3070_v35 = vunpack.c.h.s8.bf16 %v1070_v34 }
 0x220   :  { %4186 = vmatpush2.bf16.msra.mxu1 %v2998_v36  ;;  %4144 = vmatprep.subr.bf16.mxu0 %v2863_v38  ;;  %v3198_v36 = vunpack.c.h.s8.bf16 %v1134_v37  ;;  %v3063_v38 = vunpack.c.l.s8.bf16 %v1071_v29 }
 0x221   :  { %4187 = vmatprep.subr.bf16.mxu1 %v2991_v41 }
 0x223   :  { %4145 = vmatpush2.bf16.msra.mxu0 %v2862_v44  ;;  %v3062_v44 = vunpack.c.l.s8.bf16 %v1070_v34  ;;  %v1159_v34 = vld [vmem:[#allocation5 + $0x1f08] sm:$0xff] }
 0x224   :  { %4188 = vmatpush2.bf16.msra.mxu1 %v2990_v42  ;;  %4146 = vmatprep.subr.bf16.mxu0 %v2855_v43  ;;  %v3190_v42 = vunpack.c.l.s8.bf16 %v1134_v37  ;;  %v3055_v43 = vunpack.c.h.s8.bf16 %v1063_v39 }
 0x225   :  { %4189 = vmatprep.subr.bf16.mxu1 %v2983_v45  ;;  %v3183_v45 = vunpack.c.h.s8.bf16 %v1127_v40 }
 0x227   :  { %4147 = vmatpush2.bf16.msra.mxu0 %v2854_v48  ;;  %v3054_v48 = vunpack.c.h.s8.bf16 %v1062_v46 }
 0x228   :  { %4190 = vmatpush2.bf16.msra.mxu1 %v2982_v49  ;;  %4202 = vmatprep.subr.bf16.mxu0 %v3103_v50  ;;  %v3182_v49 = vunpack.c.h.s8.bf16 %v1126_v47  ;;  %v3047_v50 = vunpack.c.l.s8.bf16 %v1063_v39  ;;  %v1158_v39 = vld [vmem:[#allocation5 + $0x1f00] sm:$0xff] }
 0x229   :  { %4245 = vmatprep.subr.bf16.mxu1 %v3231_v51  ;;  %v3175_v51 = vunpack.c.l.s8.bf16 %v1127_v40 }
 0x22a   :  { %v3892_v4 = vpop.f32.mrf.mxu0  ;;  %4149 = vmatmul.mubr.bf16.vlgmr.msra.gmra.mxu0 %v7790_v54  ;;  %v3046_v54 = vunpack.c.l.s8.bf16 %v1062_v46  ;;  %v193_v46 = vld [vmem:[#allocation5 + $0xd8] sm:$0xff] }
 0x22b   :  { %v3935_v5 = vpop.f32.mrf.mxu1  ;;  %4192 = vmatmul.mubr.bf16.vlgmr.msra.gmra.mxu1 %v7791_v55  ;;  %v3893_v6 = vadd.f32 %v3892_v4, %v8288_v20  ;;  %4203 = vmatpush1.bf16.msra.mxu0 %v3102_v56  ;;  %v3174_v55 = vunpack.c.l.s8.bf16 %v1126_v47  ;;  %v3167_v56 = vunpack.c.h.s8.bf16 %v1119_v52  ;;  %v1111_v4 = vld [vmem:[#allocation5 + $0x1d88] sm:$0xff] }
 0x22c   :  { %4246 = vmatpush1.bf16.msra.mxu1 %v3230_v57  ;;  %v3894_v11 = vpop.f32.mrf.mxu0  ;;  %4204 = vmatprep.subr.bf16.mxu0 %v3095_v60  ;;  %v3295_v57 = vunpack.c.h.s8.bf16 %v1183_v53  ;;  %v1118_v60 = vld [vmem:[#allocation5 + $0x1dc0] sm:$0xff]  ;;  %v3143_v16 = vunpack.c.l.s8.bf16 %v1111_v4 }
 0x22d   :  { %v3937_v12 = vpop.f32.mrf.mxu1  ;;  %4247 = vmatprep.subr.bf16.mxu1 %v3223_v61  ;;  %v8301_v17 = vadd.f32 %v3935_v5, %v3893_v6  ;;  %v3895_v18 = vadd.f32 %v3894_v11, %v8291_v27  ;;  %4234 = vmatprep.mubr.bf16.mxu0 %v7792_v2  ;;  %v1135_v27 = vld [vmem:[#allocation5 + $0x1e48] sm:$0xff]  ;;  %v1182_v61 = vld [vmem:[#allocation5 + $0x1fc0] sm:$0xff]  ;;  %v3166_v62 = vunpack.c.h.s8.bf16 %v1118_v60  ;;  %v3159_v2 = vunpack.c.l.s8.bf16 %v1119_v52  ;;  %v192_v52 = vld [vmem:[#allocation5 + $0xd0] sm:$0xff] }
 0x22e   :  { %4277 = vmatprep.mubr.bf16.mxu1 %v7794_v3  ;;  %v3896_v19 = vpop.f32.mrf.mxu0  ;;  %v3199_v33 = vunpack.c.h.s8.bf16 %v1135_v27  ;;  %v3191_v41 = vunpack.c.l.s8.bf16 %v1135_v27  ;;  %v3294_v1 = vunpack.c.h.s8.bf16 %v1182_v61  ;;  %v3287_v3 = vunpack.c.l.s8.bf16 %v1183_v53  ;;  %v1175_v5 = vld [vmem:[#allocation5 + $0x1f88] sm:$0xff] }
 0x22f   :  { %v8304_v20 = vadd.f32 %v3937_v12, %v3895_v18  ;;  %v3897_v21 = vadd.f32 %v3896_v19, %v8294_v30  ;;  %4205 = vmatpush1.bf16.msra.mxu0 %v3094_v7  ;;  %v3939_v24 = vpop.f32.mrf.mxu1  ;;  %v3071_v30 = vunpack.c.h.s8.bf16 %v1071_v29  ;;  %v3158_v6 = vunpack.c.l.s8.bf16 %v1118_v60  ;;  %v1110_v12 = vld [vmem:[#allocation5 + $0x1d80] sm:$0xff]  ;;  %v1103_v19 = vld [vmem:[#allocation5 + $0x1d48] sm:$0xff] }
 0x230   :  { %4248 = vmatpush1.bf16.msra.mxu1 %v3222_v10  ;;  %4206 = vmatprep.subr.bf16.mxu0 %v3087_v13  ;;  %v3286_v7 = vunpack.c.l.s8.bf16 %v1182_v61  ;;  %v3151_v10 = vunpack.c.h.s8.bf16 %v1111_v4  ;;  %v3279_v11 = vunpack.c.h.s8.bf16 %v1175_v5  ;;  %v1174_v13 = vld [vmem:[#allocation5 + $0x1f80] sm:$0xff]  ;;  %v3271_v18 = vunpack.c.l.s8.bf16 %v1175_v5 }
 0x231   :  { %4249 = vmatprep.subr.bf16.mxu1 %v3215_v14  ;;  %v8307_v28 = vadd.f32 %v3939_v24, %v3897_v21  ;;  %v3150_v14 = vunpack.c.h.s8.bf16 %v1110_v12  ;;  %v3278_v15 = vunpack.c.h.s8.bf16 %v1174_v13  ;;  %v1167_v21 = vld [vmem:[#allocation5 + $0x1f48] sm:$0xff]  ;;  %v3135_v24 = vunpack.c.h.s8.bf16 %v1103_v19  ;;  %v1166_v29 = vld [vmem:[#allocation5 + $0x1f40] sm:$0xff]  ;;  %v8311_v60 = vpop.f32.mrf.mxu1 }
 0x232   :  { %v7796_v53 = vld [vmem:[#allocation2 + $0x70] ss:$136 sps:$4 sm:$0xff]  }
 0x233   :  { %4207 = vmatpush1.bf16.msra.mxu0 %v3086_v22  ;;  %v3142_v22 = vunpack.c.l.s8.bf16 %v1110_v12 }
 0x234   :  { %4250 = vmatpush1.bf16.msra.mxu1 %v3214_v23  ;;  %4208 = vmatprep.subr.bf16.mxu0 %v3079_v25  ;;  %v3270_v23 = vunpack.c.l.s8.bf16 %v1174_v13  ;;  %v3263_v25 = vunpack.c.h.s8.bf16 %v1167_v21 }
 0x235   :  { %4251 = vmatprep.subr.bf16.mxu1 %v3207_v26  ;;  %v1102_v26 = vld [vmem:[#allocation5 + $0x1d40] sm:$0xff] }
 0x236   :  { %v3134_v27 = vunpack.c.h.s8.bf16 %v1102_v26  ;;  %v3126_v37 = vunpack.c.l.s8.bf16 %v1102_v26 }
 0x237   :  { %4209 = vmatpush1.bf16.msra.mxu0 %v3078_v31  ;;  %v3262_v31 = vunpack.c.h.s8.bf16 %v1166_v29 }
 0x238   :  { %4252 = vmatpush1.bf16.msra.mxu1 %v3206_v32  ;;  %4210 = vmatprep.subr.bf16.mxu0 %v3071_v30  ;;  %v3127_v32 = vunpack.c.l.s8.bf16 %v1103_v19  ;;  %v3255_v30 = vunpack.c.l.s8.bf16 %v1167_v21  ;;  %v7873_v21 = vld [vmem:[#allocation2 + $0x4] ss:$136 sps:$4 sm:$0xff]  }
 0x239   :  { %4253 = vmatprep.subr.bf16.mxu1 %v3199_v33  ;;  %v1095_v33 = vld [vmem:[#allocation5 + $0x1d08] sm:$0xff] }
 0x23b   :  { %4211 = vmatpush1.bf16.msra.mxu0 %v3070_v35  ;;  %v3254_v35 = vunpack.c.l.s8.bf16 %v1166_v29 }
 0x23c   :  { %4254 = vmatpush1.bf16.msra.mxu1 %v3198_v36  ;;  %4212 = vmatprep.subr.bf16.mxu0 %v3063_v38  ;;  %v3119_v36 = vunpack.c.h.s8.bf16 %v1095_v33  ;;  %v3247_v38 = vunpack.c.h.s8.bf16 %v1159_v34 }
 0x23d   :  { %4255 = vmatprep.subr.bf16.mxu1 %v3191_v41  ;;  %v1094_v41 = vld [vmem:[#allocation5 + $0x1d00] sm:$0xff] }
 0x23e   :  { %v3118_v40 = vunpack.c.h.s8.bf16 %v1094_v41  ;;  %v3110_v47 = vunpack.c.l.s8.bf16 %v1094_v41 }
 0x23f   :  { %4213 = vmatpush1.bf16.msra.mxu0 %v3062_v44  ;;  %v3246_v44 = vunpack.c.h.s8.bf16 %v1158_v39 }
 0x240   :  { %4256 = vmatpush1.bf16.msra.mxu1 %v3190_v42  ;;  %4214 = vmatprep.subr.bf16.mxu0 %v3055_v43  ;;  %v3111_v42 = vunpack.c.l.s8.bf16 %v1095_v33  ;;  %v3239_v43 = vunpack.c.l.s8.bf16 %v1159_v34 }
 0x241   :  { %4257 = vmatprep.subr.bf16.mxu1 %v3183_v45  ;;  %v1215_v45 = vld [vmem:[#allocation5 + $0x20c8] sm:$0xff] }
 0x242   :  { %v3351_v61 = vunpack.c.l.s8.bf16 %v1215_v45 }
 0x243   :  { %4215 = vmatpush1.bf16.msra.mxu0 %v3054_v48  ;;  %v3238_v48 = vunpack.c.l.s8.bf16 %v1158_v39 }
 0x244   :  { %4258 = vmatpush1.bf16.msra.mxu1 %v3182_v49  ;;  %4216 = vmatprep.subr.bf16.mxu0 %v3047_v50  ;;  %v3359_v49 = vunpack.c.h.s8.bf16 %v1215_v45  ;;  %v1313_v50 = vunpack.c.h.s8.bf16 %v193_v46 }
 0x245   :  { %4259 = vmatprep.subr.bf16.mxu1 %v3175_v51  ;;  %v1214_v51 = vld [vmem:[#allocation5 + $0x20c0] sm:$0xff] }
 0x247   :  { %4217 = vmatpush1.bf16.msra.mxu0 %v3046_v54  ;;  %v7797_v54 = vld [vmem:[#allocation2 + $0x78] ss:$136 sps:$4 sm:$0xff]  }
 0x248   :  { %4260 = vmatpush1.bf16.msra.mxu1 %v3174_v55  ;;  %4218 = vmatprep.subr.bf16.mxu0 %v3167_v56  ;;  %v3358_v55 = vunpack.c.h.s8.bf16 %v1214_v51  ;;  %v1312_v56 = vunpack.c.h.s8.bf16 %v192_v52 }
 0x249   :  { %4261 = vmatprep.subr.bf16.mxu1 %v3295_v57  ;;  %v8309_v57 = vpop.f32.mrf.mxu0 }
 0x24b   :  { %4219 = vmatpush2.bf16.msra.mxu0 %v3166_v62  ;;  %v1305_v62 = vunpack.c.l.s8.bf16 %v193_v46 }
 0x24c   :  { %4262 = vmatpush2.bf16.msra.mxu1 %v3294_v1  ;;  %4220 = vmatprep.subr.bf16.mxu0 %v3159_v2  ;;  %v1207_v1 = vld [vmem:[#allocation5 + $0x2088] sm:$0xff]  ;;  %v185_v2 = vld [vmem:[#allocation5 + $0x98] sm:$0xff] }
 0x24d   :  { %4263 = vmatprep.subr.bf16.mxu1 %v3287_v3  ;;  %v7798_v3 = vld [vmem:[#allocation2 + $0x84] ss:$136 sps:$4 sm:$0xff]   ;;  %v3343_v13 = vunpack.c.h.s8.bf16 %v1207_v1  ;;  %v3335_v29 = vunpack.c.l.s8.bf16 %v1207_v1  ;;  %v1246_v1 = vld [vmem:[#allocation5 + $0x21c0] sm:$0xff] }
 0x24f   :  { %4221 = vmatpush2.bf16.msra.mxu0 %v3158_v6 }
 0x250   :  { %4264 = vmatpush2.bf16.msra.mxu1 %v3286_v7  ;;  %4222 = vmatprep.subr.bf16.mxu0 %v3151_v10  ;;  %v3350_v7 = vunpack.c.l.s8.bf16 %v1214_v51  ;;  %v1304_v10 = vunpack.c.l.s8.bf16 %v192_v52 }
 0x251   :  { %4265 = vmatprep.subr.bf16.mxu1 %v3279_v11 }
 0x253   :  { %4223 = vmatpush2.bf16.msra.mxu0 %v3150_v14  ;;  %v1297_v14 = vunpack.c.h.s8.bf16 %v185_v2 }
 0x254   :  { %4266 = vmatpush2.bf16.msra.mxu1 %v3278_v15  ;;  %4224 = vmatprep.subr.bf16.mxu0 %v3143_v16  ;;  %v1206_v15 = vld [vmem:[#allocation5 + $0x2080] sm:$0xff]  ;;  %v184_v16 = vld [vmem:[#allocation5 + $0x90] sm:$0xff] }
 0x255   :  { %4267 = vmatprep.subr.bf16.mxu1 %v3271_v18  ;;  %v1288_v33 = vunpack.c.l.s8.bf16 %v184_v16 }
 0x257   :  { %4225 = vmatpush2.bf16.msra.mxu0 %v3142_v22 }
 0x258   :  { %4268 = vmatpush2.bf16.msra.mxu1 %v3270_v23  ;;  %4226 = vmatprep.subr.bf16.mxu0 %v3135_v24  ;;  %v3342_v24 = vunpack.c.h.s8.bf16 %v1206_v15 }
 0x259   :  { %4269 = vmatprep.subr.bf16.mxu1 %v3263_v25  ;;  %v1296_v25 = vunpack.c.h.s8.bf16 %v184_v16  ;;  %v216_v16 = vld [vmem:[#allocation5 + $0x190] sm:$0xff] }
 0x25b   :  { %4227 = vmatpush2.bf16.msra.mxu0 %v3134_v27  ;;  %v1289_v27 = vunpack.c.l.s8.bf16 %v185_v2  ;;  %v224_v2 = vld [vmem:[#allocation5 + $0x1d0] sm:$0xff] }
 0x25c   :  { %4270 = vmatpush2.bf16.msra.mxu1 %v3262_v31  ;;  %4228 = vmatprep.subr.bf16.mxu0 %v3127_v32  ;;  %v177_v32 = vld [vmem:[#allocation5 + $0x58] sm:$0xff] }
 0x25d   :  { %4271 = vmatprep.subr.bf16.mxu1 %v3255_v30  ;;  %v3334_v30 = vunpack.c.l.s8.bf16 %v1206_v15  ;;  %v1281_v34 = vunpack.c.h.s8.bf16 %v177_v32  ;;  %v1273_v39 = vunpack.c.l.s8.bf16 %v177_v32  ;;  %v1238_v15 = vld [vmem:[#allocation5 + $0x2180] sm:$0xff] }
 0x25e   :  { %v1230_v32 = vld [vmem:[#allocation5 + $0x2140] sm:$0xff] }
 0x25f   :  { %4229 = vmatpush2.bf16.msra.mxu0 %v3126_v37  ;;  %v1198_v37 = vld [vmem:[#allocation5 + $0x2040] sm:$0xff] }
 0x260   :  { %4272 = vmatpush2.bf16.msra.mxu1 %v3254_v35  ;;  %4230 = vmatprep.subr.bf16.mxu0 %v3119_v36  ;;  %v176_v35 = vld [vmem:[#allocation5 + $0x50] sm:$0xff]  ;;  %v3326_v36 = vunpack.c.h.s8.bf16 %v1198_v37 }
 0x261   :  { %4273 = vmatprep.subr.bf16.mxu1 %v3247_v38  ;;  %v1280_v38 = vunpack.c.h.s8.bf16 %v176_v35 }
 0x263   :  { %4231 = vmatpush2.bf16.msra.mxu0 %v3118_v40  ;;  %v1191_v40 = vld [vmem:[#allocation5 + $0x2008] sm:$0xff] }
 0x264   :  { %4274 = vmatpush2.bf16.msra.mxu1 %v3246_v44  ;;  %4232 = vmatprep.subr.bf16.mxu0 %v3111_v42  ;;  %v169_v44 = vld [vmem:[#allocation5 + $0x18] sm:$0xff]  ;;  %v3318_v42 = vunpack.c.l.s8.bf16 %v1198_v37  ;;  %v3311_v45 = vunpack.c.h.s8.bf16 %v1191_v40  ;;  %v3303_v51 = vunpack.c.l.s8.bf16 %v1191_v40 }
 0x265   :  { %4275 = vmatprep.subr.bf16.mxu1 %v3239_v43  ;;  %v1272_v43 = vunpack.c.l.s8.bf16 %v176_v35  ;;  %v1265_v46 = vunpack.c.h.s8.bf16 %v169_v44  ;;  %v1257_v52 = vunpack.c.l.s8.bf16 %v169_v44  ;;  %v1223_v35 = vld [vmem:[#allocation5 + $0x2108] sm:$0xff]  ;;  %v1222_v44 = vld [vmem:[#allocation5 + $0x2100] sm:$0xff] }
 0x267   :  { %4233 = vmatpush2.bf16.msra.mxu0 %v3110_v47  ;;  %v1190_v47 = vld [vmem:[#allocation5 + $0x2000] sm:$0xff] }
 0x268   :  { %4276 = vmatpush2.bf16.msra.mxu1 %v3238_v48  ;;  %4288 = vmatprep.subr.bf16.mxu0 %v3359_v49  ;;  %v168_v48 = vld [vmem:[#allocation5 + $0x10] sm:$0xff]  ;;  %v3310_v49 = vunpack.c.h.s8.bf16 %v1190_v47 }
 0x269   :  { %4331 = vmatprep.subr.bf16.mxu1 %v1313_v50  ;;  %v1264_v50 = vunpack.c.h.s8.bf16 %v168_v48 }
 0x26a   :  { %v3978_v4 = vpop.f32.mrf.mxu0  ;;  %4235 = vmatmul.mubr.bf16.vlgmr.msra.gmra.mxu0 %v7796_v53  ;;  %v1247_v53 = vld [vmem:[#allocation5 + $0x21c8] sm:$0xff] }
 0x26b   :  { %v4021_v5 = vpop.f32.mrf.mxu1  ;;  %4278 = vmatmul.mubr.bf16.vlgmr.msra.gmra.mxu1 %v7797_v54  ;;  %v3979_v6 = vadd.f32 %v3978_v4, %v8301_v17  ;;  %4289 = vmatpush1.bf16.msra.mxu0 %v3358_v55  ;;  %v225_v54 = vld [vmem:[#allocation5 + $0x1d8] sm:$0xff]  ;;  %v3302_v55 = vunpack.c.l.s8.bf16 %v1190_v47  ;;  %v1376_v4 = vunpack.c.h.s8.bf16 %v224_v2 }
 0x26c   :  { %4332 = vmatpush1.bf16.msra.mxu1 %v1312_v56  ;;  %v3980_v11 = vpop.f32.mrf.mxu0  ;;  %4290 = vmatprep.subr.bf16.mxu0 %v3351_v61  ;;  %v1256_v56 = vunpack.c.l.s8.bf16 %v168_v48  ;;  %v3423_v61 = vunpack.c.h.s8.bf16 %v1247_v53  ;;  %v257_v48 = vld [vmem:[#allocation5 + $0x2d8] sm:$0xff] }
 0x26d   :  { %v4023_v12 = vpop.f32.mrf.mxu1  ;;  %4333 = vmatprep.subr.bf16.mxu1 %v1305_v62  ;;  %v8314_v18 = vadd.f32 %v4021_v5, %v3979_v6  ;;  %v3981_v19 = vadd.f32 %v3980_v11, %v8304_v20  ;;  %4320 = vmatprep.mubr.bf16.mxu0 %v7798_v3  ;;  %v1199_v20 = vld [vmem:[#allocation5 + $0x2048] sm:$0xff]  ;;  %v1377_v62 = vunpack.c.h.s8.bf16 %v225_v54  ;;  %v3422_v3 = vunpack.c.h.s8.bf16 %v1246_v1 }
 0x26e   :  { %4363 = vmatprep.mubr.bf16.mxu1 %v7873_v21  ;;  %v3982_v17 = vpop.f32.mrf.mxu0  ;;  %v3319_v41 = vunpack.c.l.s8.bf16 %v1199_v20  ;;  %v3415_v5 = vunpack.c.l.s8.bf16 %v1247_v53  ;;  %v1369_v6 = vunpack.c.l.s8.bf16 %v225_v54  ;;  %v3414_v11 = vunpack.c.l.s8.bf16 %v1246_v1  ;;  %v256_v54 = vld [vmem:[#allocation5 + $0x2d0] sm:$0xff] }
 0x26f   :  { %v8317_v22 = vadd.f32 %v4023_v12, %v3981_v19  ;;  %v3983_v23 = vadd.f32 %v3982_v17, %v8307_v28  ;;  %4291 = vmatpush1.bf16.msra.mxu0 %v3350_v7  ;;  %v4025_v26 = vpop.f32.mrf.mxu1  ;;  %v3327_v28 = vunpack.c.h.s8.bf16 %v1199_v20  ;;  %v1239_v7 = vld [vmem:[#allocation5 + $0x2188] sm:$0xff]  ;;  %v1368_v12 = vunpack.c.l.s8.bf16 %v224_v2 }
 0x270   :  { %4334 = vmatpush1.bf16.msra.mxu1 %v1304_v10  ;;  %4292 = vmatprep.subr.bf16.mxu0 %v3343_v13  ;;  %v217_v10 = vld [vmem:[#allocation5 + $0x198] sm:$0xff]  ;;  %v3407_v13 = vunpack.c.h.s8.bf16 %v1239_v7  ;;  %v3406_v19 = vunpack.c.h.s8.bf16 %v1238_v15  ;;  %v1360_v21 = vunpack.c.h.s8.bf16 %v216_v16  ;;  %v3399_v17 = vunpack.c.l.s8.bf16 %v1239_v7  ;;  %v8322_v1 = vpop.f32.mrf.mxu0 }
 0x271   :  { %4335 = vmatprep.subr.bf16.mxu1 %v1297_v14  ;;  %v8320_v31 = vadd.f32 %v4025_v26, %v3983_v23  ;;  %v1361_v14 = vunpack.c.h.s8.bf16 %v217_v10  ;;  %v1353_v23 = vunpack.c.l.s8.bf16 %v217_v10  ;;  %v3398_v26 = vunpack.c.l.s8.bf16 %v1238_v15  ;;  %v8324_v2 = vpop.f32.mrf.mxu1 }
 0x273   :  { %4293 = vmatpush1.bf16.msra.mxu0 %v3342_v24  ;;  %v1231_v24 = vld [vmem:[#allocation5 + $0x2148] sm:$0xff] }
 0x274   :  { %4336 = vmatpush1.bf16.msra.mxu1 %v1296_v25  ;;  %4294 = vmatprep.subr.bf16.mxu0 %v3335_v29  ;;  %v209_v25 = vld [vmem:[#allocation5 + $0x158] sm:$0xff]  ;;  %v1352_v29 = vunpack.c.l.s8.bf16 %v216_v16 }
 0x275   :  { %4337 = vmatprep.subr.bf16.mxu1 %v1289_v27  ;;  %v3391_v27 = vunpack.c.h.s8.bf16 %v1231_v24  ;;  %v1345_v20 = vunpack.c.h.s8.bf16 %v209_v25  ;;  %v1337_v37 = vunpack.c.l.s8.bf16 %v209_v25 }
 0x277   :  { %4295 = vmatpush1.bf16.msra.mxu0 %v3334_v30  ;;  %v208_v30 = vld [vmem:[#allocation5 + $0x150] sm:$0xff] }
 0x278   :  { %4338 = vmatpush1.bf16.msra.mxu1 %v1288_v33  ;;  %4296 = vmatprep.subr.bf16.mxu0 %v3327_v28  ;;  %v3390_v33 = vunpack.c.h.s8.bf16 %v1230_v32  ;;  %v1344_v28 = vunpack.c.h.s8.bf16 %v208_v30 }
 0x279   :  { %4339 = vmatprep.subr.bf16.mxu1 %v1281_v34  ;;  %v3383_v34 = vunpack.c.l.s8.bf16 %v1231_v24 }
 0x27b   :  { %4297 = vmatpush1.bf16.msra.mxu0 %v3326_v36  ;;  %v201_v36 = vld [vmem:[#allocation5 + $0x118] sm:$0xff] }
 0x27c   :  { %4340 = vmatpush1.bf16.msra.mxu1 %v1280_v38  ;;  %4298 = vmatprep.subr.bf16.mxu0 %v3319_v41  ;;  %v3382_v38 = vunpack.c.l.s8.bf16 %v1230_v32  ;;  %v1336_v41 = vunpack.c.l.s8.bf16 %v208_v30  ;;  %v1329_v40 = vunpack.c.h.s8.bf16 %v201_v36  ;;  %v1321_v47 = vunpack.c.l.s8.bf16 %v201_v36 }
 0x27d   :  { %4341 = vmatprep.subr.bf16.mxu1 %v1273_v39  ;;  %v3375_v39 = vunpack.c.h.s8.bf16 %v1223_v35 }
 0x27f   :  { %4299 = vmatpush1.bf16.msra.mxu0 %v3318_v42  ;;  %v200_v42 = vld [vmem:[#allocation5 + $0x110] sm:$0xff] }
 0x280   :  { %4342 = vmatpush1.bf16.msra.mxu1 %v1272_v43  ;;  %4300 = vmatprep.subr.bf16.mxu0 %v3311_v45  ;;  %v3374_v43 = vunpack.c.h.s8.bf16 %v1222_v44  ;;  %v1328_v45 = vunpack.c.h.s8.bf16 %v200_v42 }
 0x281   :  { %4343 = vmatprep.subr.bf16.mxu1 %v1265_v46  ;;  %v3367_v46 = vunpack.c.l.s8.bf16 %v1223_v35  ;;  %v305_v35 = vld [vmem:[#allocation5 + $0x458] sm:$0xff] }
 0x283   :  { %4301 = vmatpush1.bf16.msra.mxu0 %v3310_v49  ;;  %v321_v49 = vld [vmem:[#allocation5 + $0x4d8] sm:$0xff] }
 0x284   :  { %4344 = vmatpush1.bf16.msra.mxu1 %v1264_v50  ;;  %4302 = vmatprep.subr.bf16.mxu0 %v3303_v51  ;;  %v3366_v50 = vunpack.c.l.s8.bf16 %v1222_v44  ;;  %v1320_v51 = vunpack.c.l.s8.bf16 %v200_v42  ;;  %v1569_v53 = vunpack.c.h.s8.bf16 %v321_v49 }
 0x285   :  { %4345 = vmatprep.subr.bf16.mxu1 %v1257_v52  ;;  %v1441_v52 = vunpack.c.h.s8.bf16 %v257_v48 }
 0x287   :  { %4303 = vmatpush1.bf16.msra.mxu0 %v3302_v55  ;;  %v320_v55 = vld [vmem:[#allocation5 + $0x4d0] sm:$0xff] }
 0x288   :  { %4346 = vmatpush1.bf16.msra.mxu1 %v1256_v56  ;;  %4304 = vmatprep.subr.bf16.mxu0 %v3423_v61  ;;  %v7800_v56 = vld [vmem:[#allocation2 + $0x80] ss:$136 sps:$4 sm:$0xff]   ;;  %v1440_v61 = vunpack.c.h.s8.bf16 %v256_v54 }
 0x289   :  { %4347 = vmatprep.subr.bf16.mxu1 %v1377_v62  ;;  %v1568_v62 = vunpack.c.h.s8.bf16 %v320_v55 }
 0x28b   :  { %4305 = vmatpush2.bf16.msra.mxu0 %v3422_v3  ;;  %v1433_v3 = vunpack.c.l.s8.bf16 %v257_v48 }
 0x28c   :  { %4348 = vmatpush2.bf16.msra.mxu1 %v1376_v4  ;;  %4306 = vmatprep.subr.bf16.mxu0 %v3415_v5  ;;  %v1561_v4 = vunpack.c.l.s8.bf16 %v321_v49  ;;  %v249_v5 = vld [vmem:[#allocation5 + $0x298] sm:$0xff] }
 0x28d   :  { %4349 = vmatprep.subr.bf16.mxu1 %v1369_v6  ;;  %v313_v6 = vld [vmem:[#allocation5 + $0x498] sm:$0xff] }
 0x28f   :  { %4307 = vmatpush2.bf16.msra.mxu0 %v3414_v11  ;;  %v7874_v11 = vld [vmem:[#allocation2] ss:$136 sps:$4 sm:$0xff]  }
 0x290   :  { %4350 = vmatpush2.bf16.msra.mxu1 %v1368_v12  ;;  %4308 = vmatprep.subr.bf16.mxu0 %v3407_v13  ;;  %v1432_v13 = vunpack.c.l.s8.bf16 %v256_v54 }
 0x291   :  { %4351 = vmatprep.subr.bf16.mxu1 %v1361_v14  ;;  %v1560_v14 = vunpack.c.l.s8.bf16 %v320_v55 }
 0x293   :  { %4309 = vmatpush2.bf16.msra.mxu0 %v3406_v19  ;;  %v1425_v19 = vunpack.c.h.s8.bf16 %v249_v5 }
 0x294   :  { %4352 = vmatpush2.bf16.msra.mxu1 %v1360_v21  ;;  %4310 = vmatprep.subr.bf16.mxu0 %v3399_v17  ;;  %v1553_v21 = vunpack.c.h.s8.bf16 %v313_v6  ;;  %v248_v17 = vld [vmem:[#allocation5 + $0x290] sm:$0xff] }
 0x295   :  { %4353 = vmatprep.subr.bf16.mxu1 %v1353_v23  ;;  %v312_v23 = vld [vmem:[#allocation5 + $0x490] sm:$0xff]  ;;  %v1424_v32 = vunpack.c.h.s8.bf16 %v248_v17  ;;  %v1416_v36 = vunpack.c.l.s8.bf16 %v248_v17 }
 0x296   :  { %v1552_v30 = vunpack.c.h.s8.bf16 %v312_v23 }
 0x297   :  { %4311 = vmatpush2.bf16.msra.mxu0 %v3398_v26  ;;  %v7875_v26 = vld [vmem:[#allocation2 + $0xc] ss:$136 sps:$4 sm:$0xff]  }
 0x298   :  { %4354 = vmatpush2.bf16.msra.mxu1 %v1352_v29  ;;  %4312 = vmatprep.subr.bf16.mxu0 %v3391_v27  ;;  %v7876_v29 = vld [vmem:[#allocation2 + $0x14] ss:$136 sps:$4 sm:$0xff]  }
 0x299   :  { %4355 = vmatprep.subr.bf16.mxu1 %v1345_v20 }
 0x29b   :  { %4313 = vmatpush2.bf16.msra.mxu0 %v3390_v33 }
 0x29c   :  { %4356 = vmatpush2.bf16.msra.mxu1 %v1344_v28  ;;  %4314 = vmatprep.subr.bf16.mxu0 %v3383_v34  ;;  %v1417_v28 = vunpack.c.l.s8.bf16 %v249_v5  ;;  %v1545_v34 = vunpack.c.l.s8.bf16 %v313_v6 }
 0x29d   :  { %4357 = vmatprep.subr.bf16.mxu1 %v1337_v37 }
 0x29f   :  { %4315 = vmatpush2.bf16.msra.mxu0 %v3382_v38  ;;  %v1544_v38 = vunpack.c.l.s8.bf16 %v312_v23 }
 0x2a0   :  { %4358 = vmatpush2.bf16.msra.mxu1 %v1336_v41  ;;  %4316 = vmatprep.subr.bf16.mxu0 %v3375_v39  ;;  %v1537_v41 = vunpack.c.h.s8.bf16 %v305_v35  ;;  %v240_v39 = vld [vmem:[#allocation5 + $0x250] sm:$0xff] }
 0x2a1   :  { %4359 = vmatprep.subr.bf16.mxu1 %v1329_v40  ;;  %v304_v40 = vld [vmem:[#allocation5 + $0x450] sm:$0xff]  ;;  %v1408_v44 = vunpack.c.h.s8.bf16 %v240_v39  ;;  %v1400_v48 = vunpack.c.l.s8.bf16 %v240_v39 }
 0x2a2   :  { %v1536_v42 = vunpack.c.h.s8.bf16 %v304_v40  ;;  %v1528_v49 = vunpack.c.l.s8.bf16 %v304_v40 }
 0x2a3   :  { %4317 = vmatpush2.bf16.msra.mxu0 %v3374_v43 }
 0x2a4   :  { %4360 = vmatpush2.bf16.msra.mxu1 %v1328_v45  ;;  %4318 = vmatprep.subr.bf16.mxu0 %v3367_v46  ;;  %v1529_v45 = vunpack.c.l.s8.bf16 %v305_v35  ;;  %v233_v46 = vld [vmem:[#allocation5 + $0x218] sm:$0xff] }
 0x2a5   :  { %4361 = vmatprep.subr.bf16.mxu1 %v1321_v47  ;;  %v297_v47 = vld [vmem:[#allocation5 + $0x418] sm:$0xff] }
 0x2a7   :  { %4319 = vmatpush2.bf16.msra.mxu0 %v3366_v50  ;;  %v1393_v50 = vunpack.c.h.s8.bf16 %v233_v46 }
 0x2a8   :  { %4362 = vmatpush2.bf16.msra.mxu1 %v1320_v51  ;;  %4374 = vmatprep.subr.bf16.mxu0 %v1441_v52  ;;  %v1521_v51 = vunpack.c.h.s8.bf16 %v297_v47  ;;  %v232_v52 = vld [vmem:[#allocation5 + $0x210] sm:$0xff] }
 0x2a9   :  { %4417 = vmatprep.subr.bf16.mxu1 %v1569_v53  ;;  %v296_v53 = vld [vmem:[#allocation5 + $0x410] sm:$0xff]  ;;  %v1392_v54 = vunpack.c.h.s8.bf16 %v232_v52 }
 0x2aa   :  { %v4064_v7 = vpop.f32.mrf.mxu0  ;;  %4321 = vmatmul.mubr.bf16.vlgmr.msra.gmra.mxu0 %v7800_v56  ;;  %v1520_v55 = vunpack.c.h.s8.bf16 %v296_v53  ;;  %v1385_v56 = vunpack.c.l.s8.bf16 %v233_v46  ;;  %v1512_v5 = vunpack.c.l.s8.bf16 %v296_v53 }
 0x2ab   :  { %v4107_v10 = vpop.f32.mrf.mxu1  ;;  %4364 = vmatmul.mubr.bf16.vlgmr.msra.gmra.mxu1 %v7874_v11  ;;  %v4065_v12 = vadd.f32 %v4064_v7, %v8314_v18  ;;  %4375 = vmatpush1.bf16.msra.mxu0 %v1440_v61  ;;  %v1513_v61 = vunpack.c.l.s8.bf16 %v297_v47  ;;  %v352_v11 = vld [vmem:[#allocation5 + $0x5d0] sm:$0xff] }
 0x2ac   :  { %4418 = vmatpush1.bf16.msra.mxu1 %v1568_v62  ;;  %v4066_v15 = vpop.f32.mrf.mxu0  ;;  %4376 = vmatprep.subr.bf16.mxu0 %v1433_v3  ;;  %v289_v62 = vld [vmem:[#allocation5 + $0x3d8] sm:$0xff]  ;;  %v1624_v17 = vunpack.c.l.s8.bf16 %v352_v11 }
 0x2ad   :  { %v4109_v16 = vpop.f32.mrf.mxu1  ;;  %4419 = vmatprep.subr.bf16.mxu1 %v1561_v4  ;;  %v8327_v24 = vadd.f32 %v4107_v10, %v4065_v12  ;;  %v4067_v25 = vadd.f32 %v4066_v15, %v8317_v22  ;;  %4406 = vmatprep.mubr.bf16.mxu0 %v7875_v26  ;;  %v241_v22 = vld [vmem:[#allocation5 + $0x258] sm:$0xff]  ;;  %v1384_v4 = vunpack.c.l.s8.bf16 %v232_v52  ;;  %v1505_v6 = vunpack.c.h.s8.bf16 %v289_v62  ;;  %v288_v10 = vld [vmem:[#allocation5 + $0x3d0] sm:$0xff] }
 0x2ae   :  { %4449 = vmatprep.mubr.bf16.mxu1 %v7876_v29  ;;  %v4068_v18 = vpop.f32.mrf.mxu0  ;;  %v1401_v43 = vunpack.c.l.s8.bf16 %v241_v22  ;;  %v353_v3 = vld [vmem:[#allocation5 + $0x5d8] sm:$0xff]  ;;  %v1504_v12 = vunpack.c.h.s8.bf16 %v288_v10  ;;  %v280_v26 = vld [vmem:[#allocation5 + $0x390] sm:$0xff] }
 0x2af   :  { %v8330_v27 = vadd.f32 %v4109_v16, %v4067_v25  ;;  %v4069_v20 = vadd.f32 %v4068_v18, %v8320_v31  ;;  %4377 = vmatpush1.bf16.msra.mxu0 %v1432_v13  ;;  %v4111_v33 = vpop.f32.mrf.mxu1  ;;  %v1409_v31 = vunpack.c.h.s8.bf16 %v241_v22  ;;  %v1633_v7 = vunpack.c.h.s8.bf16 %v353_v3  ;;  %v281_v16 = vld [vmem:[#allocation5 + $0x398] sm:$0xff]  ;;  %v344_v29 = vld [vmem:[#allocation5 + $0x590] sm:$0xff] }
 0x2b0   :  { %4420 = vmatpush1.bf16.msra.mxu1 %v1560_v14  ;;  %4378 = vmatprep.subr.bf16.mxu0 %v1425_v19  ;;  %v1632_v13 = vunpack.c.h.s8.bf16 %v352_v11  ;;  %v1497_v14 = vunpack.c.l.s8.bf16 %v289_v62  ;;  %v1625_v15 = vunpack.c.l.s8.bf16 %v353_v3  ;;  %v345_v19 = vld [vmem:[#allocation5 + $0x598] sm:$0xff]  ;;  %v1489_v23 = vunpack.c.h.s8.bf16 %v281_v16  ;;  %v8335_v11 = vpop.f32.mrf.mxu0 }
 0x2b1   :  { %4421 = vmatprep.subr.bf16.mxu1 %v1553_v21  ;;  %v8333_v37 = vadd.f32 %v4111_v33, %v4069_v20  ;;  %v1496_v21 = vunpack.c.l.s8.bf16 %v288_v10  ;;  %v1617_v25 = vunpack.c.h.s8.bf16 %v345_v19  ;;  %v1488_v18 = vunpack.c.h.s8.bf16 %v280_v26  ;;  %v273_v33 = vld [vmem:[#allocation5 + $0x358] sm:$0xff] }
 0x2b2   :  { %v1616_v20 = vunpack.c.h.s8.bf16 %v344_v29  ;;  %v1608_v22 = vunpack.c.l.s8.bf16 %v344_v29  ;;  %v1473_v35 = vunpack.c.h.s8.bf16 %v273_v33  ;;  %v1465_v40 = vunpack.c.l.s8.bf16 %v273_v33  ;;  %v376_v33 = vld [vmem:[#allocation5 + $0x690] sm:$0xff] }
 0x2b3   :  { %4379 = vmatpush1.bf16.msra.mxu0 %v1424_v32  ;;  %v1481_v32 = vunpack.c.l.s8.bf16 %v281_v16  ;;  %v441_v16 = vld [vmem:[#allocation5 + $0x898] sm:$0xff] }
 0x2b4   :  { %4422 = vmatpush1.bf16.msra.mxu1 %v1552_v30  ;;  %4380 = vmatprep.subr.bf16.mxu0 %v1417_v28  ;;  %v1609_v30 = vunpack.c.l.s8.bf16 %v345_v19  ;;  %v337_v28 = vld [vmem:[#allocation5 + $0x558] sm:$0xff] }
 0x2b5   :  { %4423 = vmatprep.subr.bf16.mxu1 %v1545_v34  ;;  %v1480_v34 = vunpack.c.l.s8.bf16 %v280_v26 }
 0x2b7   :  { %4381 = vmatpush1.bf16.msra.mxu0 %v1416_v36  ;;  %v1601_v36 = vunpack.c.h.s8.bf16 %v337_v28 }
 0x2b8   :  { %4424 = vmatpush1.bf16.msra.mxu1 %v1544_v38  ;;  %4382 = vmatprep.subr.bf16.mxu0 %v1409_v31  ;;  %v272_v38 = vld [vmem:[#allocation5 + $0x350] sm:$0xff] }
 0x2b9   :  { %4425 = vmatprep.subr.bf16.mxu1 %v1537_v41  ;;  %v336_v31 = vld [vmem:[#allocation5 + $0x550] sm:$0xff]  ;;  %v1472_v41 = vunpack.c.h.s8.bf16 %v272_v38 }
 0x2ba   :  { %v1600_v39 = vunpack.c.h.s8.bf16 %v336_v31  ;;  %v1592_v46 = vunpack.c.l.s8.bf16 %v336_v31 }
 0x2bb   :  { %4383 = vmatpush1.bf16.msra.mxu0 %v1408_v44  ;;  %v1593_v44 = vunpack.c.l.s8.bf16 %v337_v28  ;;  %v440_v28 = vld [vmem:[#allocation5 + $0x890] sm:$0xff] }
 0x2bc   :  { %4426 = vmatpush1.bf16.msra.mxu1 %v1536_v42  ;;  %4384 = vmatprep.subr.bf16.mxu0 %v1401_v43  ;;  %v265_v42 = vld [vmem:[#allocation5 + $0x318] sm:$0xff] }
 0x2bd   :  { %4427 = vmatprep.subr.bf16.mxu1 %v1529_v45  ;;  %v329_v43 = vld [vmem:[#allocation5 + $0x518] sm:$0xff]  ;;  %v1464_v45 = vunpack.c.l.s8.bf16 %v272_v38  ;;  %v1457_v47 = vunpack.c.h.s8.bf16 %v265_v42  ;;  %v1449_v53 = vunpack.c.l.s8.bf16 %v265_v42  ;;  %v1801_v42 = vunpack.c.l.s8.bf16 %v441_v16 }
 0x2bf   :  { %4385 = vmatpush1.bf16.msra.mxu0 %v1400_v48  ;;  %v1585_v48 = vunpack.c.h.s8.bf16 %v329_v43 }
 0x2c0   :  { %4428 = vmatpush1.bf16.msra.mxu1 %v1528_v49  ;;  %4386 = vmatprep.subr.bf16.mxu0 %v1393_v50  ;;  %v264_v49 = vld [vmem:[#allocation5 + $0x310] sm:$0xff] }
 0x2c1   :  { %4429 = vmatprep.subr.bf16.mxu1 %v1521_v51  ;;  %v328_v50 = vld [vmem:[#allocation5 + $0x510] sm:$0xff]  ;;  %v1456_v51 = vunpack.c.h.s8.bf16 %v264_v49 }
 0x2c2   :  { %v1584_v52 = vunpack.c.h.s8.bf16 %v328_v50  ;;  %v1576_v62 = vunpack.c.l.s8.bf16 %v328_v50  ;;  %v432_v50 = vld [vmem:[#allocation5 + $0x850] sm:$0xff] }
 0x2c3   :  { %4387 = vmatpush1.bf16.msra.mxu0 %v1392_v54  ;;  %v1577_v54 = vunpack.c.l.s8.bf16 %v329_v43 }
 0x2c4   :  { %4430 = vmatpush1.bf16.msra.mxu1 %v1520_v55  ;;  %4388 = vmatprep.subr.bf16.mxu0 %v1385_v56  ;;  %v385_v55 = vld [vmem:[#allocation5 + $0x6d8] sm:$0xff] }
 0x2c5   :  { %4431 = vmatprep.subr.bf16.mxu1 %v1513_v61  ;;  %v449_v56 = vld [vmem:[#allocation5 + $0x8d8] sm:$0xff]  ;;  %v1448_v61 = vunpack.c.l.s8.bf16 %v264_v49  ;;  %v1697_v3 = vunpack.c.h.s8.bf16 %v385_v55  ;;  %v368_v49 = vld [vmem:[#allocation5 + $0x650] sm:$0xff] }
 0x2c7   :  { %4389 = vmatpush1.bf16.msra.mxu0 %v1384_v4  ;;  %v1825_v4 = vunpack.c.h.s8.bf16 %v449_v56 }
 0x2c8   :  { %4432 = vmatpush1.bf16.msra.mxu1 %v1512_v5  ;;  %4390 = vmatprep.subr.bf16.mxu0 %v1505_v6  ;;  %v384_v5 = vld [vmem:[#allocation5 + $0x6d0] sm:$0xff] }
 0x2c9   :  { %4433 = vmatprep.subr.bf16.mxu1 %v1633_v7  ;;  %v448_v6 = vld [vmem:[#allocation5 + $0x8d0] sm:$0xff]  ;;  %v1696_v7 = vunpack.c.h.s8.bf16 %v384_v5  ;;  %v1688_v26 = vunpack.c.l.s8.bf16 %v384_v5 }
 0x2ca   :  { %v1824_v10 = vunpack.c.h.s8.bf16 %v448_v6  ;;  %v1816_v29 = vunpack.c.l.s8.bf16 %v448_v6  ;;  %v360_v5 = vld [vmem:[#allocation5 + $0x610] sm:$0xff] }
 0x2cb   :  { %4391 = vmatpush2.bf16.msra.mxu0 %v1504_v12  ;;  %v8337_v12 = vpop.f32.mrf.mxu1  ;;  %v424_v6 = vld [vmem:[#allocation5 + $0x810] sm:$0xff] }
 0x2cc   :  { %4434 = vmatpush2.bf16.msra.mxu1 %v1632_v13  ;;  %4392 = vmatprep.subr.bf16.mxu0 %v1497_v14  ;;  %v1689_v13 = vunpack.c.l.s8.bf16 %v385_v55  ;;  %v1817_v14 = vunpack.c.l.s8.bf16 %v449_v56  ;;  %v361_v55 = vld [vmem:[#allocation5 + $0x618] sm:$0xff] }
 0x2cd   :  { %4435 = vmatprep.subr.bf16.mxu1 %v1625_v15  ;;  %v377_v15 = vld [vmem:[#allocation5 + $0x698] sm:$0xff] }
 0x2ce   :  { %v425_v56 = vld [vmem:[#allocation5 + $0x818] sm:$0xff] }
 0x2cf   :  { %4393 = vmatpush2.bf16.msra.mxu0 %v1496_v21 }
 0x2d0   :  { %4436 = vmatpush2.bf16.msra.mxu1 %v1624_v17  ;;  %4394 = vmatprep.subr.bf16.mxu0 %v1489_v23  ;;  %v7877_v17 = vld [vmem:[#allocation2 + $0x8] ss:$136 sps:$4 sm:$0xff]  }
 0x2d1   :  { %4437 = vmatprep.subr.bf16.mxu1 %v1617_v25  ;;  %v7878_v23 = vld [vmem:[#allocation2 + $0x10] ss:$136 sps:$4 sm:$0xff]  }
 0x2d3   :  { %4395 = vmatpush2.bf16.msra.mxu0 %v1488_v18 }
 0x2d4   :  { %4438 = vmatpush2.bf16.msra.mxu1 %v1616_v20  ;;  %4396 = vmatprep.subr.bf16.mxu0 %v1481_v32  ;;  %v1681_v32 = vunpack.c.h.s8.bf16 %v377_v15 }
 0x2d5   :  { %4439 = vmatprep.subr.bf16.mxu1 %v1609_v30  ;;  %v1809_v30 = vunpack.c.h.s8.bf16 %v441_v16  ;;  %v481_v16 = vld [vmem:[#allocation5 + $0x9d8] sm:$0xff] }
 0x2d7   :  { %4397 = vmatpush2.bf16.msra.mxu0 %v1480_v34 }
 0x2d8   :  { %4440 = vmatpush2.bf16.msra.mxu1 %v1608_v22  ;;  %4398 = vmatprep.subr.bf16.mxu0 %v1473_v35  ;;  %v7879_v35 = vld [vmem:[#allocation2 + $0x1c] ss:$136 sps:$4 sm:$0xff]  }
 0x2d9   :  { %4441 = vmatprep.subr.bf16.mxu1 %v1601_v36  ;;  %v7880_v36 = vld [vmem:[#allocation2 + $0x24] ss:$136 sps:$4 sm:$0xff]  }
 0x2db   :  { %4399 = vmatpush2.bf16.msra.mxu0 %v1472_v41  ;;  %v1680_v41 = vunpack.c.h.s8.bf16 %v376_v33 }
 0x2dc   :  { %4442 = vmatpush2.bf16.msra.mxu1 %v1600_v39  ;;  %4400 = vmatprep.subr.bf16.mxu0 %v1465_v40  ;;  %v1808_v39 = vunpack.c.h.s8.bf16 %v440_v28 }
 0x2dd   :  { %4443 = vmatprep.subr.bf16.mxu1 %v1593_v44  ;;  %v1673_v44 = vunpack.c.l.s8.bf16 %v377_v15  ;;  %v417_v15 = vld [vmem:[#allocation5 + $0x7d8] sm:$0xff] }
 0x2df   :  { %4401 = vmatpush2.bf16.msra.mxu0 %v1464_v45  ;;  %v433_v45 = vld [vmem:[#allocation5 + $0x858] sm:$0xff] }
 0x2e0   :  { %4444 = vmatpush2.bf16.msra.mxu1 %v1592_v46  ;;  %4402 = vmatprep.subr.bf16.mxu0 %v1457_v47  ;;  %v1672_v46 = vunpack.c.l.s8.bf16 %v376_v33  ;;  %v1800_v47 = vunpack.c.l.s8.bf16 %v440_v28  ;;  %v473_v33 = vld [vmem:[#allocation5 + $0x998] sm:$0xff] }
 0x2e1   :  { %4445 = vmatprep.subr.bf16.mxu1 %v1585_v48  ;;  %v1793_v48 = vunpack.c.h.s8.bf16 %v433_v45 }
 0x2e3   :  { %4403 = vmatpush2.bf16.msra.mxu0 %v1456_v51  ;;  %v1664_v51 = vunpack.c.h.s8.bf16 %v368_v49 }
 0x2e4   :  { %4446 = vmatpush2.bf16.msra.mxu1 %v1584_v52  ;;  %4404 = vmatprep.subr.bf16.mxu0 %v1449_v53  ;;  %v1792_v52 = vunpack.c.h.s8.bf16 %v432_v50 }
 0x2e5   :  { %4447 = vmatprep.subr.bf16.mxu1 %v1577_v54  ;;  %v1785_v54 = vunpack.c.l.s8.bf16 %v433_v45 }
 0x2e7   :  { %4405 = vmatpush2.bf16.msra.mxu0 %v1448_v61  ;;  %v1656_v61 = vunpack.c.l.s8.bf16 %v368_v49  ;;  %v464_v49 = vld [vmem:[#allocation5 + $0x950] sm:$0xff] }
 0x2e8   :  { %4448 = vmatpush2.bf16.msra.mxu1 %v1576_v62  ;;  %4460 = vmatprep.subr.bf16.mxu0 %v1697_v3  ;;  %v1784_v62 = vunpack.c.l.s8.bf16 %v432_v50  ;;  %v1649_v3 = vunpack.c.h.s8.bf16 %v361_v55 }
 0x2e9   :  { %4503 = vmatprep.subr.bf16.mxu1 %v1825_v4  ;;  %v1777_v4 = vunpack.c.h.s8.bf16 %v425_v56 }
 0x2ea   :  { %v4150_v19 = vpop.f32.mrf.mxu0  ;;  %4407 = vmatmul.mubr.bf16.vlgmr.msra.gmra.mxu0 %v7877_v17  ;;  %v1761_v17 = vunpack.c.h.s8.bf16 %v417_v15 }
 0x2eb   :  { %v4193_v21 = vpop.f32.mrf.mxu1  ;;  %4450 = vmatmul.mubr.bf16.vlgmr.msra.gmra.mxu1 %v7878_v23  ;;  %v4151_v25 = vadd.f32 %v4150_v19, %v8327_v24  ;;  %4461 = vmatpush1.bf16.msra.mxu0 %v1696_v7  ;;  %v1648_v7 = vunpack.c.h.s8.bf16 %v360_v5  ;;  %v1640_v19 = vunpack.c.l.s8.bf16 %v360_v5  ;;  %v1889_v23 = vunpack.c.h.s8.bf16 %v481_v16  ;;  %v456_v5 = vld [vmem:[#allocation5 + $0x910] sm:$0xff] }
 0x2ec   :  { %4504 = vmatpush1.bf16.msra.mxu1 %v1824_v10  ;;  %v4152_v18 = vpop.f32.mrf.mxu0  ;;  %4462 = vmatprep.subr.bf16.mxu0 %v1689_v13  ;;  %v1776_v10 = vunpack.c.h.s8.bf16 %v424_v6  ;;  %v1641_v13 = vunpack.c.l.s8.bf16 %v361_v55  ;;  %v457_v55 = vld [vmem:[#allocation5 + $0x918] sm:$0xff] }
 0x2ed   :  { %v4195_v20 = vpop.f32.mrf.mxu1  ;;  %4505 = vmatprep.subr.bf16.mxu1 %v1817_v14  ;;  %v8340_v34 = vadd.f32 %v4193_v21, %v4151_v25  ;;  %v4153_v22 = vadd.f32 %v4152_v18, %v8330_v27  ;;  %4492 = vmatprep.mubr.bf16.mxu0 %v7879_v35  ;;  %v369_v27 = vld [vmem:[#allocation5 + $0x658] sm:$0xff]  ;;  %v1769_v14 = vunpack.c.l.s8.bf16 %v425_v56  ;;  %v1768_v21 = vunpack.c.l.s8.bf16 %v424_v6  ;;  %v416_v25 = vld [vmem:[#allocation5 + $0x7d0] sm:$0xff] }
 0x2ee   :  { %4535 = vmatprep.mubr.bf16.mxu1 %v7880_v36  ;;  %v4154_v24 = vpop.f32.mrf.mxu0  ;;  %v1657_v53 = vunpack.c.l.s8.bf16 %v369_v27  ;;  %v1752_v28 = vunpack.c.l.s8.bf16 %v416_v25  ;;  %v1873_v36 = vunpack.c.h.s8.bf16 %v473_v33 }
 0x2ef   :  { %v8343_v38 = vadd.f32 %v4195_v20, %v4153_v22  ;;  %v4155_v31 = vadd.f32 %v4154_v24, %v8333_v37  ;;  %4463 = vmatpush1.bf16.msra.mxu0 %v1688_v26  ;;  %v4197_v40 = vpop.f32.mrf.mxu1  ;;  %v1665_v37 = vunpack.c.h.s8.bf16 %v369_v27  ;;  %v480_v26 = vld [vmem:[#allocation5 + $0x9d0] sm:$0xff]  ;;  %v1753_v20 = vunpack.c.l.s8.bf16 %v417_v15  ;;  %v465_v27 = vld [vmem:[#allocation5 + $0x958] sm:$0xff] }
 0x2f0   :  { %4506 = vmatpush1.bf16.msra.mxu1 %v1816_v29  ;;  %4464 = vmatprep.subr.bf16.mxu0 %v1681_v32  ;;  %v1760_v29 = vunpack.c.h.s8.bf16 %v416_v25  ;;  %v1888_v18 = vunpack.c.h.s8.bf16 %v480_v26  ;;  %v1881_v32 = vunpack.c.l.s8.bf16 %v481_v16  ;;  %v1880_v22 = vunpack.c.l.s8.bf16 %v480_v26  ;;  %v408_v24 = vld [vmem:[#allocation5 + $0x790] sm:$0xff]  ;;  %v577_v15 = vld [vmem:[#allocation5 + $0xcd8] sm:$0xff] }
 0x2f1   :  { %4507 = vmatprep.subr.bf16.mxu1 %v1809_v30  ;;  %v8346_v43 = vadd.f32 %v4197_v40, %v4155_v31  ;;  %v409_v30 = vld [vmem:[#allocation5 + $0x798] sm:$0xff]  ;;  %v472_v31 = vld [vmem:[#allocation5 + $0x990] sm:$0xff]  ;;  %v1736_v45 = vunpack.c.l.s8.bf16 %v408_v24 }
 0x2f2   :  { %v1745_v35 = vunpack.c.h.s8.bf16 %v409_v30  ;;  %v1737_v40 = vunpack.c.l.s8.bf16 %v409_v30  ;;  %v576_v25 = vld [vmem:[#allocation5 + $0xcd0] sm:$0xff]  ;;  %v2073_v30 = vunpack.c.l.s8.bf16 %v577_v15 }
 0x2f3   :  { %4465 = vmatpush1.bf16.msra.mxu0 %v1680_v41  ;;  %v1744_v41 = vunpack.c.h.s8.bf16 %v408_v24  ;;  %v7882_v24 = vld [vmem:[#allocation2 + $0x20] ss:$136 sps:$4 sm:$0xff]  }
 0x2f4   :  { %4508 = vmatpush1.bf16.msra.mxu1 %v1808_v39  ;;  %4466 = vmatprep.subr.bf16.mxu0 %v1673_v44  ;;  %v1872_v39 = vunpack.c.h.s8.bf16 %v472_v31  ;;  %v1865_v44 = vunpack.c.l.s8.bf16 %v473_v33  ;;  %v505_v33 = vld [vmem:[#allocation5 + $0xa98] sm:$0xff] }
 0x2f5   :  { %4509 = vmatprep.subr.bf16.mxu1 %v1801_v42  ;;  %v401_v42 = vld [vmem:[#allocation5 + $0x758] sm:$0xff] }
 0x2f7   :  { %4467 = vmatpush1.bf16.msra.mxu0 %v1672_v46  ;;  %v1864_v46 = vunpack.c.l.s8.bf16 %v472_v31 }
 0x2f8   :  { %4510 = vmatpush1.bf16.msra.mxu1 %v1800_v47  ;;  %4468 = vmatprep.subr.bf16.mxu0 %v1665_v37  ;;  %v1729_v47 = vunpack.c.h.s8.bf16 %v401_v42  ;;  %v1857_v37 = vunpack.c.h.s8.bf16 %v465_v27 }
 0x2f9   :  { %4511 = vmatprep.subr.bf16.mxu1 %v1793_v48  ;;  %v400_v48 = vld [vmem:[#allocation5 + $0x750] sm:$0xff] }
 0x2fa   :  { %v1728_v50 = vunpack.c.h.s8.bf16 %v400_v48  ;;  %v1720_v56 = vunpack.c.l.s8.bf16 %v400_v48  ;;  %v7883_v48 = vld [vmem:[#allocation2 + $0x2c] ss:$136 sps:$4 sm:$0xff]  }
 0x2fb   :  { %4469 = vmatpush1.bf16.msra.mxu0 %v1664_v51  ;;  %v1856_v51 = vunpack.c.h.s8.bf16 %v464_v49 }
 0x2fc   :  { %4512 = vmatpush1.bf16.msra.mxu1 %v1792_v52  ;;  %4470 = vmatprep.subr.bf16.mxu0 %v1657_v53  ;;  %v1721_v52 = vunpack.c.l.s8.bf16 %v401_v42  ;;  %v1849_v53 = vunpack.c.l.s8.bf16 %v465_v27  ;;  %v1937_v42 = vunpack.c.h.s8.bf16 %v505_v33 }
 0x2fd   :  { %4513 = vmatprep.subr.bf16.mxu1 %v1785_v54  ;;  %v393_v54 = vld [vmem:[#allocation5 + $0x718] sm:$0xff] }
 0x2ff   :  { %4471 = vmatpush1.bf16.msra.mxu0 %v1656_v61  ;;  %v1848_v61 = vunpack.c.l.s8.bf16 %v464_v49  ;;  %v7884_v49 = vld [vmem:[#allocation2 + $0x34] ss:$136 sps:$4 sm:$0xff]  }
 0x300   :  { %4514 = vmatpush1.bf16.msra.mxu1 %v1784_v62  ;;  %4472 = vmatprep.subr.bf16.mxu0 %v1649_v3  ;;  %v1713_v62 = vunpack.c.h.s8.bf16 %v393_v54  ;;  %v1841_v3 = vunpack.c.h.s8.bf16 %v457_v55 }
 0x301   :  { %4515 = vmatprep.subr.bf16.mxu1 %v1777_v4  ;;  %v392_v4 = vld [vmem:[#allocation5 + $0x710] sm:$0xff] }
 0x302   :  { %v1712_v6 = vunpack.c.h.s8.bf16 %v392_v4  ;;  %v1704_v16 = vunpack.c.l.s8.bf16 %v392_v4 }
 0x303   :  { %4473 = vmatpush1.bf16.msra.mxu0 %v1648_v7  ;;  %v1840_v7 = vunpack.c.h.s8.bf16 %v456_v5 }
 0x304   :  { %4516 = vmatpush1.bf16.msra.mxu1 %v1776_v10  ;;  %4474 = vmatprep.subr.bf16.mxu0 %v1641_v13  ;;  %v1705_v10 = vunpack.c.l.s8.bf16 %v393_v54  ;;  %v1833_v13 = vunpack.c.l.s8.bf16 %v457_v55  ;;  %v1929_v55 = vunpack.c.l.s8.bf16 %v505_v33 }
 0x305   :  { %4517 = vmatprep.subr.bf16.mxu1 %v1769_v14  ;;  %v513_v14 = vld [vmem:[#allocation5 + $0xad8] sm:$0xff] }
 0x307   :  { %4475 = vmatpush1.bf16.msra.mxu0 %v1640_v19  ;;  %v1832_v19 = vunpack.c.l.s8.bf16 %v456_v5 }
 0x308   :  { %4518 = vmatpush1.bf16.msra.mxu1 %v1768_v21  ;;  %4476 = vmatprep.subr.bf16.mxu0 %v1761_v17  ;;  %v1953_v21 = vunpack.c.h.s8.bf16 %v513_v14  ;;  %v2081_v17 = vunpack.c.h.s8.bf16 %v577_v15 }
 0x309   :  { %4519 = vmatprep.subr.bf16.mxu1 %v1889_v23  ;;  %v512_v23 = vld [vmem:[#allocation5 + $0xad0] sm:$0xff] }
 0x30a   :  { %v1952_v26 = vunpack.c.h.s8.bf16 %v512_v23 }
 0x30b   :  { %4477 = vmatpush2.bf16.msra.mxu0 %v1760_v29  ;;  %v2080_v29 = vunpack.c.h.s8.bf16 %v576_v25 }
 0x30c   :  { %4520 = vmatpush2.bf16.msra.mxu1 %v1888_v18  ;;  %4478 = vmatprep.subr.bf16.mxu0 %v1753_v20  ;;  %v8348_v18 = vpop.f32.mrf.mxu0  ;;  %v8350_v20 = vpop.f32.mrf.mxu1 }
 0x30d   :  { %4521 = vmatprep.subr.bf16.mxu1 %v1881_v32  ;;  %v1945_v32 = vunpack.c.l.s8.bf16 %v513_v14 }
 0x30f   :  { %4479 = vmatpush2.bf16.msra.mxu0 %v1752_v28  ;;  %v569_v28 = vld [vmem:[#allocation5 + $0xc98] sm:$0xff] }
 0x310   :  { %4522 = vmatpush2.bf16.msra.mxu1 %v1880_v22  ;;  %4480 = vmatprep.subr.bf16.mxu0 %v1745_v35  ;;  %v2065_v27 = vunpack.c.h.s8.bf16 %v569_v28 }
 0x311   :  { %4523 = vmatprep.subr.bf16.mxu1 %v1873_v36  ;;  %v7881_v36 = vld [vmem:[#allocation2 + $0x18] ss:$136 sps:$4 sm:$0xff]  }
 0x313   :  { %4481 = vmatpush2.bf16.msra.mxu0 %v1744_v41  ;;  %v1944_v41 = vunpack.c.l.s8.bf16 %v512_v23 }
 0x314   :  { %4524 = vmatpush2.bf16.msra.mxu1 %v1872_v39  ;;  %4482 = vmatprep.subr.bf16.mxu0 %v1737_v40  ;;  %v2072_v39 = vunpack.c.l.s8.bf16 %v576_v25 }
 0x315   :  { %4525 = vmatprep.subr.bf16.mxu1 %v1865_v44 }
 0x317   :  { %4483 = vmatpush2.bf16.msra.mxu0 %v1736_v45  ;;  %v504_v45 = vld [vmem:[#allocation5 + $0xa90] sm:$0xff] }
 0x318   :  { %4526 = vmatpush2.bf16.msra.mxu1 %v1864_v46  ;;  %4484 = vmatprep.subr.bf16.mxu0 %v1729_v47  ;;  %v568_v46 = vld [vmem:[#allocation5 + $0xc90] sm:$0xff] }
 0x319   :  { %4527 = vmatprep.subr.bf16.mxu1 %v1857_v37  ;;  %v2056_v4 = vunpack.c.l.s8.bf16 %v568_v46 }
 0x31b   :  { %4485 = vmatpush2.bf16.msra.mxu0 %v1728_v50 }
 0x31c   :  { %4528 = vmatpush2.bf16.msra.mxu1 %v1856_v51  ;;  %4486 = vmatprep.subr.bf16.mxu0 %v1721_v52  ;;  %v1936_v52 = vunpack.c.h.s8.bf16 %v504_v45 }
 0x31d   :  { %4529 = vmatprep.subr.bf16.mxu1 %v1849_v53  ;;  %v2064_v53 = vunpack.c.h.s8.bf16 %v568_v46 }
 0x31f   :  { %4487 = vmatpush2.bf16.msra.mxu0 %v1720_v56  ;;  %v2057_v56 = vunpack.c.l.s8.bf16 %v569_v28 }
 0x320   :  { %4530 = vmatpush2.bf16.msra.mxu1 %v1848_v61  ;;  %4488 = vmatprep.subr.bf16.mxu0 %v1713_v62  ;;  %v561_v62 = vld [vmem:[#allocation5 + $0xc58] sm:$0xff] }
 0x321   :  { %4531 = vmatprep.subr.bf16.mxu1 %v1841_v3  ;;  %v1928_v3 = vunpack.c.l.s8.bf16 %v504_v45  ;;  %v2049_v5 = vunpack.c.h.s8.bf16 %v561_v62  ;;  %v2041_v15 = vunpack.c.l.s8.bf16 %v561_v62 }
 0x323   :  { %4489 = vmatpush2.bf16.msra.mxu0 %v1712_v6  ;;  %v496_v6 = vld [vmem:[#allocation5 + $0xa50] sm:$0xff] }
 0x324   :  { %4532 = vmatpush2.bf16.msra.mxu1 %v1840_v7  ;;  %4490 = vmatprep.subr.bf16.mxu0 %v1705_v10  ;;  %v560_v7 = vld [vmem:[#allocation5 + $0xc50] sm:$0xff]  ;;  %v1920_v10 = vunpack.c.h.s8.bf16 %v496_v6 }
 0x325   :  { %4533 = vmatprep.subr.bf16.mxu1 %v1833_v13  ;;  %v2048_v13 = vunpack.c.h.s8.bf16 %v560_v7 }
 0x327   :  { %4491 = vmatpush2.bf16.msra.mxu0 %v1704_v16  ;;  %v489_v16 = vld [vmem:[#allocation5 + $0xa18] sm:$0xff] }
 0x328   :  { %4534 = vmatpush2.bf16.msra.mxu1 %v1832_v19  ;;  %4546 = vmatprep.subr.bf16.mxu0 %v1953_v21  ;;  %v553_v19 = vld [vmem:[#allocation5 + $0xc18] sm:$0xff]  ;;  %v1912_v21 = vunpack.c.l.s8.bf16 %v496_v6  ;;  %v1905_v23 = vunpack.c.h.s8.bf16 %v489_v16  ;;  %v1897_v33 = vunpack.c.l.s8.bf16 %v489_v16 }
 0x329   :  { %4589 = vmatprep.subr.bf16.mxu1 %v2081_v17  ;;  %v2040_v17 = vunpack.c.l.s8.bf16 %v560_v7  ;;  %v2033_v25 = vunpack.c.h.s8.bf16 %v553_v19  ;;  %v2025_v28 = vunpack.c.l.s8.bf16 %v553_v19 }
 0x32a   :  { %v4236_v22 = vpop.f32.mrf.mxu0  ;;  %4493 = vmatmul.mubr.bf16.vlgmr.msra.gmra.mxu0 %v7881_v36 }
 0x32b   :  { %v4279_v35 = vpop.f32.mrf.mxu1  ;;  %4536 = vmatmul.mubr.bf16.vlgmr.msra.gmra.mxu1 %v7882_v24  ;;  %v4237_v31 = vadd.f32 %v4236_v22, %v8340_v34  ;;  %4547 = vmatpush1.bf16.msra.mxu0 %v1952_v26  ;;  %v488_v26 = vld [vmem:[#allocation5 + $0xa10] sm:$0xff]  ;;  %v545_v22 = vld [vmem:[#allocation5 + $0xbd8] sm:$0xff] }
 0x32c   :  { %4590 = vmatpush1.bf16.msra.mxu1 %v2080_v29  ;;  %v4238_v40 = vpop.f32.mrf.mxu0  ;;  %4548 = vmatprep.subr.bf16.mxu0 %v1945_v32  ;;  %v552_v29 = vld [vmem:[#allocation5 + $0xc10] sm:$0xff]  ;;  %v1904_v32 = vunpack.c.h.s8.bf16 %v488_v26  ;;  %v1896_v36 = vunpack.c.l.s8.bf16 %v488_v26  ;;  %v2009_v46 = vunpack.c.l.s8.bf16 %v545_v22 }
 0x32d   :  { %v4281_v44 = vpop.f32.mrf.mxu1  ;;  %4591 = vmatprep.subr.bf16.mxu1 %v2073_v30  ;;  %v8353_v47 = vadd.f32 %v4279_v35, %v4237_v31  ;;  %v4239_v37 = vadd.f32 %v4238_v40, %v8343_v38  ;;  %4578 = vmatprep.mubr.bf16.mxu0 %v7883_v48  ;;  %v497_v38 = vld [vmem:[#allocation5 + $0xa58] sm:$0xff]  ;;  %v2032_v30 = vunpack.c.h.s8.bf16 %v552_v29  ;;  %v2024_v24 = vunpack.c.l.s8.bf16 %v552_v29  ;;  %v608_v40 = vld [vmem:[#allocation5 + $0xdd0] sm:$0xff] }
 0x32e   :  { %4621 = vmatprep.mubr.bf16.mxu1 %v7884_v49  ;;  %v4240_v34 = vpop.f32.mrf.mxu0  ;;  %v1913_v14 = vunpack.c.l.s8.bf16 %v497_v38  ;;  %v609_v35 = vld [vmem:[#allocation5 + $0xdd8] sm:$0xff]  ;;  %v2017_v31 = vunpack.c.h.s8.bf16 %v545_v22  ;;  %v2144_v45 = vunpack.c.h.s8.bf16 %v608_v40  ;;  %v520_v29 = vld [vmem:[#allocation5 + $0xb10] sm:$0xff] }
 0x32f   :  { %v8356_v50 = vadd.f32 %v4281_v44, %v4239_v37  ;;  %v4241_v51 = vadd.f32 %v4240_v34, %v8346_v43  ;;  %4549 = vmatpush1.bf16.msra.mxu0 %v1944_v41  ;;  %v4283_v54 = vpop.f32.mrf.mxu1  ;;  %v1921_v43 = vunpack.c.h.s8.bf16 %v497_v38  ;;  %v2145_v41 = vunpack.c.h.s8.bf16 %v609_v35  ;;  %v537_v48 = vld [vmem:[#allocation5 + $0xb98] sm:$0xff] }
 0x330   :  { %4592 = vmatpush1.bf16.msra.mxu1 %v2072_v39  ;;  %4550 = vmatprep.subr.bf16.mxu0 %v1937_v42  ;;  %v544_v39 = vld [vmem:[#allocation5 + $0xbd0] sm:$0xff]  ;;  %v3684_v44 = vadd.f32 %v8272_v9, %v8270_v8  ;;  %v2137_v37 = vunpack.c.l.s8.bf16 %v609_v35  ;;  %v601_v49 = vld [vmem:[#allocation5 + $0xd98] sm:$0xff]  ;;  %v2001_v8 = vunpack.c.h.s8.bf16 %v537_v48  ;;  %v1993_v38 = vunpack.c.l.s8.bf16 %v537_v48 }
 0x331   :  { %4593 = vmatprep.subr.bf16.mxu1 %v2065_v27  ;;  %v8359_v61 = vadd.f32 %v4283_v54, %v4241_v51  ;;  %v2016_v27 = vunpack.c.h.s8.bf16 %v544_v39  ;;  %v2008_v51 = vunpack.c.l.s8.bf16 %v544_v39  ;;  %v2129_v9 = vunpack.c.h.s8.bf16 %v601_v49 }
 0x332   :  { %v3727_v42 = vadd.f32 %v8283_v63, %v3684_v44  ;;  %v536_v63 = vld [vmem:[#allocation5 + $0xb90] sm:$0xff] }
 0x333   :  { %4551 = vmatpush1.bf16.msra.mxu0 %v1936_v52  ;;  %v2136_v52 = vunpack.c.l.s8.bf16 %v608_v40 }
 0x334   :  { %4594 = vmatpush1.bf16.msra.mxu1 %v2064_v53  ;;  %4552 = vmatprep.subr.bf16.mxu0 %v1929_v55  ;;  %v3770_v34 = vadd.f32 %v8285_v0, %v3727_v42  ;;  %v600_v53 = vld [vmem:[#allocation5 + $0xd90] sm:$0xff]  ;;  %v2000_v55 = vunpack.c.h.s8.bf16 %v536_v63  ;;  %v2121_v0 = vunpack.c.l.s8.bf16 %v601_v49 }
 0x335   :  { %4595 = vmatprep.subr.bf16.mxu1 %v2057_v56  ;;  %v2128_v56 = vunpack.c.h.s8.bf16 %v600_v53  ;;  %v2120_v6 = vunpack.c.l.s8.bf16 %v600_v53  ;;  %v640_v42 = vld [vmem:[#allocation5 + $0xed0] sm:$0xff]  ;;  %v697_v53 = vld [vmem:[#allocation5 + $0x1098] sm:$0xff] }
 0x336   :  { %v3813_v54 = vadd.f32 %v8296_v58, %v3770_v34  ;;  %v2208_v48 = vunpack.c.h.s8.bf16 %v640_v42  ;;  %v4242_v34 = vpop.f32.mrf.mxu0 }
 0x337   :  { %4553 = vmatpush1.bf16.msra.mxu0 %v1928_v3  ;;  %v529_v3 = vld [vmem:[#allocation5 + $0xb58] sm:$0xff] }
 0x338   :  { %4596 = vmatpush1.bf16.msra.mxu1 %v2056_v4  ;;  %4554 = vmatprep.subr.bf16.mxu0 %v1921_v43  ;;  %v3856_v62 = vadd.f32 %v8298_v59, %v3813_v54  ;;  %v593_v4 = vld [vmem:[#allocation5 + $0xd58] sm:$0xff]  ;;  %v1985_v58 = vunpack.c.h.s8.bf16 %v529_v3  ;;  %v1977_v16 = vunpack.c.l.s8.bf16 %v529_v3  ;;  %v6582_v54 = vld [vmem:[#allocation8] sm:$0xff] }
 0x339   :  { %4597 = vmatprep.subr.bf16.mxu1 %v2049_v5  ;;  %v1992_v5 = vunpack.c.l.s8.bf16 %v536_v63  ;;  %v2113_v7 = vunpack.c.h.s8.bf16 %v593_v4  ;;  %v633_v63 = vld [vmem:[#allocation5 + $0xe98] sm:$0xff] }
 0x33a   :  { %v3899_v43 = vadd.f32 %v8309_v57, %v3856_v62  ;;  %v2105_v57 = vunpack.c.l.s8.bf16 %v593_v4 }
 0x33b   :  { %4555 = vmatpush1.bf16.msra.mxu0 %v1920_v10  ;;  %v528_v10 = vld [vmem:[#allocation5 + $0xb50] sm:$0xff] }
 0x33c   :  { %4598 = vmatpush1.bf16.msra.mxu1 %v2048_v13  ;;  %4556 = vmatprep.subr.bf16.mxu0 %v1913_v14  ;;  %v592_v13 = vld [vmem:[#allocation5 + $0xd50] sm:$0xff]  ;;  %v3942_v14 = vadd.f32 %v8311_v60, %v3899_v43 }
 0x33d   :  { %4599 = vmatprep.subr.bf16.mxu1 %v2041_v15  ;;  %v1984_v15 = vunpack.c.h.s8.bf16 %v528_v10  ;;  %v2112_v59 = vunpack.c.h.s8.bf16 %v592_v13  ;;  %v632_v43 = vld [vmem:[#allocation5 + $0xe90] sm:$0xff] }
 0x33e   :  { %v3985_v19 = vadd.f32 %v8322_v1, %v3942_v14  ;;  %v1968_v1 = vunpack.c.h.s8.bf16 %v520_v29  ;;  %v7887_v14 = vld [vmem:[#allocation2 + $0x3c] ss:$136 sps:$4 sm:$0xff]  }
 0x33f   :  { %4557 = vmatpush1.bf16.msra.mxu0 %v1912_v21  ;;  %v521_v21 = vld [vmem:[#allocation5 + $0xb18] sm:$0xff] }
 0x340   :  { %4600 = vmatpush1.bf16.msra.mxu1 %v2040_v17  ;;  %4558 = vmatprep.subr.bf16.mxu0 %v1905_v23  ;;  %v585_v17 = vld [vmem:[#allocation5 + $0xd18] sm:$0xff]  ;;  %v1976_v23 = vunpack.c.l.s8.bf16 %v528_v10  ;;  %v1969_v26 = vunpack.c.h.s8.bf16 %v521_v21  ;;  %v1961_v35 = vunpack.c.l.s8.bf16 %v521_v21 }
 0x341   :  { %4601 = vmatprep.subr.bf16.mxu1 %v2033_v25  ;;  %v2104_v25 = vunpack.c.l.s8.bf16 %v592_v13  ;;  %v2097_v60 = vunpack.c.h.s8.bf16 %v585_v17 }
 0x343   :  { %4559 = vmatpush1.bf16.msra.mxu0 %v1904_v32  ;;  %v584_v32 = vld [vmem:[#allocation5 + $0xd10] sm:$0xff] }
 0x344   :  { %4602 = vmatpush1.bf16.msra.mxu1 %v2032_v30  ;;  %4560 = vmatprep.subr.bf16.mxu0 %v1897_v33  ;;  %v4028_v30 = vadd.f32 %v8324_v2, %v3985_v19  ;;  %v8810_v33 = vlaneseq  ;;  %v2096_v22 = vunpack.c.h.s8.bf16 %v584_v32  ;;  %v1960_v2 = vunpack.c.l.s8.bf16 %v520_v29 }
 0x345   :  { %4603 = vmatprep.subr.bf16.mxu1 %v2025_v28  ;;  %v2088_v40 = vunpack.c.l.s8.bf16 %v584_v32 }
 0x346   :  { %v4071_v28 = vadd.f32 %v8335_v11, %v4028_v30  ;;  %v625_v30 = vld [vmem:[#allocation5 + $0xe58] sm:$0xff] }
 0x347   :  { %4561 = vmatpush1.bf16.msra.mxu0 %v1896_v36  ;;  %v2089_v36 = vunpack.c.l.s8.bf16 %v585_v17 }
 0x348   :  { %4604 = vmatpush1.bf16.msra.mxu1 %v2024_v24  ;;  %4562 = vmatprep.subr.bf16.mxu0 %v2017_v31  ;;  %v8373_v24 = vshrl.u32 %v8810_v33, 7  ;;  %v641_v31 = vld [vmem:[#allocation5 + $0xed8] sm:$0xff]  ;;  %v4114_v39 = vadd.f32 %v8337_v12, %v4071_v28  ;;  %v7959_v33 = vld [vmem:[#allocation2 + $0x3c] ss:$136 sps:$4 sm:$0xff]  }
 0x349   :  { %4605 = vmatprep.subr.bf16.mxu1 %v2145_v41  ;;  %v705_v41 = vld [vmem:[#allocation5 + $0x10d8] sm:$0xff]  ;;  %v2209_v11 = vunpack.c.h.s8.bf16 %v641_v31 }
 0x34a   :  { %v2337_v44 = vunpack.c.h.s8.bf16 %v705_v41  ;;  %v6532_v12 = vsub.s32 1, %v8373_v24  ;;  %v689_v28 = vld [vmem:[#allocation5 + $0x1058] sm:$0xff] }
 0x34b   :  { %4563 = vmatpush2.bf16.msra.mxu0 %v2016_v27  ;;  %v704_v27 = vld [vmem:[#allocation5 + $0x10d0] sm:$0xff] }
 0x34c   :  { %4606 = vmatpush2.bf16.msra.mxu1 %v2144_v45  ;;  %4564 = vmatprep.subr.bf16.mxu0 %v2009_v46  ;;  %v4157_v45 = vadd.f32 %v8348_v18, %v4114_v39  ;;  %v6528_v46 = vsub.s32 0, %v8373_v24  ;;  %v2336_v49 = vunpack.c.h.s8.bf16 %v704_v27  ;;  %v2328_v4 = vunpack.c.l.s8.bf16 %v704_v27 }
 0x34d   :  { %4607 = vmatprep.subr.bf16.mxu1 %v2137_v37  ;;  %v6524_v37 = vld [vmem:[#allocation7] sm:$0xff]  ;;  %v2305_v39 = vunpack.c.h.s8.bf16 %v689_v28 }
 0x34e   :  { %v6533_v3 = vrot.slane %v6524_v37, %v6532_v12  ;;  %v6587_v10 = vrot.slane %v6582_v54, %v6528_v46 }
 0x34f   :  { %4565 = vmatpush2.bf16.msra.mxu0 %v2008_v51  ;;  %v2201_v51 = vunpack.c.l.s8.bf16 %v641_v31  ;;  %v624_v31 = vld [vmem:[#allocation5 + $0xe50] sm:$0xff] }
 0x350   :  { %4608 = vmatpush2.bf16.msra.mxu1 %v2136_v52  ;;  %4566 = vmatprep.subr.bf16.mxu0 %v2001_v8  ;;  %v2329_v52 = vunpack.c.l.s8.bf16 %v705_v41  ;;  %v4200_v8 = vadd.f32 %v8350_v20, %v4157_v45  ;;  %v2193_v20 = vunpack.c.h.s8.bf16 %v633_v63  ;;  %v2177_v41 = vunpack.c.h.s8.bf16 %v625_v30 }
 0x351   :  { %4609 = vmatprep.subr.bf16.mxu1 %v2129_v9  ;;  %v6529_v9 = vrot.slane %v6524_v37, %v6528_v46 }
 0x353   :  { %4567 = vmatpush2.bf16.msra.mxu0 %v2000_v55  ;;  %v7885_v55 = vld [vmem:[#allocation2 + $0x28] ss:$136 sps:$4 sm:$0xff]  }
 0x354   :  { %4610 = vmatpush2.bf16.msra.mxu1 %v2128_v56  ;;  %4568 = vmatprep.subr.bf16.mxu0 %v1993_v38  ;;  %v7886_v56 = vld [vmem:[#allocation2 + $0x30] ss:$136 sps:$4 sm:$0xff]   ;;  %v2200_v38 = vunpack.c.l.s8.bf16 %v640_v42  ;;  %v2176_v42 = vunpack.c.h.s8.bf16 %v624_v31 }
 0x355   :  { %4611 = vmatprep.subr.bf16.mxu1 %v2121_v0  ;;  %v4243_v0 = vadd.f32 %v4242_v34, %v4200_v8  ;;  %v681_v34 = vld [vmem:[#allocation5 + $0x1018] sm:$0xff] }
 0x357   :  { %4569 = vmatpush2.bf16.msra.mxu0 %v1992_v5 }
 0x358   :  { %4612 = vmatpush2.bf16.msra.mxu1 %v2120_v6  ;;  %4570 = vmatprep.subr.bf16.mxu0 %v1985_v58  ;;  %v2321_v6 = vunpack.c.h.s8.bf16 %v697_v53  ;;  %v696_v58 = vld [vmem:[#allocation5 + $0x1090] sm:$0xff] }
 0x359   :  { %4613 = vmatprep.subr.bf16.mxu1 %v2113_v7 }
 0x35b   :  { %4571 = vmatpush2.bf16.msra.mxu0 %v1984_v15  ;;  %v7888_v15 = vld [vmem:[#allocation2 + $0x44] ss:$136 sps:$4 sm:$0xff]  }
 0x35c   :  { %4614 = vmatpush2.bf16.msra.mxu1 %v2112_v59  ;;  %4572 = vmatprep.subr.bf16.mxu0 %v1977_v16  ;;  %v6591_v59 = vrot.slane %v6582_v54, %v6532_v12  ;;  %v617_v12 = vld [vmem:[#allocation5 + $0xe18] sm:$0xff] }
 0x35d   :  { %4615 = vmatprep.subr.bf16.mxu1 %v2105_v57  ;;  %v2192_v57 = vunpack.c.h.s8.bf16 %v632_v43 }
 0x35f   :  { %4573 = vmatpush2.bf16.msra.mxu0 %v1976_v23  ;;  %v2320_v23 = vunpack.c.h.s8.bf16 %v696_v58 }
 0x360   :  { %4616 = vmatpush2.bf16.msra.mxu1 %v2104_v25  ;;  %4574 = vmatprep.subr.bf16.mxu0 %v1969_v26  ;;  %v2185_v26 = vunpack.c.l.s8.bf16 %v633_v63  ;;  %v2289_v63 = vunpack.c.h.s8.bf16 %v681_v34 }
 0x361   :  { %4617 = vmatprep.subr.bf16.mxu1 %v2097_v60 }
 0x363   :  { %4575 = vmatpush2.bf16.msra.mxu0 %v1968_v1  ;;  %v2184_v1 = vunpack.c.l.s8.bf16 %v632_v43 }
 0x364   :  { %4618 = vmatpush2.bf16.msra.mxu1 %v2096_v22  ;;  %4576 = vmatprep.subr.bf16.mxu0 %v1961_v35 }
 0x365   :  { %4619 = vmatprep.subr.bf16.mxu1 %v2089_v36 }
 0x367   :  { %4577 = vmatpush2.bf16.msra.mxu0 %v1960_v2  ;;  %v688_v2 = vld [vmem:[#allocation5 + $0x1050] sm:$0xff] }
 0x368   :  { %4620 = vmatpush2.bf16.msra.mxu1 %v2088_v40  ;;  %4632 = vmatprep.subr.bf16.mxu0 %v2209_v11  ;;  %v2304_v46 = vunpack.c.h.s8.bf16 %v688_v2  ;;  %v2296_v8 = vunpack.c.l.s8.bf16 %v688_v2 }
 0x369   :  { %4675 = vmatprep.subr.bf16.mxu1 %v2337_v44 }
 0x36a   :  { %v4322_v18 = vpop.f32.mrf.mxu0  ;;  %4579 = vmatmul.mubr.bf16.vlgmr.msra.gmra.mxu0 %v7885_v55 }
 0x36b   :  { %4622 = vmatmul.mubr.bf16.vlgmr.msra.gmra.mxu1 %v7886_v56  ;;  %v4323_v62 = vadd.f32 %v4322_v18, %v8353_v47  ;;  %4633 = vmatpush1.bf16.msra.mxu0 %v2208_v48  ;;  %v4285_v47 = vpop.f32.mrf.mxu1  ;;  %v2169_v48 = vunpack.c.l.s8.bf16 %v625_v30  ;;  %v680_v18 = vld [vmem:[#allocation5 + $0x1010] sm:$0xff]  ;;  %v2153_v56 = vunpack.c.l.s8.bf16 %v617_v12 }
 0x36c   :  { %4676 = vmatpush1.bf16.msra.mxu1 %v2336_v49  ;;  %v4324_v5 = vpop.f32.mrf.mxu0  ;;  %4634 = vmatprep.subr.bf16.mxu0 %v2201_v51  ;;  %v4286_v19 = vadd.f32 %v4285_v47, %v4243_v0  ;;  %v2297_v49 = vunpack.c.l.s8.bf16 %v689_v28  ;;  %v2288_v55 = vunpack.c.h.s8.bf16 %v680_v18  ;;  %v673_v0 = vld [vmem:[#allocation5 + $0xfd8] sm:$0xff] }
 0x36d   :  { %4677 = vmatprep.subr.bf16.mxu1 %v2329_v52  ;;  %v6566_v7 = vmul.f32 %v6529_v9, %v4323_v62  ;;  %v4325_v13 = vadd.f32 %v4324_v5, %v8356_v50  ;;  %4664 = vmatprep.mubr.bf16.mxu0 %v7887_v14  ;;  %v2313_v50 = vunpack.c.l.s8.bf16 %v697_v53  ;;  %v2168_v52 = vunpack.c.l.s8.bf16 %v624_v31  ;;  %v616_v53 = vld [vmem:[#allocation5 + $0xe10] sm:$0xff]  ;;  %v737_v62 = vld [vmem:[#allocation5 + $0x11d8] sm:$0xff] }
 0x36e   :  { %4707 = vmatprep.mubr.bf16.mxu1 %v7888_v15  ;;  %v4326_v16 = vpop.f32.mrf.mxu0  ;;  %v2160_v54 = vunpack.c.h.s8.bf16 %v616_v53  ;;  %v2273_v43 = vunpack.c.h.s8.bf16 %v673_v0  ;;  %v2401_v5 = vunpack.c.h.s8.bf16 %v737_v62  ;;  %v665_v14 = vld [vmem:[#allocation5 + $0xf98] sm:$0xff] }
 0x36f   :  { %v6567_v21 = vmul.f32 %v6533_v3, %v4325_v13  ;;  %v4327_v17 = vadd.f32 %v4326_v16, %v8359_v61  ;;  %4635 = vmatpush1.bf16.msra.mxu0 %v2200_v38  ;;  %v6624_v60 = vadd.f32 %v6587_v10, %v6566_v7  ;;  %v2312_v61 = vunpack.c.l.s8.bf16 %v696_v58  ;;  %v729_v15 = vld [vmem:[#allocation5 + $0x1198] sm:$0xff] }
 0x370   :  { %4678 = vmatpush1.bf16.msra.mxu1 %v2328_v4  ;;  %v4328_v25 = vpop.f32.mrf.mxu0  ;;  %4636 = vmatprep.subr.bf16.mxu0 %v2193_v20  ;;  %v2281_v38 = vunpack.c.l.s8.bf16 %v681_v34  ;;  %v2280_v4 = vunpack.c.l.s8.bf16 %v680_v18  ;;  %v672_v20 = vld [vmem:[#allocation5 + $0xfd0] sm:$0xff]  ;;  %v2393_v13 = vunpack.c.l.s8.bf16 %v737_v62  ;;  %v2257_v16 = vunpack.c.h.s8.bf16 %v665_v14 }
 0x371   :  { %4679 = vmatprep.subr.bf16.mxu1 %v2321_v6  ;;  %v6574_v29 = vmul.f32 %v6529_v9, %v4327_v17  ;;  %v4329_v32 = vadd.f32 %v4328_v25, %v4286_v19  ;;  %v6625_v22 = vadd.f32 %v6591_v59, %v6567_v21  ;;  %v6640_v40 = vmax.f32 %v6624_v60, 0.0  ;;  %v736_v6 = vld [vmem:[#allocation5 + $0x11d0] sm:$0xff]  ;;  %v721_v60 = vld [vmem:[#allocation5 + $0x1158] sm:$0xff] }
 0x372   :  { %v2161_v9 = vunpack.c.h.s8.bf16 %v617_v12  ;;  %v2272_v58 = vunpack.c.h.s8.bf16 %v672_v20  ;;  %v2400_v7 = vunpack.c.h.s8.bf16 %v736_v6  ;;  %v2264_v47 = vunpack.c.l.s8.bf16 %v672_v20  ;;  %v664_v19 = vld [vmem:[#allocation5 + $0xf90] sm:$0xff] }
 0x373   :  { %v6632_v35 = vadd.f32 %v6587_v10, %v6574_v29  ;;  %v6575_v36 = vmul.f32 %v6533_v3, %v4329_v32  ;;  %4637 = vmatpush1.bf16.msra.mxu0 %v2192_v57  ;;  %v6641_v37 = vmax.f32 %v6625_v22, 0.0  ;;  %v2152_v3 = vunpack.c.l.s8.bf16 %v616_v53  ;;  %v728_v21 = vld [vmem:[#allocation5 + $0x1190] sm:$0xff] }
 0x374   :  { %4680 = vmatpush1.bf16.msra.mxu1 %v2320_v23  ;;  %4638 = vmatprep.subr.bf16.mxu0 %v2185_v26  ;;  %v2265_v10 = vunpack.c.l.s8.bf16 %v673_v0  ;;  %v2385_v57 = vunpack.c.h.s8.bf16 %v729_v15  ;;  %v2256_v17 = vunpack.c.h.s8.bf16 %v664_v19  ;;  %v2384_v23 = vunpack.c.h.s8.bf16 %v728_v21  ;;  %v720_v22 = vld [vmem:[#allocation5 + $0x1150] sm:$0xff] }
 0x375   :  { %4681 = vmatprep.subr.bf16.mxu1 %v2313_v50  ;;  %v6648_v11 = vmax.f32 %v6632_v35, 0.0  ;;  %v6633_v44 = vadd.f32 %v6591_v59, %v6575_v36  ;;  %v2392_v59 = vunpack.c.l.s8.bf16 %v736_v6  ;;  %v2249_v25 = vunpack.c.l.s8.bf16 %v665_v14  ;;  %v657_v50 = vld [vmem:[#allocation5 + $0xf58] sm:$0xff] }
 0x376   :  { %v2377_v26 = vunpack.c.l.s8.bf16 %v729_v15  ;;  %v2248_v29 = vunpack.c.l.s8.bf16 %v664_v19  ;;  %v2376_v32 = vunpack.c.l.s8.bf16 %v728_v21  ;;  %v2241_v30 = vunpack.c.h.s8.bf16 %v657_v50  ;;  %v824_v19 = vld [vmem:[#allocation5 + $0x1490] sm:$0xff] }
 0x377   :  { %v8383_v27 = vpack.c.bf16 %v6648_v11, %v6640_v40  ;;  %v6649_v45 = vmax.f32 %v6633_v44, 0.0  ;;  %4639 = vmatpush1.bf16.msra.mxu0 %v2184_v1  ;;  %v2369_v28 = vunpack.c.h.s8.bf16 %v721_v60  ;;  %v656_v1 = vld [vmem:[#allocation5 + $0xf50] sm:$0xff]  ;;  %v2368_v36 = vunpack.c.h.s8.bf16 %v720_v22  ;;  %v4365_v11 = vpop.f32.mrf.mxu1 }
 0x378   :  { %4682 = vmatpush1.bf16.msra.mxu1 %v2312_v61  ;;  %4640 = vmatprep.subr.bf16.mxu0 %v2177_v41  ;;  %v2240_v35 = vunpack.c.h.s8.bf16 %v656_v1  ;;  %v2233_v61 = vunpack.c.l.s8.bf16 %v657_v50  ;;  %v2361_v31 = vunpack.c.l.s8.bf16 %v721_v60  ;;  %v649_v41 = vld [vmem:[#allocation5 + $0xf18] sm:$0xff]  ;;  %v2232_v2 = vunpack.c.l.s8.bf16 %v656_v1 }
 0x379   :  { %4683 = vmatprep.subr.bf16.mxu1 %v2305_v39  ;;  %v8385_v51 = vpack.c.bf16 %v6649_v45, %v6641_v37  ;;  %v713_v39 = vld [vmem:[#allocation5 + $0x1118] sm:$0xff]  ;;  %v2360_v40 = vunpack.c.l.s8.bf16 %v720_v22  ;;  %v2225_v44 = vunpack.c.h.s8.bf16 %v649_v41  ;;  %v648_v45 = vld [vmem:[#allocation5 + $0xf10] sm:$0xff]  ;;  %v2217_v12 = vunpack.c.l.s8.bf16 %v649_v41 }
 0x37a   :  { %v2224_v37 = vunpack.c.h.s8.bf16 %v648_v45  ;;  %v2345_v34 = vunpack.c.l.s8.bf16 %v713_v39 }
 0x37b   :  { %4641 = vmatpush1.bf16.msra.mxu0 %v2176_v42  ;;  %v2353_v42 = vunpack.c.h.s8.bf16 %v713_v39  ;;  %v2568_v39 = vunpack.c.l.s8.bf16 %v824_v19 }
 0x37c   :  { %4684 = vmatpush1.bf16.msra.mxu1 %v2304_v46  ;;  %4642 = vmatprep.subr.bf16.mxu0 %v2169_v48  ;;  %v712_v46 = vld [vmem:[#allocation5 + $0x1110] sm:$0xff] }
 0x37d   :  { %4685 = vmatprep.subr.bf16.mxu1 %v2297_v49  ;;  %v2352_v48 = vunpack.c.h.s8.bf16 %v712_v46  ;;  %v4367_v49 = vpop.f32.mrf.mxu1 }
 0x37f   :  { %4643 = vmatpush1.bf16.msra.mxu0 %v2168_v52  ;;  %v769_v52 = vld [vmem:[#allocation5 + $0x12d8] sm:$0xff]  ;;  %v4369_v53 = vpop.f32.mrf.mxu1 }
 0x380   :  { %4686 = vmatpush1.bf16.msra.mxu1 %v2296_v8  ;;  %4644 = vmatprep.subr.bf16.mxu0 %v2161_v9  ;;  %v833_v8 = vld [vmem:[#allocation5 + $0x14d8] sm:$0xff]  ;;  %v2216_v9 = vunpack.c.l.s8.bf16 %v648_v45  ;;  %v2465_v18 = vunpack.c.h.s8.bf16 %v769_v52 }
 0x381   :  { %4687 = vmatprep.subr.bf16.mxu1 %v2289_v63  ;;  %v2344_v63 = vunpack.c.l.s8.bf16 %v712_v46  ;;  %v4371_v62 = vpop.f32.mrf.mxu1 }
 0x383   :  { %4645 = vmatpush1.bf16.msra.mxu0 %v2160_v54  ;;  %v2593_v54 = vunpack.c.h.s8.bf16 %v833_v8 }
 0x384   :  { %4688 = vmatpush1.bf16.msra.mxu1 %v2288_v55  ;;  %4646 = vmatprep.subr.bf16.mxu0 %v2153_v56  ;;  %v768_v55 = vld [vmem:[#allocation5 + $0x12d0] sm:$0xff] }
 0x385   :  { %4689 = vmatprep.subr.bf16.mxu1 %v2281_v38  ;;  %v832_v56 = vld [vmem:[#allocation5 + $0x14d0] sm:$0xff]  ;;  %v2464_v38 = vunpack.c.h.s8.bf16 %v768_v55 }
 0x386   :  { %v2592_v0 = vunpack.c.h.s8.bf16 %v832_v56  ;;  %v2584_v14 = vunpack.c.l.s8.bf16 %v832_v56  ;;  %v801_v56 = vld [vmem:[#allocation5 + $0x13d8] sm:$0xff] }
 0x387   :  { %4647 = vmatpush1.bf16.msra.mxu0 %v2152_v3  ;;  %v2457_v3 = vunpack.c.l.s8.bf16 %v769_v52 }
 0x388   :  { %4690 = vmatpush1.bf16.msra.mxu1 %v2280_v4  ;;  %4648 = vmatprep.subr.bf16.mxu0 %v2273_v43  ;;  %v2585_v4 = vunpack.c.l.s8.bf16 %v833_v8  ;;  %v761_v43 = vld [vmem:[#allocation5 + $0x1298] sm:$0xff] }
 0x389   :  { %4691 = vmatprep.subr.bf16.mxu1 %v2401_v5  ;;  %v825_v5 = vld [vmem:[#allocation5 + $0x1498] sm:$0xff]  ;;  %v2441_v1 = vunpack.c.l.s8.bf16 %v761_v43 }
 0x38a   :  { %v2569_v22 = vunpack.c.l.s8.bf16 %v825_v5 }
 0x38b   :  { %4649 = vmatpush2.bf16.msra.mxu0 %v2272_v58  ;;  %v7889_v58 = vld [vmem:[#allocation2 + $0x38] ss:$136 sps:$4 sm:$0xff]  }
 0x38c   :  { %4692 = vmatpush2.bf16.msra.mxu1 %v2400_v7  ;;  %4650 = vmatprep.subr.bf16.mxu0 %v2265_v10  ;;  %v7890_v7 = vld [vmem:[#allocation2 + $0x40] ss:$136 sps:$4 sm:$0xff]  }
 0x38d   :  { %4693 = vmatprep.subr.bf16.mxu1 %v2393_v13  ;;  %v2456_v13 = vunpack.c.l.s8.bf16 %v768_v55 }
 0x38f   :  { %4651 = vmatpush2.bf16.msra.mxu0 %v2264_v47 }
 0x390   :  { %4694 = vmatpush2.bf16.msra.mxu1 %v2392_v59  ;;  %4652 = vmatprep.subr.bf16.mxu0 %v2257_v16  ;;  %v2449_v59 = vunpack.c.h.s8.bf16 %v761_v43  ;;  %v2577_v16 = vunpack.c.h.s8.bf16 %v825_v5  ;;  %v800_v43 = vld [vmem:[#allocation5 + $0x13d0] sm:$0xff] }
 0x391   :  { %4695 = vmatprep.subr.bf16.mxu1 %v2385_v57  ;;  %v760_v57 = vld [vmem:[#allocation5 + $0x1290] sm:$0xff] }
 0x392   :  { %v2440_v41 = vunpack.c.l.s8.bf16 %v760_v57  ;;  %v864_v5 = vld [vmem:[#allocation5 + $0x15d0] sm:$0xff] }
 0x393   :  { %4653 = vmatpush2.bf16.msra.mxu0 %v2256_v17 }
 0x394   :  { %4696 = vmatpush2.bf16.msra.mxu1 %v2384_v23  ;;  %4654 = vmatprep.subr.bf16.mxu0 %v2249_v25  ;;  %v7891_v23 = vld [vmem:[#allocation2 + $0x4c] ss:$136 sps:$4 sm:$0xff]  }
 0x395   :  { %4697 = vmatprep.subr.bf16.mxu1 %v2377_v26  ;;  %v7892_v25 = vld [vmem:[#allocation2 + $0x54] ss:$136 sps:$4 sm:$0xff]  }
 0x397   :  { %4655 = vmatpush2.bf16.msra.mxu0 %v2248_v29  ;;  %v2448_v29 = vunpack.c.h.s8.bf16 %v760_v57  ;;  %v856_v57 = vld [vmem:[#allocation5 + $0x1590] sm:$0xff] }
 0x398   :  { %4698 = vmatpush2.bf16.msra.mxu1 %v2376_v32  ;;  %4656 = vmatprep.subr.bf16.mxu0 %v2241_v30  ;;  %v2576_v32 = vunpack.c.h.s8.bf16 %v824_v19 }
 0x399   :  { %4699 = vmatprep.subr.bf16.mxu1 %v2369_v28 }
 0x39b   :  { %4657 = vmatpush2.bf16.msra.mxu0 %v2240_v35 }
 0x39c   :  { %4700 = vmatpush2.bf16.msra.mxu1 %v2368_v36  ;;  %4658 = vmatprep.subr.bf16.mxu0 %v2233_v61  ;;  %v753_v61 = vld [vmem:[#allocation5 + $0x1258] sm:$0xff] }
 0x39d   :  { %4701 = vmatprep.subr.bf16.mxu1 %v2361_v31  ;;  %v817_v31 = vld [vmem:[#allocation5 + $0x1458] sm:$0xff]  ;;  %v2425_v46 = vunpack.c.l.s8.bf16 %v753_v61 }
 0x39f   :  { %4659 = vmatpush2.bf16.msra.mxu0 %v2232_v2  ;;  %v2433_v2 = vunpack.c.h.s8.bf16 %v753_v61 }
 0x3a0   :  { %4702 = vmatpush2.bf16.msra.mxu1 %v2360_v40  ;;  %4660 = vmatprep.subr.bf16.mxu0 %v2225_v44  ;;  %v2561_v40 = vunpack.c.h.s8.bf16 %v817_v31  ;;  %v816_v44 = vld [vmem:[#allocation5 + $0x1450] sm:$0xff] }
 0x3a1   :  { %4703 = vmatprep.subr.bf16.mxu1 %v2353_v42  ;;  %v2560_v45 = vunpack.c.h.s8.bf16 %v816_v44 }
 0x3a3   :  { %4661 = vmatpush2.bf16.msra.mxu0 %v2224_v37  ;;  %v2553_v37 = vunpack.c.l.s8.bf16 %v817_v31 }
 0x3a4   :  { %4704 = vmatpush2.bf16.msra.mxu1 %v2352_v48  ;;  %4662 = vmatprep.subr.bf16.mxu0 %v2217_v12  ;;  %v745_v48 = vld [vmem:[#allocation5 + $0x1218] sm:$0xff] }
 0x3a5   :  { %4705 = vmatprep.subr.bf16.mxu1 %v2345_v34  ;;  %v2552_v34 = vunpack.c.l.s8.bf16 %v816_v44  ;;  %v2417_v52 = vunpack.c.h.s8.bf16 %v745_v48 }
 0x3a7   :  { %4663 = vmatpush2.bf16.msra.mxu0 %v2216_v9  ;;  %v744_v9 = vld [vmem:[#allocation5 + $0x1210] sm:$0xff] }
 0x3a8   :  { %4706 = vmatpush2.bf16.msra.mxu1 %v2344_v63  ;;  %4718 = vmatprep.subr.bf16.mxu0 %v2465_v18  ;;  %v808_v63 = vld [vmem:[#allocation5 + $0x1410] sm:$0xff] }
 0x3a9   :  { %4761 = vmatprep.subr.bf16.mxu1 %v2593_v54  ;;  %v2544_v18 = vunpack.c.h.s8.bf16 %v808_v63  ;;  %v2409_v54 = vunpack.c.l.s8.bf16 %v745_v48 }
 0x3aa   :  { %v4408_v20 = vpop.f32.mrf.mxu0  ;;  %4665 = vmatmul.mubr.bf16.vlgmr.msra.gmra.mxu0 %v7889_v58  ;;  %v2521_v58 = vunpack.c.l.s8.bf16 %v801_v56 }
 0x3ab   :  { %v4451_v6 = vpop.f32.mrf.mxu1  ;;  %4708 = vmatmul.mubr.bf16.vlgmr.msra.gmra.mxu1 %v7890_v7  ;;  %v4409_v10 = vadd.f32 %v4408_v20, %v4365_v11  ;;  %4719 = vmatpush1.bf16.msra.mxu0 %v2464_v38  ;;  %v752_v11 = vld [vmem:[#allocation5 + $0x1250] sm:$0xff]  ;;  %v865_v38 = vld [vmem:[#allocation5 + $0x15d8] sm:$0xff]  ;;  %v2528_v20 = vunpack.c.h.s8.bf16 %v800_v43 }
 0x3ac   :  { %4762 = vmatpush1.bf16.msra.mxu1 %v2592_v0  ;;  %v4410_v15 = vpop.f32.mrf.mxu0  ;;  %4720 = vmatprep.subr.bf16.mxu0 %v2457_v3  ;;  %v2432_v42 = vunpack.c.h.s8.bf16 %v752_v11  ;;  %v2424_v12 = vunpack.c.l.s8.bf16 %v752_v11  ;;  %v2408_v0 = vunpack.c.l.s8.bf16 %v744_v9  ;;  %v2529_v3 = vunpack.c.h.s8.bf16 %v801_v56 }
 0x3ad   :  { %v4453_v47 = vpop.f32.mrf.mxu1  ;;  %4763 = vmatprep.subr.bf16.mxu1 %v2585_v4  ;;  %v8387_v21 = vadd.f32 %v4451_v6, %v4409_v10  ;;  %v4411_v17 = vadd.f32 %v4410_v15, %v4367_v49  ;;  %4750 = vmatprep.mubr.bf16.mxu0 %v7891_v23  ;;  %v809_v49 = vld [vmem:[#allocation5 + $0x1418] sm:$0xff]  ;;  %v2657_v4 = vunpack.c.h.s8.bf16 %v865_v38  ;;  %v2656_v6 = vunpack.c.h.s8.bf16 %v864_v5 }
 0x3ae   :  { %4793 = vmatprep.mubr.bf16.mxu1 %v7892_v25  ;;  %v4412_v26 = vpop.f32.mrf.mxu0  ;;  %v2545_v8 = vunpack.c.h.s8.bf16 %v809_v49  ;;  %v2537_v55 = vunpack.c.l.s8.bf16 %v809_v49  ;;  %v2649_v7 = vunpack.c.l.s8.bf16 %v865_v38  ;;  %v793_v10 = vld [vmem:[#allocation5 + $0x1398] sm:$0xff]  ;;  %v2648_v15 = vunpack.c.l.s8.bf16 %v864_v5 }
 0x3af   :  { %v8389_v50 = vadd.f32 %v4453_v47, %v4411_v17  ;;  %v4413_v60 = vadd.f32 %v4412_v26, %v4369_v53  ;;  %4721 = vmatpush1.bf16.msra.mxu0 %v2456_v13  ;;  %v4455_v30 = vpop.f32.mrf.mxu1  ;;  %v2416_v53 = vunpack.c.h.s8.bf16 %v744_v9  ;;  %v857_v13 = vld [vmem:[#allocation5 + $0x1598] sm:$0xff]  ;;  %v2513_v47 = vunpack.c.h.s8.bf16 %v793_v10 }
 0x3b0   :  { %4764 = vmatpush1.bf16.msra.mxu1 %v2584_v14  ;;  %v4414_v28 = vpop.f32.mrf.mxu0  ;;  %4722 = vmatprep.subr.bf16.mxu0 %v2449_v59  ;;  %v2520_v14 = vunpack.c.l.s8.bf16 %v800_v43  ;;  %v2641_v59 = vunpack.c.h.s8.bf16 %v857_v13  ;;  %v2640_v17 = vunpack.c.h.s8.bf16 %v856_v57  ;;  %v2505_v23 = vunpack.c.l.s8.bf16 %v793_v10  ;;  %v785_v26 = vld [vmem:[#allocation5 + $0x1358] sm:$0xff] }
 0x3b1   :  { %4765 = vmatprep.subr.bf16.mxu1 %v2577_v16  ;;  %v8391_v35 = vadd.f32 %v4455_v30, %v4413_v60  ;;  %v8393_v36 = vadd.f32 %v4414_v28, %v4371_v62  ;;  %v2536_v62 = vunpack.c.l.s8.bf16 %v808_v63  ;;  %v792_v16 = vld [vmem:[#allocation5 + $0x1390] sm:$0xff]  ;;  %v2633_v25 = vunpack.c.l.s8.bf16 %v857_v13  ;;  %v849_v60 = vld [vmem:[#allocation5 + $0x1558] sm:$0xff] }
 0x3b2   :  { %v2512_v19 = vunpack.c.h.s8.bf16 %v792_v16  ;;  %v2497_v30 = vunpack.c.h.s8.bf16 %v785_v26  ;;  %v2625_v28 = vunpack.c.h.s8.bf16 %v849_v60  ;;  %v953_v43 = vld [vmem:[#allocation5 + $0x1898] sm:$0xff] }
 0x3b3   :  { %4723 = vmatpush1.bf16.msra.mxu0 %v2448_v29  ;;  %v2504_v29 = vunpack.c.l.s8.bf16 %v792_v16  ;;  %v888_v16 = vld [vmem:[#allocation5 + $0x1690] sm:$0xff] }
 0x3b4   :  { %4766 = vmatpush1.bf16.msra.mxu1 %v2576_v32  ;;  %4724 = vmatprep.subr.bf16.mxu0 %v2441_v1  ;;  %v2632_v32 = vunpack.c.l.s8.bf16 %v856_v57  ;;  %v784_v1 = vld [vmem:[#allocation5 + $0x1350] sm:$0xff] }
 0x3b5   :  { %4767 = vmatprep.subr.bf16.mxu1 %v2569_v22  ;;  %v848_v22 = vld [vmem:[#allocation5 + $0x1550] sm:$0xff]  ;;  %v2496_v61 = vunpack.c.h.s8.bf16 %v784_v1  ;;  %v2488_v11 = vunpack.c.l.s8.bf16 %v784_v1 }
 0x3b6   :  { %v2624_v31 = vunpack.c.h.s8.bf16 %v848_v22  ;;  %v2616_v44 = vunpack.c.l.s8.bf16 %v848_v22  ;;  %v952_v57 = vld [vmem:[#allocation5 + $0x1890] sm:$0xff]  ;;  %v945_v22 = vld [vmem:[#allocation5 + $0x1858] sm:$0xff] }
 0x3b7   :  { %4725 = vmatpush1.bf16.msra.mxu0 %v2440_v41  ;;  %v2489_v41 = vunpack.c.l.s8.bf16 %v785_v26 }
 0x3b8   :  { %4768 = vmatpush1.bf16.msra.mxu1 %v2568_v39  ;;  %4726 = vmatprep.subr.bf16.mxu0 %v2433_v2  ;;  %v2617_v39 = vunpack.c.l.s8.bf16 %v849_v60  ;;  %v777_v2 = vld [vmem:[#allocation5 + $0x1318] sm:$0xff]  ;;  %v2704_v60 = vunpack.c.h.s8.bf16 %v888_v16 }
 0x3b9   :  { %4769 = vmatprep.subr.bf16.mxu1 %v2561_v40  ;;  %v841_v40 = vld [vmem:[#allocation5 + $0x1518] sm:$0xff] }
 0x3bb   :  { %4727 = vmatpush1.bf16.msra.mxu0 %v2432_v42  ;;  %v2481_v42 = vunpack.c.h.s8.bf16 %v777_v2 }
 0x3bc   :  { %4770 = vmatpush1.bf16.msra.mxu1 %v2560_v45  ;;  %4728 = vmatprep.subr.bf16.mxu0 %v2425_v46  ;;  %v2609_v45 = vunpack.c.h.s8.bf16 %v841_v40  ;;  %v776_v46 = vld [vmem:[#allocation5 + $0x1310] sm:$0xff] }
 0x3bd   :  { %4771 = vmatprep.subr.bf16.mxu1 %v2553_v37  ;;  %v840_v37 = vld [vmem:[#allocation5 + $0x1510] sm:$0xff]  ;;  %v2480_v48 = vunpack.c.h.s8.bf16 %v776_v46  ;;  %v2472_v9 = vunpack.c.l.s8.bf16 %v776_v46  ;;  %v937_v46 = vld [vmem:[#allocation5 + $0x1818] sm:$0xff] }
 0x3be   :  { %v2608_v49 = vunpack.c.h.s8.bf16 %v840_v37  ;;  %v2600_v63 = vunpack.c.l.s8.bf16 %v840_v37 }
 0x3bf   :  { %4729 = vmatpush1.bf16.msra.mxu0 %v2424_v12  ;;  %v2473_v12 = vunpack.c.l.s8.bf16 %v777_v2  ;;  %v944_v2 = vld [vmem:[#allocation5 + $0x1850] sm:$0xff] }
 0x3c0   :  { %4772 = vmatpush1.bf16.msra.mxu1 %v2552_v34  ;;  %4730 = vmatprep.subr.bf16.mxu0 %v2417_v52  ;;  %v2601_v34 = vunpack.c.l.s8.bf16 %v841_v40  ;;  %v897_v52 = vld [vmem:[#allocation5 + $0x16d8] sm:$0xff] }
 0x3c1   :  { %4773 = vmatprep.subr.bf16.mxu1 %v2545_v8  ;;  %v961_v8 = vld [vmem:[#allocation5 + $0x18d8] sm:$0xff] }
 0x3c3   :  { %4731 = vmatpush1.bf16.msra.mxu0 %v2416_v53  ;;  %v2721_v53 = vunpack.c.h.s8.bf16 %v897_v52 }
 0x3c4   :  { %4774 = vmatpush1.bf16.msra.mxu1 %v2544_v18  ;;  %4732 = vmatprep.subr.bf16.mxu0 %v2409_v54  ;;  %v2849_v18 = vunpack.c.h.s8.bf16 %v961_v8  ;;  %v896_v54 = vld [vmem:[#allocation5 + $0x16d0] sm:$0xff] }
 0x3c5   :  { %4775 = vmatprep.subr.bf16.mxu1 %v2537_v55  ;;  %v960_v55 = vld [vmem:[#allocation5 + $0x18d0] sm:$0xff]  ;;  %v2720_v56 = vunpack.c.h.s8.bf16 %v896_v54  ;;  %v2712_v10 = vunpack.c.l.s8.bf16 %v896_v54  ;;  %v993_v54 = vld [vmem:[#allocation5 + $0x19d8] sm:$0xff] }
 0x3c6   :  { %v2848_v38 = vunpack.c.h.s8.bf16 %v960_v55  ;;  %v2840_v13 = vunpack.c.l.s8.bf16 %v960_v55 }
 0x3c7   :  { %4733 = vmatpush1.bf16.msra.mxu0 %v2408_v0  ;;  %v8395_v0 = vpop.f32.mrf.mxu1 }
 0x3c8   :  { %4776 = vmatpush1.bf16.msra.mxu1 %v2536_v62  ;;  %4734 = vmatprep.subr.bf16.mxu0 %v2529_v3  ;;  %v2713_v62 = vunpack.c.l.s8.bf16 %v897_v52  ;;  %v2841_v3 = vunpack.c.l.s8.bf16 %v961_v8  ;;  %v936_v52 = vld [vmem:[#allocation5 + $0x1810] sm:$0xff] }
 0x3c9   :  { %4777 = vmatprep.subr.bf16.mxu1 %v2657_v4  ;;  %v889_v4 = vld [vmem:[#allocation5 + $0x1698] sm:$0xff] }
 0x3cb   :  { %4735 = vmatpush2.bf16.msra.mxu0 %v2528_v20 }
 0x3cc   :  { %4778 = vmatpush2.bf16.msra.mxu1 %v2656_v6  ;;  %4736 = vmatprep.subr.bf16.mxu0 %v2521_v58  ;;  %v7893_v6 = vld [vmem:[#allocation2 + $0x48] ss:$136 sps:$4 sm:$0xff]  }
 0x3cd   :  { %4779 = vmatprep.subr.bf16.mxu1 %v2649_v7  ;;  %v7894_v58 = vld [vmem:[#allocation2 + $0x50] ss:$136 sps:$4 sm:$0xff]  }
 0x3cf   :  { %4737 = vmatpush2.bf16.msra.mxu0 %v2520_v14 }
 0x3d0   :  { %4780 = vmatpush2.bf16.msra.mxu1 %v2648_v15  ;;  %4738 = vmatprep.subr.bf16.mxu0 %v2513_v47  ;;  %v2705_v47 = vunpack.c.h.s8.bf16 %v889_v4 }
 0x3d1   :  { %4781 = vmatprep.subr.bf16.mxu1 %v2641_v59  ;;  %v2833_v59 = vunpack.c.h.s8.bf16 %v953_v43 }
 0x3d3   :  { %4739 = vmatpush2.bf16.msra.mxu0 %v2512_v19 }
 0x3d4   :  { %4782 = vmatpush2.bf16.msra.mxu1 %v2640_v17  ;;  %4740 = vmatprep.subr.bf16.mxu0 %v2505_v23  ;;  %v7895_v23 = vld [vmem:[#allocation2 + $0x5c] ss:$136 sps:$4 sm:$0xff]  }
 0x3d5   :  { %4783 = vmatprep.subr.bf16.mxu1 %v2633_v25 }
 0x3d7   :  { %4741 = vmatpush2.bf16.msra.mxu0 %v2504_v29  ;;  %v2832_v29 = vunpack.c.h.s8.bf16 %v952_v57 }
 0x3d8   :  { %4784 = vmatpush2.bf16.msra.mxu1 %v2632_v32  ;;  %4742 = vmatprep.subr.bf16.mxu0 %v2497_v30  ;;  %v2697_v30 = vunpack.c.l.s8.bf16 %v889_v4  ;;  %v992_v4 = vld [vmem:[#allocation5 + $0x19d0] sm:$0xff] }
 0x3d9   :  { %4785 = vmatprep.subr.bf16.mxu1 %v2625_v28  ;;  %v2825_v28 = vunpack.c.l.s8.bf16 %v953_v43 }
 0x3db   :  { %4743 = vmatpush2.bf16.msra.mxu0 %v2496_v61  ;;  %v2696_v61 = vunpack.c.l.s8.bf16 %v888_v16  ;;  %v984_v16 = vld [vmem:[#allocation5 + $0x1990] sm:$0xff] }
 0x3dc   :  { %4786 = vmatpush2.bf16.msra.mxu1 %v2624_v31  ;;  %4744 = vmatprep.subr.bf16.mxu0 %v2489_v41  ;;  %v2824_v31 = vunpack.c.l.s8.bf16 %v952_v57  ;;  %v2817_v41 = vunpack.c.h.s8.bf16 %v945_v22 }
 0x3dd   :  { %4787 = vmatprep.subr.bf16.mxu1 %v2617_v39  ;;  %v880_v39 = vld [vmem:[#allocation5 + $0x1650] sm:$0xff] }
 0x3de   :  { %v2688_v40 = vunpack.c.h.s8.bf16 %v880_v39  ;;  %v2680_v37 = vunpack.c.l.s8.bf16 %v880_v39  ;;  %v905_v39 = vld [vmem:[#allocation5 + $0x1718] sm:$0xff] }
 0x3df   :  { %4745 = vmatpush2.bf16.msra.mxu0 %v2488_v11  ;;  %v2816_v11 = vunpack.c.h.s8.bf16 %v944_v2 }
 0x3e0   :  { %4788 = vmatpush2.bf16.msra.mxu1 %v2616_v44  ;;  %4746 = vmatprep.subr.bf16.mxu0 %v2481_v42  ;;  %v2809_v42 = vunpack.c.l.s8.bf16 %v945_v22  ;;  %v976_v22 = vld [vmem:[#allocation5 + $0x1950] sm:$0xff] }
 0x3e1   :  { %4789 = vmatprep.subr.bf16.mxu1 %v2609_v45  ;;  %v873_v45 = vld [vmem:[#allocation5 + $0x1618] sm:$0xff] }
 0x3e3   :  { %4747 = vmatpush2.bf16.msra.mxu0 %v2480_v48  ;;  %v2808_v48 = vunpack.c.l.s8.bf16 %v944_v2  ;;  %v969_v2 = vld [vmem:[#allocation5 + $0x1918] sm:$0xff] }
 0x3e4   :  { %4790 = vmatpush2.bf16.msra.mxu1 %v2608_v49  ;;  %4748 = vmatprep.subr.bf16.mxu0 %v2473_v12  ;;  %v2673_v49 = vunpack.c.h.s8.bf16 %v873_v45  ;;  %v2801_v12 = vunpack.c.h.s8.bf16 %v937_v46 }
 0x3e5   :  { %4791 = vmatprep.subr.bf16.mxu1 %v2601_v34  ;;  %v872_v34 = vld [vmem:[#allocation5 + $0x1610] sm:$0xff] }
 0x3e6   :  { %v2672_v8 = vunpack.c.h.s8.bf16 %v872_v34  ;;  %v2664_v55 = vunpack.c.l.s8.bf16 %v872_v34  ;;  %v1025_v34 = vld [vmem:[#allocation5 + $0x1ad8] sm:$0xff] }
 0x3e7   :  { %4749 = vmatpush2.bf16.msra.mxu0 %v2472_v9  ;;  %v2800_v9 = vunpack.c.h.s8.bf16 %v936_v52 }
 0x3e8   :  { %4792 = vmatpush2.bf16.msra.mxu1 %v2600_v63  ;;  %4804 = vmatprep.subr.bf16.mxu0 %v2721_v53  ;;  %v2665_v63 = vunpack.c.l.s8.bf16 %v873_v45  ;;  %v2793_v53 = vunpack.c.l.s8.bf16 %v937_v46  ;;  %v904_v45 = vld [vmem:[#allocation5 + $0x1710] sm:$0xff] }
 0x3e9   :  { %4847 = vmatprep.subr.bf16.mxu1 %v2849_v18  ;;  %v929_v18 = vld [vmem:[#allocation5 + $0x17d8] sm:$0xff]  ;;  %v968_v46 = vld [vmem:[#allocation5 + $0x1910] sm:$0xff] }
 0x3ea   :  { %v4494_v5 = vpop.f32.mrf.mxu0  ;;  %4751 = vmatmul.mubr.bf16.vlgmr.msra.gmra.mxu0 %v7893_v6  ;;  %v2905_v6 = vunpack.c.l.s8.bf16 %v993_v54 }
 0x3eb   :  { %v4537_v20 = vpop.f32.mrf.mxu1  ;;  %4794 = vmatmul.mubr.bf16.vlgmr.msra.gmra.mxu1 %v7894_v58  ;;  %v4495_v7 = vadd.f32 %v4494_v5, %v8387_v21  ;;  %4805 = vmatpush1.bf16.msra.mxu0 %v2720_v56  ;;  %v7896_v21 = vld [vmem:[#allocation2 + $0x64] ss:$136 sps:$4 sm:$0xff]   ;;  %v2792_v56 = vunpack.c.l.s8.bf16 %v936_v52  ;;  %v2912_v5 = vunpack.c.h.s8.bf16 %v992_v4 }
 0x3ec   :  { %4848 = vmatpush1.bf16.msra.mxu1 %v2848_v38  ;;  %v4496_v14 = vpop.f32.mrf.mxu0  ;;  %4806 = vmatprep.subr.bf16.mxu0 %v2713_v62  ;;  %v2785_v38 = vunpack.c.h.s8.bf16 %v929_v18  ;;  %v2913_v62 = vunpack.c.h.s8.bf16 %v993_v54  ;;  %v921_v58 = vld [vmem:[#allocation5 + $0x1798] sm:$0xff]  ;;  %v1088_v54 = vld [vmem:[#allocation5 + $0x1cd0] sm:$0xff] }
 0x3ed   :  { %v8398_v15 = vpop.f32.mrf.mxu1  ;;  %4849 = vmatprep.subr.bf16.mxu1 %v2841_v3  ;;  %v8400_v19 = vadd.f32 %v4537_v20, %v4495_v7  ;;  %v8403_v17 = vadd.f32 %v4496_v14, %v8389_v50  ;;  %4836 = vmatprep.mubr.bf16.mxu0 %v7895_v23  ;;  %v881_v50 = vld [vmem:[#allocation5 + $0x1658] sm:$0xff]  ;;  %v928_v3 = vld [vmem:[#allocation5 + $0x17d0] sm:$0xff]  ;;  %v2777_v20 = vunpack.c.l.s8.bf16 %v929_v18  ;;  %v2769_v14 = vunpack.c.h.s8.bf16 %v921_v58 }
 0x3ee   :  { %4879 = vmatprep.mubr.bf16.mxu1 %v7896_v21  ;;  %v4498_v25 = vpop.f32.mrf.mxu0  ;;  %v2681_v44 = vunpack.c.l.s8.bf16 %v881_v50  ;;  %v2784_v43 = vunpack.c.h.s8.bf16 %v928_v3  ;;  %v985_v7 = vld [vmem:[#allocation5 + $0x1998] sm:$0xff]  ;;  %v2896_v23 = vunpack.c.h.s8.bf16 %v984_v16  ;;  %v2761_v21 = vunpack.c.l.s8.bf16 %v921_v58  ;;  %v1024_v18 = vld [vmem:[#allocation5 + $0x1ad0] sm:$0xff] }
 0x3ef   :  { %v4499_v26 = vadd.f32 %v4498_v25, %v8391_v35  ;;  %4807 = vmatpush1.bf16.msra.mxu0 %v2712_v10  ;;  %v4541_v32 = vpop.f32.mrf.mxu1  ;;  %v2689_v35 = vunpack.c.h.s8.bf16 %v881_v50  ;;  %v2776_v10 = vunpack.c.l.s8.bf16 %v928_v3  ;;  %v2889_v25 = vunpack.c.l.s8.bf16 %v985_v7  ;;  %v912_v50 = vld [vmem:[#allocation5 + $0x1750] sm:$0xff]  ;;  %v1089_v52 = vld [vmem:[#allocation5 + $0x1cd8] sm:$0xff] }
 0x3f0   :  { %4850 = vmatpush1.bf16.msra.mxu1 %v2840_v13  ;;  %4808 = vmatprep.subr.bf16.mxu0 %v2705_v47  ;;  %v2904_v13 = vunpack.c.l.s8.bf16 %v992_v4  ;;  %v2897_v47 = vunpack.c.h.s8.bf16 %v985_v7  ;;  %v2969_v3 = vunpack.c.l.s8.bf16 %v1025_v34  ;;  %v3097_v4 = vunpack.c.l.s8.bf16 %v1089_v52  ;;  %v7897_v58 = vld [vmem:[#allocation2 + $0x58] ss:$136 sps:$4 sm:$0xff]  }
 0x3f1   :  { %4851 = vmatprep.subr.bf16.mxu1 %v2833_v59  ;;  %v8406_v1 = vadd.f32 %v4541_v32, %v4499_v26  ;;  %v920_v59 = vld [vmem:[#allocation5 + $0x1790] sm:$0xff]  ;;  %v913_v26 = vld [vmem:[#allocation5 + $0x1758] sm:$0xff]  ;;  %v2888_v32 = vunpack.c.l.s8.bf16 %v984_v16 }
 0x3f2   :  { %v2768_v57 = vunpack.c.h.s8.bf16 %v920_v59  ;;  %v7898_v7 = vld [vmem:[#allocation2 + $0x60] ss:$136 sps:$4 sm:$0xff]  }
 0x3f3   :  { %4809 = vmatpush1.bf16.msra.mxu0 %v2704_v60  ;;  %v977_v60 = vld [vmem:[#allocation5 + $0x1958] sm:$0xff] }
 0x3f4   :  { %4852 = vmatpush1.bf16.msra.mxu1 %v2832_v29  ;;  %4810 = vmatprep.subr.bf16.mxu0 %v2697_v30  ;;  %v2760_v29 = vunpack.c.l.s8.bf16 %v920_v59  ;;  %v2753_v30 = vunpack.c.h.s8.bf16 %v913_v26 }
 0x3f5   :  { %4853 = vmatprep.subr.bf16.mxu1 %v2825_v28  ;;  %v2881_v28 = vunpack.c.h.s8.bf16 %v977_v60 }
 0x3f7   :  { %4811 = vmatpush1.bf16.msra.mxu0 %v2696_v61  ;;  %v2752_v61 = vunpack.c.h.s8.bf16 %v912_v50 }
 0x3f8   :  { %4854 = vmatpush1.bf16.msra.mxu1 %v2824_v31  ;;  %4812 = vmatprep.subr.bf16.mxu0 %v2689_v35  ;;  %v2880_v31 = vunpack.c.h.s8.bf16 %v976_v22  ;;  %v2745_v35 = vunpack.c.l.s8.bf16 %v913_v26  ;;  %v7899_v26 = vld [vmem:[#allocation2 + $0x6c] ss:$136 sps:$4 sm:$0xff]  }
 0x3f9   :  { %4855 = vmatprep.subr.bf16.mxu1 %v2817_v41  ;;  %v2873_v41 = vunpack.c.l.s8.bf16 %v977_v60  ;;  %v7900_v60 = vld [vmem:[#allocation2 + $0x74] ss:$136 sps:$4 sm:$0xff]  }
 0x3fb   :  { %4813 = vmatpush1.bf16.msra.mxu0 %v2688_v40  ;;  %v2744_v40 = vunpack.c.l.s8.bf16 %v912_v50 }
 0x3fc   :  { %4856 = vmatpush1.bf16.msra.mxu1 %v2816_v11  ;;  %4814 = vmatprep.subr.bf16.mxu0 %v2681_v44  ;;  %v2872_v11 = vunpack.c.l.s8.bf16 %v976_v22  ;;  %v2737_v44 = vunpack.c.h.s8.bf16 %v905_v39 }
 0x3fd   :  { %4857 = vmatprep.subr.bf16.mxu1 %v2809_v42  ;;  %v2865_v42 = vunpack.c.h.s8.bf16 %v969_v2 }
 0x3ff   :  { %4815 = vmatpush1.bf16.msra.mxu0 %v2680_v37  ;;  %v2736_v37 = vunpack.c.h.s8.bf16 %v904_v45 }
 0x400   :  { %4858 = vmatpush1.bf16.msra.mxu1 %v2808_v48  ;;  %4816 = vmatprep.subr.bf16.mxu0 %v2673_v49  ;;  %v2864_v48 = vunpack.c.h.s8.bf16 %v968_v46  ;;  %v2729_v49 = vunpack.c.l.s8.bf16 %v905_v39 }
 0x401   :  { %4859 = vmatprep.subr.bf16.mxu1 %v2801_v12  ;;  %v2857_v12 = vunpack.c.l.s8.bf16 %v969_v2 }
 0x403   :  { %4817 = vmatpush1.bf16.msra.mxu0 %v2672_v8  ;;  %v2728_v8 = vunpack.c.l.s8.bf16 %v904_v45 }
 0x404   :  { %4860 = vmatpush1.bf16.msra.mxu1 %v2800_v9  ;;  %4818 = vmatprep.subr.bf16.mxu0 %v2665_v63  ;;  %v2856_v9 = vunpack.c.l.s8.bf16 %v968_v46  ;;  %v2977_v63 = vunpack.c.h.s8.bf16 %v1025_v34 }
 0x405   :  { %4861 = vmatprep.subr.bf16.mxu1 %v2793_v53  ;;  %v3105_v53 = vunpack.c.h.s8.bf16 %v1089_v52 }
 0x407   :  { %4819 = vmatpush1.bf16.msra.mxu0 %v2664_v55  ;;  %v2976_v55 = vunpack.c.h.s8.bf16 %v1024_v18 }
 0x408   :  { %4862 = vmatpush1.bf16.msra.mxu1 %v2792_v56  ;;  %4820 = vmatprep.subr.bf16.mxu0 %v2785_v38  ;;  %v3104_v56 = vunpack.c.h.s8.bf16 %v1088_v54  ;;  %v8408_v38 = vpop.f32.mrf.mxu0 }
 0x409   :  { %4863 = vmatprep.subr.bf16.mxu1 %v2913_v62  ;;  %v8410_v62 = vpop.f32.mrf.mxu1 }
 0x40b   :  { %4821 = vmatpush2.bf16.msra.mxu0 %v2784_v43  ;;  %v1017_v43 = vld [vmem:[#allocation5 + $0x1a98] sm:$0xff] }
 0x40c   :  { %4864 = vmatpush2.bf16.msra.mxu1 %v2912_v5  ;;  %4822 = vmatprep.subr.bf16.mxu0 %v2777_v20  ;;  %v1081_v5 = vld [vmem:[#allocation5 + $0x1c98] sm:$0xff]  ;;  %v2961_v16 = vunpack.c.h.s8.bf16 %v1017_v43  ;;  %v2953_v50 = vunpack.c.l.s8.bf16 %v1017_v43 }
 0x40d   :  { %4865 = vmatprep.subr.bf16.mxu1 %v2905_v6  ;;  %v3081_v22 = vunpack.c.l.s8.bf16 %v1081_v5 }
 0x40f   :  { %4823 = vmatpush2.bf16.msra.mxu0 %v2776_v10 }
 0x410   :  { %4866 = vmatpush2.bf16.msra.mxu1 %v2904_v13  ;;  %4824 = vmatprep.subr.bf16.mxu0 %v2769_v14  ;;  %v2968_v13 = vunpack.c.l.s8.bf16 %v1024_v18  ;;  %v3096_v14 = vunpack.c.l.s8.bf16 %v1088_v54 }
 0x411   :  { %4867 = vmatprep.subr.bf16.mxu1 %v2897_v47 }
 0x413   :  { %4825 = vmatpush2.bf16.msra.mxu0 %v2768_v57  ;;  %v3089_v57 = vunpack.c.h.s8.bf16 %v1081_v5 }
 0x414   :  { %4868 = vmatpush2.bf16.msra.mxu1 %v2896_v23  ;;  %4826 = vmatprep.subr.bf16.mxu0 %v2761_v21  ;;  %v1016_v23 = vld [vmem:[#allocation5 + $0x1a90] sm:$0xff] }
 0x415   :  { %4869 = vmatprep.subr.bf16.mxu1 %v2889_v25  ;;  %v1080_v21 = vld [vmem:[#allocation5 + $0x1c90] sm:$0xff] }
 0x416   :  { %v3080_v39 = vunpack.c.l.s8.bf16 %v1080_v21 }
 0x417   :  { %4827 = vmatpush2.bf16.msra.mxu0 %v2760_v29 }
 0x418   :  { %4870 = vmatpush2.bf16.msra.mxu1 %v2888_v32  ;;  %4828 = vmatprep.subr.bf16.mxu0 %v2753_v30  ;;  %v2960_v32 = vunpack.c.h.s8.bf16 %v1016_v23  ;;  %v3088_v30 = vunpack.c.h.s8.bf16 %v1080_v21 }
 0x419   :  { %4871 = vmatprep.subr.bf16.mxu1 %v2881_v28 }
 0x41b   :  { %4829 = vmatpush2.bf16.msra.mxu0 %v2752_v61 }
 0x41c   :  { %4872 = vmatpush2.bf16.msra.mxu1 %v2880_v31  ;;  %4830 = vmatprep.subr.bf16.mxu0 %v2745_v35  ;;  %v1009_v31 = vld [vmem:[#allocation5 + $0x1a58] sm:$0xff] }
 0x41d   :  { %4873 = vmatprep.subr.bf16.mxu1 %v2873_v41  ;;  %v1073_v35 = vld [vmem:[#allocation5 + $0x1c58] sm:$0xff]  ;;  %v2952_v41 = vunpack.c.l.s8.bf16 %v1016_v23  ;;  %v2937_v45 = vunpack.c.l.s8.bf16 %v1009_v31 }
 0x41e   :  { %v3073_v2 = vunpack.c.h.s8.bf16 %v1073_v35  ;;  %v3065_v46 = vunpack.c.l.s8.bf16 %v1073_v35 }
 0x41f   :  { %4831 = vmatpush2.bf16.msra.mxu0 %v2744_v40  ;;  %v1008_v40 = vld [vmem:[#allocation5 + $0x1a50] sm:$0xff] }
 0x420   :  { %4874 = vmatpush2.bf16.msra.mxu1 %v2872_v11  ;;  %4832 = vmatprep.subr.bf16.mxu0 %v2737_v44  ;;  %v1072_v11 = vld [vmem:[#allocation5 + $0x1c50] sm:$0xff]  ;;  %v2944_v44 = vunpack.c.h.s8.bf16 %v1008_v40 }
 0x421   :  { %4875 = vmatprep.subr.bf16.mxu1 %v2865_v42  ;;  %v3072_v42 = vunpack.c.h.s8.bf16 %v1072_v11 }
 0x423   :  { %4833 = vmatpush2.bf16.msra.mxu0 %v2736_v37  ;;  %v1001_v37 = vld [vmem:[#allocation5 + $0x1a18] sm:$0xff] }
 0x424   :  { %4876 = vmatpush2.bf16.msra.mxu1 %v2864_v48  ;;  %4834 = vmatprep.subr.bf16.mxu0 %v2729_v49  ;;  %v1065_v48 = vld [vmem:[#allocation5 + $0x1c18] sm:$0xff]  ;;  %v2936_v49 = vunpack.c.l.s8.bf16 %v1008_v40  ;;  %v2929_v34 = vunpack.c.h.s8.bf16 %v1001_v37  ;;  %v2921_v18 = vunpack.c.l.s8.bf16 %v1001_v37 }
 0x425   :  { %4877 = vmatprep.subr.bf16.mxu1 %v2857_v12  ;;  %v3064_v12 = vunpack.c.l.s8.bf16 %v1072_v11  ;;  %v3057_v52 = vunpack.c.h.s8.bf16 %v1065_v48  ;;  %v3049_v54 = vunpack.c.l.s8.bf16 %v1065_v48 }
 0x427   :  { %4835 = vmatpush2.bf16.msra.mxu0 %v2728_v8  ;;  %v1000_v8 = vld [vmem:[#allocation5 + $0x1a10] sm:$0xff] }
 0x428   :  { %4878 = vmatpush2.bf16.msra.mxu1 %v2856_v9  ;;  %4890 = vmatprep.subr.bf16.mxu0 %v2977_v63  ;;  %v1064_v9 = vld [vmem:[#allocation5 + $0x1c10] sm:$0xff]  ;;  %v2928_v63 = vunpack.c.h.s8.bf16 %v1000_v8 }
 0x429   :  { %4933 = vmatprep.subr.bf16.mxu1 %v3105_v53  ;;  %v3056_v53 = vunpack.c.h.s8.bf16 %v1064_v9 }
 0x42a   :  { %v4580_v20 = vpop.f32.mrf.mxu0  ;;  %4837 = vmatmul.mubr.bf16.vlgmr.msra.gmra.mxu0 %v7897_v58 }
 0x42b   :  { %v4623_v6 = vpop.f32.mrf.mxu1  ;;  %4880 = vmatmul.mubr.bf16.vlgmr.msra.gmra.mxu1 %v7898_v7  ;;  %v4581_v10 = vadd.f32 %v4580_v20, %v8400_v19  ;;  %4891 = vmatpush1.bf16.msra.mxu0 %v2976_v55  ;;  %v1057_v55 = vld [vmem:[#allocation5 + $0x1bd8] sm:$0xff]  ;;  %v1056_v20 = vld [vmem:[#allocation5 + $0x1bd0] sm:$0xff] }
 0x42c   :  { %4934 = vmatpush1.bf16.msra.mxu1 %v3104_v56  ;;  %v8413_v47 = vpop.f32.mrf.mxu0  ;;  %4892 = vmatprep.subr.bf16.mxu0 %v2969_v3  ;;  %v1121_v56 = vld [vmem:[#allocation5 + $0x1dd8] sm:$0xff]  ;;  %v2920_v3 = vunpack.c.l.s8.bf16 %v1000_v8  ;;  %v3041_v43 = vunpack.c.h.s8.bf16 %v1057_v55  ;;  %v3040_v58 = vunpack.c.h.s8.bf16 %v1056_v20 }
 0x42d   :  { %v8415_v59 = vpop.f32.mrf.mxu1  ;;  %4935 = vmatprep.subr.bf16.mxu1 %v3097_v4  ;;  %v8417_v25 = vadd.f32 %v4623_v6, %v4581_v10  ;;  %4922 = vmatprep.mubr.bf16.mxu0 %v7899_v26  ;;  %v3048_v4 = vunpack.c.l.s8.bf16 %v1064_v9  ;;  %v3169_v5 = vunpack.c.h.s8.bf16 %v1121_v56  ;;  %v1120_v6 = vld [vmem:[#allocation5 + $0x1dd0] sm:$0xff]  ;;  %v3033_v10 = vunpack.c.l.s8.bf16 %v1057_v55 }
 0x42e   :  { %4965 = vmatprep.mubr.bf16.mxu1 %v7900_v60  ;;  %v4584_v19 = vpop.f32.mrf.mxu0  ;;  %v3168_v7 = vunpack.c.h.s8.bf16 %v1120_v6  ;;  %v3160_v23 = vunpack.c.l.s8.bf16 %v1120_v6  ;;  %v1048_v60 = vld [vmem:[#allocation5 + $0x1b90] sm:$0xff] }
 0x42f   :  { %v4585_v29 = vadd.f32 %v4584_v19, %v8406_v1  ;;  %4893 = vmatpush1.bf16.msra.mxu0 %v2968_v13  ;;  %v4627_v28 = vpop.f32.mrf.mxu1  ;;  %v2945_v1 = vunpack.c.h.s8.bf16 %v1009_v31  ;;  %v3161_v13 = vunpack.c.l.s8.bf16 %v1121_v56  ;;  %v1112_v19 = vld [vmem:[#allocation5 + $0x1d90] sm:$0xff]  ;;  %v3016_v31 = vunpack.c.l.s8.bf16 %v1048_v60 }
 0x430   :  { %4936 = vmatpush1.bf16.msra.mxu1 %v3096_v14  ;;  %4894 = vmatprep.subr.bf16.mxu0 %v2961_v16  ;;  %v1049_v14 = vld [vmem:[#allocation5 + $0x1b98] sm:$0xff]  ;;  %v3144_v35 = vunpack.c.l.s8.bf16 %v1112_v19 }
 0x431   :  { %4937 = vmatprep.subr.bf16.mxu1 %v3089_v57  ;;  %v8420_v61 = vadd.f32 %v4627_v28, %v4585_v29  ;;  %v1113_v16 = vld [vmem:[#allocation5 + $0x1d98] sm:$0xff]  ;;  %v3032_v57 = vunpack.c.l.s8.bf16 %v1056_v20  ;;  %v3025_v21 = vunpack.c.h.s8.bf16 %v1049_v14  ;;  %v3024_v29 = vunpack.c.h.s8.bf16 %v1048_v60 }
 0x432   :  { %v3153_v26 = vunpack.c.h.s8.bf16 %v1113_v16  ;;  %v3145_v28 = vunpack.c.l.s8.bf16 %v1113_v16  ;;  %v1209_v16 = vld [vmem:[#allocation5 + $0x2098] sm:$0xff] }
 0x433   :  { %4895 = vmatpush1.bf16.msra.mxu0 %v2960_v32  ;;  %v3152_v32 = vunpack.c.h.s8.bf16 %v1112_v19 }
 0x434   :  { %4938 = vmatpush1.bf16.msra.mxu1 %v3088_v30  ;;  %4896 = vmatprep.subr.bf16.mxu0 %v2953_v50  ;;  %v3017_v30 = vunpack.c.l.s8.bf16 %v1049_v14  ;;  %v1041_v50 = vld [vmem:[#allocation5 + $0x1b58] sm:$0xff] }
 0x435   :  { %4939 = vmatprep.subr.bf16.mxu1 %v3081_v22  ;;  %v1105_v22 = vld [vmem:[#allocation5 + $0x1d58] sm:$0xff] }
 0x436   :  { %v1145_v14 = vld [vmem:[#allocation5 + $0x1e98] sm:$0xff] }
 0x437   :  { %4897 = vmatpush1.bf16.msra.mxu0 %v2952_v41  ;;  %v3009_v41 = vunpack.c.h.s8.bf16 %v1041_v50 }
 0x438   :  { %4940 = vmatpush1.bf16.msra.mxu1 %v3080_v39  ;;  %4898 = vmatprep.subr.bf16.mxu0 %v2945_v1  ;;  %v3137_v39 = vunpack.c.h.s8.bf16 %v1105_v22  ;;  %v1040_v1 = vld [vmem:[#allocation5 + $0x1b50] sm:$0xff] }
 0x439   :  { %4941 = vmatprep.subr.bf16.mxu1 %v3073_v2  ;;  %v1104_v2 = vld [vmem:[#allocation5 + $0x1d50] sm:$0xff]  ;;  %v3008_v40 = vunpack.c.h.s8.bf16 %v1040_v1  ;;  %v3000_v37 = vunpack.c.l.s8.bf16 %v1040_v1 }
 0x43a   :  { %v3136_v11 = vunpack.c.h.s8.bf16 %v1104_v2  ;;  %v3128_v48 = vunpack.c.l.s8.bf16 %v1104_v2 }
 0x43b   :  { %4899 = vmatpush1.bf16.msra.mxu0 %v2944_v44  ;;  %v3001_v44 = vunpack.c.l.s8.bf16 %v1041_v50  ;;  %v3345_v50 = vunpack.c.h.s8.bf16 %v1209_v16 }
 0x43c   :  { %4942 = vmatpush1.bf16.msra.mxu1 %v3072_v42  ;;  %4900 = vmatprep.subr.bf16.mxu0 %v2937_v45  ;;  %v3129_v42 = vunpack.c.l.s8.bf16 %v1105_v22  ;;  %v1033_v45 = vld [vmem:[#allocation5 + $0x1b18] sm:$0xff]  ;;  %v1144_v22 = vld [vmem:[#allocation5 + $0x1e90] sm:$0xff] }
 0x43d   :  { %4943 = vmatprep.subr.bf16.mxu1 %v3065_v46  ;;  %v1097_v46 = vld [vmem:[#allocation5 + $0x1d18] sm:$0xff]  ;;  %v3216_v2 = vunpack.c.h.s8.bf16 %v1144_v22 }
 0x43f   :  { %4901 = vmatpush1.bf16.msra.mxu0 %v2936_v49  ;;  %v2993_v49 = vunpack.c.h.s8.bf16 %v1033_v45 }
 0x440   :  { %4944 = vmatpush1.bf16.msra.mxu1 %v3064_v12  ;;  %4902 = vmatprep.subr.bf16.mxu0 %v2929_v34  ;;  %v3121_v12 = vunpack.c.h.s8.bf16 %v1097_v46  ;;  %v1032_v34 = vld [vmem:[#allocation5 + $0x1b10] sm:$0xff] }
 0x441   :  { %4945 = vmatprep.subr.bf16.mxu1 %v3057_v52  ;;  %v1096_v52 = vld [vmem:[#allocation5 + $0x1d10] sm:$0xff]  ;;  %v2992_v8 = vunpack.c.h.s8.bf16 %v1032_v34  ;;  %v2984_v55 = vunpack.c.l.s8.bf16 %v1032_v34 }
 0x442   :  { %v3120_v9 = vunpack.c.h.s8.bf16 %v1096_v52  ;;  %v3112_v56 = vunpack.c.l.s8.bf16 %v1096_v52  ;;  %v1136_v34 = vld [vmem:[#allocation5 + $0x1e50] sm:$0xff] }
 0x443   :  { %4903 = vmatpush1.bf16.msra.mxu0 %v2928_v63  ;;  %v2985_v63 = vunpack.c.l.s8.bf16 %v1033_v45  ;;  %v1200_v52 = vld [vmem:[#allocation5 + $0x2050] sm:$0xff] }
 0x444   :  { %4946 = vmatpush1.bf16.msra.mxu1 %v3056_v53  ;;  %4904 = vmatprep.subr.bf16.mxu0 %v2921_v18  ;;  %v3113_v53 = vunpack.c.l.s8.bf16 %v1097_v46  ;;  %v1153_v18 = vld [vmem:[#allocation5 + $0x1ed8] sm:$0xff] }
 0x445   :  { %4947 = vmatprep.subr.bf16.mxu1 %v3049_v54  ;;  %v1217_v54 = vld [vmem:[#allocation5 + $0x20d8] sm:$0xff] }
 0x446   :  { %v1137_v46 = vld [vmem:[#allocation5 + $0x1e58] sm:$0xff] }
 0x447   :  { %4905 = vmatpush1.bf16.msra.mxu0 %v2920_v3  ;;  %v3233_v3 = vunpack.c.h.s8.bf16 %v1153_v18 }
 0x448   :  { %4948 = vmatpush1.bf16.msra.mxu1 %v3048_v4  ;;  %4906 = vmatprep.subr.bf16.mxu0 %v3041_v43  ;;  %v3361_v4 = vunpack.c.h.s8.bf16 %v1217_v54  ;;  %v1152_v43 = vld [vmem:[#allocation5 + $0x1ed0] sm:$0xff] }
 0x449   :  { %4949 = vmatprep.subr.bf16.mxu1 %v3169_v5  ;;  %v1216_v5 = vld [vmem:[#allocation5 + $0x20d0] sm:$0xff]  ;;  %v3232_v20 = vunpack.c.h.s8.bf16 %v1152_v43  ;;  %v3224_v19 = vunpack.c.l.s8.bf16 %v1152_v43 }
 0x44a   :  { %v3360_v6 = vunpack.c.h.s8.bf16 %v1216_v5  ;;  %v1128_v43 = vld [vmem:[#allocation5 + $0x1e10] sm:$0xff] }
 0x44b   :  { %4907 = vmatpush2.bf16.msra.mxu0 %v3040_v58  ;;  %v8422_v58 = vpop.f32.mrf.mxu0 }
 0x44c   :  { %4950 = vmatpush2.bf16.msra.mxu1 %v3168_v7  ;;  %4908 = vmatprep.subr.bf16.mxu0 %v3033_v10  ;;  %v8424_v7 = vpop.f32.mrf.mxu1  ;;  %v3225_v10 = vunpack.c.l.s8.bf16 %v1153_v18  ;;  %v1129_v18 = vld [vmem:[#allocation5 + $0x1e18] sm:$0xff] }
 0x44d   :  { %4951 = vmatprep.subr.bf16.mxu1 %v3161_v13  ;;  %v3353_v13 = vunpack.c.l.s8.bf16 %v1217_v54  ;;  %v1193_v54 = vld [vmem:[#allocation5 + $0x2018] sm:$0xff] }
 0x44f   :  { %4909 = vmatpush2.bf16.msra.mxu0 %v3032_v57 }
 0x450   :  { %4952 = vmatpush2.bf16.msra.mxu1 %v3160_v23  ;;  %4910 = vmatprep.subr.bf16.mxu0 %v3025_v21  ;;  %v7901_v21 = vld [vmem:[#allocation2 + $0x68] ss:$136 sps:$4 sm:$0xff]  }
 0x451   :  { %4953 = vmatprep.subr.bf16.mxu1 %v3153_v26  ;;  %v7902_v26 = vld [vmem:[#allocation2 + $0x70] ss:$136 sps:$4 sm:$0xff]  }
 0x453   :  { %4911 = vmatpush2.bf16.msra.mxu0 %v3024_v29  ;;  %v3352_v29 = vunpack.c.l.s8.bf16 %v1216_v5  ;;  %v1192_v5 = vld [vmem:[#allocation5 + $0x2010] sm:$0xff] }
 0x454   :  { %4954 = vmatpush2.bf16.msra.mxu1 %v3152_v32  ;;  %4912 = vmatprep.subr.bf16.mxu0 %v3017_v30 }
 0x455   :  { %4955 = vmatprep.subr.bf16.mxu1 %v3145_v28  ;;  %v3217_v28 = vunpack.c.h.s8.bf16 %v1145_v14 }
 0x457   :  { %4913 = vmatpush2.bf16.msra.mxu0 %v3016_v31  ;;  %v1208_v31 = vld [vmem:[#allocation5 + $0x2090] sm:$0xff] }
 0x458   :  { %4956 = vmatpush2.bf16.msra.mxu1 %v3144_v35  ;;  %4914 = vmatprep.subr.bf16.mxu0 %v3009_v41  ;;  %v7903_v41 = vld [vmem:[#allocation2 + $0x7c] ss:$136 sps:$4 sm:$0xff]  }
 0x459   :  { %4957 = vmatprep.subr.bf16.mxu1 %v3137_v39  ;;  %v7904_v39 = vld [vmem:[#allocation2 + $0x84] ss:$136 sps:$4 sm:$0xff]  }
 0x45b   :  { %4915 = vmatpush2.bf16.msra.mxu0 %v3008_v40  ;;  %v3344_v40 = vunpack.c.h.s8.bf16 %v1208_v31 }
 0x45c   :  { %4958 = vmatpush2.bf16.msra.mxu1 %v3136_v11  ;;  %4916 = vmatprep.subr.bf16.mxu0 %v3001_v44  ;;  %v3209_v44 = vunpack.c.l.s8.bf16 %v1145_v14  ;;  %v1185_v14 = vld [vmem:[#allocation5 + $0x1fd8] sm:$0xff] }
 0x45d   :  { %4959 = vmatprep.subr.bf16.mxu1 %v3129_v42  ;;  %v3337_v42 = vunpack.c.l.s8.bf16 %v1209_v16  ;;  %v1249_v16 = vld [vmem:[#allocation5 + $0x21d8] sm:$0xff] }
 0x45f   :  { %4917 = vmatpush2.bf16.msra.mxu0 %v3000_v37  ;;  %v1201_v37 = vld [vmem:[#allocation5 + $0x2058] sm:$0xff] }
 0x460   :  { %4960 = vmatpush2.bf16.msra.mxu1 %v3128_v48  ;;  %4918 = vmatprep.subr.bf16.mxu0 %v2993_v49  ;;  %v3208_v48 = vunpack.c.l.s8.bf16 %v1144_v22  ;;  %v3336_v49 = vunpack.c.l.s8.bf16 %v1208_v31  ;;  %v3417_v22 = vunpack.c.l.s8.bf16 %v1249_v16  ;;  %v1177_v31 = vld [vmem:[#allocation5 + $0x1f98] sm:$0xff] }
 0x461   :  { %4961 = vmatprep.subr.bf16.mxu1 %v3121_v12  ;;  %v3329_v12 = vunpack.c.h.s8.bf16 %v1201_v37 }
 0x463   :  { %4919 = vmatpush2.bf16.msra.mxu0 %v2992_v8  ;;  %v3200_v8 = vunpack.c.h.s8.bf16 %v1136_v34 }
 0x464   :  { %4962 = vmatpush2.bf16.msra.mxu1 %v3120_v9  ;;  %4920 = vmatprep.subr.bf16.mxu0 %v2985_v63  ;;  %v3328_v9 = vunpack.c.h.s8.bf16 %v1200_v52  ;;  %v3193_v63 = vunpack.c.l.s8.bf16 %v1137_v46 }
 0x465   :  { %4963 = vmatprep.subr.bf16.mxu1 %v3113_v53  ;;  %v3321_v53 = vunpack.c.l.s8.bf16 %v1201_v37 }
 0x467   :  { %4921 = vmatpush2.bf16.msra.mxu0 %v2984_v55  ;;  %v3192_v55 = vunpack.c.l.s8.bf16 %v1136_v34 }
 0x468   :  { %4964 = vmatpush2.bf16.msra.mxu1 %v3112_v56  ;;  %4976 = vmatprep.subr.bf16.mxu0 %v3233_v3  ;;  %v3320_v56 = vunpack.c.l.s8.bf16 %v1200_v52  ;;  %v3185_v3 = vunpack.c.h.s8.bf16 %v1129_v18 }
 0x469   :  { %5019 = vmatprep.subr.bf16.mxu1 %v3361_v4  ;;  %v3313_v4 = vunpack.c.h.s8.bf16 %v1193_v54 }
 0x46a   :  { %v4666_v57 = vpop.f32.mrf.mxu0  ;;  %4923 = vmatmul.mubr.bf16.vlgmr.msra.gmra.mxu0 %v7901_v21  ;;  %v3297_v21 = vunpack.c.h.s8.bf16 %v1185_v14 }
 0x46b   :  { %v4709_v23 = vpop.f32.mrf.mxu1  ;;  %4966 = vmatmul.mubr.bf16.vlgmr.msra.gmra.mxu1 %v7902_v26  ;;  %v4667_v60 = vadd.f32 %v4666_v57, %v8417_v25  ;;  %4977 = vmatpush1.bf16.msra.mxu0 %v3232_v20  ;;  %v3184_v20 = vunpack.c.h.s8.bf16 %v1128_v43  ;;  %v3176_v57 = vunpack.c.l.s8.bf16 %v1128_v43  ;;  %v3425_v26 = vunpack.c.h.s8.bf16 %v1249_v16 }
 0x46c   :  { %5020 = vmatpush1.bf16.msra.mxu1 %v3360_v6  ;;  %v8427_v32 = vpop.f32.mrf.mxu0  ;;  %4978 = vmatprep.subr.bf16.mxu0 %v3225_v10  ;;  %v3312_v6 = vunpack.c.h.s8.bf16 %v1192_v5  ;;  %v3177_v10 = vunpack.c.l.s8.bf16 %v1129_v18 }
 0x46d   :  { %v8429_v30 = vpop.f32.mrf.mxu1  ;;  %5021 = vmatprep.subr.bf16.mxu1 %v3353_v13  ;;  %v8431_v35 = vadd.f32 %v4709_v23, %v4667_v60  ;;  %5008 = vmatprep.mubr.bf16.mxu0 %v7903_v41  ;;  %v3305_v13 = vunpack.c.l.s8.bf16 %v1193_v54  ;;  %v3304_v23 = vunpack.c.l.s8.bf16 %v1192_v5  ;;  %v1184_v60 = vld [vmem:[#allocation5 + $0x1fd0] sm:$0xff]  ;;  %v1241_v41 = vld [vmem:[#allocation5 + $0x2198] sm:$0xff] }
 0x46e   :  { %5051 = vmatprep.mubr.bf16.mxu1 %v7904_v39  ;;  %v4670_v25 = vpop.f32.mrf.mxu0  ;;  %v3288_v39 = vunpack.c.l.s8.bf16 %v1184_v60  ;;  %v3401_v37 = vunpack.c.l.s8.bf16 %v1241_v41 }
 0x46f   :  { %v4671_v1 = vadd.f32 %v4670_v25, %v8420_v61  ;;  %4979 = vmatpush1.bf16.msra.mxu0 %v3224_v19  ;;  %v4713_v11 = vpop.f32.mrf.mxu1  ;;  %v3201_v61 = vunpack.c.h.s8.bf16 %v1137_v46  ;;  %v1248_v19 = vld [vmem:[#allocation5 + $0x21d0] sm:$0xff]  ;;  %v3273_v46 = vunpack.c.l.s8.bf16 %v1177_v31 }
 0x470   :  { %5022 = vmatpush1.bf16.msra.mxu1 %v3352_v29  ;;  %4980 = vmatprep.subr.bf16.mxu0 %v3217_v28  ;;  %v3296_v29 = vunpack.c.h.s8.bf16 %v1184_v60  ;;  %v3424_v28 = vunpack.c.h.s8.bf16 %v1248_v19  ;;  %v3416_v25 = vunpack.c.l.s8.bf16 %v1248_v19 }
 0x471   :  { %5023 = vmatprep.subr.bf16.mxu1 %v3345_v50  ;;  %v8434_v45 = vadd.f32 %v4713_v11, %v4671_v1  ;;  %v3289_v50 = vunpack.c.l.s8.bf16 %v1185_v14  ;;  %v3281_v1 = vunpack.c.h.s8.bf16 %v1177_v31  ;;  %v1240_v11 = vld [vmem:[#allocation5 + $0x2190] sm:$0xff]  ;;  %v8436_v31 = vpop.f32.mrf.mxu0 }
 0x473   :  { %4981 = vmatpush1.bf16.msra.mxu0 %v3216_v2  ;;  %v3409_v2 = vunpack.c.h.s8.bf16 %v1241_v41  ;;  %v8438_v41 = vpop.f32.mrf.mxu1 }
 0x474   :  { %5024 = vmatpush1.bf16.msra.mxu1 %v3344_v40  ;;  %4982 = vmatprep.subr.bf16.mxu0 %v3209_v44  ;;  %v1176_v40 = vld [vmem:[#allocation5 + $0x1f90] sm:$0xff] }
 0x475   :  { %5025 = vmatprep.subr.bf16.mxu1 %v3337_v42  ;;  %v3280_v44 = vunpack.c.h.s8.bf16 %v1176_v40  ;;  %v3408_v42 = vunpack.c.h.s8.bf16 %v1240_v11 }
 0x477   :  { %4983 = vmatpush1.bf16.msra.mxu0 %v3208_v48  ;;  %v1169_v48 = vld [vmem:[#allocation5 + $0x1f58] sm:$0xff] }
 0x478   :  { %5026 = vmatpush1.bf16.msra.mxu1 %v3336_v49  ;;  %4984 = vmatprep.subr.bf16.mxu0 %v3201_v61  ;;  %v1233_v49 = vld [vmem:[#allocation5 + $0x2158] sm:$0xff]  ;;  %v3272_v61 = vunpack.c.l.s8.bf16 %v1176_v40  ;;  %v3265_v34 = vunpack.c.h.s8.bf16 %v1169_v48  ;;  %v3257_v18 = vunpack.c.l.s8.bf16 %v1169_v48 }
 0x479   :  { %5027 = vmatprep.subr.bf16.mxu1 %v3329_v12  ;;  %v3400_v12 = vunpack.c.l.s8.bf16 %v1240_v11  ;;  %v3393_v52 = vunpack.c.h.s8.bf16 %v1233_v49  ;;  %v3385_v54 = vunpack.c.l.s8.bf16 %v1233_v49 }
 0x47b   :  { %4985 = vmatpush1.bf16.msra.mxu0 %v3200_v8  ;;  %v1168_v8 = vld [vmem:[#allocation5 + $0x1f50] sm:$0xff] }
 0x47c   :  { %5028 = vmatpush1.bf16.msra.mxu1 %v3328_v9  ;;  %4986 = vmatprep.subr.bf16.mxu0 %v3193_v63  ;;  %v1232_v9 = vld [vmem:[#allocation5 + $0x2150] sm:$0xff]  ;;  %v3264_v63 = vunpack.c.h.s8.bf16 %v1168_v8 }
 0x47d   :  { %5029 = vmatprep.subr.bf16.mxu1 %v3321_v53  ;;  %v3392_v53 = vunpack.c.h.s8.bf16 %v1232_v9 }
 0x47f   :  { %4987 = vmatpush1.bf16.msra.mxu0 %v3192_v55  ;;  %v1161_v55 = vld [vmem:[#allocation5 + $0x1f18] sm:$0xff] }
 0x480   :  { %5030 = vmatpush1.bf16.msra.mxu1 %v3320_v56  ;;  %4988 = vmatprep.subr.bf16.mxu0 %v3185_v3  ;;  %v1225_v56 = vld [vmem:[#allocation5 + $0x2118] sm:$0xff]  ;;  %v3256_v3 = vunpack.c.l.s8.bf16 %v1168_v8  ;;  %v3249_v43 = vunpack.c.h.s8.bf16 %v1161_v55  ;;  %v3241_v14 = vunpack.c.l.s8.bf16 %v1161_v55  ;;  %v250_v8 = vld [vmem:[#allocation5 + $0x2a0] sm:$0xff] }
 0x481   :  { %5031 = vmatprep.subr.bf16.mxu1 %v3313_v4  ;;  %v3384_v4 = vunpack.c.l.s8.bf16 %v1232_v9  ;;  %v3377_v5 = vunpack.c.h.s8.bf16 %v1225_v56  ;;  %v3369_v16 = vunpack.c.l.s8.bf16 %v1225_v56  ;;  %v1426_v55 = vunpack.c.h.s8.bf16 %v250_v8 }
 0x483   :  { %4989 = vmatpush1.bf16.msra.mxu0 %v3184_v20  ;;  %v1160_v20 = vld [vmem:[#allocation5 + $0x1f10] sm:$0xff] }
 0x484   :  { %5032 = vmatpush1.bf16.msra.mxu1 %v3312_v6  ;;  %4990 = vmatprep.subr.bf16.mxu0 %v3177_v10  ;;  %v1224_v6 = vld [vmem:[#allocation5 + $0x2110] sm:$0xff]  ;;  %v3248_v10 = vunpack.c.h.s8.bf16 %v1160_v20 }
 0x485   :  { %5033 = vmatprep.subr.bf16.mxu1 %v3305_v13  ;;  %v3376_v13 = vunpack.c.h.s8.bf16 %v1224_v6 }
 0x487   :  { %4991 = vmatpush1.bf16.msra.mxu0 %v3176_v57  ;;  %v195_v57 = vld [vmem:[#allocation5 + $0xe8] sm:$0xff] }
 0x488   :  { %5034 = vmatpush1.bf16.msra.mxu1 %v3304_v23  ;;  %4992 = vmatprep.subr.bf16.mxu0 %v3297_v21  ;;  %v259_v23 = vld [vmem:[#allocation5 + $0x2e8] sm:$0xff]  ;;  %v3240_v21 = vunpack.c.l.s8.bf16 %v1160_v20  ;;  %v1315_v60 = vunpack.c.h.s8.bf16 %v195_v57 }
 0x489   :  { %5035 = vmatprep.subr.bf16.mxu1 %v3425_v26  ;;  %v3368_v26 = vunpack.c.l.s8.bf16 %v1224_v6  ;;  %v1443_v19 = vunpack.c.h.s8.bf16 %v259_v23  ;;  %v243_v20 = vld [vmem:[#allocation5 + $0x268] sm:$0xff] }
 0x48b   :  { %4993 = vmatpush2.bf16.msra.mxu0 %v3296_v29  ;;  %v194_v29 = vld [vmem:[#allocation5 + $0xe0] sm:$0xff] }
 0x48c   :  { %5036 = vmatpush2.bf16.msra.mxu1 %v3424_v28  ;;  %4994 = vmatprep.subr.bf16.mxu0 %v3289_v50  ;;  %v258_v28 = vld [vmem:[#allocation5 + $0x2e0] sm:$0xff]  ;;  %v1314_v50 = vunpack.c.h.s8.bf16 %v194_v29 }
 0x48d   :  { %5037 = vmatprep.subr.bf16.mxu1 %v3417_v22  ;;  %v1442_v22 = vunpack.c.h.s8.bf16 %v258_v28  ;;  %v1434_v48 = vunpack.c.l.s8.bf16 %v258_v28 }
 0x48f   :  { %4995 = vmatpush2.bf16.msra.mxu0 %v3288_v39  ;;  %v1307_v39 = vunpack.c.l.s8.bf16 %v195_v57 }
 0x490   :  { %5038 = vmatpush2.bf16.msra.mxu1 %v3416_v25  ;;  %4996 = vmatprep.subr.bf16.mxu0 %v3281_v1  ;;  %v1435_v25 = vunpack.c.l.s8.bf16 %v259_v23  ;;  %v187_v1 = vld [vmem:[#allocation5 + $0xa8] sm:$0xff] }
 0x491   :  { %5039 = vmatprep.subr.bf16.mxu1 %v3409_v2  ;;  %v251_v2 = vld [vmem:[#allocation5 + $0x2a8] sm:$0xff] }
 0x493   :  { %4997 = vmatpush2.bf16.msra.mxu0 %v3280_v44  ;;  %v7905_v44 = vld [vmem:[#allocation2 + $0x78] ss:$136 sps:$4 sm:$0xff]  }
 0x494   :  { %5040 = vmatpush2.bf16.msra.mxu1 %v3408_v42  ;;  %4998 = vmatprep.subr.bf16.mxu0 %v3273_v46  ;;  %v7906_v42 = vld [vmem:[#allocation2 + $0x80] ss:$136 sps:$4 sm:$0xff]  }
 0x495   :  { %5041 = vmatprep.subr.bf16.mxu1 %v3401_v37  ;;  %v1306_v37 = vunpack.c.l.s8.bf16 %v194_v29 }
 0x497   :  { %4999 = vmatpush2.bf16.msra.mxu0 %v3272_v61 }
 0x498   :  { %5042 = vmatpush2.bf16.msra.mxu1 %v3400_v12  ;;  %5000 = vmatprep.subr.bf16.mxu0 %v3265_v34  ;;  %v1299_v12 = vunpack.c.h.s8.bf16 %v187_v1  ;;  %v1427_v34 = vunpack.c.h.s8.bf16 %v251_v2 }
 0x499   :  { %5043 = vmatprep.subr.bf16.mxu1 %v3393_v52  ;;  %v186_v52 = vld [vmem:[#allocation5 + $0xa0] sm:$0xff] }
 0x49a   :  { %v1290_v6 = vunpack.c.l.s8.bf16 %v186_v52 }
 0x49b   :  { %5001 = vmatpush2.bf16.msra.mxu0 %v3264_v63  ;;  %v7907_v63 = vld [vmem:[#allocation2 + $0x4] ss:$136 sps:$4 sm:$0xff]  }
 0x49c   :  { %5044 = vmatpush2.bf16.msra.mxu1 %v3392_v53  ;;  %5002 = vmatprep.subr.bf16.mxu0 %v3257_v18  ;;  %v7908_v53 = vld [vmem:[#allocation2 + $0xc] ss:$136 sps:$4 sm:$0xff]  }
 0x49d   :  { %5045 = vmatprep.subr.bf16.mxu1 %v3385_v54  ;;  %v1298_v54 = vunpack.c.h.s8.bf16 %v186_v52  ;;  %v290_v52 = vld [vmem:[#allocation5 + $0x3e0] sm:$0xff] }
 0x49f   :  { %5003 = vmatpush2.bf16.msra.mxu0 %v3256_v3  ;;  %v1291_v3 = vunpack.c.l.s8.bf16 %v187_v1 }
 0x4a0   :  { %5046 = vmatpush2.bf16.msra.mxu1 %v3384_v4  ;;  %5004 = vmatprep.subr.bf16.mxu0 %v3249_v43  ;;  %v1419_v4 = vunpack.c.l.s8.bf16 %v251_v2 }
 0x4a1   :  { %5047 = vmatprep.subr.bf16.mxu1 %v3377_v5  ;;  %v179_v5 = vld [vmem:[#allocation5 + $0x68] sm:$0xff] }
 0x4a3   :  { %5005 = vmatpush2.bf16.msra.mxu0 %v3248_v10  ;;  %v1418_v10 = vunpack.c.l.s8.bf16 %v250_v8 }
 0x4a4   :  { %5048 = vmatpush2.bf16.msra.mxu1 %v3376_v13  ;;  %5006 = vmatprep.subr.bf16.mxu0 %v3241_v14  ;;  %v1411_v13 = vunpack.c.h.s8.bf16 %v243_v20  ;;  %v178_v14 = vld [vmem:[#allocation5 + $0x60] sm:$0xff] }
 0x4a5   :  { %5049 = vmatprep.subr.bf16.mxu1 %v3369_v16  ;;  %v242_v16 = vld [vmem:[#allocation5 + $0x260] sm:$0xff]  ;;  %v1282_v57 = vunpack.c.h.s8.bf16 %v178_v14  ;;  %v1274_v29 = vunpack.c.l.s8.bf16 %v178_v14  ;;  %v211_v14 = vld [vmem:[#allocation5 + $0x168] sm:$0xff] }
 0x4a6   :  { %v1410_v23 = vunpack.c.h.s8.bf16 %v242_v16  ;;  %v1402_v28 = vunpack.c.l.s8.bf16 %v242_v16  ;;  %v275_v16 = vld [vmem:[#allocation5 + $0x368] sm:$0xff] }
 0x4a7   :  { %5007 = vmatpush2.bf16.msra.mxu0 %v3240_v21  ;;  %v1275_v21 = vunpack.c.l.s8.bf16 %v179_v5 }
 0x4a8   :  { %5050 = vmatpush2.bf16.msra.mxu1 %v3368_v26  ;;  %5062 = vmatprep.subr.bf16.mxu0 %v1315_v60  ;;  %v1403_v26 = vunpack.c.l.s8.bf16 %v243_v20  ;;  %v171_v60 = vld [vmem:[#allocation5 + $0x28] sm:$0xff]  ;;  %v282_v20 = vld [vmem:[#allocation5 + $0x3a0] sm:$0xff] }
 0x4a9   :  { %5105 = vmatprep.subr.bf16.mxu1 %v1443_v19  ;;  %v235_v19 = vld [vmem:[#allocation5 + $0x228] sm:$0xff] }
 0x4aa   :  { %v4752_v40 = vpop.f32.mrf.mxu0  ;;  %5009 = vmatmul.mubr.bf16.vlgmr.msra.gmra.mxu0 %v7905_v44  ;;  %v227_v44 = vld [vmem:[#allocation5 + $0x1e8] sm:$0xff] }
 0x4ab   :  { %v4795_v11 = vpop.f32.mrf.mxu1  ;;  %5052 = vmatmul.mubr.bf16.vlgmr.msra.gmra.mxu1 %v7906_v42  ;;  %v4753_v46 = vadd.f32 %v4752_v40, %v8431_v35  ;;  %5063 = vmatpush1.bf16.msra.mxu0 %v1314_v50  ;;  %v1267_v50 = vunpack.c.h.s8.bf16 %v171_v60  ;;  %v1259_v40 = vunpack.c.l.s8.bf16 %v171_v60  ;;  %v291_v42 = vld [vmem:[#allocation5 + $0x3e8] sm:$0xff]  ;;  %v210_v60 = vld [vmem:[#allocation5 + $0x160] sm:$0xff] }
 0x4ac   :  { %5106 = vmatpush1.bf16.msra.mxu1 %v1442_v22  ;;  %v8441_v49 = vpop.f32.mrf.mxu0  ;;  %5064 = vmatprep.subr.bf16.mxu0 %v1307_v39  ;;  %v1395_v22 = vunpack.c.h.s8.bf16 %v235_v19  ;;  %v170_v39 = vld [vmem:[#allocation5 + $0x20] sm:$0xff] }
 0x4ad   :  { %v8443_v61 = vpop.f32.mrf.mxu1  ;;  %5107 = vmatprep.subr.bf16.mxu1 %v1435_v25  ;;  %v8445_v9 = vadd.f32 %v4795_v11, %v4753_v46  ;;  %5094 = vmatprep.mubr.bf16.mxu0 %v7907_v63  ;;  %v234_v25 = vld [vmem:[#allocation5 + $0x220] sm:$0xff]  ;;  %v1266_v1 = vunpack.c.h.s8.bf16 %v170_v39  ;;  %v1387_v11 = vunpack.c.l.s8.bf16 %v235_v19  ;;  %v1258_v46 = vunpack.c.l.s8.bf16 %v170_v39  ;;  %v203_v39 = vld [vmem:[#allocation5 + $0x128] sm:$0xff] }
 0x4ae   :  { %5137 = vmatprep.mubr.bf16.mxu1 %v7908_v53  ;;  %v4756_v35 = vpop.f32.mrf.mxu0  ;;  %v1394_v2 = vunpack.c.h.s8.bf16 %v234_v25  ;;  %v1506_v63 = vunpack.c.h.s8.bf16 %v290_v52  ;;  %v1371_v53 = vunpack.c.l.s8.bf16 %v227_v44  ;;  %v274_v19 = vld [vmem:[#allocation5 + $0x360] sm:$0xff] }
 0x4af   :  { %v4757_v18 = vadd.f32 %v4756_v35, %v8434_v45  ;;  %5065 = vmatpush1.bf16.msra.mxu0 %v1306_v37  ;;  %v4799_v56 = vpop.f32.mrf.mxu1  ;;  %v1283_v45 = vunpack.c.h.s8.bf16 %v179_v5  ;;  %v1386_v37 = vunpack.c.l.s8.bf16 %v234_v25  ;;  %v1499_v35 = vunpack.c.l.s8.bf16 %v291_v42  ;;  %v218_v5 = vld [vmem:[#allocation5 + $0x1a0] sm:$0xff]  ;;  %v267_v25 = vld [vmem:[#allocation5 + $0x328] sm:$0xff] }
 0x4b0   :  { %5108 = vmatpush1.bf16.msra.mxu1 %v1434_v48  ;;  %5066 = vmatprep.subr.bf16.mxu0 %v1299_v12  ;;  %v1379_v48 = vunpack.c.h.s8.bf16 %v227_v44  ;;  %v1507_v12 = vunpack.c.h.s8.bf16 %v291_v42  ;;  %v202_v44 = vld [vmem:[#allocation5 + $0x120] sm:$0xff] }
 0x4b1   :  { %5109 = vmatprep.subr.bf16.mxu1 %v1427_v34  ;;  %v8448_v43 = vadd.f32 %v4799_v56, %v4757_v18  ;;  %v226_v34 = vld [vmem:[#allocation5 + $0x1e0] sm:$0xff]  ;;  %v219_v18 = vld [vmem:[#allocation5 + $0x1a8] sm:$0xff]  ;;  %v1498_v56 = vunpack.c.l.s8.bf16 %v290_v52 }
 0x4b2   :  { %v1378_v8 = vunpack.c.h.s8.bf16 %v226_v34  ;;  %v266_v42 = vld [vmem:[#allocation5 + $0x320] sm:$0xff]  ;;  %v387_v52 = vld [vmem:[#allocation5 + $0x6e8] sm:$0xff] }
 0x4b3   :  { %5067 = vmatpush1.bf16.msra.mxu0 %v1298_v54  ;;  %v283_v54 = vld [vmem:[#allocation5 + $0x3a8] sm:$0xff] }
 0x4b4   :  { %5110 = vmatpush1.bf16.msra.mxu1 %v1426_v55  ;;  %5068 = vmatprep.subr.bf16.mxu0 %v1291_v3  ;;  %v1370_v55 = vunpack.c.l.s8.bf16 %v226_v34  ;;  %v1363_v3 = vunpack.c.h.s8.bf16 %v219_v18  ;;  %v323_v34 = vld [vmem:[#allocation5 + $0x4e8] sm:$0xff] }
 0x4b5   :  { %5111 = vmatprep.subr.bf16.mxu1 %v1419_v4  ;;  %v1491_v4 = vunpack.c.h.s8.bf16 %v283_v54 }
 0x4b7   :  { %5069 = vmatpush1.bf16.msra.mxu0 %v1290_v6  ;;  %v1362_v6 = vunpack.c.h.s8.bf16 %v218_v5 }
 0x4b8   :  { %5112 = vmatpush1.bf16.msra.mxu1 %v1418_v10  ;;  %5070 = vmatprep.subr.bf16.mxu0 %v1283_v45  ;;  %v1490_v10 = vunpack.c.h.s8.bf16 %v282_v20  ;;  %v1355_v45 = vunpack.c.l.s8.bf16 %v219_v18  ;;  %v322_v18 = vld [vmem:[#allocation5 + $0x4e0] sm:$0xff] }
 0x4b9   :  { %5113 = vmatprep.subr.bf16.mxu1 %v1411_v13  ;;  %v1483_v13 = vunpack.c.l.s8.bf16 %v283_v54  ;;  %v386_v54 = vld [vmem:[#allocation5 + $0x6e0] sm:$0xff] }
 0x4bb   :  { %5071 = vmatpush1.bf16.msra.mxu0 %v1282_v57  ;;  %v1354_v57 = vunpack.c.l.s8.bf16 %v218_v5  ;;  %v1563_v5 = vunpack.c.l.s8.bf16 %v323_v34 }
 0x4bc   :  { %5114 = vmatpush1.bf16.msra.mxu1 %v1410_v23  ;;  %5072 = vmatprep.subr.bf16.mxu0 %v1275_v21  ;;  %v1482_v23 = vunpack.c.l.s8.bf16 %v282_v20  ;;  %v1347_v21 = vunpack.c.h.s8.bf16 %v211_v14  ;;  %v1691_v20 = vunpack.c.l.s8.bf16 %v387_v52 }
 0x4bd   :  { %5115 = vmatprep.subr.bf16.mxu1 %v1403_v26  ;;  %v1475_v26 = vunpack.c.h.s8.bf16 %v275_v16 }
 0x4bf   :  { %5073 = vmatpush1.bf16.msra.mxu0 %v1274_v29  ;;  %v1346_v29 = vunpack.c.h.s8.bf16 %v210_v60 }
 0x4c0   :  { %5116 = vmatpush1.bf16.msra.mxu1 %v1402_v28  ;;  %5074 = vmatprep.subr.bf16.mxu0 %v1267_v50  ;;  %v1474_v28 = vunpack.c.h.s8.bf16 %v274_v19  ;;  %v1339_v50 = vunpack.c.l.s8.bf16 %v211_v14  ;;  %v7909_v14 = vld [vmem:[#allocation2] ss:$136 sps:$4 sm:$0xff]  }
 0x4c1   :  { %5117 = vmatprep.subr.bf16.mxu1 %v1395_v22  ;;  %v1467_v22 = vunpack.c.l.s8.bf16 %v275_v16  ;;  %v7910_v16 = vld [vmem:[#allocation2 + $0x8] ss:$136 sps:$4 sm:$0xff]  }
 0x4c3   :  { %5075 = vmatpush1.bf16.msra.mxu0 %v1266_v1  ;;  %v1338_v1 = vunpack.c.l.s8.bf16 %v210_v60 }
 0x4c4   :  { %5118 = vmatpush1.bf16.msra.mxu1 %v1394_v2  ;;  %5076 = vmatprep.subr.bf16.mxu0 %v1259_v40  ;;  %v1466_v2 = vunpack.c.l.s8.bf16 %v274_v19  ;;  %v1331_v40 = vunpack.c.h.s8.bf16 %v203_v39 }
 0x4c5   :  { %5119 = vmatprep.subr.bf16.mxu1 %v1387_v11  ;;  %v1459_v11 = vunpack.c.h.s8.bf16 %v267_v25 }
 0x4c7   :  { %5077 = vmatpush1.bf16.msra.mxu0 %v1258_v46  ;;  %v1330_v46 = vunpack.c.h.s8.bf16 %v202_v44 }
 0x4c8   :  { %5120 = vmatpush1.bf16.msra.mxu1 %v1386_v37  ;;  %5078 = vmatprep.subr.bf16.mxu0 %v1379_v48  ;;  %v1458_v37 = vunpack.c.h.s8.bf16 %v266_v42  ;;  %v1323_v48 = vunpack.c.l.s8.bf16 %v203_v39  ;;  %v7911_v39 = vld [vmem:[#allocation2 + $0x14] ss:$136 sps:$4 sm:$0xff]  }
 0x4c9   :  { %5121 = vmatprep.subr.bf16.mxu1 %v1507_v12  ;;  %v1451_v12 = vunpack.c.l.s8.bf16 %v267_v25  ;;  %v7912_v25 = vld [vmem:[#allocation2 + $0x1c] ss:$136 sps:$4 sm:$0xff]  }
 0x4cb   :  { %5079 = vmatpush2.bf16.msra.mxu0 %v1378_v8  ;;  %v1322_v8 = vunpack.c.l.s8.bf16 %v202_v44 }
 0x4cc   :  { %5122 = vmatpush2.bf16.msra.mxu1 %v1506_v63  ;;  %5080 = vmatprep.subr.bf16.mxu0 %v1371_v53  ;;  %v1450_v63 = vunpack.c.l.s8.bf16 %v266_v42  ;;  %v1571_v53 = vunpack.c.h.s8.bf16 %v323_v34 }
 0x4cd   :  { %5123 = vmatprep.subr.bf16.mxu1 %v1499_v35  ;;  %v1699_v35 = vunpack.c.h.s8.bf16 %v387_v52 }
 0x4cf   :  { %5081 = vmatpush2.bf16.msra.mxu0 %v1370_v55  ;;  %v1570_v55 = vunpack.c.h.s8.bf16 %v322_v18 }
 0x4d0   :  { %5124 = vmatpush2.bf16.msra.mxu1 %v1498_v56  ;;  %5082 = vmatprep.subr.bf16.mxu0 %v1363_v3  ;;  %v1698_v56 = vunpack.c.h.s8.bf16 %v386_v54  ;;  %v8450_v3 = vpop.f32.mrf.mxu0 }
 0x4d1   :  { %5125 = vmatprep.subr.bf16.mxu1 %v1491_v4  ;;  %v8452_v4 = vpop.f32.mrf.mxu1 }
 0x4d3   :  { %5083 = vmatpush2.bf16.msra.mxu0 %v1362_v6  ;;  %v315_v6 = vld [vmem:[#allocation5 + $0x4a8] sm:$0xff] }
 0x4d4   :  { %5126 = vmatpush2.bf16.msra.mxu1 %v1490_v10  ;;  %5084 = vmatprep.subr.bf16.mxu0 %v1355_v45  ;;  %v379_v10 = vld [vmem:[#allocation5 + $0x6a8] sm:$0xff]  ;;  %v1555_v19 = vunpack.c.h.s8.bf16 %v315_v6  ;;  %v1547_v44 = vunpack.c.l.s8.bf16 %v315_v6 }
 0x4d5   :  { %5127 = vmatprep.subr.bf16.mxu1 %v1483_v13  ;;  %v1675_v42 = vunpack.c.l.s8.bf16 %v379_v10 }
 0x4d7   :  { %5085 = vmatpush2.bf16.msra.mxu0 %v1354_v57 }
 0x4d8   :  { %5128 = vmatpush2.bf16.msra.mxu1 %v1482_v23  ;;  %5086 = vmatprep.subr.bf16.mxu0 %v1347_v21  ;;  %v1562_v23 = vunpack.c.l.s8.bf16 %v322_v18  ;;  %v1690_v21 = vunpack.c.l.s8.bf16 %v386_v54 }
 0x4d9   :  { %5129 = vmatprep.subr.bf16.mxu1 %v1475_v26 }
 0x4db   :  { %5087 = vmatpush2.bf16.msra.mxu0 %v1346_v29  ;;  %v1683_v29 = vunpack.c.h.s8.bf16 %v379_v10 }
 0x4dc   :  { %5130 = vmatpush2.bf16.msra.mxu1 %v1474_v28  ;;  %5088 = vmatprep.subr.bf16.mxu0 %v1339_v50  ;;  %v314_v28 = vld [vmem:[#allocation5 + $0x4a0] sm:$0xff] }
 0x4dd   :  { %5131 = vmatprep.subr.bf16.mxu1 %v1467_v22  ;;  %v378_v50 = vld [vmem:[#allocation5 + $0x6a0] sm:$0xff] }
 0x4de   :  { %v1674_v34 = vunpack.c.l.s8.bf16 %v378_v50 }
 0x4df   :  { %5089 = vmatpush2.bf16.msra.mxu0 %v1338_v1 }
 0x4e0   :  { %5132 = vmatpush2.bf16.msra.mxu1 %v1466_v2  ;;  %5090 = vmatprep.subr.bf16.mxu0 %v1331_v40  ;;  %v1554_v2 = vunpack.c.h.s8.bf16 %v314_v28  ;;  %v1682_v40 = vunpack.c.h.s8.bf16 %v378_v50 }
 0x4e1   :  { %5133 = vmatprep.subr.bf16.mxu1 %v1459_v11 }
 0x4e3   :  { %5091 = vmatpush2.bf16.msra.mxu0 %v1330_v46 }
 0x4e4   :  { %5134 = vmatpush2.bf16.msra.mxu1 %v1458_v37  ;;  %5092 = vmatprep.subr.bf16.mxu0 %v1323_v48  ;;  %v307_v37 = vld [vmem:[#allocation5 + $0x468] sm:$0xff] }
 0x4e5   :  { %5135 = vmatprep.subr.bf16.mxu1 %v1451_v12  ;;  %v371_v48 = vld [vmem:[#allocation5 + $0x668] sm:$0xff]  ;;  %v1546_v12 = vunpack.c.l.s8.bf16 %v314_v28  ;;  %v1531_v18 = vunpack.c.l.s8.bf16 %v307_v37 }
 0x4e6   :  { %v1667_v52 = vunpack.c.h.s8.bf16 %v371_v48  ;;  %v1659_v54 = vunpack.c.l.s8.bf16 %v371_v48 }
 0x4e7   :  { %5093 = vmatpush2.bf16.msra.mxu0 %v1322_v8  ;;  %v306_v8 = vld [vmem:[#allocation5 + $0x460] sm:$0xff] }
 0x4e8   :  { %5136 = vmatpush2.bf16.msra.mxu1 %v1450_v63  ;;  %5148 = vmatprep.subr.bf16.mxu0 %v1571_v53  ;;  %v370_v63 = vld [vmem:[#allocation5 + $0x660] sm:$0xff]  ;;  %v1538_v53 = vunpack.c.h.s8.bf16 %v306_v8 }
 0x4e9   :  { %5191 = vmatprep.subr.bf16.mxu1 %v1699_v35  ;;  %v1666_v35 = vunpack.c.h.s8.bf16 %v370_v63 }
 0x4ea   :  { %v4838_v45 = vpop.f32.mrf.mxu0  ;;  %5095 = vmatmul.mubr.bf16.vlgmr.msra.gmra.mxu0 %v7909_v14 }
 0x4eb   :  { %v4881_v13 = vpop.f32.mrf.mxu1  ;;  %5138 = vmatmul.mubr.bf16.vlgmr.msra.gmra.mxu1 %v7910_v16  ;;  %v4839_v57 = vadd.f32 %v4838_v45, %v8445_v9  ;;  %5149 = vmatpush1.bf16.msra.mxu0 %v1570_v55  ;;  %v299_v55 = vld [vmem:[#allocation5 + $0x428] sm:$0xff]  ;;  %v298_v45 = vld [vmem:[#allocation5 + $0x420] sm:$0xff] }
 0x4ec   :  { %5192 = vmatpush1.bf16.msra.mxu1 %v1698_v56  ;;  %v8455_v26 = vpop.f32.mrf.mxu0  ;;  %5150 = vmatprep.subr.bf16.mxu0 %v1563_v5  ;;  %v363_v56 = vld [vmem:[#allocation5 + $0x628] sm:$0xff]  ;;  %v1530_v5 = vunpack.c.l.s8.bf16 %v306_v8  ;;  %v1523_v6 = vunpack.c.h.s8.bf16 %v299_v55  ;;  %v1522_v14 = vunpack.c.h.s8.bf16 %v298_v45 }
 0x4ed   :  { %v8457_v60 = vpop.f32.mrf.mxu1  ;;  %5193 = vmatprep.subr.bf16.mxu1 %v1691_v20  ;;  %v8459_v22 = vadd.f32 %v4881_v13, %v4839_v57  ;;  %5180 = vmatprep.mubr.bf16.mxu0 %v7911_v39  ;;  %v1658_v20 = vunpack.c.l.s8.bf16 %v370_v63  ;;  %v1651_v10 = vunpack.c.h.s8.bf16 %v363_v56  ;;  %v362_v13 = vld [vmem:[#allocation5 + $0x620] sm:$0xff]  ;;  %v1515_v57 = vunpack.c.l.s8.bf16 %v299_v55 }
 0x4ee   :  { %5223 = vmatprep.mubr.bf16.mxu1 %v7912_v25  ;;  %v4842_v9 = vpop.f32.mrf.mxu0  ;;  %v1650_v16 = vunpack.c.h.s8.bf16 %v362_v13  ;;  %v1642_v28 = vunpack.c.l.s8.bf16 %v362_v13  ;;  %v354_v25 = vld [vmem:[#allocation5 + $0x5e0] sm:$0xff] }
 0x4ef   :  { %v4843_v1 = vadd.f32 %v4842_v9, %v8448_v43  ;;  %5151 = vmatpush1.bf16.msra.mxu0 %v1562_v23  ;;  %v4885_v11 = vpop.f32.mrf.mxu1  ;;  %v1539_v43 = vunpack.c.h.s8.bf16 %v307_v37  ;;  %v1643_v23 = vunpack.c.l.s8.bf16 %v363_v56  ;;  %v418_v9 = vld [vmem:[#allocation5 + $0x7e0] sm:$0xff]  ;;  %v1626_v37 = vunpack.c.l.s8.bf16 %v354_v25 }
 0x4f0   :  { %5194 = vmatpush1.bf16.msra.mxu1 %v1690_v21  ;;  %5152 = vmatprep.subr.bf16.mxu0 %v1555_v19  ;;  %v355_v21 = vld [vmem:[#allocation5 + $0x5e8] sm:$0xff]  ;;  %v1754_v48 = vunpack.c.l.s8.bf16 %v418_v9 }
 0x4f1   :  { %5195 = vmatprep.subr.bf16.mxu1 %v1683_v29  ;;  %v8462_v46 = vadd.f32 %v4885_v11, %v4843_v1  ;;  %v419_v19 = vld [vmem:[#allocation5 + $0x7e8] sm:$0xff]  ;;  %v1514_v29 = vunpack.c.l.s8.bf16 %v298_v45  ;;  %v1635_v50 = vunpack.c.h.s8.bf16 %v355_v21  ;;  %v1634_v1 = vunpack.c.h.s8.bf16 %v354_v25 }
 0x4f2   :  { %v1763_v39 = vunpack.c.h.s8.bf16 %v419_v19  ;;  %v1755_v11 = vunpack.c.l.s8.bf16 %v419_v19 }
 0x4f3   :  { %5153 = vmatpush1.bf16.msra.mxu0 %v1554_v2  ;;  %v1762_v2 = vunpack.c.h.s8.bf16 %v418_v9 }
 0x4f4   :  { %5196 = vmatpush1.bf16.msra.mxu1 %v1682_v40  ;;  %5154 = vmatprep.subr.bf16.mxu0 %v1547_v44  ;;  %v1627_v40 = vunpack.c.l.s8.bf16 %v355_v21  ;;  %v347_v44 = vld [vmem:[#allocation5 + $0x5a8] sm:$0xff] }
 0x4f5   :  { %5197 = vmatprep.subr.bf16.mxu1 %v1675_v42  ;;  %v411_v42 = vld [vmem:[#allocation5 + $0x7a8] sm:$0xff] }
 0x4f7   :  { %5155 = vmatpush1.bf16.msra.mxu0 %v1546_v12  ;;  %v1619_v12 = vunpack.c.h.s8.bf16 %v347_v44 }
 0x4f8   :  { %5198 = vmatpush1.bf16.msra.mxu1 %v1674_v34  ;;  %5156 = vmatprep.subr.bf16.mxu0 %v1539_v43  ;;  %v1747_v34 = vunpack.c.h.s8.bf16 %v411_v42  ;;  %v346_v43 = vld [vmem:[#allocation5 + $0x5a0] sm:$0xff] }
 0x4f9   :  { %5199 = vmatprep.subr.bf16.mxu1 %v1667_v52  ;;  %v410_v52 = vld [vmem:[#allocation5 + $0x7a0] sm:$0xff]  ;;  %v1618_v8 = vunpack.c.h.s8.bf16 %v346_v43  ;;  %v1610_v55 = vunpack.c.l.s8.bf16 %v346_v43 }
 0x4fa   :  { %v1746_v63 = vunpack.c.h.s8.bf16 %v410_v52  ;;  %v1738_v56 = vunpack.c.l.s8.bf16 %v410_v52 }
 0x4fb   :  { %5157 = vmatpush1.bf16.msra.mxu0 %v1538_v53  ;;  %v1611_v53 = vunpack.c.l.s8.bf16 %v347_v44 }
 0x4fc   :  { %5200 = vmatpush1.bf16.msra.mxu1 %v1666_v35  ;;  %5158 = vmatprep.subr.bf16.mxu0 %v1531_v18  ;;  %v1739_v35 = vunpack.c.l.s8.bf16 %v411_v42  ;;  %v339_v18 = vld [vmem:[#allocation5 + $0x568] sm:$0xff] }
 0x4fd   :  { %5201 = vmatprep.subr.bf16.mxu1 %v1659_v54  ;;  %v403_v54 = vld [vmem:[#allocation5 + $0x768] sm:$0xff] }
 0x4ff   :  { %5159 = vmatpush1.bf16.msra.mxu0 %v1530_v5  ;;  %v1603_v5 = vunpack.c.h.s8.bf16 %v339_v18 }
 0x500   :  { %5202 = vmatpush1.bf16.msra.mxu1 %v1658_v20  ;;  %5160 = vmatprep.subr.bf16.mxu0 %v1523_v6  ;;  %v1731_v20 = vunpack.c.h.s8.bf16 %v403_v54  ;;  %v338_v6 = vld [vmem:[#allocation5 + $0x560] sm:$0xff] }
 0x501   :  { %5203 = vmatprep.subr.bf16.mxu1 %v1651_v10  ;;  %v402_v10 = vld [vmem:[#allocation5 + $0x760] sm:$0xff]  ;;  %v1602_v45 = vunpack.c.h.s8.bf16 %v338_v6  ;;  %v1594_v21 = vunpack.c.l.s8.bf16 %v338_v6 }
 0x502   :  { %v1730_v13 = vunpack.c.h.s8.bf16 %v402_v10  ;;  %v1722_v19 = vunpack.c.l.s8.bf16 %v402_v10 }
 0x503   :  { %5161 = vmatpush1.bf16.msra.mxu0 %v1522_v14  ;;  %v1595_v14 = vunpack.c.l.s8.bf16 %v339_v18  ;;  %v443_v18 = vld [vmem:[#allocation5 + $0x8a8] sm:$0xff] }
 0x504   :  { %5204 = vmatpush1.bf16.msra.mxu1 %v1650_v16  ;;  %5162 = vmatprep.subr.bf16.mxu0 %v1515_v57  ;;  %v1723_v16 = vunpack.c.l.s8.bf16 %v403_v54  ;;  %v331_v57 = vld [vmem:[#allocation5 + $0x528] sm:$0xff] }
 0x505   :  { %5205 = vmatprep.subr.bf16.mxu1 %v1643_v23  ;;  %v395_v23 = vld [vmem:[#allocation5 + $0x728] sm:$0xff] }
 0x506   :  { %v507_v54 = vld [vmem:[#allocation5 + $0xaa8] sm:$0xff] }
 0x507   :  { %5163 = vmatpush1.bf16.msra.mxu0 %v1514_v29  ;;  %v1587_v29 = vunpack.c.h.s8.bf16 %v331_v57 }
 0x508   :  { %5206 = vmatpush1.bf16.msra.mxu1 %v1642_v28  ;;  %5164 = vmatprep.subr.bf16.mxu0 %v1635_v50  ;;  %v1715_v28 = vunpack.c.h.s8.bf16 %v395_v23  ;;  %v330_v50 = vld [vmem:[#allocation5 + $0x520] sm:$0xff] }
 0x509   :  { %5207 = vmatprep.subr.bf16.mxu1 %v1763_v39  ;;  %v394_v39 = vld [vmem:[#allocation5 + $0x720] sm:$0xff]  ;;  %v1586_v25 = vunpack.c.h.s8.bf16 %v330_v50  ;;  %v1578_v44 = vunpack.c.l.s8.bf16 %v330_v50 }
 0x50a   :  { %v1714_v9 = vunpack.c.h.s8.bf16 %v394_v39  ;;  %v1706_v42 = vunpack.c.l.s8.bf16 %v394_v39 }
 0x50b   :  { %5165 = vmatpush2.bf16.msra.mxu0 %v1634_v1  ;;  %v1579_v1 = vunpack.c.l.s8.bf16 %v331_v57  ;;  %v1939_v57 = vunpack.c.h.s8.bf16 %v507_v54 }
 0x50c   :  { %5208 = vmatpush2.bf16.msra.mxu1 %v1762_v2  ;;  %5166 = vmatprep.subr.bf16.mxu0 %v1627_v40  ;;  %v1707_v2 = vunpack.c.l.s8.bf16 %v395_v23  ;;  %v451_v40 = vld [vmem:[#allocation5 + $0x8e8] sm:$0xff]  ;;  %v442_v23 = vld [vmem:[#allocation5 + $0x8a0] sm:$0xff] }
 0x50d   :  { %5209 = vmatprep.subr.bf16.mxu1 %v1755_v11  ;;  %v515_v11 = vld [vmem:[#allocation5 + $0xae8] sm:$0xff]  ;;  %v1810_v39 = vunpack.c.h.s8.bf16 %v442_v23 }
 0x50f   :  { %5167 = vmatpush2.bf16.msra.mxu0 %v1626_v37  ;;  %v1827_v37 = vunpack.c.h.s8.bf16 %v451_v40 }
 0x510   :  { %5210 = vmatpush2.bf16.msra.mxu1 %v1754_v48  ;;  %5168 = vmatprep.subr.bf16.mxu0 %v1619_v12  ;;  %v1955_v48 = vunpack.c.h.s8.bf16 %v515_v11  ;;  %v450_v12 = vld [vmem:[#allocation5 + $0x8e0] sm:$0xff] }
 0x511   :  { %5211 = vmatprep.subr.bf16.mxu1 %v1747_v34  ;;  %v514_v34 = vld [vmem:[#allocation5 + $0xae0] sm:$0xff]  ;;  %v1826_v43 = vunpack.c.h.s8.bf16 %v450_v12  ;;  %v1818_v10 = vunpack.c.l.s8.bf16 %v450_v12 }
 0x512   :  { %v1954_v52 = vunpack.c.h.s8.bf16 %v514_v34  ;;  %v434_v12 = vld [vmem:[#allocation5 + $0x860] sm:$0xff] }
 0x513   :  { %5169 = vmatpush2.bf16.msra.mxu0 %v1618_v8  ;;  %v8464_v8 = vpop.f32.mrf.mxu0 }
 0x514   :  { %5212 = vmatpush2.bf16.msra.mxu1 %v1746_v63  ;;  %5170 = vmatprep.subr.bf16.mxu0 %v1611_v53  ;;  %v8466_v63 = vpop.f32.mrf.mxu1  ;;  %v1819_v53 = vunpack.c.l.s8.bf16 %v451_v40 }
 0x515   :  { %5213 = vmatprep.subr.bf16.mxu1 %v1739_v35  ;;  %v1947_v35 = vunpack.c.l.s8.bf16 %v515_v11  ;;  %v435_v11 = vld [vmem:[#allocation5 + $0x868] sm:$0xff] }
 0x517   :  { %5171 = vmatpush2.bf16.msra.mxu0 %v1610_v55 }
 0x518   :  { %5214 = vmatpush2.bf16.msra.mxu1 %v1738_v56  ;;  %5172 = vmatprep.subr.bf16.mxu0 %v1603_v5  ;;  %v7913_v5 = vld [vmem:[#allocation2 + $0x10] ss:$136 sps:$4 sm:$0xff]  }
 0x519   :  { %5215 = vmatprep.subr.bf16.mxu1 %v1731_v20  ;;  %v7914_v20 = vld [vmem:[#allocation2 + $0x18] ss:$136 sps:$4 sm:$0xff]  }
 0x51b   :  { %5173 = vmatpush2.bf16.msra.mxu0 %v1602_v45  ;;  %v1946_v45 = vunpack.c.l.s8.bf16 %v514_v34  ;;  %v498_v34 = vld [vmem:[#allocation5 + $0xa60] sm:$0xff] }
 0x51c   :  { %5216 = vmatpush2.bf16.msra.mxu1 %v1730_v13  ;;  %5174 = vmatprep.subr.bf16.mxu0 %v1595_v14 }
 0x51d   :  { %5217 = vmatprep.subr.bf16.mxu1 %v1723_v16  ;;  %v1811_v16 = vunpack.c.h.s8.bf16 %v443_v18 }
 0x51f   :  { %5175 = vmatpush2.bf16.msra.mxu0 %v1594_v21  ;;  %v506_v21 = vld [vmem:[#allocation5 + $0xaa0] sm:$0xff] }
 0x520   :  { %5218 = vmatpush2.bf16.msra.mxu1 %v1722_v19  ;;  %5176 = vmatprep.subr.bf16.mxu0 %v1587_v29  ;;  %v7915_v29 = vld [vmem:[#allocation2 + $0x24] ss:$136 sps:$4 sm:$0xff]  }
 0x521   :  { %5219 = vmatprep.subr.bf16.mxu1 %v1715_v28  ;;  %v7916_v28 = vld [vmem:[#allocation2 + $0x2c] ss:$136 sps:$4 sm:$0xff]  }
 0x523   :  { %5177 = vmatpush2.bf16.msra.mxu0 %v1586_v25  ;;  %v1938_v25 = vunpack.c.h.s8.bf16 %v506_v21 }
 0x524   :  { %5220 = vmatpush2.bf16.msra.mxu1 %v1714_v9  ;;  %5178 = vmatprep.subr.bf16.mxu0 %v1579_v1  ;;  %v1803_v1 = vunpack.c.l.s8.bf16 %v443_v18  ;;  %v427_v18 = vld [vmem:[#allocation5 + $0x828] sm:$0xff] }
 0x525   :  { %5221 = vmatprep.subr.bf16.mxu1 %v1707_v2  ;;  %v1931_v2 = vunpack.c.l.s8.bf16 %v507_v54  ;;  %v491_v54 = vld [vmem:[#allocation5 + $0xa28] sm:$0xff] }
 0x527   :  { %5179 = vmatpush2.bf16.msra.mxu0 %v1578_v44  ;;  %v499_v44 = vld [vmem:[#allocation5 + $0xa68] sm:$0xff] }
 0x528   :  { %5222 = vmatpush2.bf16.msra.mxu1 %v1706_v42  ;;  %5234 = vmatprep.subr.bf16.mxu0 %v1827_v37  ;;  %v1802_v42 = vunpack.c.l.s8.bf16 %v442_v23  ;;  %v1930_v37 = vunpack.c.l.s8.bf16 %v506_v21  ;;  %v1899_v23 = vunpack.c.l.s8.bf16 %v491_v54  ;;  %v483_v21 = vld [vmem:[#allocation5 + $0x9e8] sm:$0xff] }
 0x529   :  { %5277 = vmatprep.subr.bf16.mxu1 %v1955_v48  ;;  %v1923_v48 = vunpack.c.h.s8.bf16 %v499_v44 }
 0x52a   :  { %v4924_v55 = vpop.f32.mrf.mxu0  ;;  %5181 = vmatmul.mubr.bf16.vlgmr.msra.gmra.mxu0 %v7913_v5  ;;  %v1779_v5 = vunpack.c.h.s8.bf16 %v427_v18 }
 0x52b   :  { %v4967_v56 = vpop.f32.mrf.mxu1  ;;  %5224 = vmatmul.mubr.bf16.vlgmr.msra.gmra.mxu1 %v7914_v20  ;;  %v4925_v6 = vadd.f32 %v4924_v55, %v8459_v22  ;;  %5235 = vmatpush1.bf16.msra.mxu0 %v1826_v43  ;;  %v1794_v43 = vunpack.c.h.s8.bf16 %v434_v12  ;;  %v1786_v55 = vunpack.c.l.s8.bf16 %v434_v12  ;;  %v1907_v20 = vunpack.c.h.s8.bf16 %v491_v54 }
 0x52c   :  { %5278 = vmatpush1.bf16.msra.mxu1 %v1954_v52  ;;  %v8469_v13 = vpop.f32.mrf.mxu0  ;;  %5236 = vmatprep.subr.bf16.mxu0 %v1819_v53  ;;  %v1922_v52 = vunpack.c.h.s8.bf16 %v498_v34  ;;  %v1787_v53 = vunpack.c.l.s8.bf16 %v435_v11 }
 0x52d   :  { %v8471_v14 = vpop.f32.mrf.mxu1  ;;  %5279 = vmatprep.subr.bf16.mxu1 %v1947_v35  ;;  %v8473_v19 = vadd.f32 %v4967_v56, %v4925_v6  ;;  %5266 = vmatprep.mubr.bf16.mxu0 %v7915_v29  ;;  %v1915_v35 = vunpack.c.l.s8.bf16 %v499_v44  ;;  %v1914_v56 = vunpack.c.l.s8.bf16 %v498_v34  ;;  %v426_v6 = vld [vmem:[#allocation5 + $0x820] sm:$0xff]  ;;  %v547_v29 = vld [vmem:[#allocation5 + $0xbe8] sm:$0xff] }
 0x52e   :  { %5309 = vmatprep.mubr.bf16.mxu1 %v7916_v28  ;;  %v4928_v22 = vpop.f32.mrf.mxu0  ;;  %v1770_v28 = vunpack.c.l.s8.bf16 %v426_v6  ;;  %v2011_v44 = vunpack.c.l.s8.bf16 %v547_v29 }
 0x52f   :  { %v4929_v50 = vadd.f32 %v4928_v22, %v8462_v46  ;;  %5237 = vmatpush1.bf16.msra.mxu0 %v1818_v10  ;;  %v4971_v9 = vpop.f32.mrf.mxu1  ;;  %v1795_v46 = vunpack.c.h.s8.bf16 %v435_v11  ;;  %v490_v10 = vld [vmem:[#allocation5 + $0xa20] sm:$0xff]  ;;  %v1883_v11 = vunpack.c.l.s8.bf16 %v483_v21 }
 0x530   :  { %5280 = vmatpush1.bf16.msra.mxu1 %v1946_v45  ;;  %5238 = vmatprep.subr.bf16.mxu0 %v1811_v16  ;;  %v1778_v45 = vunpack.c.h.s8.bf16 %v426_v6  ;;  %v1906_v16 = vunpack.c.h.s8.bf16 %v490_v10  ;;  %v1898_v22 = vunpack.c.l.s8.bf16 %v490_v10 }
 0x531   :  { %5281 = vmatprep.subr.bf16.mxu1 %v1939_v57  ;;  %v8476_v40 = vadd.f32 %v4971_v9, %v4929_v50  ;;  %v1771_v57 = vunpack.c.l.s8.bf16 %v427_v18  ;;  %v1891_v50 = vunpack.c.h.s8.bf16 %v483_v21  ;;  %v546_v9 = vld [vmem:[#allocation5 + $0xbe0] sm:$0xff]  ;;  %v4540_v18 = vadd.f32 %v8398_v15, %v8403_v17 }
 0x532   :  { %v2010_v12 = vunpack.c.l.s8.bf16 %v546_v9 }
 0x533   :  { %5239 = vmatpush1.bf16.msra.mxu0 %v1810_v39  ;;  %v2019_v39 = vunpack.c.h.s8.bf16 %v547_v29  ;;  %v4583_v54 = vadd.f32 %v8413_v47, %v4540_v18  ;;  %v642_v18 = vld [vmem:[#allocation5 + $0xee0] sm:$0xff] }
 0x534   :  { %5282 = vmatpush1.bf16.msra.mxu1 %v1938_v25  ;;  %5240 = vmatprep.subr.bf16.mxu0 %v1803_v1  ;;  %v482_v25 = vld [vmem:[#allocation5 + $0x9e0] sm:$0xff] }
 0x535   :  { %5283 = vmatprep.subr.bf16.mxu1 %v1931_v2  ;;  %v1890_v1 = vunpack.c.h.s8.bf16 %v482_v25  ;;  %v2018_v2 = vunpack.c.h.s8.bf16 %v546_v9  ;;  %v4626_v10 = vadd.f32 %v8415_v59, %v4583_v54 }
 0x537   :  { %5241 = vmatpush1.bf16.msra.mxu0 %v1802_v42  ;;  %v475_v42 = vld [vmem:[#allocation5 + $0x9a8] sm:$0xff] }
 0x538   :  { %5284 = vmatpush1.bf16.msra.mxu1 %v1930_v37  ;;  %5242 = vmatprep.subr.bf16.mxu0 %v1795_v46  ;;  %v539_v37 = vld [vmem:[#allocation5 + $0xba8] sm:$0xff]  ;;  %v4458_v46 = vadd.f32 %v8395_v0, %v8393_v36 }
 0x539   :  { %5285 = vmatprep.subr.bf16.mxu1 %v1923_v48  ;;  %v1882_v48 = vunpack.c.l.s8.bf16 %v482_v25 }
 0x53a   :  { %v4501_v34 = vadd.f32 %v8408_v38, %v4458_v46  ;;  %v1867_v38 = vunpack.c.l.s8.bf16 %v475_v42 }
 0x53b   :  { %5243 = vmatpush1.bf16.msra.mxu0 %v1794_v43  ;;  %v1875_v43 = vunpack.c.h.s8.bf16 %v475_v42 }
 0x53c   :  { %5286 = vmatpush1.bf16.msra.mxu1 %v1922_v52  ;;  %5244 = vmatprep.subr.bf16.mxu0 %v1787_v53  ;;  %v2003_v52 = vunpack.c.h.s8.bf16 %v539_v37  ;;  %v474_v53 = vld [vmem:[#allocation5 + $0x9a0] sm:$0xff] }
 0x53d   :  { %5287 = vmatprep.subr.bf16.mxu1 %v1915_v35  ;;  %v538_v35 = vld [vmem:[#allocation5 + $0xba0] sm:$0xff]  ;;  %v1874_v36 = vunpack.c.h.s8.bf16 %v474_v53  ;;  %v1866_v15 = vunpack.c.l.s8.bf16 %v474_v53 }
 0x53e   :  { %v2002_v0 = vunpack.c.h.s8.bf16 %v538_v35  ;;  %v1994_v17 = vunpack.c.l.s8.bf16 %v538_v35  ;;  %v578_v35 = vld [vmem:[#allocation5 + $0xce0] sm:$0xff] }
 0x53f   :  { %5245 = vmatpush1.bf16.msra.mxu0 %v1786_v55  ;;  %v4544_v55 = vadd.f32 %v8410_v62, %v4501_v34  ;;  %v530_v62 = vld [vmem:[#allocation5 + $0xb60] sm:$0xff] }
 0x540   :  { %5288 = vmatpush1.bf16.msra.mxu1 %v1914_v56  ;;  %5246 = vmatprep.subr.bf16.mxu0 %v1779_v5  ;;  %v1995_v56 = vunpack.c.l.s8.bf16 %v539_v37  ;;  %v467_v5 = vld [vmem:[#allocation5 + $0x968] sm:$0xff] }
 0x541   :  { %5289 = vmatprep.subr.bf16.mxu1 %v1907_v20  ;;  %v531_v20 = vld [vmem:[#allocation5 + $0xb68] sm:$0xff]  ;;  %v4587_v6 = vadd.f32 %v8422_v58, %v4544_v55  ;;  %v1859_v47 = vunpack.c.h.s8.bf16 %v467_v5  ;;  %v1986_v58 = vunpack.c.h.s8.bf16 %v530_v62  ;;  %v1851_v29 = vunpack.c.l.s8.bf16 %v467_v5 }
 0x542   :  { %v2210_v55 = vunpack.c.h.s8.bf16 %v642_v18 }
 0x543   :  { %5247 = vmatpush1.bf16.msra.mxu0 %v1778_v45  ;;  %v1987_v45 = vunpack.c.h.s8.bf16 %v531_v20 }
 0x544   :  { %5290 = vmatpush1.bf16.msra.mxu1 %v1906_v16  ;;  %5248 = vmatprep.subr.bf16.mxu0 %v1771_v57  ;;  %v466_v16 = vld [vmem:[#allocation5 + $0x960] sm:$0xff]  ;;  %v4669_v57 = vadd.f32 %v8427_v32, %v4626_v10 }
 0x545   :  { %5291 = vmatprep.subr.bf16.mxu1 %v1899_v23  ;;  %v4630_v23 = vadd.f32 %v8424_v7, %v4587_v6  ;;  %v1858_v21 = vunpack.c.h.s8.bf16 %v466_v16  ;;  %v1850_v32 = vunpack.c.l.s8.bf16 %v466_v16  ;;  %v1978_v7 = vunpack.c.l.s8.bf16 %v530_v62  ;;  %v8503_v6 = vld [vmem:[#allocation5 + $0xca8] sm:$0xff]  ;;  %v7919_v16 = vld [vmem:[#allocation2 + $0x28] ss:$136 sps:$4 sm:$0xff]  }
 0x547   :  { %5249 = vmatpush1.bf16.msra.mxu0 %v1770_v28  ;;  %v4673_v59 = vadd.f32 %v8436_v31, %v4630_v23  ;;  %v1979_v28 = vunpack.c.l.s8.bf16 %v531_v20  ;;  %v6540_v20 = vsub.s32 3, %v8373_v24  ;;  %v2202_v23 = vunpack.c.l.s8.bf16 %v642_v18 }
 0x548   :  { %5292 = vmatpush1.bf16.msra.mxu1 %v1898_v22  ;;  %5250 = vmatprep.subr.bf16.mxu0 %v1891_v50  ;;  %v4712_v22 = vadd.f32 %v8429_v30, %v4669_v57  ;;  %v459_v50 = vld [vmem:[#allocation5 + $0x928] sm:$0xff]  ;;  %v2074_v57 = vunpack.c.l.s8.bf16 %v578_v35 }
 0x549   :  { %5293 = vmatprep.subr.bf16.mxu1 %v2019_v39  ;;  %v523_v39 = vld [vmem:[#allocation5 + $0xb28] sm:$0xff]  ;;  %v4716_v9 = vadd.f32 %v8438_v41, %v4673_v59  ;;  %v1835_v37 = vunpack.c.l.s8.bf16 %v459_v50 }
 0x54a   :  { %v4755_v25 = vadd.f32 %v8441_v49, %v4712_v22  ;;  %v1971_v31 = vunpack.c.h.s8.bf16 %v523_v39  ;;  %v1963_v46 = vunpack.c.l.s8.bf16 %v523_v39  ;;  %v634_v22 = vld [vmem:[#allocation5 + $0xea0] sm:$0xff] }
 0x54b   :  { %5251 = vmatpush2.bf16.msra.mxu0 %v1890_v1  ;;  %v1843_v1 = vunpack.c.h.s8.bf16 %v459_v50  ;;  %v2186_v18 = vunpack.c.l.s8.bf16 %v634_v22 }
 0x54c   :  { %5294 = vmatpush2.bf16.msra.mxu1 %v2018_v2  ;;  %5252 = vmatprep.subr.bf16.mxu0 %v1883_v11  ;;  %v458_v2 = vld [vmem:[#allocation5 + $0x920] sm:$0xff]  ;;  %v4798_v30 = vadd.f32 %v8443_v61, %v4755_v25 }
 0x54d   :  { %5295 = vmatprep.subr.bf16.mxu1 %v2011_v44  ;;  %v522_v11 = vld [vmem:[#allocation5 + $0xb20] sm:$0xff]  ;;  %v4759_v44 = vadd.f32 %v8450_v3, %v4716_v9  ;;  %v1842_v42 = vunpack.c.h.s8.bf16 %v458_v2 }
 0x54e   :  { %v1970_v49 = vunpack.c.h.s8.bf16 %v522_v11  ;;  %v4841_v41 = vadd.f32 %v8455_v26, %v4798_v30  ;;  %v1962_v3 = vunpack.c.l.s8.bf16 %v522_v11  ;;  %v6536_v26 = vsub.s32 2, %v8373_v24 }
 0x54f   :  { %5253 = vmatpush2.bf16.msra.mxu0 %v1882_v48  ;;  %v579_v48 = vld [vmem:[#allocation5 + $0xce8] sm:$0xff]  ;;  %v4802_v34 = vadd.f32 %v8452_v4, %v4759_v44  ;;  %v2082_v4 = vunpack.c.h.s8.bf16 %v578_v35 }
 0x550   :  { %5296 = vmatpush2.bf16.msra.mxu1 %v2010_v12  ;;  %5254 = vmatprep.subr.bf16.mxu0 %v1875_v43  ;;  %v643_v12 = vld [vmem:[#allocation5 + $0xee8] sm:$0xff]  ;;  %v1834_v43 = vunpack.c.l.s8.bf16 %v458_v2  ;;  %v4884_v54 = vadd.f32 %v8457_v60, %v4841_v41 }
 0x551   :  { %5297 = vmatprep.subr.bf16.mxu1 %v2003_v52  ;;  %v4845_v61 = vadd.f32 %v8464_v8, %v4802_v34  ;;  %v2083_v52 = vunpack.c.h.s8.bf16 %v579_v48  ;;  %v2211_v53 = vunpack.c.h.s8.bf16 %v643_v12  ;;  %v4973_v8 = vpop.f32.mrf.mxu1  ;;  %v2203_v5 = vunpack.c.l.s8.bf16 %v643_v12  ;;  %v8505_v60 = vld [vmem:[#allocation5 + $0xea8] sm:$0xff] }
 0x553   :  { %5255 = vmatpush2.bf16.msra.mxu0 %v1874_v36  ;;  %v4927_v36 = vadd.f32 %v8469_v13, %v4884_v54  ;;  %v562_v54 = vld [vmem:[#allocation5 + $0xc60] sm:$0xff] }
 0x554   :  { %5298 = vmatpush2.bf16.msra.mxu1 %v2002_v0  ;;  %5256 = vmatprep.subr.bf16.mxu0 %v1867_v38  ;;  %v4930_v0 = vpop.f32.mrf.mxu0  ;;  %v4888_v38 = vadd.f32 %v8466_v63, %v4845_v61 }
 0x555   :  { %5299 = vmatprep.subr.bf16.mxu1 %v1995_v56  ;;  %v2075_v56 = vunpack.c.l.s8.bf16 %v579_v48  ;;  %v4970_v63 = vadd.f32 %v8471_v14, %v4927_v36  ;;  %v7920_v14 = vld [vmem:[#allocation2 + $0x34] ss:$136 sps:$4 sm:$0xff]  }
 0x556   :  { %v4931_v10 = vadd.f32 %v4930_v0, %v4888_v38  ;;  %v626_v0 = vld [vmem:[#allocation5 + $0xe60] sm:$0xff] }
 0x557   :  { %5257 = vmatpush2.bf16.msra.mxu0 %v1866_v15 }
 0x558   :  { %5300 = vmatpush2.bf16.msra.mxu1 %v1994_v17  ;;  %5258 = vmatprep.subr.bf16.mxu0 %v1859_v47  ;;  %v7917_v17 = vld [vmem:[#allocation7] sm:$0xff] }
 0x559   :  { %5301 = vmatprep.subr.bf16.mxu1 %v1987_v45  ;;  %v6537_v47 = vrot.slane %v7917_v17, %v6536_v26  ;;  %v7918_v45 = vld [vmem:[#allocation2 + $0x20] ss:$136 sps:$4 sm:$0xff]   ;;  %v6541_v25 = vrot.slane %v7917_v17, %v6540_v20 }
 0x55b   :  { %5259 = vmatpush2.bf16.msra.mxu0 %v1858_v21  ;;  %v570_v21 = vld [vmem:[#allocation5 + $0xca0] sm:$0xff] }
 0x55c   :  { %5302 = vmatpush2.bf16.msra.mxu1 %v1986_v58  ;;  %5260 = vmatprep.subr.bf16.mxu0 %v1851_v29  ;;  %v2067_v29 = vunpack.c.h.s8.bf16 %v8503_v6  ;;  %v2066_v2 = vunpack.c.h.s8.bf16 %v570_v21 }
 0x55d   :  { %5303 = vmatprep.subr.bf16.mxu1 %v1979_v28  ;;  %v2195_v28 = vunpack.c.h.s8.bf16 %v8505_v60 }
 0x55f   :  { %5261 = vmatpush2.bf16.msra.mxu0 %v1850_v32  ;;  %v4974_v32 = vadd.f32 %v4973_v8, %v4931_v10  ;;  %v2050_v8 = vunpack.c.h.s8.bf16 %v562_v54 }
 0x560   :  { %5304 = vmatpush2.bf16.msra.mxu1 %v1978_v7  ;;  %5262 = vmatprep.subr.bf16.mxu0 %v1843_v1  ;;  %v7922_v7 = vld [vmem:[#allocation8] sm:$0xff] }
 0x561   :  { %5305 = vmatprep.subr.bf16.mxu1 %v1971_v31  ;;  %v6595_v9 = vrot.slane %v7922_v7, %v6536_v26  ;;  %v6599_v48 = vrot.slane %v7922_v7, %v6540_v20  ;;  %v610_v7 = vld [vmem:[#allocation5 + $0xde0] sm:$0xff] }
 0x563   :  { %5263 = vmatpush2.bf16.msra.mxu0 %v1842_v42  ;;  %v2194_v42 = vunpack.c.h.s8.bf16 %v634_v22 }
 0x564   :  { %5306 = vmatpush2.bf16.msra.mxu1 %v1970_v49  ;;  %5264 = vmatprep.subr.bf16.mxu0 %v1835_v37  ;;  %v2059_v37 = vunpack.c.l.s8.bf16 %v8503_v6  ;;  %v2178_v6 = vunpack.c.h.s8.bf16 %v626_v0 }
 0x565   :  { %5307 = vmatprep.subr.bf16.mxu1 %v1963_v46  ;;  %v2187_v46 = vunpack.c.l.s8.bf16 %v8505_v60 }
 0x567   :  { %5265 = vmatpush2.bf16.msra.mxu0 %v1834_v43  ;;  %v563_v43 = vld [vmem:[#allocation5 + $0xc68] sm:$0xff] }
 0x568   :  { %5308 = vmatpush2.bf16.msra.mxu1 %v1962_v3  ;;  %5320 = vmatprep.subr.bf16.mxu0 %v2083_v52  ;;  %v627_v3 = vld [vmem:[#allocation5 + $0xe68] sm:$0xff]  ;;  %v2058_v52 = vunpack.c.l.s8.bf16 %v570_v21  ;;  %v2051_v26 = vunpack.c.h.s8.bf16 %v563_v43  ;;  %v2043_v60 = vunpack.c.l.s8.bf16 %v563_v43  ;;  %v554_v21 = vld [vmem:[#allocation5 + $0xc20] sm:$0xff] }
 0x569   :  { %5363 = vmatprep.subr.bf16.mxu1 %v2211_v53  ;;  %v2179_v36 = vunpack.c.h.s8.bf16 %v627_v3  ;;  %v2171_v10 = vunpack.c.l.s8.bf16 %v627_v3 }
 0x56a   :  { %v5010_v13 = vpop.f32.mrf.mxu0  ;;  %5267 = vmatmul.mubr.bf16.vlgmr.msra.gmra.mxu0 %v7918_v45  ;;  %v619_v45 = vld [vmem:[#allocation5 + $0xe28] sm:$0xff] }
 0x56b   :  { %v5053_v15 = vpop.f32.mrf.mxu1  ;;  %5310 = vmatmul.mubr.bf16.vlgmr.msra.gmra.mxu1 %v7919_v16  ;;  %v5011_v62 = vadd.f32 %v5010_v13, %v8473_v19  ;;  %5321 = vmatpush1.bf16.msra.mxu0 %v2082_v4  ;;  %v7921_v19 = vld [vmem:[#allocation2 + $0x3c] ss:$136 sps:$4 sm:$0xff]   ;;  %v2042_v16 = vunpack.c.l.s8.bf16 %v562_v54  ;;  %v2155_v22 = vunpack.c.l.s8.bf16 %v619_v45  ;;  %v594_v54 = vld [vmem:[#allocation5 + $0xd60] sm:$0xff] }
 0x56c   :  { %5364 = vmatpush1.bf16.msra.mxu1 %v2210_v55  ;;  %v5012_v58 = vpop.f32.mrf.mxu0  ;;  %5322 = vmatprep.subr.bf16.mxu0 %v2075_v56 }
 0x56d   :  { %v5055_v59 = vpop.f32.mrf.mxu1  ;;  %5365 = vmatprep.subr.bf16.mxu1 %v2203_v5  ;;  %v5054_v50 = vadd.f32 %v5053_v15, %v5011_v62  ;;  %v5013_v39 = vadd.f32 %v5012_v58, %v4970_v63  ;;  %5352 = vmatprep.mubr.bf16.mxu0 %v7920_v14  ;;  %v2170_v63 = vunpack.c.l.s8.bf16 %v626_v0  ;;  %v618_v58 = vld [vmem:[#allocation5 + $0xe20] sm:$0xff] }
 0x56e   :  { %5395 = vmatprep.mubr.bf16.mxu1 %v7921_v19  ;;  %v5014_v1 = vpop.f32.mrf.mxu0  ;;  %v2154_v14 = vunpack.c.l.s8.bf16 %v618_v58 }
 0x56f   :  { %v5057_v31 = vpop.f32.mrf.mxu1  ;;  %v6568_v11 = vmul.f32 %v6537_v47, %v5054_v50  ;;  %v5056_v44 = vadd.f32 %v5055_v59, %v5013_v39  ;;  %v5015_v30 = vadd.f32 %v5014_v1, %v8476_v40  ;;  %5323 = vmatpush1.bf16.msra.mxu0 %v2074_v57  ;;  %v2034_v59 = vunpack.c.h.s8.bf16 %v554_v21  ;;  %v611_v50 = vld [vmem:[#allocation5 + $0xde8] sm:$0xff] }
 0x570   :  { %5366 = vmatpush1.bf16.msra.mxu1 %v2202_v23  ;;  %v5016_v49 = vpop.f32.mrf.mxu0  ;;  %5324 = vmatprep.subr.bf16.mxu0 %v2067_v29  ;;  %v2163_v23 = vunpack.c.h.s8.bf16 %v619_v45  ;;  %v2162_v29 = vunpack.c.h.s8.bf16 %v618_v58  ;;  %v675_v39 = vld [vmem:[#allocation5 + $0xfe8] sm:$0xff]  ;;  %v2147_v19 = vunpack.c.h.s8.bf16 %v611_v50  ;;  %v2146_v1 = vunpack.c.h.s8.bf16 %v610_v7 }
 0x571   :  { %5367 = vmatprep.subr.bf16.mxu1 %v2195_v28  ;;  %v6569_v41 = vmul.f32 %v6541_v25, %v5056_v44  ;;  %v5058_v12 = vadd.f32 %v5057_v31, %v5015_v30  ;;  %v5017_v34 = vadd.f32 %v5016_v49, %v4974_v32  ;;  %v5059_v61 = vpop.f32.mrf.mxu1  ;;  %v6626_v53 = vadd.f32 %v6595_v9, %v6568_v11  ;;  %v603_v44 = vld [vmem:[#allocation5 + $0xda8] sm:$0xff] }
 0x572   :  { %v2275_v32 = vunpack.c.h.s8.bf16 %v675_v39  ;;  %v2267_v11 = vunpack.c.l.s8.bf16 %v675_v39  ;;  %v667_v30 = vld [vmem:[#allocation5 + $0xfa8] sm:$0xff]  ;;  %v2123_v43 = vunpack.c.l.s8.bf16 %v603_v44 }
 0x573   :  { %v6576_v40 = vmul.f32 %v6537_v47, %v5058_v12  ;;  %v5060_v35 = vadd.f32 %v5059_v61, %v5017_v34  ;;  %5325 = vmatpush1.bf16.msra.mxu0 %v2066_v2  ;;  %v6627_v4 = vadd.f32 %v6599_v48, %v6569_v41  ;;  %v6642_v56 = vmax.f32 %v6626_v53, 0.0  ;;  %v555_v47 = vld [vmem:[#allocation5 + $0xc28] sm:$0xff]  ;;  %v602_v41 = vld [vmem:[#allocation5 + $0xda0] sm:$0xff] }
 0x574   :  { %5368 = vmatpush1.bf16.msra.mxu1 %v2194_v42  ;;  %5326 = vmatprep.subr.bf16.mxu0 %v2059_v37  ;;  %v2035_v57 = vunpack.c.h.s8.bf16 %v555_v47  ;;  %v2027_v28 = vunpack.c.l.s8.bf16 %v555_v47  ;;  %v2139_v2 = vunpack.c.l.s8.bf16 %v611_v50  ;;  %v2138_v42 = vunpack.c.l.s8.bf16 %v610_v7  ;;  %v595_v61 = vld [vmem:[#allocation5 + $0xd68] sm:$0xff] }
 0x575   :  { %5369 = vmatprep.subr.bf16.mxu1 %v2187_v46  ;;  %v6634_v55 = vadd.f32 %v6595_v9, %v6576_v40  ;;  %v6577_v38 = vmul.f32 %v6541_v25, %v5060_v35  ;;  %v6643_v13 = vmax.f32 %v6627_v4, 0.0  ;;  %v2026_v25 = vunpack.c.l.s8.bf16 %v554_v21  ;;  %v674_v9 = vld [vmem:[#allocation5 + $0xfe0] sm:$0xff] }
 0x576   :  { %v2274_v31 = vunpack.c.h.s8.bf16 %v674_v9  ;;  %v2266_v49 = vunpack.c.l.s8.bf16 %v674_v9  ;;  %v2131_v37 = vunpack.c.h.s8.bf16 %v603_v44  ;;  %v2259_v46 = vunpack.c.h.s8.bf16 %v667_v30  ;;  %v7923_v7 = vld [vmem:[#allocation2 + $0x30] ss:$136 sps:$4 sm:$0xff]  }
 0x577   :  { %v6650_v5 = vmax.f32 %v6634_v55, 0.0  ;;  %v6635_v20 = vadd.f32 %v6599_v48, %v6577_v38  ;;  %5327 = vmatpush1.bf16.msra.mxu0 %v2058_v52  ;;  %v666_v48 = vld [vmem:[#allocation5 + $0xfa0] sm:$0xff]  ;;  %v2130_v12 = vunpack.c.h.s8.bf16 %v602_v41  ;;  %v2251_v3 = vunpack.c.l.s8.bf16 %v667_v30  ;;  %v659_v52 = vld [vmem:[#allocation5 + $0xf68] sm:$0xff] }
 0x578   :  { %5370 = vmatpush1.bf16.msra.mxu1 %v2186_v18  ;;  %5328 = vmatprep.subr.bf16.mxu0 %v2051_v26  ;;  %v2258_v34 = vunpack.c.h.s8.bf16 %v666_v48  ;;  %v2122_v53 = vunpack.c.l.s8.bf16 %v602_v41  ;;  %v2250_v40 = vunpack.c.l.s8.bf16 %v666_v48  ;;  %v2115_v35 = vunpack.c.h.s8.bf16 %v595_v61  ;;  %v658_v26 = vld [vmem:[#allocation5 + $0xf60] sm:$0xff]  ;;  %v587_v38 = vld [vmem:[#allocation5 + $0xd28] sm:$0xff] }
 0x579   :  { %5371 = vmatprep.subr.bf16.mxu1 %v2179_v36  ;;  %v8514_v15 = vpack.c.bf16 %v6650_v5, %v6642_v56  ;;  %v6651_v17 = vmax.f32 %v6635_v20, 0.0  ;;  %v2243_v18 = vunpack.c.h.s8.bf16 %v659_v52  ;;  %v2114_v36 = vunpack.c.h.s8.bf16 %v594_v54  ;;  %v7924_v9 = vld [vmem:[#allocation2 + $0x38] ss:$136 sps:$4 sm:$0xff]   ;;  %v698_v30 = vld [vmem:[#allocation5 + $0x10a0] sm:$0xff] }
 0x57a   :  { %v2242_v0 = vunpack.c.h.s8.bf16 %v658_v26  ;;  %v2107_v4 = vunpack.c.l.s8.bf16 %v595_v61  ;;  %v2235_v55 = vunpack.c.l.s8.bf16 %v659_v52  ;;  %v2106_v56 = vunpack.c.l.s8.bf16 %v594_v54 }
 0x57b   :  { %5329 = vmatpush1.bf16.msra.mxu0 %v2050_v8  ;;  %v8516_v62 = vpack.c.bf16 %v6651_v17, %v6643_v13  ;;  %v651_v8 = vld [vmem:[#allocation5 + $0xf28] sm:$0xff]  ;;  %v2234_v5 = vunpack.c.l.s8.bf16 %v658_v26  ;;  %v2099_v20 = vunpack.c.h.s8.bf16 %v587_v38  ;;  %v2091_v47 = vunpack.c.l.s8.bf16 %v587_v38 }
 0x57c   :  { %5372 = vmatpush1.bf16.msra.mxu1 %v2178_v6  ;;  %5330 = vmatprep.subr.bf16.mxu0 %v2043_v60  ;;  %v2227_v6 = vunpack.c.h.s8.bf16 %v651_v8  ;;  %v586_v60 = vld [vmem:[#allocation5 + $0xd20] sm:$0xff]  ;;  %v2219_v45 = vunpack.c.l.s8.bf16 %v651_v8 }
 0x57d   :  { %5373 = vmatprep.subr.bf16.mxu1 %v2171_v10  ;;  %v650_v10 = vld [vmem:[#allocation5 + $0xf20] sm:$0xff]  ;;  %v2098_v13 = vunpack.c.h.s8.bf16 %v586_v60 }
 0x57e   :  { %v2226_v17 = vunpack.c.h.s8.bf16 %v650_v10 }
 0x57f   :  { %5331 = vmatpush1.bf16.msra.mxu0 %v2042_v16  ;;  %v707_v16 = vld [vmem:[#allocation5 + $0x10e8] sm:$0xff] }
 0x580   :  { %5374 = vmatpush1.bf16.msra.mxu1 %v2170_v63  ;;  %5332 = vmatprep.subr.bf16.mxu0 %v2035_v57  ;;  %v771_v63 = vld [vmem:[#allocation5 + $0x12e8] sm:$0xff]  ;;  %v2090_v57 = vunpack.c.l.s8.bf16 %v586_v60  ;;  %v2339_v21 = vunpack.c.h.s8.bf16 %v707_v16  ;;  %v2331_v50 = vunpack.c.l.s8.bf16 %v707_v16 }
 0x581   :  { %5375 = vmatprep.subr.bf16.mxu1 %v2163_v23  ;;  %v2218_v23 = vunpack.c.l.s8.bf16 %v650_v10  ;;  %v2467_v58 = vunpack.c.h.s8.bf16 %v771_v63  ;;  %v2459_v39 = vunpack.c.l.s8.bf16 %v771_v63 }
 0x583   :  { %5333 = vmatpush1.bf16.msra.mxu0 %v2034_v59  ;;  %v706_v59 = vld [vmem:[#allocation5 + $0x10e0] sm:$0xff] }
 0x584   :  { %5376 = vmatpush1.bf16.msra.mxu1 %v2162_v29  ;;  %5334 = vmatprep.subr.bf16.mxu0 %v2027_v28  ;;  %v770_v29 = vld [vmem:[#allocation5 + $0x12e0] sm:$0xff]  ;;  %v2338_v28 = vunpack.c.h.s8.bf16 %v706_v59 }
 0x585   :  { %5377 = vmatprep.subr.bf16.mxu1 %v2155_v22  ;;  %v2466_v22 = vunpack.c.h.s8.bf16 %v770_v29 }
 0x587   :  { %5335 = vmatpush1.bf16.msra.mxu0 %v2026_v25  ;;  %v699_v25 = vld [vmem:[#allocation5 + $0x10a8] sm:$0xff] }
 0x588   :  { %5378 = vmatpush1.bf16.msra.mxu1 %v2154_v14  ;;  %5336 = vmatprep.subr.bf16.mxu0 %v2147_v19  ;;  %v763_v14 = vld [vmem:[#allocation5 + $0x12a8] sm:$0xff]  ;;  %v2315_v48 = vunpack.c.l.s8.bf16 %v699_v25 }
 0x589   :  { %5379 = vmatprep.subr.bf16.mxu1 %v2275_v32  ;;  %v2451_v44 = vunpack.c.h.s8.bf16 %v763_v14 }
 0x58b   :  { %5337 = vmatpush2.bf16.msra.mxu0 %v2146_v1 }
 0x58c   :  { %5380 = vmatpush2.bf16.msra.mxu1 %v2274_v31  ;;  %5338 = vmatprep.subr.bf16.mxu0 %v2139_v2  ;;  %v2330_v31 = vunpack.c.l.s8.bf16 %v706_v59  ;;  %v2458_v2 = vunpack.c.l.s8.bf16 %v770_v29 }
 0x58d   :  { %5381 = vmatprep.subr.bf16.mxu1 %v2267_v11  ;;  %v2323_v11 = vunpack.c.h.s8.bf16 %v699_v25 }
 0x58f   :  { %5339 = vmatpush2.bf16.msra.mxu0 %v2138_v42  ;;  %v762_v42 = vld [vmem:[#allocation5 + $0x12a0] sm:$0xff] }
 0x590   :  { %5382 = vmatpush2.bf16.msra.mxu1 %v2266_v49  ;;  %5340 = vmatprep.subr.bf16.mxu0 %v2131_v37  ;;  %v7925_v49 = vld [vmem:[#allocation2 + $0x44] ss:$136 sps:$4 sm:$0xff]   ;;  %v2450_v41 = vunpack.c.h.s8.bf16 %v762_v42  ;;  %v2442_v61 = vunpack.c.l.s8.bf16 %v762_v42 }
 0x591   :  { %5383 = vmatprep.subr.bf16.mxu1 %v2259_v46  ;;  %v7926_v37 = vld [vmem:[#allocation2 + $0x4c] ss:$136 sps:$4 sm:$0xff]   ;;  %v2322_v46 = vunpack.c.h.s8.bf16 %v698_v30 }
 0x593   :  { %5341 = vmatpush2.bf16.msra.mxu0 %v2130_v12  ;;  %v2443_v12 = vunpack.c.l.s8.bf16 %v763_v14 }
 0x594   :  { %5384 = vmatpush2.bf16.msra.mxu1 %v2258_v34  ;;  %5342 = vmatprep.subr.bf16.mxu0 %v2123_v43  ;;  %v691_v34 = vld [vmem:[#allocation5 + $0x1068] sm:$0xff] }
 0x595   :  { %5385 = vmatprep.subr.bf16.mxu1 %v2251_v3  ;;  %v755_v43 = vld [vmem:[#allocation5 + $0x1268] sm:$0xff]  ;;  %v2314_v3 = vunpack.c.l.s8.bf16 %v698_v30  ;;  %v2307_v52 = vunpack.c.h.s8.bf16 %v691_v34  ;;  %v2299_v26 = vunpack.c.l.s8.bf16 %v691_v34 }
 0x596   :  { %v787_v30 = vld [vmem:[#allocation5 + $0x1368] sm:$0xff] }
 0x597   :  { %5343 = vmatpush2.bf16.msra.mxu0 %v2122_v53  ;;  %v2435_v53 = vunpack.c.h.s8.bf16 %v755_v43 }
 0x598   :  { %5386 = vmatpush2.bf16.msra.mxu1 %v2250_v40  ;;  %5344 = vmatprep.subr.bf16.mxu0 %v2115_v35  ;;  %v690_v40 = vld [vmem:[#allocation5 + $0x1060] sm:$0xff] }
 0x599   :  { %5387 = vmatprep.subr.bf16.mxu1 %v2243_v18  ;;  %v754_v35 = vld [vmem:[#allocation5 + $0x1260] sm:$0xff]  ;;  %v2306_v18 = vunpack.c.h.s8.bf16 %v690_v40 }
 0x59a   :  { %v2434_v54 = vunpack.c.h.s8.bf16 %v754_v35  ;;  %v2426_v38 = vunpack.c.l.s8.bf16 %v754_v35 }
 0x59b   :  { %5345 = vmatpush2.bf16.msra.mxu0 %v2114_v36  ;;  %v2427_v36 = vunpack.c.l.s8.bf16 %v755_v43 }
 0x59c   :  { %5388 = vmatpush2.bf16.msra.mxu1 %v2242_v0  ;;  %5346 = vmatprep.subr.bf16.mxu0 %v2107_v4  ;;  %v683_v0 = vld [vmem:[#allocation5 + $0x1028] sm:$0xff] }
 0x59d   :  { %5389 = vmatprep.subr.bf16.mxu1 %v2235_v55  ;;  %v747_v4 = vld [vmem:[#allocation5 + $0x1228] sm:$0xff]  ;;  %v2298_v55 = vunpack.c.l.s8.bf16 %v690_v40  ;;  %v2291_v8 = vunpack.c.h.s8.bf16 %v683_v0  ;;  %v2283_v10 = vunpack.c.l.s8.bf16 %v683_v0 }
 0x59f   :  { %5347 = vmatpush2.bf16.msra.mxu0 %v2106_v56  ;;  %v2419_v56 = vunpack.c.h.s8.bf16 %v747_v4 }
 0x5a0   :  { %5390 = vmatpush2.bf16.msra.mxu1 %v2234_v5  ;;  %5348 = vmatprep.subr.bf16.mxu0 %v2099_v20  ;;  %v682_v5 = vld [vmem:[#allocation5 + $0x1020] sm:$0xff] }
 0x5a1   :  { %5391 = vmatprep.subr.bf16.mxu1 %v2227_v6  ;;  %v746_v20 = vld [vmem:[#allocation5 + $0x1220] sm:$0xff]  ;;  %v2290_v6 = vunpack.c.h.s8.bf16 %v682_v5 }
 0x5a2   :  { %v2418_v60 = vunpack.c.h.s8.bf16 %v746_v20  ;;  %v2410_v16 = vunpack.c.l.s8.bf16 %v746_v20 }
 0x5a3   :  { %5349 = vmatpush2.bf16.msra.mxu0 %v2098_v13  ;;  %v2411_v13 = vunpack.c.l.s8.bf16 %v747_v4 }
 0x5a4   :  { %5392 = vmatpush2.bf16.msra.mxu1 %v2226_v17  ;;  %5350 = vmatprep.subr.bf16.mxu0 %v2091_v47  ;;  %v739_v17 = vld [vmem:[#allocation5 + $0x11e8] sm:$0xff] }
 0x5a5   :  { %5393 = vmatprep.subr.bf16.mxu1 %v2219_v45  ;;  %v803_v47 = vld [vmem:[#allocation5 + $0x13e8] sm:$0xff]  ;;  %v2282_v45 = vunpack.c.l.s8.bf16 %v682_v5  ;;  %v2403_v63 = vunpack.c.h.s8.bf16 %v739_v17  ;;  %v2395_v29 = vunpack.c.l.s8.bf16 %v739_v17  ;;  %v898_v17 = vld [vmem:[#allocation5 + $0x16e0] sm:$0xff] }
 0x5a7   :  { %5351 = vmatpush2.bf16.msra.mxu0 %v2090_v57  ;;  %v2531_v57 = vunpack.c.h.s8.bf16 %v803_v47 }
 0x5a8   :  { %5394 = vmatpush2.bf16.msra.mxu1 %v2218_v23  ;;  %5406 = vmatprep.subr.bf16.mxu0 %v2339_v21  ;;  %v738_v23 = vld [vmem:[#allocation5 + $0x11e0] sm:$0xff] }
 0x5a9   :  { %5449 = vmatprep.subr.bf16.mxu1 %v2467_v58  ;;  %v802_v21 = vld [vmem:[#allocation5 + $0x13e0] sm:$0xff]  ;;  %v2402_v58 = vunpack.c.h.s8.bf16 %v738_v23 }
 0x5aa   :  { %v5096_v19 = vpop.f32.mrf.mxu0  ;;  %5353 = vmatmul.mubr.bf16.vlgmr.msra.gmra.mxu0 %v7923_v7  ;;  %v2530_v59 = vunpack.c.h.s8.bf16 %v802_v21  ;;  %v2522_v25 = vunpack.c.l.s8.bf16 %v802_v21  ;;  %v794_v7 = vld [vmem:[#allocation5 + $0x13a0] sm:$0xff]  ;;  %v891_v21 = vld [vmem:[#allocation5 + $0x16a8] sm:$0xff] }
 0x5ab   :  { %v5139_v32 = vpop.f32.mrf.mxu1  ;;  %5396 = vmatmul.mubr.bf16.vlgmr.msra.gmra.mxu1 %v7924_v9  ;;  %5407 = vmatpush1.bf16.msra.mxu0 %v2338_v28  ;;  %v2523_v28 = vunpack.c.l.s8.bf16 %v803_v47 }
 0x5ac   :  { %v8518_v1 = vadd.f32 %v5139_v32, %v5096_v19  ;;  %5450 = vmatpush1.bf16.msra.mxu1 %v2466_v22  ;;  %5408 = vmatprep.subr.bf16.mxu0 %v2331_v50  ;;  %v731_v22 = vld [vmem:[#allocation5 + $0x11a8] sm:$0xff]  ;;  %v730_v32 = vld [vmem:[#allocation5 + $0x11a0] sm:$0xff]  ;;  %v8520_v4 = vpop.f32.mrf.mxu0 }
 0x5ad   :  { %5451 = vmatprep.subr.bf16.mxu1 %v2459_v39  ;;  %5438 = vmatprep.mubr.bf16.mxu0 %v7925_v49  ;;  %v795_v50 = vld [vmem:[#allocation5 + $0x13a8] sm:$0xff]  ;;  %v2394_v39 = vunpack.c.l.s8.bf16 %v738_v23  ;;  %v2387_v14 = vunpack.c.h.s8.bf16 %v731_v22  ;;  %v2386_v9 = vunpack.c.h.s8.bf16 %v730_v32  ;;  %v2378_v42 = vunpack.c.l.s8.bf16 %v730_v32 }
 0x5ae   :  { %5481 = vmatprep.mubr.bf16.mxu1 %v7926_v37  ;;  %v2515_v19 = vunpack.c.h.s8.bf16 %v795_v50  ;;  %v2506_v49 = vunpack.c.l.s8.bf16 %v794_v7  ;;  %v827_v23 = vld [vmem:[#allocation5 + $0x14a8] sm:$0xff] }
 0x5af   :  { %5409 = vmatpush1.bf16.msra.mxu0 %v2330_v31  ;;  %v2514_v31 = vunpack.c.h.s8.bf16 %v794_v7  ;;  %v7929_v32 = vld [vmem:[#allocation2 + $0x54] ss:$136 sps:$4 sm:$0xff]  }
 0x5b0   :  { %5452 = vmatpush1.bf16.msra.mxu1 %v2458_v2  ;;  %5410 = vmatprep.subr.bf16.mxu0 %v2323_v11  ;;  %v2379_v2 = vunpack.c.l.s8.bf16 %v731_v22  ;;  %v2507_v11 = vunpack.c.l.s8.bf16 %v795_v50  ;;  %v2714_v50 = vunpack.c.l.s8.bf16 %v898_v17  ;;  %v7930_v7 = vld [vmem:[#allocation2 + $0x5c] ss:$136 sps:$4 sm:$0xff]  }
 0x5b1   :  { %5453 = vmatprep.subr.bf16.mxu1 %v2451_v44  ;;  %v723_v44 = vld [vmem:[#allocation5 + $0x1168] sm:$0xff] }
 0x5b2   :  { %v2371_v37 = vunpack.c.h.s8.bf16 %v723_v44  ;;  %v2363_v43 = vunpack.c.l.s8.bf16 %v723_v44  ;;  %v883_v44 = vld [vmem:[#allocation5 + $0x1668] sm:$0xff] }
 0x5b3   :  { %5411 = vmatpush1.bf16.msra.mxu0 %v2322_v46  ;;  %v2499_v46 = vunpack.c.h.s8.bf16 %v787_v30 }
 0x5b4   :  { %5454 = vmatpush1.bf16.msra.mxu1 %v2450_v41  ;;  %5412 = vmatprep.subr.bf16.mxu0 %v2315_v48  ;;  %v722_v41 = vld [vmem:[#allocation5 + $0x1160] sm:$0xff] }
 0x5b5   :  { %5455 = vmatprep.subr.bf16.mxu1 %v2443_v12  ;;  %v786_v48 = vld [vmem:[#allocation5 + $0x1360] sm:$0xff]  ;;  %v2370_v12 = vunpack.c.h.s8.bf16 %v722_v41 }
 0x5b6   :  { %v2498_v34 = vunpack.c.h.s8.bf16 %v786_v48  ;;  %v2490_v40 = vunpack.c.l.s8.bf16 %v786_v48 }
 0x5b7   :  { %5413 = vmatpush1.bf16.msra.mxu0 %v2314_v3  ;;  %v2491_v3 = vunpack.c.l.s8.bf16 %v787_v30 }
 0x5b8   :  { %5456 = vmatpush1.bf16.msra.mxu1 %v2442_v61  ;;  %5414 = vmatprep.subr.bf16.mxu0 %v2307_v52  ;;  %v715_v61 = vld [vmem:[#allocation5 + $0x1128] sm:$0xff] }
 0x5b9   :  { %5457 = vmatprep.subr.bf16.mxu1 %v2435_v53  ;;  %v779_v52 = vld [vmem:[#allocation5 + $0x1328] sm:$0xff]  ;;  %v2362_v53 = vunpack.c.l.s8.bf16 %v722_v41  ;;  %v2355_v35 = vunpack.c.h.s8.bf16 %v715_v61  ;;  %v882_v41 = vld [vmem:[#allocation5 + $0x1660] sm:$0xff] }
 0x5bb   :  { %5415 = vmatpush1.bf16.msra.mxu0 %v2306_v18  ;;  %v2483_v18 = vunpack.c.h.s8.bf16 %v779_v52 }
 0x5bc   :  { %5458 = vmatpush1.bf16.msra.mxu1 %v2434_v54  ;;  %5416 = vmatprep.subr.bf16.mxu0 %v2299_v26  ;;  %v714_v54 = vld [vmem:[#allocation5 + $0x1120] sm:$0xff] }
 0x5bd   :  { %5459 = vmatprep.subr.bf16.mxu1 %v2427_v36  ;;  %v778_v26 = vld [vmem:[#allocation5 + $0x1320] sm:$0xff]  ;;  %v2354_v36 = vunpack.c.h.s8.bf16 %v714_v54  ;;  %v2346_v5 = vunpack.c.l.s8.bf16 %v714_v54 }
 0x5be   :  { %v2482_v0 = vunpack.c.h.s8.bf16 %v778_v26  ;;  %v2474_v20 = vunpack.c.l.s8.bf16 %v778_v26  ;;  %v874_v54 = vld [vmem:[#allocation5 + $0x1620] sm:$0xff] }
 0x5bf   :  { %5417 = vmatpush1.bf16.msra.mxu0 %v2298_v55  ;;  %v2347_v55 = vunpack.c.l.s8.bf16 %v715_v61  ;;  %v875_v61 = vld [vmem:[#allocation5 + $0x1628] sm:$0xff] }
 0x5c0   :  { %5460 = vmatpush1.bf16.msra.mxu1 %v2426_v38  ;;  %5418 = vmatprep.subr.bf16.mxu0 %v2291_v8  ;;  %v2475_v38 = vunpack.c.l.s8.bf16 %v779_v52  ;;  %v835_v8 = vld [vmem:[#allocation5 + $0x14e8] sm:$0xff] }
 0x5c1   :  { %5461 = vmatprep.subr.bf16.mxu1 %v2419_v56  ;;  %v899_v56 = vld [vmem:[#allocation5 + $0x16e8] sm:$0xff] }
 0x5c3   :  { %5419 = vmatpush1.bf16.msra.mxu0 %v2290_v6  ;;  %v8522_v6 = vpop.f32.mrf.mxu0 }
 0x5c4   :  { %5462 = vmatpush1.bf16.msra.mxu1 %v2418_v60  ;;  %5420 = vmatprep.subr.bf16.mxu0 %v2283_v10  ;;  %v2595_v60 = vunpack.c.h.s8.bf16 %v835_v8  ;;  %v2723_v10 = vunpack.c.h.s8.bf16 %v899_v56 }
 0x5c5   :  { %5463 = vmatprep.subr.bf16.mxu1 %v2411_v13  ;;  %v834_v13 = vld [vmem:[#allocation5 + $0x14e0] sm:$0xff] }
 0x5c6   :  { %v2594_v47 = vunpack.c.h.s8.bf16 %v834_v13  ;;  %v2586_v22 = vunpack.c.l.s8.bf16 %v834_v13  ;;  %v930_v13 = vld [vmem:[#allocation5 + $0x17e0] sm:$0xff] }
 0x5c7   :  { %5421 = vmatpush1.bf16.msra.mxu0 %v2282_v45  ;;  %v2722_v45 = vunpack.c.h.s8.bf16 %v898_v17 }
 0x5c8   :  { %5464 = vmatpush1.bf16.msra.mxu1 %v2410_v16  ;;  %5422 = vmatprep.subr.bf16.mxu0 %v2403_v63  ;;  %v8524_v16 = vpop.f32.mrf.mxu0  ;;  %v2587_v63 = vunpack.c.l.s8.bf16 %v835_v8  ;;  %v931_v8 = vld [vmem:[#allocation5 + $0x17e8] sm:$0xff] }
 0x5c9   :  { %5465 = vmatprep.subr.bf16.mxu1 %v2531_v57  ;;  %v2715_v57 = vunpack.c.l.s8.bf16 %v899_v56 }
 0x5cb   :  { %5423 = vmatpush2.bf16.msra.mxu0 %v2402_v58 }
 0x5cc   :  { %5466 = vmatpush2.bf16.msra.mxu1 %v2530_v59  ;;  %5424 = vmatprep.subr.bf16.mxu0 %v2395_v29  ;;  %v7927_v59 = vld [vmem:[#allocation2 + $0x40] ss:$136 sps:$4 sm:$0xff]  }
 0x5cd   :  { %5467 = vmatprep.subr.bf16.mxu1 %v2523_v28  ;;  %v7928_v29 = vld [vmem:[#allocation2 + $0x48] ss:$136 sps:$4 sm:$0xff]  }
 0x5cf   :  { %5425 = vmatpush2.bf16.msra.mxu0 %v2394_v39  ;;  %v2579_v39 = vunpack.c.h.s8.bf16 %v827_v23 }
 0x5d0   :  { %5468 = vmatpush2.bf16.msra.mxu1 %v2522_v25  ;;  %5426 = vmatprep.subr.bf16.mxu0 %v2387_v14  ;;  %v2707_v25 = vunpack.c.h.s8.bf16 %v891_v21  ;;  %v826_v14 = vld [vmem:[#allocation5 + $0x14a0] sm:$0xff] }
 0x5d1   :  { %5469 = vmatprep.subr.bf16.mxu1 %v2515_v19  ;;  %v890_v19 = vld [vmem:[#allocation5 + $0x16a0] sm:$0xff]  ;;  %v2570_v30 = vunpack.c.l.s8.bf16 %v826_v14 }
 0x5d3   :  { %5427 = vmatpush2.bf16.msra.mxu0 %v2386_v9  ;;  %v2578_v9 = vunpack.c.h.s8.bf16 %v826_v14 }
 0x5d4   :  { %5470 = vmatpush2.bf16.msra.mxu1 %v2514_v31  ;;  %5428 = vmatprep.subr.bf16.mxu0 %v2379_v2  ;;  %v2706_v31 = vunpack.c.h.s8.bf16 %v890_v19  ;;  %v2699_v2 = vunpack.c.l.s8.bf16 %v891_v21 }
 0x5d5   :  { %5471 = vmatprep.subr.bf16.mxu1 %v2507_v11  ;;  %v819_v11 = vld [vmem:[#allocation5 + $0x1468] sm:$0xff] }
 0x5d7   :  { %5429 = vmatpush2.bf16.msra.mxu0 %v2378_v42  ;;  %v2698_v42 = vunpack.c.l.s8.bf16 %v890_v19 }
 0x5d8   :  { %5472 = vmatpush2.bf16.msra.mxu1 %v2506_v49  ;;  %5430 = vmatprep.subr.bf16.mxu0 %v2371_v37  ;;  %v2563_v49 = vunpack.c.h.s8.bf16 %v819_v11  ;;  %v2691_v37 = vunpack.c.h.s8.bf16 %v883_v44 }
 0x5d9   :  { %5473 = vmatprep.subr.bf16.mxu1 %v2499_v46  ;;  %v818_v46 = vld [vmem:[#allocation5 + $0x1460] sm:$0xff] }
 0x5da   :  { %v2562_v48 = vunpack.c.h.s8.bf16 %v818_v46  ;;  %v2554_v52 = vunpack.c.l.s8.bf16 %v818_v46  ;;  %v843_v46 = vld [vmem:[#allocation5 + $0x1528] sm:$0xff] }
 0x5db   :  { %5431 = vmatpush2.bf16.msra.mxu0 %v2370_v12  ;;  %v2690_v12 = vunpack.c.h.s8.bf16 %v882_v41 }
 0x5dc   :  { %5474 = vmatpush2.bf16.msra.mxu1 %v2498_v34  ;;  %5432 = vmatprep.subr.bf16.mxu0 %v2363_v43  ;;  %v2555_v34 = vunpack.c.l.s8.bf16 %v819_v11  ;;  %v2683_v43 = vunpack.c.l.s8.bf16 %v883_v44  ;;  %v850_v11 = vld [vmem:[#allocation5 + $0x1560] sm:$0xff] }
 0x5dd   :  { %5475 = vmatprep.subr.bf16.mxu1 %v2491_v3  ;;  %v811_v3 = vld [vmem:[#allocation5 + $0x1428] sm:$0xff]  ;;  %v914_v44 = vld [vmem:[#allocation5 + $0x1760] sm:$0xff] }
 0x5df   :  { %5433 = vmatpush2.bf16.msra.mxu0 %v2362_v53  ;;  %v2682_v53 = vunpack.c.l.s8.bf16 %v882_v41  ;;  %v907_v41 = vld [vmem:[#allocation5 + $0x1728] sm:$0xff] }
 0x5e0   :  { %5476 = vmatpush2.bf16.msra.mxu1 %v2490_v40  ;;  %5434 = vmatprep.subr.bf16.mxu0 %v2355_v35  ;;  %v2547_v40 = vunpack.c.h.s8.bf16 %v811_v3  ;;  %v2675_v35 = vunpack.c.h.s8.bf16 %v875_v61 }
 0x5e1   :  { %5477 = vmatprep.subr.bf16.mxu1 %v2483_v18  ;;  %v810_v18 = vld [vmem:[#allocation5 + $0x1420] sm:$0xff] }
 0x5e2   :  { %v2546_v26 = vunpack.c.h.s8.bf16 %v810_v18  ;;  %v2538_v56 = vunpack.c.l.s8.bf16 %v810_v18  ;;  %v963_v18 = vld [vmem:[#allocation5 + $0x18e8] sm:$0xff] }
 0x5e3   :  { %5435 = vmatpush2.bf16.msra.mxu0 %v2354_v36  ;;  %v2674_v36 = vunpack.c.h.s8.bf16 %v874_v54 }
 0x5e4   :  { %5478 = vmatpush2.bf16.msra.mxu1 %v2482_v0  ;;  %5436 = vmatprep.subr.bf16.mxu0 %v2347_v55  ;;  %v2539_v0 = vunpack.c.l.s8.bf16 %v811_v3  ;;  %v2667_v55 = vunpack.c.l.s8.bf16 %v875_v61  ;;  %v842_v3 = vld [vmem:[#allocation5 + $0x1520] sm:$0xff] }
 0x5e5   :  { %5479 = vmatprep.subr.bf16.mxu1 %v2475_v38  ;;  %v867_v38 = vld [vmem:[#allocation5 + $0x15e8] sm:$0xff]  ;;  %v906_v61 = vld [vmem:[#allocation5 + $0x1720] sm:$0xff] }
 0x5e7   :  { %5437 = vmatpush2.bf16.msra.mxu0 %v2346_v5  ;;  %v2666_v5 = vunpack.c.l.s8.bf16 %v874_v54  ;;  %v1027_v54 = vld [vmem:[#allocation5 + $0x1ae8] sm:$0xff] }
 0x5e8   :  { %5480 = vmatpush2.bf16.msra.mxu1 %v2474_v20  ;;  %5492 = vmatprep.subr.bf16.mxu0 %v2595_v60  ;;  %v2659_v20 = vunpack.c.h.s8.bf16 %v867_v38  ;;  %v2787_v60 = vunpack.c.h.s8.bf16 %v931_v8 }
 0x5e9   :  { %5535 = vmatprep.subr.bf16.mxu1 %v2723_v10  ;;  %v866_v10 = vld [vmem:[#allocation5 + $0x15e0] sm:$0xff] }
 0x5ea   :  { %v5182_v58 = vpop.f32.mrf.mxu0  ;;  %5439 = vmatmul.mubr.bf16.vlgmr.msra.gmra.mxu0 %v7927_v59  ;;  %v2658_v17 = vunpack.c.h.s8.bf16 %v866_v10  ;;  %v2650_v21 = vunpack.c.l.s8.bf16 %v866_v10  ;;  %v955_v10 = vld [vmem:[#allocation5 + $0x18a8] sm:$0xff] }
 0x5eb   :  { %5482 = vmatmul.mubr.bf16.vlgmr.msra.gmra.mxu1 %v7928_v29  ;;  %v8527_v28 = vadd.f32 %v5182_v58, %v8518_v1  ;;  %5493 = vmatpush1.bf16.msra.mxu0 %v2594_v47  ;;  %v2571_v1 = vunpack.c.l.s8.bf16 %v827_v23  ;;  %v2786_v47 = vunpack.c.h.s8.bf16 %v930_v13  ;;  %v923_v23 = vld [vmem:[#allocation5 + $0x17a8] sm:$0xff]  ;;  %v2778_v58 = vunpack.c.l.s8.bf16 %v930_v13 }
 0x5ec   :  { %5536 = vmatpush1.bf16.msra.mxu1 %v2722_v45  ;;  %5494 = vmatprep.subr.bf16.mxu0 %v2587_v63  ;;  %v2651_v45 = vunpack.c.l.s8.bf16 %v867_v38  ;;  %v2779_v63 = vunpack.c.l.s8.bf16 %v931_v8  ;;  %v2771_v29 = vunpack.c.h.s8.bf16 %v923_v23  ;;  %v2763_v19 = vunpack.c.l.s8.bf16 %v923_v23  ;;  %v962_v38 = vld [vmem:[#allocation5 + $0x18e0] sm:$0xff]  ;;  %v1019_v13 = vld [vmem:[#allocation5 + $0x1aa8] sm:$0xff] }
 0x5ed   :  { %5537 = vmatprep.subr.bf16.mxu1 %v2715_v57  ;;  %5524 = vmatprep.mubr.bf16.mxu0 %v7929_v32  ;;  %v859_v57 = vld [vmem:[#allocation5 + $0x15a8] sm:$0xff]  ;;  %v1026_v8 = vld [vmem:[#allocation5 + $0x1ae0] sm:$0xff]  ;;  %v2963_v23 = vunpack.c.h.s8.bf16 %v1019_v13 }
 0x5ee   :  { %5567 = vmatprep.mubr.bf16.mxu1 %v7930_v7  ;;  %v2643_v59 = vunpack.c.h.s8.bf16 %v859_v57  ;;  %v2635_v14 = vunpack.c.l.s8.bf16 %v859_v57  ;;  %v851_v32 = vld [vmem:[#allocation5 + $0x1568] sm:$0xff]  ;;  %v2835_v57 = vunpack.c.h.s8.bf16 %v955_v10 }
 0x5ef   :  { %5495 = vmatpush1.bf16.msra.mxu0 %v2586_v22  ;;  %v858_v22 = vld [vmem:[#allocation5 + $0x15a0] sm:$0xff]  ;;  %v915_v7 = vld [vmem:[#allocation5 + $0x1768] sm:$0xff] }
 0x5f0   :  { %5538 = vmatpush1.bf16.msra.mxu1 %v2714_v50  ;;  %5496 = vmatprep.subr.bf16.mxu0 %v2579_v39  ;;  %v922_v50 = vld [vmem:[#allocation5 + $0x17a0] sm:$0xff]  ;;  %v2642_v39 = vunpack.c.h.s8.bf16 %v858_v22 }
 0x5f1   :  { %5539 = vmatprep.subr.bf16.mxu1 %v2707_v25  ;;  %v2770_v25 = vunpack.c.h.s8.bf16 %v922_v50 }
 0x5f3   :  { %5497 = vmatpush1.bf16.msra.mxu0 %v2578_v9  ;;  %v2634_v9 = vunpack.c.l.s8.bf16 %v858_v22 }
 0x5f4   :  { %5540 = vmatpush1.bf16.msra.mxu1 %v2706_v31  ;;  %5498 = vmatprep.subr.bf16.mxu0 %v2571_v1  ;;  %v2762_v31 = vunpack.c.l.s8.bf16 %v922_v50  ;;  %v2627_v1 = vunpack.c.h.s8.bf16 %v851_v32 }
 0x5f5   :  { %5541 = vmatprep.subr.bf16.mxu1 %v2699_v2  ;;  %v2755_v2 = vunpack.c.h.s8.bf16 %v915_v7 }
 0x5f7   :  { %5499 = vmatpush1.bf16.msra.mxu0 %v2570_v30  ;;  %v2626_v30 = vunpack.c.h.s8.bf16 %v850_v11 }
 0x5f8   :  { %5542 = vmatpush1.bf16.msra.mxu1 %v2698_v42  ;;  %5500 = vmatprep.subr.bf16.mxu0 %v2563_v49  ;;  %v2754_v42 = vunpack.c.h.s8.bf16 %v914_v44  ;;  %v2619_v49 = vunpack.c.l.s8.bf16 %v851_v32 }
 0x5f9   :  { %5543 = vmatprep.subr.bf16.mxu1 %v2691_v37  ;;  %v2747_v37 = vunpack.c.l.s8.bf16 %v915_v7 }
 0x5fb   :  { %5501 = vmatpush1.bf16.msra.mxu0 %v2562_v48  ;;  %v2618_v48 = vunpack.c.l.s8.bf16 %v850_v11 }
 0x5fc   :  { %5544 = vmatpush1.bf16.msra.mxu1 %v2690_v12  ;;  %5502 = vmatprep.subr.bf16.mxu0 %v2555_v34  ;;  %v2746_v12 = vunpack.c.l.s8.bf16 %v914_v44  ;;  %v2611_v34 = vunpack.c.h.s8.bf16 %v843_v46 }
 0x5fd   :  { %5545 = vmatprep.subr.bf16.mxu1 %v2683_v43  ;;  %v2739_v43 = vunpack.c.h.s8.bf16 %v907_v41 }
 0x5ff   :  { %5503 = vmatpush1.bf16.msra.mxu0 %v2554_v52  ;;  %v2610_v52 = vunpack.c.h.s8.bf16 %v842_v3 }
 0x600   :  { %5546 = vmatpush1.bf16.msra.mxu1 %v2682_v53  ;;  %5504 = vmatprep.subr.bf16.mxu0 %v2547_v40  ;;  %v2738_v53 = vunpack.c.h.s8.bf16 %v906_v61  ;;  %v2603_v40 = vunpack.c.l.s8.bf16 %v843_v46 }
 0x601   :  { %5547 = vmatprep.subr.bf16.mxu1 %v2675_v35  ;;  %v2731_v35 = vunpack.c.l.s8.bf16 %v907_v41 }
 0x603   :  { %5505 = vmatpush1.bf16.msra.mxu0 %v2546_v26  ;;  %v2602_v26 = vunpack.c.l.s8.bf16 %v842_v3 }
 0x604   :  { %5548 = vmatpush1.bf16.msra.mxu1 %v2674_v36  ;;  %5506 = vmatprep.subr.bf16.mxu0 %v2539_v0  ;;  %v2730_v36 = vunpack.c.l.s8.bf16 %v906_v61  ;;  %v2851_v0 = vunpack.c.h.s8.bf16 %v963_v18 }
 0x605   :  { %5549 = vmatprep.subr.bf16.mxu1 %v2667_v55  ;;  %v2979_v55 = vunpack.c.h.s8.bf16 %v1027_v54 }
 0x607   :  { %5507 = vmatpush1.bf16.msra.mxu0 %v2538_v56  ;;  %v2850_v56 = vunpack.c.h.s8.bf16 %v962_v38 }
 0x608   :  { %5550 = vmatpush1.bf16.msra.mxu1 %v2666_v5  ;;  %5508 = vmatprep.subr.bf16.mxu0 %v2659_v20  ;;  %v2978_v5 = vunpack.c.h.s8.bf16 %v1026_v8  ;;  %v2843_v20 = vunpack.c.l.s8.bf16 %v963_v18 }
 0x609   :  { %5551 = vmatprep.subr.bf16.mxu1 %v2787_v60  ;;  %v2971_v60 = vunpack.c.l.s8.bf16 %v1027_v54 }
 0x60b   :  { %5509 = vmatpush2.bf16.msra.mxu0 %v2658_v17  ;;  %v7931_v17 = vld [vmem:[#allocation2 + $0x50] ss:$136 sps:$4 sm:$0xff]  }
 0x60c   :  { %5552 = vmatpush2.bf16.msra.mxu1 %v2786_v47  ;;  %5510 = vmatprep.subr.bf16.mxu0 %v2651_v45  ;;  %v7932_v47 = vld [vmem:[#allocation2 + $0x58] ss:$136 sps:$4 sm:$0xff]   ;;  %v2842_v45 = vunpack.c.l.s8.bf16 %v962_v38 }
 0x60d   :  { %5553 = vmatprep.subr.bf16.mxu1 %v2779_v63  ;;  %v2970_v63 = vunpack.c.l.s8.bf16 %v1026_v8 }
 0x60f   :  { %5511 = vmatpush2.bf16.msra.mxu0 %v2650_v21  ;;  %v954_v21 = vld [vmem:[#allocation5 + $0x18a0] sm:$0xff] }
 0x610   :  { %5554 = vmatpush2.bf16.msra.mxu1 %v2778_v58  ;;  %5512 = vmatprep.subr.bf16.mxu0 %v2643_v59  ;;  %v1018_v58 = vld [vmem:[#allocation5 + $0x1aa0] sm:$0xff]  ;;  %v7933_v59 = vld [vmem:[#allocation2 + $0x64] ss:$136 sps:$4 sm:$0xff]   ;;  %v2834_v22 = vunpack.c.h.s8.bf16 %v954_v21  ;;  %v2826_v32 = vunpack.c.l.s8.bf16 %v954_v21 }
 0x611   :  { %5555 = vmatprep.subr.bf16.mxu1 %v2771_v29  ;;  %v7934_v29 = vld [vmem:[#allocation2 + $0x6c] ss:$136 sps:$4 sm:$0xff]   ;;  %v2962_v50 = vunpack.c.h.s8.bf16 %v1018_v58  ;;  %v2954_v7 = vunpack.c.l.s8.bf16 %v1018_v58 }
 0x613   :  { %5513 = vmatpush2.bf16.msra.mxu0 %v2642_v39  ;;  %v2827_v39 = vunpack.c.l.s8.bf16 %v955_v10 }
 0x614   :  { %5556 = vmatpush2.bf16.msra.mxu1 %v2770_v25  ;;  %5514 = vmatprep.subr.bf16.mxu0 %v2635_v14  ;;  %v2955_v25 = vunpack.c.l.s8.bf16 %v1019_v13  ;;  %v947_v14 = vld [vmem:[#allocation5 + $0x1868] sm:$0xff] }
 0x615   :  { %5557 = vmatprep.subr.bf16.mxu1 %v2763_v19  ;;  %v1011_v19 = vld [vmem:[#allocation5 + $0x1a68] sm:$0xff] }
 0x617   :  { %5515 = vmatpush2.bf16.msra.mxu0 %v2634_v9  ;;  %v2819_v9 = vunpack.c.h.s8.bf16 %v947_v14 }
 0x618   :  { %5558 = vmatpush2.bf16.msra.mxu1 %v2762_v31  ;;  %5516 = vmatprep.subr.bf16.mxu0 %v2627_v1  ;;  %v2947_v31 = vunpack.c.h.s8.bf16 %v1011_v19  ;;  %v946_v1 = vld [vmem:[#allocation5 + $0x1860] sm:$0xff] }
 0x619   :  { %5559 = vmatprep.subr.bf16.mxu1 %v2755_v2  ;;  %v1010_v2 = vld [vmem:[#allocation5 + $0x1a60] sm:$0xff]  ;;  %v2818_v11 = vunpack.c.h.s8.bf16 %v946_v1  ;;  %v2810_v46 = vunpack.c.l.s8.bf16 %v946_v1  ;;  %v971_v1 = vld [vmem:[#allocation5 + $0x1928] sm:$0xff] }
 0x61a   :  { %v2946_v44 = vunpack.c.h.s8.bf16 %v1010_v2  ;;  %v2938_v41 = vunpack.c.l.s8.bf16 %v1010_v2  ;;  %v1035_v2 = vld [vmem:[#allocation5 + $0x1b28] sm:$0xff] }
 0x61b   :  { %5517 = vmatpush2.bf16.msra.mxu0 %v2626_v30  ;;  %v2811_v30 = vunpack.c.l.s8.bf16 %v947_v14  ;;  %v978_v14 = vld [vmem:[#allocation5 + $0x1960] sm:$0xff] }
 0x61c   :  { %5560 = vmatpush2.bf16.msra.mxu1 %v2754_v42  ;;  %5518 = vmatprep.subr.bf16.mxu0 %v2619_v49  ;;  %v2939_v42 = vunpack.c.l.s8.bf16 %v1011_v19  ;;  %v939_v49 = vld [vmem:[#allocation5 + $0x1828] sm:$0xff]  ;;  %v1042_v19 = vld [vmem:[#allocation5 + $0x1b60] sm:$0xff] }
 0x61d   :  { %5561 = vmatprep.subr.bf16.mxu1 %v2747_v37  ;;  %v1003_v37 = vld [vmem:[#allocation5 + $0x1a28] sm:$0xff] }
 0x61f   :  { %5519 = vmatpush2.bf16.msra.mxu0 %v2618_v48  ;;  %v2803_v48 = vunpack.c.h.s8.bf16 %v939_v49 }
 0x620   :  { %5562 = vmatpush2.bf16.msra.mxu1 %v2746_v12  ;;  %5520 = vmatprep.subr.bf16.mxu0 %v2611_v34  ;;  %v2931_v12 = vunpack.c.h.s8.bf16 %v1003_v37  ;;  %v938_v34 = vld [vmem:[#allocation5 + $0x1820] sm:$0xff] }
 0x621   :  { %5563 = vmatprep.subr.bf16.mxu1 %v2739_v43  ;;  %v1002_v43 = vld [vmem:[#allocation5 + $0x1a20] sm:$0xff]  ;;  %v2802_v3 = vunpack.c.h.s8.bf16 %v938_v34  ;;  %v2794_v18 = vunpack.c.l.s8.bf16 %v938_v34  ;;  %v1091_v34 = vld [vmem:[#allocation5 + $0x1ce8] sm:$0xff] }
 0x622   :  { %v2930_v61 = vunpack.c.h.s8.bf16 %v1002_v43  ;;  %v2922_v54 = vunpack.c.l.s8.bf16 %v1002_v43  ;;  %v1155_v43 = vld [vmem:[#allocation5 + $0x1ee8] sm:$0xff] }
 0x623   :  { %5521 = vmatpush2.bf16.msra.mxu0 %v2610_v52  ;;  %v2795_v52 = vunpack.c.l.s8.bf16 %v939_v49  ;;  %v970_v49 = vld [vmem:[#allocation5 + $0x1920] sm:$0xff] }
 0x624   :  { %5564 = vmatpush2.bf16.msra.mxu1 %v2738_v53  ;;  %5522 = vmatprep.subr.bf16.mxu0 %v2603_v40  ;;  %v2923_v53 = vunpack.c.l.s8.bf16 %v1003_v37  ;;  %v995_v40 = vld [vmem:[#allocation5 + $0x19e8] sm:$0xff]  ;;  %v1034_v37 = vld [vmem:[#allocation5 + $0x1b20] sm:$0xff] }
 0x625   :  { %5565 = vmatprep.subr.bf16.mxu1 %v2731_v35  ;;  %v1059_v35 = vld [vmem:[#allocation5 + $0x1be8] sm:$0xff] }
 0x627   :  { %5523 = vmatpush2.bf16.msra.mxu0 %v2602_v26  ;;  %v2915_v26 = vunpack.c.h.s8.bf16 %v995_v40 }
 0x628   :  { %5566 = vmatpush2.bf16.msra.mxu1 %v2730_v36  ;;  %5578 = vmatprep.subr.bf16.mxu0 %v2851_v0  ;;  %v3043_v36 = vunpack.c.h.s8.bf16 %v1059_v35  ;;  %v994_v0 = vld [vmem:[#allocation5 + $0x19e0] sm:$0xff] }
 0x629   :  { %5621 = vmatprep.subr.bf16.mxu1 %v2979_v55  ;;  %v1058_v55 = vld [vmem:[#allocation5 + $0x1be0] sm:$0xff]  ;;  %v2914_v38 = vunpack.c.h.s8.bf16 %v994_v0  ;;  %v2906_v10 = vunpack.c.l.s8.bf16 %v994_v0  ;;  %v1083_v0 = vld [vmem:[#allocation5 + $0x1ca8] sm:$0xff] }
 0x62a   :  { %5525 = vmatmul.mubr.bf16.vlgmr.msra.gmra.mxu0 %v7931_v17  ;;  %v3042_v8 = vunpack.c.h.s8.bf16 %v1058_v55  ;;  %v3034_v13 = vunpack.c.l.s8.bf16 %v1058_v55  ;;  %v1147_v55 = vld [vmem:[#allocation5 + $0x1ea8] sm:$0xff] }
 0x62b   :  { %5568 = vmatmul.mubr.bf16.vlgmr.msra.gmra.mxu1 %v7932_v47  ;;  %5579 = vmatpush1.bf16.msra.mxu0 %v2850_v56  ;;  %v2907_v56 = vunpack.c.l.s8.bf16 %v995_v40  ;;  %v1090_v40 = vld [vmem:[#allocation5 + $0x1ce0] sm:$0xff] }
 0x62c   :  { %5622 = vmatpush1.bf16.msra.mxu1 %v2978_v5  ;;  %5580 = vmatprep.subr.bf16.mxu0 %v2843_v20  ;;  %v3035_v5 = vunpack.c.l.s8.bf16 %v1059_v35  ;;  %v987_v20 = vld [vmem:[#allocation5 + $0x19a8] sm:$0xff]  ;;  %v1154_v35 = vld [vmem:[#allocation5 + $0x1ee0] sm:$0xff] }
 0x62d   :  { %5623 = vmatprep.subr.bf16.mxu1 %v2971_v60  ;;  %5610 = vmatprep.mubr.bf16.mxu0 %v7933_v59  ;;  %v1051_v60 = vld [vmem:[#allocation5 + $0x1ba8] sm:$0xff]  ;;  %v2899_v17 = vunpack.c.h.s8.bf16 %v987_v20  ;;  %v2891_v21 = vunpack.c.l.s8.bf16 %v987_v20  ;;  %v3091_v20 = vunpack.c.h.s8.bf16 %v1083_v0 }
 0x62e   :  { %5653 = vmatprep.mubr.bf16.mxu1 %v7934_v29  ;;  %v3027_v47 = vunpack.c.h.s8.bf16 %v1051_v60  ;;  %v3019_v58 = vunpack.c.l.s8.bf16 %v1051_v60  ;;  %v979_v59 = vld [vmem:[#allocation5 + $0x1968] sm:$0xff]  ;;  %v3219_v60 = vunpack.c.h.s8.bf16 %v1147_v55 }
 0x62f   :  { %5581 = vmatpush1.bf16.msra.mxu0 %v2842_v45  ;;  %v986_v45 = vld [vmem:[#allocation5 + $0x19a0] sm:$0xff]  ;;  %v1043_v29 = vld [vmem:[#allocation5 + $0x1b68] sm:$0xff] }
 0x630   :  { %5624 = vmatpush1.bf16.msra.mxu1 %v2970_v63  ;;  %5582 = vmatprep.subr.bf16.mxu0 %v2835_v57  ;;  %v1050_v63 = vld [vmem:[#allocation5 + $0x1ba0] sm:$0xff]  ;;  %v2898_v57 = vunpack.c.h.s8.bf16 %v986_v45 }
 0x631   :  { %5625 = vmatprep.subr.bf16.mxu1 %v2963_v23  ;;  %v3026_v23 = vunpack.c.h.s8.bf16 %v1050_v63 }
 0x633   :  { %5583 = vmatpush1.bf16.msra.mxu0 %v2834_v22  ;;  %v2890_v22 = vunpack.c.l.s8.bf16 %v986_v45 }
 0x634   :  { %5626 = vmatpush1.bf16.msra.mxu1 %v2962_v50  ;;  %5584 = vmatprep.subr.bf16.mxu0 %v2827_v39  ;;  %v3018_v50 = vunpack.c.l.s8.bf16 %v1050_v63  ;;  %v2883_v39 = vunpack.c.h.s8.bf16 %v979_v59 }
 0x635   :  { %5627 = vmatprep.subr.bf16.mxu1 %v2955_v25  ;;  %v3011_v25 = vunpack.c.h.s8.bf16 %v1043_v29 }
 0x637   :  { %5585 = vmatpush1.bf16.msra.mxu0 %v2826_v32  ;;  %v2882_v32 = vunpack.c.h.s8.bf16 %v978_v14 }
 0x638   :  { %5628 = vmatpush1.bf16.msra.mxu1 %v2954_v7  ;;  %5586 = vmatprep.subr.bf16.mxu0 %v2819_v9  ;;  %v3010_v7 = vunpack.c.h.s8.bf16 %v1042_v19  ;;  %v2875_v9 = vunpack.c.l.s8.bf16 %v979_v59 }
 0x639   :  { %5629 = vmatprep.subr.bf16.mxu1 %v2947_v31  ;;  %v3003_v31 = vunpack.c.l.s8.bf16 %v1043_v29 }
 0x63b   :  { %5587 = vmatpush1.bf16.msra.mxu0 %v2818_v11  ;;  %v2874_v11 = vunpack.c.l.s8.bf16 %v978_v14 }
 0x63c   :  { %5630 = vmatpush1.bf16.msra.mxu1 %v2946_v44  ;;  %5588 = vmatprep.subr.bf16.mxu0 %v2811_v30  ;;  %v3002_v44 = vunpack.c.l.s8.bf16 %v1042_v19  ;;  %v2867_v30 = vunpack.c.h.s8.bf16 %v971_v1 }
 0x63d   :  { %5631 = vmatprep.subr.bf16.mxu1 %v2939_v42  ;;  %v2995_v42 = vunpack.c.h.s8.bf16 %v1035_v2 }
 0x63f   :  { %5589 = vmatpush1.bf16.msra.mxu0 %v2810_v46  ;;  %v2866_v46 = vunpack.c.h.s8.bf16 %v970_v49 }
 0x640   :  { %5632 = vmatpush1.bf16.msra.mxu1 %v2938_v41  ;;  %5590 = vmatprep.subr.bf16.mxu0 %v2803_v48  ;;  %v2994_v41 = vunpack.c.h.s8.bf16 %v1034_v37  ;;  %v2859_v48 = vunpack.c.l.s8.bf16 %v971_v1 }
 0x641   :  { %5633 = vmatprep.subr.bf16.mxu1 %v2931_v12  ;;  %v2987_v12 = vunpack.c.l.s8.bf16 %v1035_v2 }
 0x643   :  { %5591 = vmatpush1.bf16.msra.mxu0 %v2802_v3  ;;  %v2858_v3 = vunpack.c.l.s8.bf16 %v970_v49 }
 0x644   :  { %5634 = vmatpush1.bf16.msra.mxu1 %v2930_v61  ;;  %5592 = vmatprep.subr.bf16.mxu0 %v2795_v52  ;;  %v2986_v61 = vunpack.c.l.s8.bf16 %v1034_v37  ;;  %v3107_v52 = vunpack.c.h.s8.bf16 %v1091_v34 }
 0x645   :  { %5635 = vmatprep.subr.bf16.mxu1 %v2923_v53  ;;  %v3235_v53 = vunpack.c.h.s8.bf16 %v1155_v43 }
 0x647   :  { %5593 = vmatpush1.bf16.msra.mxu0 %v2794_v18  ;;  %v3106_v18 = vunpack.c.h.s8.bf16 %v1090_v40 }
 0x648   :  { %5636 = vmatpush1.bf16.msra.mxu1 %v2922_v54  ;;  %5594 = vmatprep.subr.bf16.mxu0 %v2915_v26  ;;  %v3234_v54 = vunpack.c.h.s8.bf16 %v1154_v35  ;;  %v3099_v26 = vunpack.c.l.s8.bf16 %v1091_v34 }
 0x649   :  { %5637 = vmatprep.subr.bf16.mxu1 %v3043_v36  ;;  %v3227_v36 = vunpack.c.l.s8.bf16 %v1155_v43 }
 0x64b   :  { %5595 = vmatpush2.bf16.msra.mxu0 %v2914_v38  ;;  %v7935_v38 = vld [vmem:[#allocation2 + $0x60] ss:$136 sps:$4 sm:$0xff]  }
 0x64c   :  { %5638 = vmatpush2.bf16.msra.mxu1 %v3042_v8  ;;  %5596 = vmatprep.subr.bf16.mxu0 %v2907_v56  ;;  %v7936_v8 = vld [vmem:[#allocation2 + $0x68] ss:$136 sps:$4 sm:$0xff]   ;;  %v3098_v56 = vunpack.c.l.s8.bf16 %v1090_v40 }
 0x64d   :  { %5639 = vmatprep.subr.bf16.mxu1 %v3035_v5  ;;  %v3226_v5 = vunpack.c.l.s8.bf16 %v1154_v35 }
 0x64f   :  { %5597 = vmatpush2.bf16.msra.mxu0 %v2906_v10  ;;  %v1082_v10 = vld [vmem:[#allocation5 + $0x1ca0] sm:$0xff] }
 0x650   :  { %5640 = vmatpush2.bf16.msra.mxu1 %v3034_v13  ;;  %5598 = vmatprep.subr.bf16.mxu0 %v2899_v17  ;;  %v1146_v13 = vld [vmem:[#allocation5 + $0x1ea0] sm:$0xff]  ;;  %v3090_v45 = vunpack.c.h.s8.bf16 %v1082_v10  ;;  %v3082_v59 = vunpack.c.l.s8.bf16 %v1082_v10 }
 0x651   :  { %5641 = vmatprep.subr.bf16.mxu1 %v3027_v47  ;;  %v7937_v17 = vld [vmem:[#allocation2 + $0x74] ss:$136 sps:$4 sm:$0xff]   ;;  %v3218_v63 = vunpack.c.h.s8.bf16 %v1146_v13  ;;  %v3210_v29 = vunpack.c.l.s8.bf16 %v1146_v13 }
 0x652   :  { %v7938_v47 = vld [vmem:[#allocation2 + $0x7c] ss:$136 sps:$4 sm:$0xff]  }
 0x653   :  { %5599 = vmatpush2.bf16.msra.mxu0 %v2898_v57  ;;  %v3083_v57 = vunpack.c.l.s8.bf16 %v1083_v0 }
 0x654   :  { %5642 = vmatpush2.bf16.msra.mxu1 %v3026_v23  ;;  %5600 = vmatprep.subr.bf16.mxu0 %v2891_v21  ;;  %v3211_v23 = vunpack.c.l.s8.bf16 %v1147_v55  ;;  %v1075_v21 = vld [vmem:[#allocation5 + $0x1c68] sm:$0xff] }
 0x655   :  { %5643 = vmatprep.subr.bf16.mxu1 %v3019_v58  ;;  %v1139_v58 = vld [vmem:[#allocation5 + $0x1e68] sm:$0xff] }
 0x657   :  { %5601 = vmatpush2.bf16.msra.mxu0 %v2890_v22  ;;  %v3075_v22 = vunpack.c.h.s8.bf16 %v1075_v21 }
 0x658   :  { %5644 = vmatpush2.bf16.msra.mxu1 %v3018_v50  ;;  %5602 = vmatprep.subr.bf16.mxu0 %v2883_v39  ;;  %v3203_v50 = vunpack.c.h.s8.bf16 %v1139_v58  ;;  %v1074_v39 = vld [vmem:[#allocation5 + $0x1c60] sm:$0xff] }
 0x659   :  { %5645 = vmatprep.subr.bf16.mxu1 %v3011_v25  ;;  %v1138_v25 = vld [vmem:[#allocation5 + $0x1e60] sm:$0xff]  ;;  %v3074_v14 = vunpack.c.h.s8.bf16 %v1074_v39  ;;  %v3066_v1 = vunpack.c.l.s8.bf16 %v1074_v39  ;;  %v1099_v39 = vld [vmem:[#allocation5 + $0x1d28] sm:$0xff] }
 0x65a   :  { %v3202_v19 = vunpack.c.h.s8.bf16 %v1138_v25  ;;  %v3194_v2 = vunpack.c.l.s8.bf16 %v1138_v25  ;;  %v1163_v25 = vld [vmem:[#allocation5 + $0x1f28] sm:$0xff] }
 0x65b   :  { %5603 = vmatpush2.bf16.msra.mxu0 %v2882_v32  ;;  %v3067_v32 = vunpack.c.l.s8.bf16 %v1075_v21  ;;  %v1106_v21 = vld [vmem:[#allocation5 + $0x1d60] sm:$0xff] }
 0x65c   :  { %5646 = vmatpush2.bf16.msra.mxu1 %v3010_v7  ;;  %5604 = vmatprep.subr.bf16.mxu0 %v2875_v9  ;;  %v3195_v7 = vunpack.c.l.s8.bf16 %v1139_v58  ;;  %v1067_v9 = vld [vmem:[#allocation5 + $0x1c28] sm:$0xff]  ;;  %v1170_v58 = vld [vmem:[#allocation5 + $0x1f60] sm:$0xff] }
 0x65d   :  { %5647 = vmatprep.subr.bf16.mxu1 %v3003_v31  ;;  %v1131_v31 = vld [vmem:[#allocation5 + $0x1e28] sm:$0xff] }
 0x65f   :  { %5605 = vmatpush2.bf16.msra.mxu0 %v2874_v11  ;;  %v3059_v11 = vunpack.c.h.s8.bf16 %v1067_v9 }
 0x660   :  { %5648 = vmatpush2.bf16.msra.mxu1 %v3002_v44  ;;  %5606 = vmatprep.subr.bf16.mxu0 %v2867_v30  ;;  %v3187_v44 = vunpack.c.h.s8.bf16 %v1131_v31  ;;  %v1066_v30 = vld [vmem:[#allocation5 + $0x1c20] sm:$0xff] }
 0x661   :  { %5649 = vmatprep.subr.bf16.mxu1 %v2995_v42  ;;  %v1130_v42 = vld [vmem:[#allocation5 + $0x1e20] sm:$0xff]  ;;  %v3058_v49 = vunpack.c.h.s8.bf16 %v1066_v30  ;;  %v3050_v34 = vunpack.c.l.s8.bf16 %v1066_v30  ;;  %v1219_v30 = vld [vmem:[#allocation5 + $0x20e8] sm:$0xff] }
 0x662   :  { %v3186_v37 = vunpack.c.h.s8.bf16 %v1130_v42  ;;  %v3178_v43 = vunpack.c.l.s8.bf16 %v1130_v42  ;;  %v197_v42 = vld [vmem:[#allocation5 + $0xf8] sm:$0xff] }
 0x663   :  { %5607 = vmatpush2.bf16.msra.mxu0 %v2866_v46  ;;  %v3051_v46 = vunpack.c.l.s8.bf16 %v1067_v9  ;;  %v1098_v9 = vld [vmem:[#allocation5 + $0x1d20] sm:$0xff] }
 0x664   :  { %5650 = vmatpush2.bf16.msra.mxu1 %v2994_v41  ;;  %5608 = vmatprep.subr.bf16.mxu0 %v2859_v48  ;;  %v3179_v41 = vunpack.c.l.s8.bf16 %v1131_v31  ;;  %v1123_v48 = vld [vmem:[#allocation5 + $0x1de8] sm:$0xff]  ;;  %v1162_v31 = vld [vmem:[#allocation5 + $0x1f20] sm:$0xff] }
 0x665   :  { %5651 = vmatprep.subr.bf16.mxu1 %v2987_v12  ;;  %v1187_v12 = vld [vmem:[#allocation5 + $0x1fe8] sm:$0xff] }
 0x667   :  { %5609 = vmatpush2.bf16.msra.mxu0 %v2858_v3  ;;  %v3171_v3 = vunpack.c.h.s8.bf16 %v1123_v48 }
 0x668   :  { %5652 = vmatpush2.bf16.msra.mxu1 %v2986_v61  ;;  %5664 = vmatprep.subr.bf16.mxu0 %v3107_v52  ;;  %v3299_v61 = vunpack.c.h.s8.bf16 %v1187_v12  ;;  %v1122_v52 = vld [vmem:[#allocation5 + $0x1de0] sm:$0xff] }
 0x669   :  { %5707 = vmatprep.subr.bf16.mxu1 %v3235_v53  ;;  %v1186_v53 = vld [vmem:[#allocation5 + $0x1fe0] sm:$0xff]  ;;  %v3170_v40 = vunpack.c.h.s8.bf16 %v1122_v52  ;;  %v3162_v0 = vunpack.c.l.s8.bf16 %v1122_v52  ;;  %v1211_v52 = vld [vmem:[#allocation5 + $0x20a8] sm:$0xff] }
 0x66a   :  { %5611 = vmatmul.mubr.bf16.vlgmr.msra.gmra.mxu0 %v7935_v38  ;;  %v3298_v35 = vunpack.c.h.s8.bf16 %v1186_v53  ;;  %v3290_v55 = vunpack.c.l.s8.bf16 %v1186_v53  ;;  %v189_v53 = vld [vmem:[#allocation5 + $0xb8] sm:$0xff] }
 0x66b   :  { %5654 = vmatmul.mubr.bf16.vlgmr.msra.gmra.mxu1 %v7936_v8  ;;  %5665 = vmatpush1.bf16.msra.mxu0 %v3106_v18  ;;  %v3163_v18 = vunpack.c.l.s8.bf16 %v1123_v48  ;;  %v1218_v48 = vld [vmem:[#allocation5 + $0x20e0] sm:$0xff] }
 0x66c   :  { %5708 = vmatpush1.bf16.msra.mxu1 %v3234_v54  ;;  %5666 = vmatprep.subr.bf16.mxu0 %v3099_v26  ;;  %v3291_v54 = vunpack.c.l.s8.bf16 %v1187_v12  ;;  %v1115_v26 = vld [vmem:[#allocation5 + $0x1da8] sm:$0xff]  ;;  %v196_v12 = vld [vmem:[#allocation5 + $0xf0] sm:$0xff] }
 0x66d   :  { %5709 = vmatprep.subr.bf16.mxu1 %v3227_v36  ;;  %5696 = vmatprep.mubr.bf16.mxu0 %v7937_v17  ;;  %v1179_v36 = vld [vmem:[#allocation5 + $0x1fa8] sm:$0xff]  ;;  %v3155_v38 = vunpack.c.h.s8.bf16 %v1115_v26  ;;  %v3147_v10 = vunpack.c.l.s8.bf16 %v1115_v26  ;;  %v3347_v26 = vunpack.c.h.s8.bf16 %v1211_v52 }
 0x66e   :  { %5739 = vmatprep.mubr.bf16.mxu1 %v7938_v47  ;;  %v3283_v8 = vunpack.c.h.s8.bf16 %v1179_v36  ;;  %v3275_v13 = vunpack.c.l.s8.bf16 %v1179_v36  ;;  %v1107_v17 = vld [vmem:[#allocation5 + $0x1d68] sm:$0xff]  ;;  %v1301_v36 = vunpack.c.h.s8.bf16 %v189_v53 }
 0x66f   :  { %5667 = vmatpush1.bf16.msra.mxu0 %v3098_v56  ;;  %v1114_v56 = vld [vmem:[#allocation5 + $0x1da0] sm:$0xff]  ;;  %v1171_v47 = vld [vmem:[#allocation5 + $0x1f68] sm:$0xff] }
 0x670   :  { %5710 = vmatpush1.bf16.msra.mxu1 %v3226_v5  ;;  %5668 = vmatprep.subr.bf16.mxu0 %v3091_v20  ;;  %v1178_v5 = vld [vmem:[#allocation5 + $0x1fa0] sm:$0xff]  ;;  %v3154_v20 = vunpack.c.h.s8.bf16 %v1114_v56 }
 0x671   :  { %5711 = vmatprep.subr.bf16.mxu1 %v3219_v60  ;;  %v3282_v60 = vunpack.c.h.s8.bf16 %v1178_v5 }
 0x673   :  { %5669 = vmatpush1.bf16.msra.mxu0 %v3090_v45  ;;  %v3146_v45 = vunpack.c.l.s8.bf16 %v1114_v56 }
 0x674   :  { %5712 = vmatpush1.bf16.msra.mxu1 %v3218_v63  ;;  %5670 = vmatprep.subr.bf16.mxu0 %v3083_v57  ;;  %v3274_v63 = vunpack.c.l.s8.bf16 %v1178_v5  ;;  %v3139_v57 = vunpack.c.h.s8.bf16 %v1107_v17 }
 0x675   :  { %5713 = vmatprep.subr.bf16.mxu1 %v3211_v23  ;;  %v3267_v23 = vunpack.c.h.s8.bf16 %v1171_v47 }
 0x677   :  { %5671 = vmatpush1.bf16.msra.mxu0 %v3082_v59  ;;  %v3138_v59 = vunpack.c.h.s8.bf16 %v1106_v21 }
 0x678   :  { %5714 = vmatpush1.bf16.msra.mxu1 %v3210_v29  ;;  %5672 = vmatprep.subr.bf16.mxu0 %v3075_v22  ;;  %v3266_v29 = vunpack.c.h.s8.bf16 %v1170_v58  ;;  %v3131_v22 = vunpack.c.l.s8.bf16 %v1107_v17 }
 0x679   :  { %5715 = vmatprep.subr.bf16.mxu1 %v3203_v50  ;;  %v3259_v50 = vunpack.c.l.s8.bf16 %v1171_v47 }
 0x67b   :  { %5673 = vmatpush1.bf16.msra.mxu0 %v3074_v14  ;;  %v3130_v14 = vunpack.c.l.s8.bf16 %v1106_v21 }
 0x67c   :  { %5716 = vmatpush1.bf16.msra.mxu1 %v3202_v19  ;;  %5674 = vmatprep.subr.bf16.mxu0 %v3067_v32  ;;  %v3258_v19 = vunpack.c.l.s8.bf16 %v1170_v58  ;;  %v3123_v32 = vunpack.c.h.s8.bf16 %v1099_v39 }
 0x67d   :  { %5717 = vmatprep.subr.bf16.mxu1 %v3195_v7  ;;  %v3251_v7 = vunpack.c.h.s8.bf16 %v1163_v25 }
 0x67f   :  { %5675 = vmatpush1.bf16.msra.mxu0 %v3066_v1  ;;  %v3122_v1 = vunpack.c.h.s8.bf16 %v1098_v9 }
 0x680   :  { %5718 = vmatpush1.bf16.msra.mxu1 %v3194_v2  ;;  %5676 = vmatprep.subr.bf16.mxu0 %v3059_v11  ;;  %v3250_v2 = vunpack.c.h.s8.bf16 %v1162_v31  ;;  %v3115_v11 = vunpack.c.l.s8.bf16 %v1099_v39 }
 0x681   :  { %5719 = vmatprep.subr.bf16.mxu1 %v3187_v44  ;;  %v3243_v44 = vunpack.c.l.s8.bf16 %v1163_v25 }
 0x683   :  { %5677 = vmatpush1.bf16.msra.mxu0 %v3058_v49  ;;  %v3114_v49 = vunpack.c.l.s8.bf16 %v1098_v9 }
 0x684   :  { %5720 = vmatpush1.bf16.msra.mxu1 %v3186_v37  ;;  %5678 = vmatprep.subr.bf16.mxu0 %v3051_v46  ;;  %v3242_v37 = vunpack.c.l.s8.bf16 %v1162_v31  ;;  %v3363_v46 = vunpack.c.h.s8.bf16 %v1219_v30 }
 0x685   :  { %5721 = vmatprep.subr.bf16.mxu1 %v3179_v41  ;;  %v1317_v41 = vunpack.c.h.s8.bf16 %v197_v42 }
 0x687   :  { %5679 = vmatpush1.bf16.msra.mxu0 %v3050_v34  ;;  %v3362_v34 = vunpack.c.h.s8.bf16 %v1218_v48 }
 0x688   :  { %5722 = vmatpush1.bf16.msra.mxu1 %v3178_v43  ;;  %5680 = vmatprep.subr.bf16.mxu0 %v3171_v3  ;;  %v1316_v43 = vunpack.c.h.s8.bf16 %v196_v12  ;;  %v3355_v3 = vunpack.c.l.s8.bf16 %v1219_v30 }
 0x689   :  { %5723 = vmatprep.subr.bf16.mxu1 %v3299_v61  ;;  %v1309_v61 = vunpack.c.l.s8.bf16 %v197_v42 }
 0x68b   :  { %5681 = vmatpush2.bf16.msra.mxu0 %v3170_v40  ;;  %v7939_v40 = vld [vmem:[#allocation2 + $0x70] ss:$136 sps:$4 sm:$0xff]  }
 0x68c   :  { %5724 = vmatpush2.bf16.msra.mxu1 %v3298_v35  ;;  %5682 = vmatprep.subr.bf16.mxu0 %v3163_v18  ;;  %v7940_v35 = vld [vmem:[#allocation2 + $0x78] ss:$136 sps:$4 sm:$0xff]   ;;  %v3354_v18 = vunpack.c.l.s8.bf16 %v1218_v48 }
 0x68d   :  { %5725 = vmatprep.subr.bf16.mxu1 %v3291_v54  ;;  %v1308_v54 = vunpack.c.l.s8.bf16 %v196_v12 }
 0x68f   :  { %5683 = vmatpush2.bf16.msra.mxu0 %v3162_v0  ;;  %v1210_v0 = vld [vmem:[#allocation5 + $0x20a0] sm:$0xff] }
 0x690   :  { %5726 = vmatpush2.bf16.msra.mxu1 %v3290_v55  ;;  %5684 = vmatprep.subr.bf16.mxu0 %v3155_v38  ;;  %v188_v55 = vld [vmem:[#allocation5 + $0xb0] sm:$0xff]  ;;  %v3346_v56 = vunpack.c.h.s8.bf16 %v1210_v0  ;;  %v3338_v17 = vunpack.c.l.s8.bf16 %v1210_v0 }
 0x691   :  { %5727 = vmatprep.subr.bf16.mxu1 %v3283_v8  ;;  %v7941_v38 = vld [vmem:[#allocation2 + $0x84] ss:$136 sps:$4 sm:$0xff]   ;;  %v1300_v5 = vunpack.c.h.s8.bf16 %v188_v55  ;;  %v1292_v47 = vunpack.c.l.s8.bf16 %v188_v55 }
 0x692   :  { %v7942_v8 = vld [vmem:[#allocation2 + $0x4] ss:$136 sps:$4 sm:$0xff]  }
 0x693   :  { %5685 = vmatpush2.bf16.msra.mxu0 %v3154_v20  ;;  %v3339_v20 = vunpack.c.l.s8.bf16 %v1211_v52 }
 0x694   :  { %5728 = vmatpush2.bf16.msra.mxu1 %v3282_v60  ;;  %5686 = vmatprep.subr.bf16.mxu0 %v3147_v10  ;;  %v1293_v60 = vunpack.c.l.s8.bf16 %v189_v53  ;;  %v1203_v10 = vld [vmem:[#allocation5 + $0x2068] sm:$0xff] }
 0x695   :  { %5729 = vmatprep.subr.bf16.mxu1 %v3275_v13  ;;  %v181_v13 = vld [vmem:[#allocation5 + $0x78] sm:$0xff] }
 0x697   :  { %5687 = vmatpush2.bf16.msra.mxu0 %v3146_v45  ;;  %v3331_v45 = vunpack.c.h.s8.bf16 %v1203_v10 }
 0x698   :  { %5730 = vmatpush2.bf16.msra.mxu1 %v3274_v63  ;;  %5688 = vmatprep.subr.bf16.mxu0 %v3139_v57  ;;  %v1285_v63 = vunpack.c.h.s8.bf16 %v181_v13  ;;  %v1202_v57 = vld [vmem:[#allocation5 + $0x2060] sm:$0xff] }
 0x699   :  { %5731 = vmatprep.subr.bf16.mxu1 %v3267_v23  ;;  %v180_v23 = vld [vmem:[#allocation5 + $0x70] sm:$0xff]  ;;  %v3330_v21 = vunpack.c.h.s8.bf16 %v1202_v57  ;;  %v3322_v39 = vunpack.c.l.s8.bf16 %v1202_v57  ;;  %v1227_v57 = vld [vmem:[#allocation5 + $0x2128] sm:$0xff] }
 0x69a   :  { %v1284_v58 = vunpack.c.h.s8.bf16 %v180_v23  ;;  %v1276_v25 = vunpack.c.l.s8.bf16 %v180_v23  ;;  %v205_v23 = vld [vmem:[#allocation5 + $0x138] sm:$0xff] }
 0x69b   :  { %5689 = vmatpush2.bf16.msra.mxu0 %v3138_v59  ;;  %v3323_v59 = vunpack.c.l.s8.bf16 %v1203_v10  ;;  %v1234_v10 = vld [vmem:[#allocation5 + $0x2160] sm:$0xff] }
 0x69c   :  { %5732 = vmatpush2.bf16.msra.mxu1 %v3266_v29  ;;  %5690 = vmatprep.subr.bf16.mxu0 %v3131_v22  ;;  %v1277_v29 = vunpack.c.l.s8.bf16 %v181_v13  ;;  %v1195_v22 = vld [vmem:[#allocation5 + $0x2028] sm:$0xff]  ;;  %v212_v13 = vld [vmem:[#allocation5 + $0x170] sm:$0xff] }
 0x69d   :  { %5733 = vmatprep.subr.bf16.mxu1 %v3259_v50  ;;  %v173_v50 = vld [vmem:[#allocation5 + $0x38] sm:$0xff] }
 0x69f   :  { %5691 = vmatpush2.bf16.msra.mxu0 %v3130_v14  ;;  %v3315_v14 = vunpack.c.h.s8.bf16 %v1195_v22 }
 0x6a0   :  { %5734 = vmatpush2.bf16.msra.mxu1 %v3258_v19  ;;  %5692 = vmatprep.subr.bf16.mxu0 %v3123_v32  ;;  %v1269_v19 = vunpack.c.h.s8.bf16 %v173_v50  ;;  %v1194_v32 = vld [vmem:[#allocation5 + $0x2020] sm:$0xff] }
 0x6a1   :  { %5735 = vmatprep.subr.bf16.mxu1 %v3251_v7  ;;  %v172_v7 = vld [vmem:[#allocation5 + $0x30] sm:$0xff]  ;;  %v3314_v9 = vunpack.c.h.s8.bf16 %v1194_v32  ;;  %v3306_v30 = vunpack.c.l.s8.bf16 %v1194_v32  ;;  %v261_v32 = vld [vmem:[#allocation5 + $0x2f8] sm:$0xff] }
 0x6a2   :  { %v1268_v31 = vunpack.c.h.s8.bf16 %v172_v7  ;;  %v1260_v42 = vunpack.c.l.s8.bf16 %v172_v7  ;;  %v325_v7 = vld [vmem:[#allocation5 + $0x4f8] sm:$0xff] }
 0x6a3   :  { %5693 = vmatpush2.bf16.msra.mxu0 %v3122_v1  ;;  %v3307_v1 = vunpack.c.l.s8.bf16 %v1195_v22  ;;  %v1226_v22 = vld [vmem:[#allocation5 + $0x2120] sm:$0xff] }
 0x6a4   :  { %5736 = vmatpush2.bf16.msra.mxu1 %v3250_v2  ;;  %5694 = vmatprep.subr.bf16.mxu0 %v3115_v11  ;;  %v1261_v2 = vunpack.c.l.s8.bf16 %v173_v50  ;;  %v1251_v11 = vld [vmem:[#allocation5 + $0x21e8] sm:$0xff]  ;;  %v204_v50 = vld [vmem:[#allocation5 + $0x130] sm:$0xff] }
 0x6a5   :  { %5737 = vmatprep.subr.bf16.mxu1 %v3243_v44  ;;  %v229_v44 = vld [vmem:[#allocation5 + $0x1f8] sm:$0xff] }
 0x6a7   :  { %5695 = vmatpush2.bf16.msra.mxu0 %v3114_v49  ;;  %v3427_v49 = vunpack.c.h.s8.bf16 %v1251_v11 }
 0x6a8   :  { %5738 = vmatpush2.bf16.msra.mxu1 %v3242_v37  ;;  %5750 = vmatprep.subr.bf16.mxu0 %v3363_v46  ;;  %v1381_v37 = vunpack.c.h.s8.bf16 %v229_v44  ;;  %v1250_v46 = vld [vmem:[#allocation5 + $0x21e0] sm:$0xff] }
 0x6a9   :  { %5793 = vmatprep.subr.bf16.mxu1 %v1317_v41  ;;  %v228_v41 = vld [vmem:[#allocation5 + $0x1f0] sm:$0xff]  ;;  %v3426_v48 = vunpack.c.h.s8.bf16 %v1250_v46  ;;  %v3418_v52 = vunpack.c.l.s8.bf16 %v1250_v46  ;;  %v253_v46 = vld [vmem:[#allocation5 + $0x2b8] sm:$0xff] }
 0x6aa   :  { %5697 = vmatmul.mubr.bf16.vlgmr.msra.gmra.mxu0 %v7939_v40  ;;  %v1380_v12 = vunpack.c.h.s8.bf16 %v228_v41  ;;  %v1372_v53 = vunpack.c.l.s8.bf16 %v228_v41  ;;  %v317_v41 = vld [vmem:[#allocation5 + $0x4b8] sm:$0xff] }
 0x6ab   :  { %5740 = vmatmul.mubr.bf16.vlgmr.msra.gmra.mxu1 %v7940_v35  ;;  %5751 = vmatpush1.bf16.msra.mxu0 %v3362_v34  ;;  %v3419_v34 = vunpack.c.l.s8.bf16 %v1251_v11  ;;  %v260_v11 = vld [vmem:[#allocation5 + $0x2f0] sm:$0xff] }
 0x6ac   :  { %5794 = vmatpush1.bf16.msra.mxu1 %v1316_v43  ;;  %5752 = vmatprep.subr.bf16.mxu0 %v3355_v3  ;;  %v1373_v43 = vunpack.c.l.s8.bf16 %v229_v44  ;;  %v1243_v3 = vld [vmem:[#allocation5 + $0x21a8] sm:$0xff]  ;;  %v324_v44 = vld [vmem:[#allocation5 + $0x4f0] sm:$0xff] }
 0x6ad   :  { %5795 = vmatprep.subr.bf16.mxu1 %v1309_v61  ;;  %5782 = vmatprep.mubr.bf16.mxu0 %v7941_v38  ;;  %v221_v61 = vld [vmem:[#allocation5 + $0x1b8] sm:$0xff]  ;;  %v3411_v40 = vunpack.c.h.s8.bf16 %v1243_v3  ;;  %v3403_v0 = vunpack.c.l.s8.bf16 %v1243_v3  ;;  %v1235_v38 = vld [vmem:[#allocation5 + $0x2168] sm:$0xff]  ;;  %v1429_v3 = vunpack.c.h.s8.bf16 %v253_v46 }
 0x6ae   :  { %5825 = vmatprep.mubr.bf16.mxu1 %v7942_v8  ;;  %v1365_v35 = vunpack.c.h.s8.bf16 %v221_v61  ;;  %v1357_v55 = vunpack.c.l.s8.bf16 %v221_v61  ;;  %v213_v8 = vld [vmem:[#allocation5 + $0x178] sm:$0xff]  ;;  %v1557_v61 = vunpack.c.h.s8.bf16 %v317_v41 }
 0x6af   :  { %5753 = vmatpush1.bf16.msra.mxu0 %v3354_v18  ;;  %v1242_v18 = vld [vmem:[#allocation5 + $0x21a0] sm:$0xff] }
 0x6b0   :  { %5796 = vmatpush1.bf16.msra.mxu1 %v1308_v54  ;;  %5754 = vmatprep.subr.bf16.mxu0 %v3347_v26  ;;  %v220_v54 = vld [vmem:[#allocation5 + $0x1b0] sm:$0xff]  ;;  %v3410_v26 = vunpack.c.h.s8.bf16 %v1242_v18 }
 0x6b1   :  { %5797 = vmatprep.subr.bf16.mxu1 %v1301_v36  ;;  %v1364_v36 = vunpack.c.h.s8.bf16 %v220_v54 }
 0x6b3   :  { %5755 = vmatpush1.bf16.msra.mxu0 %v3346_v56  ;;  %v3402_v56 = vunpack.c.l.s8.bf16 %v1242_v18 }
 0x6b4   :  { %5798 = vmatpush1.bf16.msra.mxu1 %v1300_v5  ;;  %5756 = vmatprep.subr.bf16.mxu0 %v3339_v20  ;;  %v1356_v5 = vunpack.c.l.s8.bf16 %v220_v54  ;;  %v3395_v20 = vunpack.c.h.s8.bf16 %v1235_v38 }
 0x6b5   :  { %5799 = vmatprep.subr.bf16.mxu1 %v1293_v60  ;;  %v1349_v60 = vunpack.c.h.s8.bf16 %v213_v8 }
 0x6b7   :  { %5757 = vmatpush1.bf16.msra.mxu0 %v3338_v17  ;;  %v3394_v17 = vunpack.c.h.s8.bf16 %v1234_v10 }
 0x6b8   :  { %5800 = vmatpush1.bf16.msra.mxu1 %v1292_v47  ;;  %5758 = vmatprep.subr.bf16.mxu0 %v3331_v45  ;;  %v1348_v47 = vunpack.c.h.s8.bf16 %v212_v13  ;;  %v3387_v45 = vunpack.c.l.s8.bf16 %v1235_v38 }
 0x6b9   :  { %5801 = vmatprep.subr.bf16.mxu1 %v1285_v63  ;;  %v1341_v63 = vunpack.c.l.s8.bf16 %v213_v8 }
 0x6bb   :  { %5759 = vmatpush1.bf16.msra.mxu0 %v3330_v21  ;;  %v3386_v21 = vunpack.c.l.s8.bf16 %v1234_v10 }
 0x6bc   :  { %5802 = vmatpush1.bf16.msra.mxu1 %v1284_v58  ;;  %5760 = vmatprep.subr.bf16.mxu0 %v3323_v59  ;;  %v1340_v58 = vunpack.c.l.s8.bf16 %v212_v13  ;;  %v3379_v59 = vunpack.c.h.s8.bf16 %v1227_v57 }
 0x6bd   :  { %5803 = vmatprep.subr.bf16.mxu1 %v1277_v29  ;;  %v1333_v29 = vunpack.c.h.s8.bf16 %v205_v23 }
 0x6bf   :  { %5761 = vmatpush1.bf16.msra.mxu0 %v3322_v39  ;;  %v3378_v39 = vunpack.c.h.s8.bf16 %v1226_v22 }
 0x6c0   :  { %5804 = vmatpush1.bf16.msra.mxu1 %v1276_v25  ;;  %5762 = vmatprep.subr.bf16.mxu0 %v3315_v14  ;;  %v1332_v25 = vunpack.c.h.s8.bf16 %v204_v50  ;;  %v3371_v14 = vunpack.c.l.s8.bf16 %v1227_v57 }
 0x6c1   :  { %5805 = vmatprep.subr.bf16.mxu1 %v1269_v19  ;;  %v1325_v19 = vunpack.c.l.s8.bf16 %v205_v23 }
 0x6c3   :  { %5763 = vmatpush1.bf16.msra.mxu0 %v3314_v9  ;;  %v3370_v9 = vunpack.c.l.s8.bf16 %v1226_v22 }
 0x6c4   :  { %5806 = vmatpush1.bf16.msra.mxu1 %v1268_v31  ;;  %5764 = vmatprep.subr.bf16.mxu0 %v3307_v1  ;;  %v1324_v31 = vunpack.c.l.s8.bf16 %v204_v50  ;;  %v1445_v1 = vunpack.c.h.s8.bf16 %v261_v32 }
 0x6c5   :  { %5807 = vmatprep.subr.bf16.mxu1 %v1261_v2  ;;  %v1573_v2 = vunpack.c.h.s8.bf16 %v325_v7 }
 0x6c7   :  { %5765 = vmatpush1.bf16.msra.mxu0 %v3306_v30  ;;  %v1444_v30 = vunpack.c.h.s8.bf16 %v260_v11 }
 0x6c8   :  { %5808 = vmatpush1.bf16.msra.mxu1 %v1260_v42  ;;  %5766 = vmatprep.subr.bf16.mxu0 %v3427_v49  ;;  %v1572_v42 = vunpack.c.h.s8.bf16 %v324_v44  ;;  %v1437_v49 = vunpack.c.l.s8.bf16 %v261_v32 }
 0x6c9   :  { %5809 = vmatprep.subr.bf16.mxu1 %v1381_v37  ;;  %v1565_v37 = vunpack.c.l.s8.bf16 %v325_v7 }
 0x6cb   :  { %5767 = vmatpush2.bf16.msra.mxu0 %v3426_v48  ;;  %v7943_v48 = vld [vmem:[#allocation2 + $0x80] ss:$136 sps:$4 sm:$0xff]  }
 0x6cc   :  { %5810 = vmatpush2.bf16.msra.mxu1 %v1380_v12  ;;  %5768 = vmatprep.subr.bf16.mxu0 %v3419_v34  ;;  %v7944_v12 = vld [vmem:[#allocation2] ss:$136 sps:$4 sm:$0xff]   ;;  %v1436_v34 = vunpack.c.l.s8.bf16 %v260_v11 }
 0x6cd   :  { %5811 = vmatprep.subr.bf16.mxu1 %v1373_v43  ;;  %v1564_v43 = vunpack.c.l.s8.bf16 %v324_v44 }
 0x6cf   :  { %5769 = vmatpush2.bf16.msra.mxu0 %v3418_v52  ;;  %v252_v52 = vld [vmem:[#allocation5 + $0x2b0] sm:$0xff] }
 0x6d0   :  { %5812 = vmatpush2.bf16.msra.mxu1 %v1372_v53  ;;  %5770 = vmatprep.subr.bf16.mxu0 %v3411_v40  ;;  %v316_v53 = vld [vmem:[#allocation5 + $0x4b0] sm:$0xff]  ;;  %v7945_v40 = vld [vmem:[#allocation2 + $0xc] ss:$136 sps:$4 sm:$0xff]   ;;  %v1428_v18 = vunpack.c.h.s8.bf16 %v252_v52  ;;  %v1420_v38 = vunpack.c.l.s8.bf16 %v252_v52 }
 0x6d1   :  { %5813 = vmatprep.subr.bf16.mxu1 %v1365_v35  ;;  %v7946_v35 = vld [vmem:[#allocation2 + $0x14] ss:$136 sps:$4 sm:$0xff]   ;;  %v1556_v54 = vunpack.c.h.s8.bf16 %v316_v53  ;;  %v1548_v8 = vunpack.c.l.s8.bf16 %v316_v53 }
 0x6d3   :  { %5771 = vmatpush2.bf16.msra.mxu0 %v3410_v26  ;;  %v1421_v26 = vunpack.c.l.s8.bf16 %v253_v46 }
 0x6d4   :  { %5814 = vmatpush2.bf16.msra.mxu1 %v1364_v36  ;;  %5772 = vmatprep.subr.bf16.mxu0 %v3403_v0  ;;  %v1549_v36 = vunpack.c.l.s8.bf16 %v317_v41  ;;  %v245_v0 = vld [vmem:[#allocation5 + $0x278] sm:$0xff] }
 0x6d5   :  { %5815 = vmatprep.subr.bf16.mxu1 %v1357_v55  ;;  %v309_v55 = vld [vmem:[#allocation5 + $0x478] sm:$0xff] }
 0x6d7   :  { %5773 = vmatpush2.bf16.msra.mxu0 %v3402_v56  ;;  %v1413_v56 = vunpack.c.h.s8.bf16 %v245_v0 }
 0x6d8   :  { %5816 = vmatpush2.bf16.msra.mxu1 %v1356_v5  ;;  %5774 = vmatprep.subr.bf16.mxu0 %v3395_v20  ;;  %v1541_v5 = vunpack.c.h.s8.bf16 %v309_v55  ;;  %v244_v20 = vld [vmem:[#allocation5 + $0x270] sm:$0xff] }
 0x6d9   :  { %5817 = vmatprep.subr.bf16.mxu1 %v1349_v60  ;;  %v308_v60 = vld [vmem:[#allocation5 + $0x470] sm:$0xff]  ;;  %v1412_v10 = vunpack.c.h.s8.bf16 %v244_v20  ;;  %v1404_v57 = vunpack.c.l.s8.bf16 %v244_v20  ;;  %v269_v20 = vld [vmem:[#allocation5 + $0x338] sm:$0xff] }
 0x6da   :  { %v1540_v13 = vunpack.c.h.s8.bf16 %v308_v60  ;;  %v1532_v23 = vunpack.c.l.s8.bf16 %v308_v60  ;;  %v333_v60 = vld [vmem:[#allocation5 + $0x538] sm:$0xff] }
 0x6db   :  { %5775 = vmatpush2.bf16.msra.mxu0 %v3394_v17  ;;  %v1405_v17 = vunpack.c.l.s8.bf16 %v245_v0  ;;  %v276_v0 = vld [vmem:[#allocation5 + $0x370] sm:$0xff] }
 0x6dc   :  { %5818 = vmatpush2.bf16.msra.mxu1 %v1348_v47  ;;  %5776 = vmatprep.subr.bf16.mxu0 %v3387_v45  ;;  %v1533_v47 = vunpack.c.l.s8.bf16 %v309_v55  ;;  %v237_v45 = vld [vmem:[#allocation5 + $0x238] sm:$0xff]  ;;  %v340_v55 = vld [vmem:[#allocation5 + $0x570] sm:$0xff] }
 0x6dd   :  { %5819 = vmatprep.subr.bf16.mxu1 %v1341_v63  ;;  %v301_v63 = vld [vmem:[#allocation5 + $0x438] sm:$0xff] }
 0x6df   :  { %5777 = vmatpush2.bf16.msra.mxu0 %v3386_v21  ;;  %v1397_v21 = vunpack.c.h.s8.bf16 %v237_v45 }
 0x6e0   :  { %5820 = vmatpush2.bf16.msra.mxu1 %v1340_v58  ;;  %5778 = vmatprep.subr.bf16.mxu0 %v3379_v59  ;;  %v1525_v58 = vunpack.c.h.s8.bf16 %v301_v63  ;;  %v236_v59 = vld [vmem:[#allocation5 + $0x230] sm:$0xff] }
 0x6e1   :  { %5821 = vmatprep.subr.bf16.mxu1 %v1333_v29  ;;  %v300_v29 = vld [vmem:[#allocation5 + $0x430] sm:$0xff]  ;;  %v1396_v22 = vunpack.c.h.s8.bf16 %v236_v59  ;;  %v1388_v32 = vunpack.c.l.s8.bf16 %v236_v59  ;;  %v389_v59 = vld [vmem:[#allocation5 + $0x6f8] sm:$0xff] }
 0x6e2   :  { %v1524_v50 = vunpack.c.h.s8.bf16 %v300_v29  ;;  %v1516_v7 = vunpack.c.l.s8.bf16 %v300_v29  ;;  %v453_v29 = vld [vmem:[#allocation5 + $0x8f8] sm:$0xff] }
 0x6e3   :  { %5779 = vmatpush2.bf16.msra.mxu0 %v3378_v39  ;;  %v1389_v39 = vunpack.c.l.s8.bf16 %v237_v45  ;;  %v268_v45 = vld [vmem:[#allocation5 + $0x330] sm:$0xff] }
 0x6e4   :  { %5822 = vmatpush2.bf16.msra.mxu1 %v1332_v25  ;;  %5780 = vmatprep.subr.bf16.mxu0 %v3371_v14  ;;  %v1517_v25 = vunpack.c.l.s8.bf16 %v301_v63  ;;  %v293_v14 = vld [vmem:[#allocation5 + $0x3f8] sm:$0xff]  ;;  %v332_v63 = vld [vmem:[#allocation5 + $0x530] sm:$0xff] }
 0x6e5   :  { %5823 = vmatprep.subr.bf16.mxu1 %v1325_v19  ;;  %v357_v19 = vld [vmem:[#allocation5 + $0x5f8] sm:$0xff] }
 0x6e7   :  { %5781 = vmatpush2.bf16.msra.mxu0 %v3370_v9  ;;  %v1509_v9 = vunpack.c.h.s8.bf16 %v293_v14 }
 0x6e8   :  { %5824 = vmatpush2.bf16.msra.mxu1 %v1324_v31  ;;  %5836 = vmatprep.subr.bf16.mxu0 %v1445_v1  ;;  %v1637_v31 = vunpack.c.h.s8.bf16 %v357_v19  ;;  %v292_v1 = vld [vmem:[#allocation5 + $0x3f0] sm:$0xff] }
 0x6e9   :  { %5879 = vmatprep.subr.bf16.mxu1 %v1573_v2  ;;  %v356_v2 = vld [vmem:[#allocation5 + $0x5f0] sm:$0xff]  ;;  %v1508_v11 = vunpack.c.h.s8.bf16 %v292_v1  ;;  %v1500_v46 = vunpack.c.l.s8.bf16 %v292_v1  ;;  %v381_v1 = vld [vmem:[#allocation5 + $0x6b8] sm:$0xff] }
 0x6ea   :  { %5783 = vmatmul.mubr.bf16.vlgmr.msra.gmra.mxu0 %v7943_v48  ;;  %v1636_v44 = vunpack.c.h.s8.bf16 %v356_v2  ;;  %v1628_v41 = vunpack.c.l.s8.bf16 %v356_v2  ;;  %v445_v2 = vld [vmem:[#allocation5 + $0x8b8] sm:$0xff] }
 0x6eb   :  { %5826 = vmatmul.mubr.bf16.vlgmr.msra.gmra.mxu1 %v7944_v12  ;;  %5837 = vmatpush1.bf16.msra.mxu0 %v1444_v30  ;;  %v1501_v30 = vunpack.c.l.s8.bf16 %v293_v14  ;;  %v388_v14 = vld [vmem:[#allocation5 + $0x6f0] sm:$0xff] }
 0x6ec   :  { %5880 = vmatpush1.bf16.msra.mxu1 %v1572_v42  ;;  %5838 = vmatprep.subr.bf16.mxu0 %v1437_v49  ;;  %v1629_v42 = vunpack.c.l.s8.bf16 %v357_v19  ;;  %v285_v49 = vld [vmem:[#allocation5 + $0x3b8] sm:$0xff]  ;;  %v452_v19 = vld [vmem:[#allocation5 + $0x8f0] sm:$0xff] }
 0x6ed   :  { %5881 = vmatprep.subr.bf16.mxu1 %v1565_v37  ;;  %5868 = vmatprep.mubr.bf16.mxu0 %v7945_v40  ;;  %v349_v37 = vld [vmem:[#allocation5 + $0x5b8] sm:$0xff]  ;;  %v1493_v48 = vunpack.c.h.s8.bf16 %v285_v49  ;;  %v1485_v52 = vunpack.c.l.s8.bf16 %v285_v49  ;;  %v1685_v49 = vunpack.c.h.s8.bf16 %v381_v1 }
 0x6ee   :  { %5911 = vmatprep.mubr.bf16.mxu1 %v7946_v35  ;;  %v1621_v12 = vunpack.c.h.s8.bf16 %v349_v37  ;;  %v1613_v53 = vunpack.c.l.s8.bf16 %v349_v37  ;;  %v277_v40 = vld [vmem:[#allocation5 + $0x378] sm:$0xff]  ;;  %v1813_v37 = vunpack.c.h.s8.bf16 %v445_v2 }
 0x6ef   :  { %5839 = vmatpush1.bf16.msra.mxu0 %v1436_v34  ;;  %v284_v34 = vld [vmem:[#allocation5 + $0x3b0] sm:$0xff]  ;;  %v341_v35 = vld [vmem:[#allocation5 + $0x578] sm:$0xff] }
 0x6f0   :  { %5882 = vmatpush1.bf16.msra.mxu1 %v1564_v43  ;;  %5840 = vmatprep.subr.bf16.mxu0 %v1429_v3  ;;  %v348_v43 = vld [vmem:[#allocation5 + $0x5b0] sm:$0xff]  ;;  %v1492_v3 = vunpack.c.h.s8.bf16 %v284_v34 }
 0x6f1   :  { %5883 = vmatprep.subr.bf16.mxu1 %v1557_v61  ;;  %v1620_v61 = vunpack.c.h.s8.bf16 %v348_v43 }
 0x6f3   :  { %5841 = vmatpush1.bf16.msra.mxu0 %v1428_v18  ;;  %v1484_v18 = vunpack.c.l.s8.bf16 %v284_v34 }
 0x6f4   :  { %5884 = vmatpush1.bf16.msra.mxu1 %v1556_v54  ;;  %5842 = vmatprep.subr.bf16.mxu0 %v1421_v26  ;;  %v1612_v54 = vunpack.c.l.s8.bf16 %v348_v43  ;;  %v1477_v26 = vunpack.c.h.s8.bf16 %v277_v40 }
 0x6f5   :  { %5885 = vmatprep.subr.bf16.mxu1 %v1549_v36  ;;  %v1605_v36 = vunpack.c.h.s8.bf16 %v341_v35 }
 0x6f7   :  { %5843 = vmatpush1.bf16.msra.mxu0 %v1420_v38  ;;  %v1476_v38 = vunpack.c.h.s8.bf16 %v276_v0 }
 0x6f8   :  { %5886 = vmatpush1.bf16.msra.mxu1 %v1548_v8  ;;  %5844 = vmatprep.subr.bf16.mxu0 %v1413_v56  ;;  %v1604_v8 = vunpack.c.h.s8.bf16 %v340_v55  ;;  %v1469_v56 = vunpack.c.l.s8.bf16 %v277_v40 }
 0x6f9   :  { %5887 = vmatprep.subr.bf16.mxu1 %v1541_v5  ;;  %v1597_v5 = vunpack.c.l.s8.bf16 %v341_v35 }
 0x6fb   :  { %5845 = vmatpush1.bf16.msra.mxu0 %v1412_v10  ;;  %v1468_v10 = vunpack.c.l.s8.bf16 %v276_v0 }
 0x6fc   :  { %5888 = vmatpush1.bf16.msra.mxu1 %v1540_v13  ;;  %5846 = vmatprep.subr.bf16.mxu0 %v1405_v17  ;;  %v1596_v13 = vunpack.c.l.s8.bf16 %v340_v55  ;;  %v1461_v17 = vunpack.c.h.s8.bf16 %v269_v20 }
 0x6fd   :  { %5889 = vmatprep.subr.bf16.mxu1 %v1533_v47  ;;  %v1589_v47 = vunpack.c.h.s8.bf16 %v333_v60 }
 0x6ff   :  { %5847 = vmatpush1.bf16.msra.mxu0 %v1404_v57  ;;  %v1460_v57 = vunpack.c.h.s8.bf16 %v268_v45 }
 0x700   :  { %5890 = vmatpush1.bf16.msra.mxu1 %v1532_v23  ;;  %5848 = vmatprep.subr.bf16.mxu0 %v1397_v21  ;;  %v1588_v23 = vunpack.c.h.s8.bf16 %v332_v63  ;;  %v1453_v21 = vunpack.c.l.s8.bf16 %v269_v20 }
 0x701   :  { %5891 = vmatprep.subr.bf16.mxu1 %v1525_v58  ;;  %v1581_v58 = vunpack.c.l.s8.bf16 %v333_v60 }
 0x703   :  { %5849 = vmatpush1.bf16.msra.mxu0 %v1396_v22  ;;  %v1452_v22 = vunpack.c.l.s8.bf16 %v268_v45 }
 0x704   :  { %5892 = vmatpush1.bf16.msra.mxu1 %v1524_v50  ;;  %5850 = vmatprep.subr.bf16.mxu0 %v1389_v39  ;;  %v1580_v50 = vunpack.c.l.s8.bf16 %v332_v63  ;;  %v1701_v39 = vunpack.c.h.s8.bf16 %v389_v59 }
 0x705   :  { %5893 = vmatprep.subr.bf16.mxu1 %v1517_v25  ;;  %v1829_v25 = vunpack.c.h.s8.bf16 %v453_v29 }
 0x707   :  { %5851 = vmatpush1.bf16.msra.mxu0 %v1388_v32  ;;  %v1700_v32 = vunpack.c.h.s8.bf16 %v388_v14 }
 0x708   :  { %5894 = vmatpush1.bf16.msra.mxu1 %v1516_v7  ;;  %5852 = vmatprep.subr.bf16.mxu0 %v1509_v9  ;;  %v1828_v7 = vunpack.c.h.s8.bf16 %v452_v19  ;;  %v1693_v9 = vunpack.c.l.s8.bf16 %v389_v59 }
 0x709   :  { %5895 = vmatprep.subr.bf16.mxu1 %v1637_v31  ;;  %v1821_v31 = vunpack.c.l.s8.bf16 %v453_v29 }
 0x70b   :  { %5853 = vmatpush2.bf16.msra.mxu0 %v1508_v11  ;;  %v7947_v11 = vld [vmem:[#allocation2 + $0x8] ss:$136 sps:$4 sm:$0xff]  }
 0x70c   :  { %5896 = vmatpush2.bf16.msra.mxu1 %v1636_v44  ;;  %5854 = vmatprep.subr.bf16.mxu0 %v1501_v30  ;;  %v7948_v44 = vld [vmem:[#allocation2 + $0x10] ss:$136 sps:$4 sm:$0xff]   ;;  %v1692_v30 = vunpack.c.l.s8.bf16 %v388_v14  ;;  %v8529_v14 = vpop.f32.mrf.mxu1 }
 0x70d   :  { %5897 = vmatprep.subr.bf16.mxu1 %v1629_v42  ;;  %v1820_v42 = vunpack.c.l.s8.bf16 %v452_v19 }
 0x70f   :  { %5855 = vmatpush2.bf16.msra.mxu0 %v1500_v46  ;;  %v380_v46 = vld [vmem:[#allocation5 + $0x6b0] sm:$0xff] }
 0x710   :  { %5898 = vmatpush2.bf16.msra.mxu1 %v1628_v41  ;;  %5856 = vmatprep.subr.bf16.mxu0 %v1493_v48  ;;  %v444_v41 = vld [vmem:[#allocation5 + $0x8b0] sm:$0xff]  ;;  %v1684_v34 = vunpack.c.h.s8.bf16 %v380_v46  ;;  %v1676_v40 = vunpack.c.l.s8.bf16 %v380_v46 }
 0x711   :  { %5899 = vmatprep.subr.bf16.mxu1 %v1621_v12  ;;  %v7949_v48 = vld [vmem:[#allocation2 + $0x1c] ss:$136 sps:$4 sm:$0xff]   ;;  %v1812_v43 = vunpack.c.h.s8.bf16 %v444_v41  ;;  %v1804_v35 = vunpack.c.l.s8.bf16 %v444_v41 }
 0x712   :  { %v7950_v12 = vld [vmem:[#allocation2 + $0x24] ss:$136 sps:$4 sm:$0xff]  }
 0x713   :  { %5857 = vmatpush2.bf16.msra.mxu0 %v1492_v3  ;;  %v1677_v3 = vunpack.c.l.s8.bf16 %v381_v1  ;;  %v477_v1 = vld [vmem:[#allocation5 + $0x9b8] sm:$0xff]  ;;  %v476_v46 = vld [vmem:[#allocation5 + $0x9b0] sm:$0xff] }
 0x714   :  { %5900 = vmatpush2.bf16.msra.mxu1 %v1620_v61  ;;  %5858 = vmatprep.subr.bf16.mxu0 %v1485_v52  ;;  %v1805_v61 = vunpack.c.l.s8.bf16 %v445_v2  ;;  %v373_v52 = vld [vmem:[#allocation5 + $0x678] sm:$0xff]  ;;  %v8531_v2 = vpop.f32.mrf.mxu1 }
 0x715   :  { %5901 = vmatprep.subr.bf16.mxu1 %v1613_v53  ;;  %v437_v53 = vld [vmem:[#allocation5 + $0x878] sm:$0xff] }
 0x716   :  { %v8535_v41 = vpop.f32.mrf.mxu1 }
 0x717   :  { %5859 = vmatpush2.bf16.msra.mxu0 %v1484_v18  ;;  %v1669_v18 = vunpack.c.h.s8.bf16 %v373_v52 }
 0x718   :  { %5902 = vmatpush2.bf16.msra.mxu1 %v1612_v54  ;;  %5860 = vmatprep.subr.bf16.mxu0 %v1477_v26  ;;  %v1797_v54 = vunpack.c.h.s8.bf16 %v437_v53  ;;  %v372_v26 = vld [vmem:[#allocation5 + $0x670] sm:$0xff] }
 0x719   :  { %5903 = vmatprep.subr.bf16.mxu1 %v1605_v36  ;;  %v436_v36 = vld [vmem:[#allocation5 + $0x870] sm:$0xff]  ;;  %v1668_v0 = vunpack.c.h.s8.bf16 %v372_v26  ;;  %v1660_v20 = vunpack.c.l.s8.bf16 %v372_v26 }
 0x71a   :  { %v1796_v55 = vunpack.c.h.s8.bf16 %v436_v36  ;;  %v1788_v60 = vunpack.c.l.s8.bf16 %v436_v36 }
 0x71b   :  { %5861 = vmatpush2.bf16.msra.mxu0 %v1476_v38  ;;  %v1661_v38 = vunpack.c.l.s8.bf16 %v373_v52  ;;  %v405_v52 = vld [vmem:[#allocation5 + $0x778] sm:$0xff] }
 0x71c   :  { %5904 = vmatpush2.bf16.msra.mxu1 %v1604_v8  ;;  %5862 = vmatprep.subr.bf16.mxu0 %v1469_v56  ;;  %v1789_v8 = vunpack.c.l.s8.bf16 %v437_v53  ;;  %v365_v56 = vld [vmem:[#allocation5 + $0x638] sm:$0xff]  ;;  %v1733_v26 = vunpack.c.h.s8.bf16 %v405_v52 }
 0x71d   :  { %5905 = vmatprep.subr.bf16.mxu1 %v1597_v5  ;;  %v429_v5 = vld [vmem:[#allocation5 + $0x838] sm:$0xff] }
 0x71e   :  { %v469_v53 = vld [vmem:[#allocation5 + $0x978] sm:$0xff] }
 0x71f   :  { %5863 = vmatpush2.bf16.msra.mxu0 %v1468_v10  ;;  %v1653_v10 = vunpack.c.h.s8.bf16 %v365_v56  ;;  %v1861_v36 = vunpack.c.h.s8.bf16 %v469_v53 }
 0x720   :  { %5906 = vmatpush2.bf16.msra.mxu1 %v1596_v13  ;;  %5864 = vmatprep.subr.bf16.mxu0 %v1461_v17  ;;  %v1781_v13 = vunpack.c.h.s8.bf16 %v429_v5  ;;  %v364_v17 = vld [vmem:[#allocation5 + $0x630] sm:$0xff] }
 0x721   :  { %5907 = vmatprep.subr.bf16.mxu1 %v1589_v47  ;;  %v428_v47 = vld [vmem:[#allocation5 + $0x830] sm:$0xff]  ;;  %v1652_v45 = vunpack.c.h.s8.bf16 %v364_v17  ;;  %v1644_v59 = vunpack.c.l.s8.bf16 %v364_v17 }
 0x722   :  { %v1780_v63 = vunpack.c.h.s8.bf16 %v428_v47  ;;  %v1772_v29 = vunpack.c.l.s8.bf16 %v428_v47 }
 0x723   :  { %5865 = vmatpush2.bf16.msra.mxu0 %v1460_v57  ;;  %v1645_v57 = vunpack.c.l.s8.bf16 %v365_v56 }
 0x724   :  { %5908 = vmatpush2.bf16.msra.mxu1 %v1588_v23  ;;  %5866 = vmatprep.subr.bf16.mxu0 %v1453_v21  ;;  %v1773_v23 = vunpack.c.l.s8.bf16 %v429_v5  ;;  %v421_v21 = vld [vmem:[#allocation5 + $0x7f8] sm:$0xff] }
 0x725   :  { %5909 = vmatprep.subr.bf16.mxu1 %v1581_v58  ;;  %v485_v58 = vld [vmem:[#allocation5 + $0x9f8] sm:$0xff] }
 0x727   :  { %5867 = vmatpush2.bf16.msra.mxu0 %v1452_v22  ;;  %v1765_v22 = vunpack.c.h.s8.bf16 %v421_v21 }
 0x728   :  { %5910 = vmatpush2.bf16.msra.mxu1 %v1580_v50  ;;  %5922 = vmatprep.subr.bf16.mxu0 %v1701_v39  ;;  %v1893_v50 = vunpack.c.h.s8.bf16 %v485_v58  ;;  %v420_v39 = vld [vmem:[#allocation5 + $0x7f0] sm:$0xff] }
 0x729   :  { %5965 = vmatprep.subr.bf16.mxu1 %v1829_v25  ;;  %v484_v25 = vld [vmem:[#allocation5 + $0x9f0] sm:$0xff]  ;;  %v1764_v19 = vunpack.c.h.s8.bf16 %v420_v39 }
 0x72a   :  { %5869 = vmatmul.mubr.bf16.vlgmr.msra.gmra.mxu0 %v7947_v11  ;;  %v1756_v11 = vunpack.c.l.s8.bf16 %v420_v39 }
 0x72b   :  { %5912 = vmatmul.mubr.bf16.vlgmr.msra.gmra.mxu1 %v7948_v44  ;;  %5923 = vmatpush1.bf16.msra.mxu0 %v1700_v32  ;;  %v1892_v32 = vunpack.c.h.s8.bf16 %v484_v25  ;;  %v1884_v44 = vunpack.c.l.s8.bf16 %v484_v25 }
 0x72c   :  { %5966 = vmatpush1.bf16.msra.mxu1 %v1828_v7  ;;  %5924 = vmatprep.subr.bf16.mxu0 %v1693_v9  ;;  %v1757_v7 = vunpack.c.l.s8.bf16 %v421_v21  ;;  %v1885_v9 = vunpack.c.l.s8.bf16 %v485_v58  ;;  %v396_v21 = vld [vmem:[#allocation5 + $0x730] sm:$0xff] }
 0x72d   :  { %5967 = vmatprep.subr.bf16.mxu1 %v1821_v31  ;;  %5954 = vmatprep.mubr.bf16.mxu0 %v7949_v48  ;;  %v413_v31 = vld [vmem:[#allocation5 + $0x7b8] sm:$0xff]  ;;  %v460_v58 = vld [vmem:[#allocation5 + $0x930] sm:$0xff] }
 0x72e   :  { %5997 = vmatprep.mubr.bf16.mxu1 %v7950_v12  ;;  %v1876_v12 = vunpack.c.h.s8.bf16 %v476_v46 }
 0x72f   :  { %5925 = vmatpush1.bf16.msra.mxu0 %v1692_v30  ;;  %v8533_v30 = vpop.f32.mrf.mxu0 }
 0x730   :  { %5968 = vmatpush1.bf16.msra.mxu1 %v1820_v42  ;;  %5926 = vmatprep.subr.bf16.mxu0 %v1685_v49  ;;  %v1749_v42 = vunpack.c.h.s8.bf16 %v413_v31  ;;  %v1877_v49 = vunpack.c.h.s8.bf16 %v477_v1 }
 0x731   :  { %5969 = vmatprep.subr.bf16.mxu1 %v1813_v37  ;;  %v412_v37 = vld [vmem:[#allocation5 + $0x7b0] sm:$0xff] }
 0x732   :  { %v1748_v48 = vunpack.c.h.s8.bf16 %v412_v37 }
 0x733   :  { %5927 = vmatpush1.bf16.msra.mxu0 %v1684_v34  ;;  %v8537_v34 = vpop.f32.mrf.mxu1 }
 0x734   :  { %5970 = vmatpush1.bf16.msra.mxu1 %v1812_v43  ;;  %5928 = vmatprep.subr.bf16.mxu0 %v1677_v3  ;;  %v8539_v43 = vpop.f32.mrf.mxu0  ;;  %v1741_v3 = vunpack.c.l.s8.bf16 %v413_v31  ;;  %v1708_v31 = vunpack.c.l.s8.bf16 %v396_v21 }
 0x735   :  { %5971 = vmatprep.subr.bf16.mxu1 %v1805_v61  ;;  %v1869_v61 = vunpack.c.l.s8.bf16 %v477_v1  ;;  %v1836_v1 = vunpack.c.l.s8.bf16 %v460_v58 }
 0x737   :  { %5929 = vmatpush1.bf16.msra.mxu0 %v1676_v40  ;;  %v1740_v40 = vunpack.c.l.s8.bf16 %v412_v37  ;;  %v580_v37 = vld [vmem:[#allocation5 + $0xcf0] sm:$0xff] }
 0x738   :  { %5972 = vmatpush1.bf16.msra.mxu1 %v1804_v35  ;;  %5930 = vmatprep.subr.bf16.mxu0 %v1669_v18  ;;  %v1868_v35 = vunpack.c.l.s8.bf16 %v476_v46  ;;  %v8541_v18 = vpop.f32.mrf.mxu1 }
 0x739   :  { %5973 = vmatprep.subr.bf16.mxu1 %v1797_v54  ;;  %v8543_v54 = vpop.f32.mrf.mxu0 }
 0x73a   :  { %v8547_v5 = vpop.f32.mrf.mxu1 }
 0x73b   :  { %5931 = vmatpush1.bf16.msra.mxu0 %v1668_v0  ;;  %v404_v0 = vld [vmem:[#allocation5 + $0x770] sm:$0xff] }
 0x73c   :  { %5974 = vmatpush1.bf16.msra.mxu1 %v1796_v55  ;;  %5932 = vmatprep.subr.bf16.mxu0 %v1661_v38  ;;  %v468_v55 = vld [vmem:[#allocation5 + $0x970] sm:$0xff]  ;;  %v8545_v38 = vpop.f32.mrf.mxu0  ;;  %v1724_v47 = vunpack.c.l.s8.bf16 %v404_v0 }
 0x73d   :  { %5975 = vmatprep.subr.bf16.mxu1 %v1789_v8  ;;  %v1732_v8 = vunpack.c.h.s8.bf16 %v404_v0  ;;  %v1860_v56 = vunpack.c.h.s8.bf16 %v468_v55 }
 0x73e   :  { %v8549_v17 = vpop.f32.mrf.mxu0 }
 0x73f   :  { %5933 = vmatpush1.bf16.msra.mxu0 %v1660_v20  ;;  %v1725_v20 = vunpack.c.l.s8.bf16 %v405_v52 }
 0x740   :  { %5976 = vmatpush1.bf16.msra.mxu1 %v1788_v60  ;;  %5934 = vmatprep.subr.bf16.mxu0 %v1653_v10  ;;  %v1853_v60 = vunpack.c.l.s8.bf16 %v469_v53  ;;  %v397_v10 = vld [vmem:[#allocation5 + $0x738] sm:$0xff] }
 0x741   :  { %5977 = vmatprep.subr.bf16.mxu1 %v1781_v13  ;;  %v461_v13 = vld [vmem:[#allocation5 + $0x938] sm:$0xff]  ;;  %v1709_v39 = vunpack.c.l.s8.bf16 %v397_v10 }
 0x742   :  { %v1837_v25 = vunpack.c.l.s8.bf16 %v461_v13  ;;  %v509_v53 = vld [vmem:[#allocation5 + $0xab8] sm:$0xff] }
 0x743   :  { %5935 = vmatpush1.bf16.msra.mxu0 %v1652_v45  ;;  %v1852_v45 = vunpack.c.l.s8.bf16 %v468_v55  ;;  %v2076_v55 = vunpack.c.l.s8.bf16 %v580_v37 }
 0x744   :  { %5978 = vmatpush1.bf16.msra.mxu1 %v1780_v63  ;;  %5936 = vmatprep.subr.bf16.mxu0 %v1645_v57  ;;  %v8551_v63 = vpop.f32.mrf.mxu1  ;;  %v1717_v57 = vunpack.c.h.s8.bf16 %v397_v10  ;;  %v508_v10 = vld [vmem:[#allocation5 + $0xab0] sm:$0xff] }
 0x745   :  { %5979 = vmatprep.subr.bf16.mxu1 %v1773_v23  ;;  %v1845_v23 = vunpack.c.h.s8.bf16 %v461_v13  ;;  %v572_v13 = vld [vmem:[#allocation5 + $0xcb0] sm:$0xff] }
 0x747   :  { %5937 = vmatpush1.bf16.msra.mxu0 %v1644_v59  ;;  %v8553_v59 = vpop.f32.mrf.mxu1 }
 0x748   :  { %5980 = vmatpush1.bf16.msra.mxu1 %v1772_v29  ;;  %5938 = vmatprep.subr.bf16.mxu0 %v1765_v22  ;;  %v8555_v29 = vpop.f32.mrf.mxu0  ;;  %v1716_v22 = vunpack.c.h.s8.bf16 %v396_v21 }
 0x749   :  { %5981 = vmatprep.subr.bf16.mxu1 %v1893_v50  ;;  %v1844_v50 = vunpack.c.h.s8.bf16 %v460_v58 }
 0x74b   :  { %5939 = vmatpush2.bf16.msra.mxu0 %v1764_v19  ;;  %v517_v19 = vld [vmem:[#allocation5 + $0xaf8] sm:$0xff] }
 0x74c   :  { %5982 = vmatpush2.bf16.msra.mxu1 %v1892_v32  ;;  %5940 = vmatprep.subr.bf16.mxu0 %v1757_v7  ;;  %v581_v32 = vld [vmem:[#allocation5 + $0xcf8] sm:$0xff]  ;;  %v8557_v7 = vpop.f32.mrf.mxu1 }
 0x74d   :  { %5983 = vmatprep.subr.bf16.mxu1 %v1885_v9  ;;  %v8559_v9 = vpop.f32.mrf.mxu0  ;;  %v2077_v52 = vunpack.c.l.s8.bf16 %v581_v32 }
 0x74e   :  { %v8563_v46 = vpop.f32.mrf.mxu1 }
 0x74f   :  { %5941 = vmatpush2.bf16.msra.mxu0 %v1756_v11  ;;  %v8561_v11 = vpop.f32.mrf.mxu0 }
 0x750   :  { %5984 = vmatpush2.bf16.msra.mxu1 %v1884_v44  ;;  %5942 = vmatprep.subr.bf16.mxu0 %v1749_v42  ;;  %v1957_v44 = vunpack.c.h.s8.bf16 %v517_v19  ;;  %v2085_v42 = vunpack.c.h.s8.bf16 %v581_v32  ;;  %v1932_v32 = vunpack.c.l.s8.bf16 %v508_v10 }
 0x751   :  { %5985 = vmatprep.subr.bf16.mxu1 %v1877_v49  ;;  %v516_v49 = vld [vmem:[#allocation5 + $0xaf0] sm:$0xff] }
 0x752   :  { %v1948_v0 = vunpack.c.l.s8.bf16 %v516_v49 }
 0x753   :  { %5943 = vmatpush2.bf16.msra.mxu0 %v1748_v48  ;;  %v1956_v48 = vunpack.c.h.s8.bf16 %v516_v49  ;;  %v500_v49 = vld [vmem:[#allocation5 + $0xa70] sm:$0xff] }
 0x754   :  { %5986 = vmatpush2.bf16.msra.mxu1 %v1876_v12  ;;  %5944 = vmatprep.subr.bf16.mxu0 %v1741_v3  ;;  %v2084_v12 = vunpack.c.h.s8.bf16 %v580_v37  ;;  %v8565_v3 = vpop.f32.mrf.mxu0  ;;  %v564_v37 = vld [vmem:[#allocation5 + $0xc70] sm:$0xff] }
 0x755   :  { %5987 = vmatprep.subr.bf16.mxu1 %v1869_v61  ;;  %v1949_v61 = vunpack.c.l.s8.bf16 %v517_v19 }
 0x757   :  { %5945 = vmatpush2.bf16.msra.mxu0 %v1740_v40  ;;  %v573_v40 = vld [vmem:[#allocation5 + $0xcb8] sm:$0xff] }
 0x758   :  { %5988 = vmatpush2.bf16.msra.mxu1 %v1868_v35  ;;  %5946 = vmatprep.subr.bf16.mxu0 %v1733_v26  ;;  %v8567_v35 = vpop.f32.mrf.mxu1  ;;  %v7951_v26 = vld [vmem:[#allocation2 + $0x18] ss:$136 sps:$4 sm:$0xff]  }
 0x759   :  { %5989 = vmatprep.subr.bf16.mxu1 %v1861_v36  ;;  %v7952_v36 = vld [vmem:[#allocation2 + $0x20] ss:$136 sps:$4 sm:$0xff]  }
 0x75b   :  { %5947 = vmatpush2.bf16.msra.mxu0 %v1732_v8  ;;  %v8569_v8 = vpop.f32.mrf.mxu1 }
 0x75c   :  { %5990 = vmatpush2.bf16.msra.mxu1 %v1860_v56  ;;  %5948 = vmatprep.subr.bf16.mxu0 %v1725_v20  ;;  %v8571_v56 = vpop.f32.mrf.mxu0  ;;  %v1941_v20 = vunpack.c.h.s8.bf16 %v509_v53 }
 0x75d   :  { %5991 = vmatprep.subr.bf16.mxu1 %v1853_v60  ;;  %v2069_v60 = vunpack.c.h.s8.bf16 %v573_v40  ;;  %v8573_v21 = vpop.f32.mrf.mxu1 }
 0x75e   :  { %v8575_v58 = vpop.f32.mrf.mxu0 }
 0x75f   :  { %5949 = vmatpush2.bf16.msra.mxu0 %v1724_v47  ;;  %v7953_v47 = vld [vmem:[#allocation2 + $0x2c] ss:$136 sps:$4 sm:$0xff]  }
 0x760   :  { %5992 = vmatpush2.bf16.msra.mxu1 %v1852_v45  ;;  %5950 = vmatprep.subr.bf16.mxu0 %v1717_v57  ;;  %v7954_v45 = vld [vmem:[#allocation2 + $0x34] ss:$136 sps:$4 sm:$0xff]   ;;  %v1940_v57 = vunpack.c.h.s8.bf16 %v508_v10  ;;  %v8577_v19 = vpop.f32.mrf.mxu0 }
 0x761   :  { %5993 = vmatprep.subr.bf16.mxu1 %v1845_v23  ;;  %v2068_v23 = vunpack.c.h.s8.bf16 %v572_v13 }
 0x763   :  { %5951 = vmatpush2.bf16.msra.mxu0 %v1716_v22  ;;  %v1933_v22 = vunpack.c.l.s8.bf16 %v509_v53 }
 0x764   :  { %5994 = vmatpush2.bf16.msra.mxu1 %v1844_v50  ;;  %5952 = vmatprep.subr.bf16.mxu0 %v1709_v39  ;;  %v2061_v50 = vunpack.c.l.s8.bf16 %v573_v40  ;;  %v501_v39 = vld [vmem:[#allocation5 + $0xa78] sm:$0xff] }
 0x765   :  { %5995 = vmatprep.subr.bf16.mxu1 %v1837_v25  ;;  %v565_v25 = vld [vmem:[#allocation5 + $0xc78] sm:$0xff]  ;;  %v1917_v53 = vunpack.c.l.s8.bf16 %v501_v39 }
 0x766   :  { %v2045_v40 = vunpack.c.l.s8.bf16 %v565_v25 }
 0x767   :  { %5953 = vmatpush2.bf16.msra.mxu0 %v1708_v31  ;;  %v2060_v31 = vunpack.c.l.s8.bf16 %v572_v13 }
 0x768   :  { %5996 = vmatpush2.bf16.msra.mxu1 %v1836_v1  ;;  %6008 = vmatprep.subr.bf16.mxu0 %v1957_v44  ;;  %v8579_v1 = vpop.f32.mrf.mxu1  ;;  %v1925_v44 = vunpack.c.h.s8.bf16 %v501_v39 }
 0x769   :  { %6051 = vmatprep.subr.bf16.mxu1 %v2085_v42  ;;  %v2053_v42 = vunpack.c.h.s8.bf16 %v565_v25 }
 0x76a   :  { %5955 = vmatmul.mubr.bf16.vlgmr.msra.gmra.mxu0 %v7951_v26  ;;  %v493_v26 = vld [vmem:[#allocation5 + $0xa38] sm:$0xff] }
 0x76b   :  { %5998 = vmatmul.mubr.bf16.vlgmr.msra.gmra.mxu1 %v7952_v36  ;;  %6009 = vmatpush1.bf16.msra.mxu0 %v1956_v48  ;;  %v8581_v48 = vpop.f32.mrf.mxu0  ;;  %v557_v36 = vld [vmem:[#allocation5 + $0xc38] sm:$0xff]  ;;  %v1909_v10 = vunpack.c.h.s8.bf16 %v493_v26  ;;  %v1901_v25 = vunpack.c.l.s8.bf16 %v493_v26  ;;  %v612_v26 = vld [vmem:[#allocation5 + $0xdf0] sm:$0xff] }
 0x76c   :  { %6052 = vmatpush1.bf16.msra.mxu1 %v2084_v12  ;;  %6010 = vmatprep.subr.bf16.mxu0 %v1949_v61  ;;  %v1924_v12 = vunpack.c.h.s8.bf16 %v500_v49  ;;  %v2052_v61 = vunpack.c.h.s8.bf16 %v564_v37  ;;  %v2037_v13 = vunpack.c.h.s8.bf16 %v557_v36 }
 0x76d   :  { %6053 = vmatprep.subr.bf16.mxu1 %v2077_v52  ;;  %6040 = vmatprep.mubr.bf16.mxu0 %v7953_v47  ;;  %v8583_v52 = vpop.f32.mrf.mxu1  ;;  %v492_v47 = vld [vmem:[#allocation5 + $0xa30] sm:$0xff] }
 0x76e   :  { %6083 = vmatprep.mubr.bf16.mxu1 %v7954_v45  ;;  %v556_v45 = vld [vmem:[#allocation5 + $0xc30] sm:$0xff] }
 0x76f   :  { %6011 = vmatpush1.bf16.msra.mxu0 %v1948_v0  ;;  %v8585_v0 = vpop.f32.mrf.mxu1 }
 0x770   :  { %6054 = vmatpush1.bf16.msra.mxu1 %v2076_v55  ;;  %6012 = vmatprep.subr.bf16.mxu0 %v1941_v20  ;;  %v8587_v55 = vpop.f32.mrf.mxu0  ;;  %v1916_v20 = vunpack.c.l.s8.bf16 %v500_v49  ;;  %v5144_v49 = vadd.f32 %v8531_v2, %v8522_v6 }
 0x771   :  { %6055 = vmatprep.subr.bf16.mxu1 %v2069_v60  ;;  %v2044_v60 = vunpack.c.l.s8.bf16 %v564_v37  ;;  %v1900_v37 = vunpack.c.l.s8.bf16 %v492_v47 }
 0x773   :  { %6013 = vmatpush1.bf16.msra.mxu0 %v1940_v57  ;;  %v8589_v57 = vpop.f32.mrf.mxu1 }
 0x774   :  { %6056 = vmatpush1.bf16.msra.mxu1 %v2068_v23  ;;  %6014 = vmatprep.subr.bf16.mxu0 %v1933_v22  ;;  %v8591_v23 = vpop.f32.mrf.mxu0  ;;  %v1908_v22 = vunpack.c.h.s8.bf16 %v492_v47 }
 0x775   :  { %6057 = vmatprep.subr.bf16.mxu1 %v2061_v50  ;;  %v2036_v50 = vunpack.c.h.s8.bf16 %v556_v45 }
 0x776   :  { %v8593_v39 = vpop.f32.mrf.mxu0 }
 0x777   :  { %6015 = vmatpush1.bf16.msra.mxu0 %v1932_v32  ;;  %v2029_v32 = vunpack.c.l.s8.bf16 %v557_v36  ;;  %v5226_v36 = vadd.f32 %v8537_v34, %v8527_v28  ;;  %v541_v34 = vld [vmem:[#allocation5 + $0xbb8] sm:$0xff] }
 0x778   :  { %6058 = vmatpush1.bf16.msra.mxu1 %v2060_v31  ;;  %6016 = vmatprep.subr.bf16.mxu0 %v1925_v44  ;;  %v549_v31 = vld [vmem:[#allocation5 + $0xbf8] sm:$0xff] }
 0x779   :  { %6059 = vmatprep.subr.bf16.mxu1 %v2053_v42  ;;  %v613_v44 = vld [vmem:[#allocation5 + $0xdf8] sm:$0xff]  ;;  %v8595_v42 = vpop.f32.mrf.mxu1  ;;  %v5269_v6 = vadd.f32 %v8545_v38, %v5226_v36 }
 0x77b   :  { %6017 = vmatpush1.bf16.msra.mxu0 %v1924_v12  ;;  %v2028_v12 = vunpack.c.l.s8.bf16 %v556_v45 }
 0x77c   :  { %6060 = vmatpush1.bf16.msra.mxu1 %v2052_v61  ;;  %6018 = vmatprep.subr.bf16.mxu0 %v1917_v53  ;;  %v8599_v61 = vpop.f32.mrf.mxu0  ;;  %v2021_v53 = vunpack.c.h.s8.bf16 %v549_v31 }
 0x77d   :  { %6061 = vmatprep.subr.bf16.mxu1 %v2045_v40  ;;  %v2149_v40 = vunpack.c.h.s8.bf16 %v613_v44 }
 0x77e   :  { %v8609_v45 = vpop.f32.mrf.mxu0 }
 0x77f   :  { %6019 = vmatpush1.bf16.msra.mxu0 %v1916_v20  ;;  %v548_v20 = vld [vmem:[#allocation5 + $0xbf0] sm:$0xff] }
 0x780   :  { %6062 = vmatpush1.bf16.msra.mxu1 %v2044_v60  ;;  %6020 = vmatprep.subr.bf16.mxu0 %v1909_v10  ;;  %v5187_v60 = vadd.f32 %v8539_v43, %v5144_v49  ;;  %v8604_v10 = vpop.f32.mrf.mxu1  ;;  %v2020_v2 = vunpack.c.h.s8.bf16 %v548_v20  ;;  %v605_v43 = vld [vmem:[#allocation5 + $0xdb8] sm:$0xff]  ;;  %v2140_v49 = vunpack.c.l.s8.bf16 %v612_v26 }
 0x781   :  { %6063 = vmatprep.subr.bf16.mxu1 %v2037_v13  ;;  %v2148_v13 = vunpack.c.h.s8.bf16 %v612_v26 }
 0x782   :  { %v8607_v47 = vpop.f32.mrf.mxu1  ;;  %v5230_v28 = vadd.f32 %v8547_v5, %v5187_v60  ;;  %v604_v5 = vld [vmem:[#allocation5 + $0xdb0] sm:$0xff]  ;;  %v1997_v60 = vunpack.c.l.s8.bf16 %v541_v34 }
 0x783   :  { %6021 = vmatpush1.bf16.msra.mxu0 %v1908_v22  ;;  %v2013_v22 = vunpack.c.l.s8.bf16 %v549_v31  ;;  %v2005_v31 = vunpack.c.h.s8.bf16 %v541_v34 }
 0x784   :  { %6064 = vmatpush1.bf16.msra.mxu1 %v2036_v50  ;;  %6022 = vmatprep.subr.bf16.mxu0 %v1901_v25  ;;  %v2141_v50 = vunpack.c.l.s8.bf16 %v613_v44  ;;  %v5312_v25 = vadd.f32 %v8553_v59, %v5269_v6  ;;  %v5273_v38 = vadd.f32 %v8555_v29, %v5230_v28  ;;  %v2133_v44 = vunpack.c.h.s8.bf16 %v605_v43 }
 0x785   :  { %6065 = vmatprep.subr.bf16.mxu1 %v2029_v32  ;;  %v2012_v32 = vunpack.c.l.s8.bf16 %v548_v20  ;;  %v2132_v20 = vunpack.c.h.s8.bf16 %v604_v5  ;;  %v2125_v6 = vunpack.c.l.s8.bf16 %v605_v43 }
 0x786   :  { %v5316_v59 = vadd.f32 %v8563_v46, %v5273_v38 }
 0x787   :  { %6023 = vmatpush1.bf16.msra.mxu0 %v1900_v37  ;;  %v8614_v37 = vpop.f32.mrf.mxu1 }
 0x788   :  { %6066 = vmatpush1.bf16.msra.mxu1 %v2028_v12  ;;  %6024 = vmatprep.subr.bf16.mxu0 %v2021_v53  ;;  %v8616_v12 = vpop.f32.mrf.mxu0  ;;  %v540_v53 = vld [vmem:[#allocation5 + $0xbb0] sm:$0xff] }
 0x789   :  { %6067 = vmatprep.subr.bf16.mxu1 %v2149_v40  ;;  %v5355_v40 = vadd.f32 %v8561_v11, %v5312_v25  ;;  %v2004_v29 = vunpack.c.h.s8.bf16 %v540_v53  ;;  %v8620_v26 = vpop.f32.mrf.mxu1  ;;  %v1996_v28 = vunpack.c.l.s8.bf16 %v540_v53  ;;  %v2124_v25 = vunpack.c.l.s8.bf16 %v604_v5 }
 0x78a   :  { %v5612_v36 = vpop.f32.mrf.mxu0 }
 0x78b   :  { %6025 = vmatpush2.bf16.msra.mxu0 %v2020_v2  ;;  %v5398_v2 = vadd.f32 %v8569_v8, %v5355_v40  ;;  %v8627_v38 = vpop.f32.mrf.mxu1  ;;  %v596_v8 = vld [vmem:[#allocation5 + $0xd70] sm:$0xff] }
 0x78c   :  { %6068 = vmatpush2.bf16.msra.mxu1 %v2148_v13  ;;  %6026 = vmatprep.subr.bf16.mxu0 %v2013_v22  ;;  %v5359_v13 = vadd.f32 %v8571_v56, %v5316_v59  ;;  %v533_v22 = vld [vmem:[#allocation5 + $0xb78] sm:$0xff]  ;;  %v8624_v11 = vpop.f32.mrf.mxu0  ;;  %v2116_v5 = vunpack.c.h.s8.bf16 %v596_v8 }
 0x78d   :  { %6069 = vmatprep.subr.bf16.mxu1 %v2141_v50  ;;  %v597_v50 = vld [vmem:[#allocation5 + $0xd78] sm:$0xff]  ;;  %v5441_v46 = vadd.f32 %v8577_v19, %v5398_v2  ;;  %v1989_v34 = vunpack.c.h.s8.bf16 %v533_v22  ;;  %v1981_v40 = vunpack.c.l.s8.bf16 %v533_v22  ;;  %v2108_v2 = vunpack.c.l.s8.bf16 %v596_v8 }
 0x78e   :  { %v2117_v43 = vunpack.c.h.s8.bf16 %v597_v50  ;;  %v5402_v56 = vadd.f32 %v8579_v1, %v5359_v13  ;;  %v2109_v59 = vunpack.c.l.s8.bf16 %v597_v50  ;;  %v524_v50 = vld [vmem:[#allocation5 + $0xb30] sm:$0xff] }
 0x78f   :  { %6027 = vmatpush2.bf16.msra.mxu0 %v2012_v32  ;;  %v532_v32 = vld [vmem:[#allocation5 + $0xb70] sm:$0xff] }
 0x790   :  { %6070 = vmatpush2.bf16.msra.mxu1 %v2140_v49  ;;  %6028 = vmatprep.subr.bf16.mxu0 %v2005_v31  ;;  %v5655_v49 = vpop.f32.mrf.mxu1  ;;  %v5616_v31 = vpop.f32.mrf.mxu0  ;;  %v5445_v19 = vadd.f32 %v8587_v55, %v5402_v56  ;;  %v1988_v53 = vunpack.c.h.s8.bf16 %v532_v32  ;;  %v1980_v55 = vunpack.c.l.s8.bf16 %v532_v32 }
 0x791   :  { %6071 = vmatprep.subr.bf16.mxu1 %v2133_v44  ;;  %v5484_v44 = vadd.f32 %v8585_v0, %v5441_v46 }
 0x792   :  { %v8635_v1 = vpop.f32.mrf.mxu0  ;;  %v5488_v0 = vadd.f32 %v8595_v42, %v5445_v19  ;;  %v1972_v42 = vunpack.c.h.s8.bf16 %v524_v50 }
 0x793   :  { %6029 = vmatpush2.bf16.msra.mxu0 %v2004_v29  ;;  %v5527_v29 = vadd.f32 %v8593_v39, %v5484_v44 }
 0x794   :  { %6072 = vmatpush2.bf16.msra.mxu1 %v2132_v20  ;;  %6030 = vmatprep.subr.bf16.mxu0 %v1997_v60  ;;  %v525_v20 = vld [vmem:[#allocation5 + $0xb38] sm:$0xff]  ;;  %v5698_v13 = vpop.f32.mrf.mxu0 }
 0x795   :  { %6073 = vmatprep.subr.bf16.mxu1 %v2125_v6  ;;  %v589_v60 = vld [vmem:[#allocation5 + $0xd38] sm:$0xff]  ;;  %v8633_v6 = vpop.f32.mrf.mxu1  ;;  %v1973_v46 = vunpack.c.h.s8.bf16 %v525_v20  ;;  %v5570_v39 = vadd.f32 %v8607_v47, %v5527_v29  ;;  %v1965_v32 = vunpack.c.l.s8.bf16 %v525_v20  ;;  %v644_v20 = vld [vmem:[#allocation5 + $0xef0] sm:$0xff] }
 0x796   :  { %v2101_v22 = vunpack.c.h.s8.bf16 %v589_v60  ;;  %v8640_v44 = vpop.f32.mrf.mxu0  ;;  %v2093_v8 = vunpack.c.l.s8.bf16 %v589_v60  ;;  %v708_v60 = vld [vmem:[#allocation5 + $0x10f0] sm:$0xff] }
 0x797   :  { %6031 = vmatpush2.bf16.msra.mxu0 %v1996_v28  ;;  %v588_v28 = vld [vmem:[#allocation5 + $0xd30] sm:$0xff] }
 0x798   :  { %6074 = vmatpush2.bf16.msra.mxu1 %v2124_v25  ;;  %6032 = vmatprep.subr.bf16.mxu0 %v1989_v34  ;;  %v5531_v25 = vadd.f32 %v8609_v45, %v5488_v0  ;;  %v5659_v34 = vpop.f32.mrf.mxu1  ;;  %v2100_v56 = vunpack.c.h.s8.bf16 %v588_v28  ;;  %v5702_v0 = vpop.f32.mrf.mxu0 }
 0x799   :  { %6075 = vmatprep.subr.bf16.mxu1 %v2117_v43  ;;  %v5613_v43 = vadd.f32 %v5612_v36, %v5570_v39  ;;  %v1964_v36 = vunpack.c.l.s8.bf16 %v524_v50 }
 0x79a   :  { %v5574_v19 = vadd.f32 %v8620_v26, %v5531_v25  ;;  %v6544_v26 = vsub.s32 4, %v8373_v24  ;;  %v8648_v50 = vpop.f32.mrf.mxu0 }
 0x79b   :  { %6033 = vmatpush2.bf16.msra.mxu0 %v1988_v53  ;;  %v645_v53 = vld [vmem:[#allocation5 + $0xef8] sm:$0xff]  ;;  %v5656_v47 = vadd.f32 %v5655_v49, %v5613_v43  ;;  %v2212_v49 = vunpack.c.h.s8.bf16 %v644_v20 }
 0x79c   :  { %6076 = vmatpush2.bf16.msra.mxu1 %v2116_v5  ;;  %6034 = vmatprep.subr.bf16.mxu0 %v1981_v40  ;;  %v709_v5 = vld [vmem:[#allocation5 + $0x10f8] sm:$0xff]  ;;  %v8643_v40 = vpop.f32.mrf.mxu1  ;;  %v5617_v45 = vadd.f32 %v5616_v31, %v5574_v19  ;;  %v2340_v31 = vunpack.c.h.s8.bf16 %v708_v60 }
 0x79d   :  { %6077 = vmatprep.subr.bf16.mxu1 %v2109_v59  ;;  %v2092_v59 = vunpack.c.l.s8.bf16 %v588_v28  ;;  %v2205_v28 = vunpack.c.l.s8.bf16 %v645_v53  ;;  %v2333_v25 = vunpack.c.l.s8.bf16 %v709_v5 }
 0x79e   :  { %v5741_v29 = vpop.f32.mrf.mxu1 }
 0x79f   :  { %6035 = vmatpush2.bf16.msra.mxu0 %v1980_v55  ;;  %v2213_v55 = vunpack.c.h.s8.bf16 %v645_v53 }
 0x7a0   :  { %6078 = vmatpush2.bf16.msra.mxu1 %v2108_v2  ;;  %6036 = vmatprep.subr.bf16.mxu0 %v1973_v46  ;;  %v2341_v2 = vunpack.c.h.s8.bf16 %v709_v5  ;;  %v5699_v46 = vadd.f32 %v5698_v13, %v5656_v47  ;;  %v8646_v39 = vpop.f32.mrf.mxu1  ;;  %v637_v13 = vld [vmem:[#allocation5 + $0xeb8] sm:$0xff]  ;;  %v7957_v47 = vld [vmem:[#allocation2 + $0x30] ss:$136 sps:$4 sm:$0xff]  }
 0x7a1   :  { %6079 = vmatprep.subr.bf16.mxu1 %v2101_v22  ;;  %v5660_v22 = vadd.f32 %v5659_v34, %v5617_v45  ;;  %v7956_v34 = vld [vmem:[#allocation2 + $0x28] ss:$136 sps:$4 sm:$0xff]   ;;  %v2197_v53 = vunpack.c.h.s8.bf16 %v637_v13 }
 0x7a2   :  { %v5742_v43 = vadd.f32 %v5741_v29, %v5699_v46  ;;  %v636_v29 = vld [vmem:[#allocation5 + $0xeb0] sm:$0xff] }
 0x7a3   :  { %6037 = vmatpush2.bf16.msra.mxu0 %v1972_v42  ;;  %v5703_v42 = vadd.f32 %v5702_v0, %v5660_v22  ;;  %v700_v0 = vld [vmem:[#allocation5 + $0x10b0] sm:$0xff] }
 0x7a4   :  { %6080 = vmatpush2.bf16.msra.mxu1 %v2100_v56  ;;  %6038 = vmatprep.subr.bf16.mxu0 %v1965_v32  ;;  %v7955_v56 = vld [vmem:[#allocation7] sm:$0xff] }
 0x7a5   :  { %6081 = vmatprep.subr.bf16.mxu1 %v2093_v8  ;;  %v6545_v32 = vrot.slane %v7955_v56, %v6544_v26  ;;  %v701_v8 = vld [vmem:[#allocation5 + $0x10b8] sm:$0xff]  ;;  %v7958_v56 = vld [vmem:[#allocation8] sm:$0xff] }
 0x7a6   :  { %v2325_v5 = vunpack.c.h.s8.bf16 %v701_v8 }
 0x7a7   :  { %6039 = vmatpush2.bf16.msra.mxu0 %v1964_v36  ;;  %v2204_v36 = vunpack.c.l.s8.bf16 %v644_v20 }
 0x7a8   :  { %6082 = vmatpush2.bf16.msra.mxu1 %v2092_v59  ;;  %6094 = vmatprep.subr.bf16.mxu0 %v2213_v55  ;;  %v2332_v59 = vunpack.c.l.s8.bf16 %v708_v60  ;;  %v5745_v55 = vpop.f32.mrf.mxu1  ;;  %v2196_v60 = vunpack.c.h.s8.bf16 %v636_v29 }
 0x7a9   :  { %6137 = vmatprep.subr.bf16.mxu1 %v2341_v2  ;;  %v5746_v46 = vadd.f32 %v5745_v55, %v5703_v42  ;;  %v629_v42 = vld [vmem:[#allocation5 + $0xe78] sm:$0xff] }
 0x7aa   :  { %v5784_v19 = vpop.f32.mrf.mxu0  ;;  %6041 = vmatmul.mubr.bf16.vlgmr.msra.gmra.mxu0 %v7956_v34  ;;  %v6603_v34 = vrot.slane %v7958_v56, %v6544_v26  ;;  %v2316_v26 = vunpack.c.l.s8.bf16 %v700_v0  ;;  %v692_v56 = vld [vmem:[#allocation5 + $0x1070] sm:$0xff] }
 0x7ab   :  { %6084 = vmatmul.mubr.bf16.vlgmr.msra.gmra.mxu1 %v7957_v47  ;;  %v5785_v45 = vadd.f32 %v5784_v19, %v5742_v43  ;;  %6095 = vmatpush1.bf16.msra.mxu0 %v2212_v49  ;;  %v7960_v43 = vld [vmem:[#allocation2 + $0x44] ss:$136 sps:$4 sm:$0xff]  }
 0x7ac   :  { %6138 = vmatpush1.bf16.msra.mxu1 %v2340_v31  ;;  %v8650_v2 = vpop.f32.mrf.mxu0  ;;  %6096 = vmatprep.subr.bf16.mxu0 %v2205_v28  ;;  %v2324_v31 = vunpack.c.h.s8.bf16 %v700_v0  ;;  %v2189_v28 = vunpack.c.l.s8.bf16 %v637_v13  ;;  %v2308_v13 = vunpack.c.h.s8.bf16 %v692_v56  ;;  %v685_v0 = vld [vmem:[#allocation5 + $0x1038] sm:$0xff] }
 0x7ad   :  { %6139 = vmatprep.subr.bf16.mxu1 %v2333_v25  ;;  %v6570_v22 = vmul.f32 %v6545_v32, %v5785_v45  ;;  %6126 = vmatprep.mubr.bf16.mxu0 %v7959_v33  ;;  %v2317_v25 = vunpack.c.l.s8.bf16 %v701_v8  ;;  %v693_v45 = vld [vmem:[#allocation5 + $0x1078] sm:$0xff]  ;;  %v2188_v33 = vunpack.c.l.s8.bf16 %v636_v29  ;;  %v2173_v8 = vunpack.c.l.s8.bf16 %v629_v42 }
 0x7ae   :  { %6169 = vmatprep.mubr.bf16.mxu1 %v7960_v43  ;;  %v5788_v49 = vpop.f32.mrf.mxu0  ;;  %v621_v29 = vld [vmem:[#allocation5 + $0xe38] sm:$0xff] }
 0x7af   :  { %v5789_v20 = vadd.f32 %v5788_v49, %v5746_v46  ;;  %6097 = vmatpush1.bf16.msra.mxu0 %v2204_v36  ;;  %v6628_v19 = vadd.f32 %v6603_v34, %v6570_v22  ;;  %v2181_v46 = vunpack.c.h.s8.bf16 %v629_v42  ;;  %v2309_v36 = vunpack.c.h.s8.bf16 %v693_v45 }
 0x7b0   :  { %6140 = vmatpush1.bf16.msra.mxu1 %v2332_v59  ;;  %6098 = vmatprep.subr.bf16.mxu0 %v2197_v53  ;;  %v628_v59 = vld [vmem:[#allocation5 + $0xe70] sm:$0xff]  ;;  %v2301_v22 = vunpack.c.l.s8.bf16 %v693_v45  ;;  %v2300_v49 = vunpack.c.l.s8.bf16 %v692_v56  ;;  %v2285_v42 = vunpack.c.l.s8.bf16 %v685_v0  ;;  %v677_v45 = vld [vmem:[#allocation5 + $0xff8] sm:$0xff] }
 0x7b1   :  { %6141 = vmatprep.subr.bf16.mxu1 %v2325_v5  ;;  %v6578_v47 = vmul.f32 %v6545_v32, %v5789_v20  ;;  %v6644_v43 = vmax.f32 %v6628_v19, 0.0  ;;  %v2180_v32 = vunpack.c.h.s8.bf16 %v628_v59  ;;  %v2165_v20 = vunpack.c.h.s8.bf16 %v621_v29  ;;  %v740_v56 = vld [vmem:[#allocation5 + $0x11f0] sm:$0xff] }
 0x7b3   :  { %v6636_v55 = vadd.f32 %v6603_v34, %v6578_v47  ;;  %6099 = vmatpush1.bf16.msra.mxu0 %v2196_v60  ;;  %v2172_v34 = vunpack.c.l.s8.bf16 %v628_v59  ;;  %v2293_v60 = vunpack.c.h.s8.bf16 %v685_v0  ;;  %v2157_v47 = vunpack.c.l.s8.bf16 %v621_v29  ;;  %v676_v59 = vld [vmem:[#allocation5 + $0xff0] sm:$0xff] }
 0x7b4   :  { %6142 = vmatpush1.bf16.msra.mxu1 %v2324_v31  ;;  %6100 = vmatprep.subr.bf16.mxu0 %v2189_v28  ;;  %v620_v31 = vld [vmem:[#allocation5 + $0xe30] sm:$0xff]  ;;  %v2268_v29 = vunpack.c.l.s8.bf16 %v676_v59  ;;  %v2396_v0 = vunpack.c.l.s8.bf16 %v740_v56 }
 0x7b5   :  { %6143 = vmatprep.subr.bf16.mxu1 %v2317_v25  ;;  %v6652_v53 = vmax.f32 %v6636_v55, 0.0  ;;  %v684_v28 = vld [vmem:[#allocation5 + $0x1030] sm:$0xff]  ;;  %v2164_v25 = vunpack.c.h.s8.bf16 %v620_v31  ;;  %v741_v55 = vld [vmem:[#allocation5 + $0x11f8] sm:$0xff] }
 0x7b6   :  { %v2292_v19 = vunpack.c.h.s8.bf16 %v684_v28 }
 0x7b7   :  { %v8652_v5 = vpack.c.bf16 %v6652_v53, %v6644_v43  ;;  %6101 = vmatpush1.bf16.msra.mxu0 %v2188_v33  ;;  %v2156_v33 = vunpack.c.l.s8.bf16 %v620_v31  ;;  %v2276_v43 = vunpack.c.h.s8.bf16 %v676_v59  ;;  %v2404_v53 = vunpack.c.h.s8.bf16 %v740_v56 }
 0x7b8   :  { %6144 = vmatpush1.bf16.msra.mxu1 %v2316_v26  ;;  %6102 = vmatprep.subr.bf16.mxu0 %v2181_v46  ;;  %v2284_v26 = vunpack.c.l.s8.bf16 %v684_v28  ;;  %v2277_v46 = vunpack.c.h.s8.bf16 %v677_v45 }
 0x7b9   :  { %6145 = vmatprep.subr.bf16.mxu1 %v2309_v36  ;;  %v2405_v36 = vunpack.c.h.s8.bf16 %v741_v55 }
 0x7bb   :  { %6103 = vmatpush1.bf16.msra.mxu0 %v2180_v32  ;;  %v2269_v32 = vunpack.c.l.s8.bf16 %v677_v45 }
 0x7bc   :  { %6146 = vmatpush1.bf16.msra.mxu1 %v2308_v13  ;;  %6104 = vmatprep.subr.bf16.mxu0 %v2173_v8  ;;  %v2397_v13 = vunpack.c.l.s8.bf16 %v741_v55  ;;  %v669_v8 = vld [vmem:[#allocation5 + $0xfb8] sm:$0xff] }
 0x7bd   :  { %6147 = vmatprep.subr.bf16.mxu1 %v2301_v22  ;;  %v733_v22 = vld [vmem:[#allocation5 + $0x11b8] sm:$0xff] }
 0x7bf   :  { %6105 = vmatpush1.bf16.msra.mxu0 %v2172_v34  ;;  %v2261_v34 = vunpack.c.h.s8.bf16 %v669_v8 }
 0x7c0   :  { %6148 = vmatpush1.bf16.msra.mxu1 %v2300_v49  ;;  %6106 = vmatprep.subr.bf16.mxu0 %v2165_v20  ;;  %v2389_v49 = vunpack.c.h.s8.bf16 %v733_v22  ;;  %v668_v20 = vld [vmem:[#allocation5 + $0xfb0] sm:$0xff] }
 0x7c1   :  { %6149 = vmatprep.subr.bf16.mxu1 %v2293_v60  ;;  %v732_v60 = vld [vmem:[#allocation5 + $0x11b0] sm:$0xff]  ;;  %v2260_v31 = vunpack.c.h.s8.bf16 %v668_v20  ;;  %v2252_v45 = vunpack.c.l.s8.bf16 %v668_v20 }
 0x7c2   :  { %v2388_v28 = vunpack.c.h.s8.bf16 %v732_v60  ;;  %v2380_v55 = vunpack.c.l.s8.bf16 %v732_v60 }
 0x7c3   :  { %6107 = vmatpush1.bf16.msra.mxu0 %v2164_v25  ;;  %v2253_v25 = vunpack.c.l.s8.bf16 %v669_v8 }
 0x7c4   :  { %6150 = vmatpush1.bf16.msra.mxu1 %v2292_v19  ;;  %6108 = vmatprep.subr.bf16.mxu0 %v2157_v47  ;;  %v2381_v19 = vunpack.c.l.s8.bf16 %v733_v22  ;;  %v661_v47 = vld [vmem:[#allocation5 + $0xf78] sm:$0xff] }
 0x7c5   :  { %6151 = vmatprep.subr.bf16.mxu1 %v2285_v42  ;;  %v725_v42 = vld [vmem:[#allocation5 + $0x1178] sm:$0xff] }
 0x7c7   :  { %6109 = vmatpush1.bf16.msra.mxu0 %v2156_v33  ;;  %v2245_v33 = vunpack.c.h.s8.bf16 %v661_v47 }
 0x7c8   :  { %6152 = vmatpush1.bf16.msra.mxu1 %v2284_v26  ;;  %6110 = vmatprep.subr.bf16.mxu0 %v2277_v46  ;;  %v2373_v26 = vunpack.c.h.s8.bf16 %v725_v42  ;;  %v660_v46 = vld [vmem:[#allocation5 + $0xf70] sm:$0xff] }
 0x7c9   :  { %6153 = vmatprep.subr.bf16.mxu1 %v2405_v36  ;;  %v724_v36 = vld [vmem:[#allocation5 + $0x1170] sm:$0xff]  ;;  %v2244_v59 = vunpack.c.h.s8.bf16 %v660_v46  ;;  %v2236_v8 = vunpack.c.l.s8.bf16 %v660_v46 }
 0x7ca   :  { %v2372_v56 = vunpack.c.h.s8.bf16 %v724_v36  ;;  %v2364_v22 = vunpack.c.l.s8.bf16 %v724_v36 }
 0x7cb   :  { %6111 = vmatpush2.bf16.msra.mxu0 %v2276_v43  ;;  %v2237_v43 = vunpack.c.l.s8.bf16 %v661_v47 }
 0x7cc   :  { %6154 = vmatpush2.bf16.msra.mxu1 %v2404_v53  ;;  %6112 = vmatprep.subr.bf16.mxu0 %v2269_v32  ;;  %v2365_v53 = vunpack.c.l.s8.bf16 %v725_v42  ;;  %v653_v32 = vld [vmem:[#allocation5 + $0xf38] sm:$0xff] }
 0x7cd   :  { %6155 = vmatprep.subr.bf16.mxu1 %v2397_v13  ;;  %v717_v13 = vld [vmem:[#allocation5 + $0x1138] sm:$0xff] }
 0x7cf   :  { %6113 = vmatpush2.bf16.msra.mxu0 %v2268_v29  ;;  %v2229_v29 = vunpack.c.h.s8.bf16 %v653_v32 }
 0x7d0   :  { %6156 = vmatpush2.bf16.msra.mxu1 %v2396_v0  ;;  %6114 = vmatprep.subr.bf16.mxu0 %v2261_v34  ;;  %v2357_v0 = vunpack.c.h.s8.bf16 %v717_v13  ;;  %v652_v34 = vld [vmem:[#allocation5 + $0xf30] sm:$0xff] }
 0x7d1   :  { %6157 = vmatprep.subr.bf16.mxu1 %v2389_v49  ;;  %v716_v49 = vld [vmem:[#allocation5 + $0x1130] sm:$0xff]  ;;  %v2228_v20 = vunpack.c.h.s8.bf16 %v652_v34  ;;  %v2220_v47 = vunpack.c.l.s8.bf16 %v652_v34 }
 0x7d2   :  { %v2356_v60 = vunpack.c.h.s8.bf16 %v716_v49  ;;  %v2348_v42 = vunpack.c.l.s8.bf16 %v716_v49  ;;  %v764_v34 = vld [vmem:[#allocation5 + $0x12b0] sm:$0xff] }
 0x7d3   :  { %6115 = vmatpush2.bf16.msra.mxu0 %v2260_v31  ;;  %v2221_v31 = vunpack.c.l.s8.bf16 %v653_v32  ;;  %v7961_v32 = vld [vmem:[#allocation2 + $0x38] ss:$136 sps:$4 sm:$0xff]  }
 0x7d4   :  { %6158 = vmatpush2.bf16.msra.mxu1 %v2388_v28  ;;  %6116 = vmatprep.subr.bf16.mxu0 %v2253_v25  ;;  %v2349_v28 = vunpack.c.l.s8.bf16 %v717_v13  ;;  %v773_v25 = vld [vmem:[#allocation5 + $0x12f8] sm:$0xff]  ;;  %v828_v49 = vld [vmem:[#allocation5 + $0x14b0] sm:$0xff] }
 0x7d5   :  { %6159 = vmatprep.subr.bf16.mxu1 %v2381_v19  ;;  %v837_v19 = vld [vmem:[#allocation5 + $0x14f8] sm:$0xff] }
 0x7d6   :  { %v7962_v13 = vld [vmem:[#allocation2 + $0x40] ss:$136 sps:$4 sm:$0xff]  }
 0x7d7   :  { %6117 = vmatpush2.bf16.msra.mxu0 %v2252_v45  ;;  %v2469_v45 = vunpack.c.h.s8.bf16 %v773_v25 }
 0x7d8   :  { %6160 = vmatpush2.bf16.msra.mxu1 %v2380_v55  ;;  %6118 = vmatprep.subr.bf16.mxu0 %v2245_v33  ;;  %v2597_v55 = vunpack.c.h.s8.bf16 %v837_v19  ;;  %v772_v33 = vld [vmem:[#allocation5 + $0x12f0] sm:$0xff] }
 0x7d9   :  { %6161 = vmatprep.subr.bf16.mxu1 %v2373_v26  ;;  %v836_v26 = vld [vmem:[#allocation5 + $0x14f0] sm:$0xff]  ;;  %v2468_v46 = vunpack.c.h.s8.bf16 %v772_v33 }
 0x7da   :  { %v2596_v36 = vunpack.c.h.s8.bf16 %v836_v26 }
 0x7db   :  { %6119 = vmatpush2.bf16.msra.mxu0 %v2244_v59  ;;  %v2461_v59 = vunpack.c.l.s8.bf16 %v773_v25 }
 0x7dc   :  { %6162 = vmatpush2.bf16.msra.mxu1 %v2372_v56  ;;  %6120 = vmatprep.subr.bf16.mxu0 %v2237_v43  ;;  %v2589_v56 = vunpack.c.l.s8.bf16 %v837_v19  ;;  %v765_v43 = vld [vmem:[#allocation5 + $0x12b8] sm:$0xff] }
 0x7dd   :  { %6163 = vmatprep.subr.bf16.mxu1 %v2365_v53  ;;  %v829_v53 = vld [vmem:[#allocation5 + $0x14b8] sm:$0xff]  ;;  %v2445_v25 = vunpack.c.l.s8.bf16 %v765_v43 }
 0x7de   :  { %v2573_v19 = vunpack.c.l.s8.bf16 %v829_v53 }
 0x7df   :  { %6121 = vmatpush2.bf16.msra.mxu0 %v2236_v8  ;;  %v2460_v8 = vunpack.c.l.s8.bf16 %v772_v33 }
 0x7e0   :  { %6164 = vmatpush2.bf16.msra.mxu1 %v2364_v22  ;;  %6122 = vmatprep.subr.bf16.mxu0 %v2229_v29  ;;  %v2588_v22 = vunpack.c.l.s8.bf16 %v836_v26  ;;  %v2453_v29 = vunpack.c.h.s8.bf16 %v765_v43 }
 0x7e1   :  { %6165 = vmatprep.subr.bf16.mxu1 %v2357_v0  ;;  %v2581_v0 = vunpack.c.h.s8.bf16 %v829_v53 }
 0x7e3   :  { %6123 = vmatpush2.bf16.msra.mxu0 %v2228_v20  ;;  %v7963_v20 = vld [vmem:[#allocation2 + $0x4c] ss:$136 sps:$4 sm:$0xff]  }
 0x7e4   :  { %6166 = vmatpush2.bf16.msra.mxu1 %v2356_v60  ;;  %6124 = vmatprep.subr.bf16.mxu0 %v2221_v31  ;;  %v7964_v60 = vld [vmem:[#allocation2 + $0x54] ss:$136 sps:$4 sm:$0xff]   ;;  %v2452_v31 = vunpack.c.h.s8.bf16 %v764_v34 }
 0x7e5   :  { %6167 = vmatprep.subr.bf16.mxu1 %v2349_v28  ;;  %v2580_v28 = vunpack.c.h.s8.bf16 %v828_v49 }
 0x7e7   :  { %6125 = vmatpush2.bf16.msra.mxu0 %v2220_v47  ;;  %v757_v47 = vld [vmem:[#allocation5 + $0x1278] sm:$0xff] }
 0x7e8   :  { %6168 = vmatpush2.bf16.msra.mxu1 %v2348_v42  ;;  %6180 = vmatprep.subr.bf16.mxu0 %v2469_v45  ;;  %v821_v42 = vld [vmem:[#allocation5 + $0x1478] sm:$0xff]  ;;  %v2444_v45 = vunpack.c.l.s8.bf16 %v764_v34  ;;  %v2437_v33 = vunpack.c.h.s8.bf16 %v757_v47  ;;  %v2429_v43 = vunpack.c.l.s8.bf16 %v757_v47  ;;  %v748_v34 = vld [vmem:[#allocation5 + $0x1230] sm:$0xff] }
 0x7e9   :  { %6223 = vmatprep.subr.bf16.mxu1 %v2597_v55  ;;  %v2572_v55 = vunpack.c.l.s8.bf16 %v828_v49  ;;  %v2565_v26 = vunpack.c.h.s8.bf16 %v821_v42  ;;  %v2557_v53 = vunpack.c.l.s8.bf16 %v821_v42  ;;  %v812_v49 = vld [vmem:[#allocation5 + $0x1430] sm:$0xff]  ;;  %v2412_v47 = vunpack.c.l.s8.bf16 %v748_v34 }
 0x7ea   :  { %6127 = vmatmul.mubr.bf16.vlgmr.msra.gmra.mxu0 %v7961_v32  ;;  %v749_v32 = vld [vmem:[#allocation5 + $0x1238] sm:$0xff]  ;;  %v2540_v42 = vunpack.c.l.s8.bf16 %v812_v49 }
 0x7eb   :  { %6170 = vmatmul.mubr.bf16.vlgmr.msra.gmra.mxu1 %v7962_v13  ;;  %6181 = vmatpush1.bf16.msra.mxu0 %v2468_v46  ;;  %v756_v46 = vld [vmem:[#allocation5 + $0x1270] sm:$0xff]  ;;  %v813_v13 = vld [vmem:[#allocation5 + $0x1438] sm:$0xff] }
 0x7ec   :  { %6224 = vmatpush1.bf16.msra.mxu1 %v2596_v36  ;;  %6182 = vmatprep.subr.bf16.mxu0 %v2461_v59  ;;  %v820_v36 = vld [vmem:[#allocation5 + $0x1470] sm:$0xff]  ;;  %v2436_v59 = vunpack.c.h.s8.bf16 %v756_v46 }
 0x7ed   :  { %6225 = vmatprep.subr.bf16.mxu1 %v2589_v56  ;;  %6212 = vmatprep.mubr.bf16.mxu0 %v7963_v20  ;;  %v2564_v56 = vunpack.c.h.s8.bf16 %v820_v36  ;;  %v2420_v20 = vunpack.c.h.s8.bf16 %v748_v34 }
 0x7ee   :  { %6255 = vmatprep.mubr.bf16.mxu1 %v7964_v60  ;;  %v2548_v60 = vunpack.c.h.s8.bf16 %v812_v49 }
 0x7ef   :  { %6183 = vmatpush1.bf16.msra.mxu0 %v2460_v8  ;;  %v2428_v8 = vunpack.c.l.s8.bf16 %v756_v46 }
 0x7f0   :  { %6226 = vmatpush1.bf16.msra.mxu1 %v2588_v22  ;;  %6184 = vmatprep.subr.bf16.mxu0 %v2453_v29  ;;  %v2556_v22 = vunpack.c.l.s8.bf16 %v820_v36  ;;  %v2421_v29 = vunpack.c.h.s8.bf16 %v749_v32 }
 0x7f1   :  { %6227 = vmatprep.subr.bf16.mxu1 %v2581_v0  ;;  %v2549_v0 = vunpack.c.h.s8.bf16 %v813_v13 }
 0x7f3   :  { %6185 = vmatpush1.bf16.msra.mxu0 %v2452_v31  ;;  %v2413_v31 = vunpack.c.l.s8.bf16 %v749_v32 }
 0x7f4   :  { %6228 = vmatpush1.bf16.msra.mxu1 %v2580_v28  ;;  %6186 = vmatprep.subr.bf16.mxu0 %v2445_v25  ;;  %v2541_v28 = vunpack.c.l.s8.bf16 %v813_v13  ;;  %v805_v25 = vld [vmem:[#allocation5 + $0x13f8] sm:$0xff] }
 0x7f5   :  { %6229 = vmatprep.subr.bf16.mxu1 %v2573_v19  ;;  %v869_v19 = vld [vmem:[#allocation5 + $0x15f8] sm:$0xff] }
 0x7f7   :  { %6187 = vmatpush1.bf16.msra.mxu0 %v2444_v45  ;;  %v2533_v45 = vunpack.c.h.s8.bf16 %v805_v25 }
 0x7f8   :  { %6230 = vmatpush1.bf16.msra.mxu1 %v2572_v55  ;;  %6188 = vmatprep.subr.bf16.mxu0 %v2437_v33  ;;  %v2661_v55 = vunpack.c.h.s8.bf16 %v869_v19  ;;  %v804_v33 = vld [vmem:[#allocation5 + $0x13f0] sm:$0xff] }
 0x7f9   :  { %6231 = vmatprep.subr.bf16.mxu1 %v2565_v26  ;;  %v868_v26 = vld [vmem:[#allocation5 + $0x15f0] sm:$0xff]  ;;  %v2532_v46 = vunpack.c.h.s8.bf16 %v804_v33  ;;  %v2524_v32 = vunpack.c.l.s8.bf16 %v804_v33 }
 0x7fa   :  { %v2660_v36 = vunpack.c.h.s8.bf16 %v868_v26  ;;  %v2652_v13 = vunpack.c.l.s8.bf16 %v868_v26 }
 0x7fb   :  { %6189 = vmatpush1.bf16.msra.mxu0 %v2436_v59  ;;  %v2525_v59 = vunpack.c.l.s8.bf16 %v805_v25 }
 0x7fc   :  { %6232 = vmatpush1.bf16.msra.mxu1 %v2564_v56  ;;  %6190 = vmatprep.subr.bf16.mxu0 %v2429_v43  ;;  %v2653_v56 = vunpack.c.l.s8.bf16 %v869_v19  ;;  %v797_v43 = vld [vmem:[#allocation5 + $0x13b8] sm:$0xff] }
 0x7fd   :  { %6233 = vmatprep.subr.bf16.mxu1 %v2557_v53  ;;  %v861_v53 = vld [vmem:[#allocation5 + $0x15b8] sm:$0xff] }
 0x7ff   :  { %6191 = vmatpush1.bf16.msra.mxu0 %v2428_v8  ;;  %v2517_v8 = vunpack.c.h.s8.bf16 %v797_v43 }
 0x800   :  { %6234 = vmatpush1.bf16.msra.mxu1 %v2556_v22  ;;  %6192 = vmatprep.subr.bf16.mxu0 %v2421_v29  ;;  %v2645_v22 = vunpack.c.h.s8.bf16 %v861_v53  ;;  %v796_v29 = vld [vmem:[#allocation5 + $0x13b0] sm:$0xff] }
 0x801   :  { %6235 = vmatprep.subr.bf16.mxu1 %v2549_v0  ;;  %v860_v0 = vld [vmem:[#allocation5 + $0x15b0] sm:$0xff]  ;;  %v2516_v34 = vunpack.c.h.s8.bf16 %v796_v29  ;;  %v2508_v25 = vunpack.c.l.s8.bf16 %v796_v29 }
 0x802   :  { %v2644_v49 = vunpack.c.h.s8.bf16 %v860_v0  ;;  %v2636_v19 = vunpack.c.l.s8.bf16 %v860_v0 }
 0x803   :  { %6193 = vmatpush1.bf16.msra.mxu0 %v2420_v20  ;;  %v2509_v20 = vunpack.c.l.s8.bf16 %v797_v43 }
 0x804   :  { %6236 = vmatpush1.bf16.msra.mxu1 %v2548_v60  ;;  %6194 = vmatprep.subr.bf16.mxu0 %v2413_v31  ;;  %v2637_v60 = vunpack.c.l.s8.bf16 %v861_v53  ;;  %v789_v31 = vld [vmem:[#allocation5 + $0x1378] sm:$0xff] }
 0x805   :  { %6237 = vmatprep.subr.bf16.mxu1 %v2541_v28  ;;  %v853_v28 = vld [vmem:[#allocation5 + $0x1578] sm:$0xff] }
 0x807   :  { %6195 = vmatpush1.bf16.msra.mxu0 %v2412_v47  ;;  %v2501_v47 = vunpack.c.h.s8.bf16 %v789_v31 }
 0x808   :  { %6238 = vmatpush1.bf16.msra.mxu1 %v2540_v42  ;;  %6196 = vmatprep.subr.bf16.mxu0 %v2533_v45  ;;  %v2629_v42 = vunpack.c.h.s8.bf16 %v853_v28  ;;  %v788_v45 = vld [vmem:[#allocation5 + $0x1370] sm:$0xff] }
 0x809   :  { %6239 = vmatprep.subr.bf16.mxu1 %v2661_v55  ;;  %v852_v55 = vld [vmem:[#allocation5 + $0x1570] sm:$0xff]  ;;  %v2500_v33 = vunpack.c.h.s8.bf16 %v788_v45  ;;  %v2492_v43 = vunpack.c.l.s8.bf16 %v788_v45 }
 0x80a   :  { %v2628_v26 = vunpack.c.h.s8.bf16 %v852_v55  ;;  %v2620_v53 = vunpack.c.l.s8.bf16 %v852_v55 }
 0x80b   :  { %6197 = vmatpush2.bf16.msra.mxu0 %v2532_v46  ;;  %v2493_v46 = vunpack.c.l.s8.bf16 %v789_v31 }
 0x80c   :  { %6240 = vmatpush2.bf16.msra.mxu1 %v2660_v36  ;;  %6198 = vmatprep.subr.bf16.mxu0 %v2525_v59  ;;  %v2621_v36 = vunpack.c.l.s8.bf16 %v853_v28  ;;  %v781_v59 = vld [vmem:[#allocation5 + $0x1338] sm:$0xff] }
 0x80d   :  { %6241 = vmatprep.subr.bf16.mxu1 %v2653_v56  ;;  %v845_v56 = vld [vmem:[#allocation5 + $0x1538] sm:$0xff] }
 0x80f   :  { %6199 = vmatpush2.bf16.msra.mxu0 %v2524_v32  ;;  %v2485_v32 = vunpack.c.h.s8.bf16 %v781_v59 }
 0x810   :  { %6242 = vmatpush2.bf16.msra.mxu1 %v2652_v13  ;;  %6200 = vmatprep.subr.bf16.mxu0 %v2517_v8  ;;  %v2613_v13 = vunpack.c.h.s8.bf16 %v845_v56  ;;  %v780_v8 = vld [vmem:[#allocation5 + $0x1330] sm:$0xff] }
 0x811   :  { %6243 = vmatprep.subr.bf16.mxu1 %v2645_v22  ;;  %v844_v22 = vld [vmem:[#allocation5 + $0x1530] sm:$0xff]  ;;  %v2484_v29 = vunpack.c.h.s8.bf16 %v780_v8  ;;  %v2476_v31 = vunpack.c.l.s8.bf16 %v780_v8 }
 0x812   :  { %v2612_v0 = vunpack.c.h.s8.bf16 %v844_v22  ;;  %v2604_v28 = vunpack.c.l.s8.bf16 %v844_v22  ;;  %v892_v8 = vld [vmem:[#allocation5 + $0x16b0] sm:$0xff] }
 0x813   :  { %6201 = vmatpush2.bf16.msra.mxu0 %v2516_v34  ;;  %v2477_v34 = vunpack.c.l.s8.bf16 %v781_v59  ;;  %v7965_v59 = vld [vmem:[#allocation2 + $0x48] ss:$136 sps:$4 sm:$0xff]   ;;  %v956_v22 = vld [vmem:[#allocation5 + $0x18b0] sm:$0xff] }
 0x814   :  { %6244 = vmatpush2.bf16.msra.mxu1 %v2644_v49  ;;  %6202 = vmatprep.subr.bf16.mxu0 %v2509_v20  ;;  %v2605_v49 = vunpack.c.l.s8.bf16 %v845_v56  ;;  %v901_v20 = vld [vmem:[#allocation5 + $0x16f8] sm:$0xff]  ;;  %v7966_v56 = vld [vmem:[#allocation2 + $0x50] ss:$136 sps:$4 sm:$0xff]  }
 0x815   :  { %6245 = vmatprep.subr.bf16.mxu1 %v2637_v60  ;;  %v965_v60 = vld [vmem:[#allocation5 + $0x18f8] sm:$0xff] }
 0x817   :  { %6203 = vmatpush2.bf16.msra.mxu0 %v2508_v25  ;;  %v2725_v25 = vunpack.c.h.s8.bf16 %v901_v20 }
 0x818   :  { %6246 = vmatpush2.bf16.msra.mxu1 %v2636_v19  ;;  %6204 = vmatprep.subr.bf16.mxu0 %v2501_v47  ;;  %v2853_v19 = vunpack.c.h.s8.bf16 %v965_v60  ;;  %v900_v47 = vld [vmem:[#allocation5 + $0x16f0] sm:$0xff] }
 0x819   :  { %6247 = vmatprep.subr.bf16.mxu1 %v2629_v42  ;;  %v964_v42 = vld [vmem:[#allocation5 + $0x18f0] sm:$0xff]  ;;  %v2724_v45 = vunpack.c.h.s8.bf16 %v900_v47 }
 0x81a   :  { %v2852_v55 = vunpack.c.h.s8.bf16 %v964_v42 }
 0x81b   :  { %6205 = vmatpush2.bf16.msra.mxu0 %v2500_v33  ;;  %v2717_v33 = vunpack.c.l.s8.bf16 %v901_v20 }
 0x81c   :  { %6248 = vmatpush2.bf16.msra.mxu1 %v2628_v26  ;;  %6206 = vmatprep.subr.bf16.mxu0 %v2493_v46  ;;  %v2845_v26 = vunpack.c.l.s8.bf16 %v965_v60  ;;  %v893_v46 = vld [vmem:[#allocation5 + $0x16b8] sm:$0xff] }
 0x81d   :  { %6249 = vmatprep.subr.bf16.mxu1 %v2621_v36  ;;  %v957_v36 = vld [vmem:[#allocation5 + $0x18b8] sm:$0xff]  ;;  %v2701_v20 = vunpack.c.l.s8.bf16 %v893_v46 }
 0x81e   :  { %v2829_v60 = vunpack.c.l.s8.bf16 %v957_v36 }
 0x81f   :  { %6207 = vmatpush2.bf16.msra.mxu0 %v2492_v43  ;;  %v2716_v43 = vunpack.c.l.s8.bf16 %v900_v47 }
 0x820   :  { %6250 = vmatpush2.bf16.msra.mxu1 %v2620_v53  ;;  %6208 = vmatprep.subr.bf16.mxu0 %v2485_v32  ;;  %v2844_v53 = vunpack.c.l.s8.bf16 %v964_v42  ;;  %v2709_v32 = vunpack.c.h.s8.bf16 %v893_v46 }
 0x821   :  { %6251 = vmatprep.subr.bf16.mxu1 %v2613_v13  ;;  %v2837_v13 = vunpack.c.h.s8.bf16 %v957_v36 }
 0x823   :  { %6209 = vmatpush2.bf16.msra.mxu0 %v2484_v29  ;;  %v7967_v29 = vld [vmem:[#allocation2 + $0x5c] ss:$136 sps:$4 sm:$0xff]  }
 0x824   :  { %6252 = vmatpush2.bf16.msra.mxu1 %v2612_v0  ;;  %6210 = vmatprep.subr.bf16.mxu0 %v2477_v34  ;;  %v7968_v0 = vld [vmem:[#allocation2 + $0x64] ss:$136 sps:$4 sm:$0xff]   ;;  %v2708_v34 = vunpack.c.h.s8.bf16 %v892_v8 }
 0x825   :  { %6253 = vmatprep.subr.bf16.mxu1 %v2605_v49  ;;  %v2836_v49 = vunpack.c.h.s8.bf16 %v956_v22 }
 0x827   :  { %6211 = vmatpush2.bf16.msra.mxu0 %v2476_v31  ;;  %v885_v31 = vld [vmem:[#allocation5 + $0x1678] sm:$0xff] }
 0x828   :  { %6254 = vmatpush2.bf16.msra.mxu1 %v2604_v28  ;;  %6266 = vmatprep.subr.bf16.mxu0 %v2725_v25  ;;  %v949_v28 = vld [vmem:[#allocation5 + $0x1878] sm:$0xff]  ;;  %v2700_v25 = vunpack.c.l.s8.bf16 %v892_v8  ;;  %v2693_v47 = vunpack.c.h.s8.bf16 %v885_v31  ;;  %v2685_v46 = vunpack.c.l.s8.bf16 %v885_v31  ;;  %v876_v8 = vld [vmem:[#allocation5 + $0x1630] sm:$0xff] }
 0x829   :  { %6309 = vmatprep.subr.bf16.mxu1 %v2853_v19  ;;  %v2828_v19 = vunpack.c.l.s8.bf16 %v956_v22  ;;  %v2821_v42 = vunpack.c.h.s8.bf16 %v949_v28  ;;  %v2813_v36 = vunpack.c.l.s8.bf16 %v949_v28  ;;  %v940_v22 = vld [vmem:[#allocation5 + $0x1830] sm:$0xff]  ;;  %v2668_v31 = vunpack.c.l.s8.bf16 %v876_v8 }
 0x82a   :  { %6213 = vmatmul.mubr.bf16.vlgmr.msra.gmra.mxu0 %v7965_v59  ;;  %v877_v59 = vld [vmem:[#allocation5 + $0x1638] sm:$0xff]  ;;  %v2796_v28 = vunpack.c.l.s8.bf16 %v940_v22 }
 0x82b   :  { %6256 = vmatmul.mubr.bf16.vlgmr.msra.gmra.mxu1 %v7966_v56  ;;  %6267 = vmatpush1.bf16.msra.mxu0 %v2724_v45  ;;  %v884_v45 = vld [vmem:[#allocation5 + $0x1670] sm:$0xff]  ;;  %v941_v56 = vld [vmem:[#allocation5 + $0x1838] sm:$0xff] }
 0x82c   :  { %6310 = vmatpush1.bf16.msra.mxu1 %v2852_v55  ;;  %6268 = vmatprep.subr.bf16.mxu0 %v2717_v33  ;;  %v948_v55 = vld [vmem:[#allocation5 + $0x1870] sm:$0xff]  ;;  %v2692_v33 = vunpack.c.h.s8.bf16 %v884_v45 }
 0x82d   :  { %6311 = vmatprep.subr.bf16.mxu1 %v2845_v26  ;;  %6298 = vmatprep.mubr.bf16.mxu0 %v7967_v29  ;;  %v2820_v26 = vunpack.c.h.s8.bf16 %v948_v55  ;;  %v2676_v29 = vunpack.c.h.s8.bf16 %v876_v8 }
 0x82e   :  { %6341 = vmatprep.mubr.bf16.mxu1 %v7968_v0  ;;  %v2804_v0 = vunpack.c.h.s8.bf16 %v940_v22 }
 0x82f   :  { %6269 = vmatpush1.bf16.msra.mxu0 %v2716_v43  ;;  %v2684_v43 = vunpack.c.l.s8.bf16 %v884_v45 }
 0x830   :  { %6312 = vmatpush1.bf16.msra.mxu1 %v2844_v53  ;;  %6270 = vmatprep.subr.bf16.mxu0 %v2709_v32  ;;  %v2812_v53 = vunpack.c.l.s8.bf16 %v948_v55  ;;  %v2677_v32 = vunpack.c.h.s8.bf16 %v877_v59 }
 0x831   :  { %6313 = vmatprep.subr.bf16.mxu1 %v2837_v13  ;;  %v2805_v13 = vunpack.c.h.s8.bf16 %v941_v56 }
 0x833   :  { %6271 = vmatpush1.bf16.msra.mxu0 %v2708_v34  ;;  %v2669_v34 = vunpack.c.l.s8.bf16 %v877_v59 }
 0x834   :  { %6314 = vmatpush1.bf16.msra.mxu1 %v2836_v49  ;;  %6272 = vmatprep.subr.bf16.mxu0 %v2701_v20  ;;  %v2797_v49 = vunpack.c.l.s8.bf16 %v941_v56  ;;  %v933_v20 = vld [vmem:[#allocation5 + $0x17f8] sm:$0xff] }
 0x835   :  { %6315 = vmatprep.subr.bf16.mxu1 %v2829_v60  ;;  %v997_v60 = vld [vmem:[#allocation5 + $0x19f8] sm:$0xff] }
 0x837   :  { %6273 = vmatpush1.bf16.msra.mxu0 %v2700_v25  ;;  %v2789_v25 = vunpack.c.h.s8.bf16 %v933_v20 }
 0x838   :  { %6316 = vmatpush1.bf16.msra.mxu1 %v2828_v19  ;;  %6274 = vmatprep.subr.bf16.mxu0 %v2693_v47  ;;  %v2917_v19 = vunpack.c.h.s8.bf16 %v997_v60  ;;  %v932_v47 = vld [vmem:[#allocation5 + $0x17f0] sm:$0xff] }
 0x839   :  { %6317 = vmatprep.subr.bf16.mxu1 %v2821_v42  ;;  %v996_v42 = vld [vmem:[#allocation5 + $0x19f0] sm:$0xff]  ;;  %v2788_v45 = vunpack.c.h.s8.bf16 %v932_v47  ;;  %v2780_v59 = vunpack.c.l.s8.bf16 %v932_v47 }
 0x83a   :  { %v2916_v55 = vunpack.c.h.s8.bf16 %v996_v42  ;;  %v2908_v56 = vunpack.c.l.s8.bf16 %v996_v42 }
 0x83b   :  { %6275 = vmatpush1.bf16.msra.mxu0 %v2692_v33  ;;  %v2781_v33 = vunpack.c.l.s8.bf16 %v933_v20 }
 0x83c   :  { %6318 = vmatpush1.bf16.msra.mxu1 %v2820_v26  ;;  %6276 = vmatprep.subr.bf16.mxu0 %v2685_v46  ;;  %v2909_v26 = vunpack.c.l.s8.bf16 %v997_v60  ;;  %v925_v46 = vld [vmem:[#allocation5 + $0x17b8] sm:$0xff] }
 0x83d   :  { %6319 = vmatprep.subr.bf16.mxu1 %v2813_v36  ;;  %v989_v36 = vld [vmem:[#allocation5 + $0x19b8] sm:$0xff] }
 0x83f   :  { %6277 = vmatpush1.bf16.msra.mxu0 %v2684_v43  ;;  %v2773_v43 = vunpack.c.h.s8.bf16 %v925_v46 }
 0x840   :  { %6320 = vmatpush1.bf16.msra.mxu1 %v2812_v53  ;;  %6278 = vmatprep.subr.bf16.mxu0 %v2677_v32  ;;  %v2901_v53 = vunpack.c.h.s8.bf16 %v989_v36  ;;  %v924_v32 = vld [vmem:[#allocation5 + $0x17b0] sm:$0xff] }
 0x841   :  { %6321 = vmatprep.subr.bf16.mxu1 %v2805_v13  ;;  %v988_v13 = vld [vmem:[#allocation5 + $0x19b0] sm:$0xff]  ;;  %v2772_v8 = vunpack.c.h.s8.bf16 %v924_v32  ;;  %v2764_v20 = vunpack.c.l.s8.bf16 %v924_v32 }
 0x842   :  { %v2900_v22 = vunpack.c.h.s8.bf16 %v988_v13  ;;  %v2892_v60 = vunpack.c.l.s8.bf16 %v988_v13 }
 0x843   :  { %6279 = vmatpush1.bf16.msra.mxu0 %v2676_v29  ;;  %v2765_v29 = vunpack.c.l.s8.bf16 %v925_v46 }
 0x844   :  { %6322 = vmatpush1.bf16.msra.mxu1 %v2804_v0  ;;  %6280 = vmatprep.subr.bf16.mxu0 %v2669_v34  ;;  %v2893_v0 = vunpack.c.l.s8.bf16 %v989_v36  ;;  %v917_v34 = vld [vmem:[#allocation5 + $0x1778] sm:$0xff] }
 0x845   :  { %6323 = vmatprep.subr.bf16.mxu1 %v2797_v49  ;;  %v981_v49 = vld [vmem:[#allocation5 + $0x1978] sm:$0xff] }
 0x847   :  { %6281 = vmatpush1.bf16.msra.mxu0 %v2668_v31  ;;  %v2757_v31 = vunpack.c.h.s8.bf16 %v917_v34 }
 0x848   :  { %6324 = vmatpush1.bf16.msra.mxu1 %v2796_v28  ;;  %6282 = vmatprep.subr.bf16.mxu0 %v2789_v25  ;;  %v2885_v28 = vunpack.c.h.s8.bf16 %v981_v49  ;;  %v916_v25 = vld [vmem:[#allocation5 + $0x1770] sm:$0xff] }
 0x849   :  { %6325 = vmatprep.subr.bf16.mxu1 %v2917_v19  ;;  %v980_v19 = vld [vmem:[#allocation5 + $0x1970] sm:$0xff]  ;;  %v2756_v47 = vunpack.c.h.s8.bf16 %v916_v25  ;;  %v2748_v46 = vunpack.c.l.s8.bf16 %v916_v25 }
 0x84a   :  { %v2884_v42 = vunpack.c.h.s8.bf16 %v980_v19  ;;  %v2876_v36 = vunpack.c.l.s8.bf16 %v980_v19 }
 0x84b   :  { %6283 = vmatpush2.bf16.msra.mxu0 %v2788_v45  ;;  %v2749_v45 = vunpack.c.l.s8.bf16 %v917_v34 }
 0x84c   :  { %6326 = vmatpush2.bf16.msra.mxu1 %v2916_v55  ;;  %6284 = vmatprep.subr.bf16.mxu0 %v2781_v33  ;;  %v2877_v55 = vunpack.c.l.s8.bf16 %v981_v49  ;;  %v909_v33 = vld [vmem:[#allocation5 + $0x1738] sm:$0xff] }
 0x84d   :  { %6327 = vmatprep.subr.bf16.mxu1 %v2909_v26  ;;  %v973_v26 = vld [vmem:[#allocation5 + $0x1938] sm:$0xff] }
 0x84f   :  { %6285 = vmatpush2.bf16.msra.mxu0 %v2780_v59  ;;  %v2741_v59 = vunpack.c.h.s8.bf16 %v909_v33 }
 0x850   :  { %6328 = vmatpush2.bf16.msra.mxu1 %v2908_v56  ;;  %6286 = vmatprep.subr.bf16.mxu0 %v2773_v43  ;;  %v2869_v56 = vunpack.c.h.s8.bf16 %v973_v26  ;;  %v908_v43 = vld [vmem:[#allocation5 + $0x1730] sm:$0xff] }
 0x851   :  { %6329 = vmatprep.subr.bf16.mxu1 %v2901_v53  ;;  %v972_v53 = vld [vmem:[#allocation5 + $0x1930] sm:$0xff]  ;;  %v2740_v32 = vunpack.c.h.s8.bf16 %v908_v43  ;;  %v2732_v34 = vunpack.c.l.s8.bf16 %v908_v43 }
 0x852   :  { %v2868_v13 = vunpack.c.h.s8.bf16 %v972_v53  ;;  %v2860_v49 = vunpack.c.l.s8.bf16 %v972_v53  ;;  %v1020_v43 = vld [vmem:[#allocation5 + $0x1ab0] sm:$0xff] }
 0x853   :  { %6287 = vmatpush2.bf16.msra.mxu0 %v2772_v8  ;;  %v2733_v8 = vunpack.c.l.s8.bf16 %v909_v33  ;;  %v7969_v33 = vld [vmem:[#allocation2 + $0x58] ss:$136 sps:$4 sm:$0xff]  }
 0x854   :  { %6330 = vmatpush2.bf16.msra.mxu1 %v2900_v22  ;;  %6288 = vmatprep.subr.bf16.mxu0 %v2765_v29  ;;  %v2861_v22 = vunpack.c.l.s8.bf16 %v973_v26  ;;  %v1029_v29 = vld [vmem:[#allocation5 + $0x1af8] sm:$0xff]  ;;  %v1084_v53 = vld [vmem:[#allocation5 + $0x1cb0] sm:$0xff] }
 0x855   :  { %6331 = vmatprep.subr.bf16.mxu1 %v2893_v0  ;;  %v1093_v0 = vld [vmem:[#allocation5 + $0x1cf8] sm:$0xff] }
 0x856   :  { %v7970_v26 = vld [vmem:[#allocation2 + $0x60] ss:$136 sps:$4 sm:$0xff]  }
 0x857   :  { %6289 = vmatpush2.bf16.msra.mxu0 %v2764_v20  ;;  %v2981_v20 = vunpack.c.h.s8.bf16 %v1029_v29 }
 0x858   :  { %6332 = vmatpush2.bf16.msra.mxu1 %v2892_v60  ;;  %6290 = vmatprep.subr.bf16.mxu0 %v2757_v31  ;;  %v3109_v60 = vunpack.c.h.s8.bf16 %v1093_v0  ;;  %v1028_v31 = vld [vmem:[#allocation5 + $0x1af0] sm:$0xff] }
 0x859   :  { %6333 = vmatprep.subr.bf16.mxu1 %v2885_v28  ;;  %v1092_v28 = vld [vmem:[#allocation5 + $0x1cf0] sm:$0xff]  ;;  %v2980_v25 = vunpack.c.h.s8.bf16 %v1028_v31 }
 0x85a   :  { %v3108_v19 = vunpack.c.h.s8.bf16 %v1092_v28 }
 0x85b   :  { %6291 = vmatpush2.bf16.msra.mxu0 %v2756_v47  ;;  %v2973_v47 = vunpack.c.l.s8.bf16 %v1029_v29 }
 0x85c   :  { %6334 = vmatpush2.bf16.msra.mxu1 %v2884_v42  ;;  %6292 = vmatprep.subr.bf16.mxu0 %v2749_v45  ;;  %v3101_v42 = vunpack.c.l.s8.bf16 %v1093_v0  ;;  %v1021_v45 = vld [vmem:[#allocation5 + $0x1ab8] sm:$0xff] }
 0x85d   :  { %6335 = vmatprep.subr.bf16.mxu1 %v2877_v55  ;;  %v1085_v55 = vld [vmem:[#allocation5 + $0x1cb8] sm:$0xff]  ;;  %v2957_v29 = vunpack.c.l.s8.bf16 %v1021_v45 }
 0x85e   :  { %v3085_v0 = vunpack.c.l.s8.bf16 %v1085_v55 }
 0x85f   :  { %6293 = vmatpush2.bf16.msra.mxu0 %v2748_v46  ;;  %v2972_v46 = vunpack.c.l.s8.bf16 %v1028_v31 }
 0x860   :  { %6336 = vmatpush2.bf16.msra.mxu1 %v2876_v36  ;;  %6294 = vmatprep.subr.bf16.mxu0 %v2741_v59  ;;  %v3100_v36 = vunpack.c.l.s8.bf16 %v1092_v28  ;;  %v2965_v59 = vunpack.c.h.s8.bf16 %v1021_v45 }
 0x861   :  { %6337 = vmatprep.subr.bf16.mxu1 %v2869_v56  ;;  %v3093_v56 = vunpack.c.h.s8.bf16 %v1085_v55 }
 0x863   :  { %6295 = vmatpush2.bf16.msra.mxu0 %v2740_v32  ;;  %v7971_v32 = vld [vmem:[#allocation2 + $0x6c] ss:$136 sps:$4 sm:$0xff]  }
 0x864   :  { %6338 = vmatpush2.bf16.msra.mxu1 %v2868_v13  ;;  %6296 = vmatprep.subr.bf16.mxu0 %v2733_v8  ;;  %v7972_v13 = vld [vmem:[#allocation2 + $0x74] ss:$136 sps:$4 sm:$0xff]   ;;  %v2964_v8 = vunpack.c.h.s8.bf16 %v1020_v43 }
 0x865   :  { %6339 = vmatprep.subr.bf16.mxu1 %v2861_v22  ;;  %v3092_v22 = vunpack.c.h.s8.bf16 %v1084_v53 }
 0x867   :  { %6297 = vmatpush2.bf16.msra.mxu0 %v2732_v34  ;;  %v1013_v34 = vld [vmem:[#allocation5 + $0x1a78] sm:$0xff] }
 0x868   :  { %6340 = vmatpush2.bf16.msra.mxu1 %v2860_v49  ;;  %6352 = vmatprep.subr.bf16.mxu0 %v2981_v20  ;;  %v1077_v49 = vld [vmem:[#allocation5 + $0x1c78] sm:$0xff]  ;;  %v2956_v20 = vunpack.c.l.s8.bf16 %v1020_v43  ;;  %v2949_v31 = vunpack.c.h.s8.bf16 %v1013_v34  ;;  %v2941_v45 = vunpack.c.l.s8.bf16 %v1013_v34  ;;  %v1004_v43 = vld [vmem:[#allocation5 + $0x1a30] sm:$0xff] }
 0x869   :  { %6395 = vmatprep.subr.bf16.mxu1 %v3109_v60  ;;  %v3084_v60 = vunpack.c.l.s8.bf16 %v1084_v53  ;;  %v3077_v28 = vunpack.c.h.s8.bf16 %v1077_v49  ;;  %v3069_v55 = vunpack.c.l.s8.bf16 %v1077_v49  ;;  %v1068_v53 = vld [vmem:[#allocation5 + $0x1c30] sm:$0xff]  ;;  %v2924_v34 = vunpack.c.l.s8.bf16 %v1004_v43 }
 0x86a   :  { %6299 = vmatmul.mubr.bf16.vlgmr.msra.gmra.mxu0 %v7969_v33  ;;  %v1005_v33 = vld [vmem:[#allocation5 + $0x1a38] sm:$0xff]  ;;  %v3052_v49 = vunpack.c.l.s8.bf16 %v1068_v53 }
 0x86b   :  { %6342 = vmatmul.mubr.bf16.vlgmr.msra.gmra.mxu1 %v7970_v26  ;;  %6353 = vmatpush1.bf16.msra.mxu0 %v2980_v25  ;;  %v1012_v25 = vld [vmem:[#allocation5 + $0x1a70] sm:$0xff]  ;;  %v1069_v26 = vld [vmem:[#allocation5 + $0x1c38] sm:$0xff] }
 0x86c   :  { %6396 = vmatpush1.bf16.msra.mxu1 %v3108_v19  ;;  %6354 = vmatprep.subr.bf16.mxu0 %v2973_v47  ;;  %v1076_v19 = vld [vmem:[#allocation5 + $0x1c70] sm:$0xff]  ;;  %v2948_v47 = vunpack.c.h.s8.bf16 %v1012_v25 }
 0x86d   :  { %6397 = vmatprep.subr.bf16.mxu1 %v3101_v42  ;;  %6384 = vmatprep.mubr.bf16.mxu0 %v7971_v32  ;;  %v3076_v42 = vunpack.c.h.s8.bf16 %v1076_v19  ;;  %v2932_v32 = vunpack.c.h.s8.bf16 %v1004_v43 }
 0x86e   :  { %6427 = vmatprep.mubr.bf16.mxu1 %v7972_v13  ;;  %v3060_v13 = vunpack.c.h.s8.bf16 %v1068_v53 }
 0x86f   :  { %6355 = vmatpush1.bf16.msra.mxu0 %v2972_v46  ;;  %v2940_v46 = vunpack.c.l.s8.bf16 %v1012_v25 }
 0x870   :  { %6398 = vmatpush1.bf16.msra.mxu1 %v3100_v36  ;;  %6356 = vmatprep.subr.bf16.mxu0 %v2965_v59  ;;  %v3068_v36 = vunpack.c.l.s8.bf16 %v1076_v19  ;;  %v2933_v59 = vunpack.c.h.s8.bf16 %v1005_v33 }
 0x871   :  { %6399 = vmatprep.subr.bf16.mxu1 %v3093_v56  ;;  %v3061_v56 = vunpack.c.h.s8.bf16 %v1069_v26 }
 0x873   :  { %6357 = vmatpush1.bf16.msra.mxu0 %v2964_v8  ;;  %v2925_v8 = vunpack.c.l.s8.bf16 %v1005_v33 }
 0x874   :  { %6400 = vmatpush1.bf16.msra.mxu1 %v3092_v22  ;;  %6358 = vmatprep.subr.bf16.mxu0 %v2957_v29  ;;  %v3053_v22 = vunpack.c.l.s8.bf16 %v1069_v26  ;;  %v1061_v29 = vld [vmem:[#allocation5 + $0x1bf8] sm:$0xff] }
 0x875   :  { %6401 = vmatprep.subr.bf16.mxu1 %v3085_v0  ;;  %v1125_v0 = vld [vmem:[#allocation5 + $0x1df8] sm:$0xff] }
 0x877   :  { %6359 = vmatpush1.bf16.msra.mxu0 %v2956_v20  ;;  %v3045_v20 = vunpack.c.h.s8.bf16 %v1061_v29 }
 0x878   :  { %6402 = vmatpush1.bf16.msra.mxu1 %v3084_v60  ;;  %6360 = vmatprep.subr.bf16.mxu0 %v2949_v31  ;;  %v3173_v60 = vunpack.c.h.s8.bf16 %v1125_v0  ;;  %v1060_v31 = vld [vmem:[#allocation5 + $0x1bf0] sm:$0xff] }
 0x879   :  { %6403 = vmatprep.subr.bf16.mxu1 %v3077_v28  ;;  %v1124_v28 = vld [vmem:[#allocation5 + $0x1df0] sm:$0xff]  ;;  %v3044_v25 = vunpack.c.h.s8.bf16 %v1060_v31  ;;  %v3036_v33 = vunpack.c.l.s8.bf16 %v1060_v31 }
 0x87a   :  { %v3172_v19 = vunpack.c.h.s8.bf16 %v1124_v28  ;;  %v3164_v26 = vunpack.c.l.s8.bf16 %v1124_v28 }
 0x87b   :  { %6361 = vmatpush1.bf16.msra.mxu0 %v2948_v47  ;;  %v3037_v47 = vunpack.c.l.s8.bf16 %v1061_v29 }
 0x87c   :  { %6404 = vmatpush1.bf16.msra.mxu1 %v3076_v42  ;;  %6362 = vmatprep.subr.bf16.mxu0 %v2941_v45  ;;  %v3165_v42 = vunpack.c.l.s8.bf16 %v1125_v0  ;;  %v1053_v45 = vld [vmem:[#allocation5 + $0x1bb8] sm:$0xff] }
 0x87d   :  { %6405 = vmatprep.subr.bf16.mxu1 %v3069_v55  ;;  %v1117_v55 = vld [vmem:[#allocation5 + $0x1db8] sm:$0xff] }
 0x87f   :  { %6363 = vmatpush1.bf16.msra.mxu0 %v2940_v46  ;;  %v3029_v46 = vunpack.c.h.s8.bf16 %v1053_v45 }
 0x880   :  { %6406 = vmatpush1.bf16.msra.mxu1 %v3068_v36  ;;  %6364 = vmatprep.subr.bf16.mxu0 %v2933_v59  ;;  %v3157_v36 = vunpack.c.h.s8.bf16 %v1117_v55  ;;  %v1052_v59 = vld [vmem:[#allocation5 + $0x1bb0] sm:$0xff] }
 0x881   :  { %6407 = vmatprep.subr.bf16.mxu1 %v3061_v56  ;;  %v1116_v56 = vld [vmem:[#allocation5 + $0x1db0] sm:$0xff]  ;;  %v3028_v43 = vunpack.c.h.s8.bf16 %v1052_v59  ;;  %v3020_v29 = vunpack.c.l.s8.bf16 %v1052_v59 }
 0x882   :  { %v3156_v53 = vunpack.c.h.s8.bf16 %v1116_v56  ;;  %v3148_v0 = vunpack.c.l.s8.bf16 %v1116_v56 }
 0x883   :  { %6365 = vmatpush1.bf16.msra.mxu0 %v2932_v32  ;;  %v3021_v32 = vunpack.c.l.s8.bf16 %v1053_v45 }
 0x884   :  { %6408 = vmatpush1.bf16.msra.mxu1 %v3060_v13  ;;  %6366 = vmatprep.subr.bf16.mxu0 %v2925_v8  ;;  %v3149_v13 = vunpack.c.l.s8.bf16 %v1117_v55  ;;  %v1045_v8 = vld [vmem:[#allocation5 + $0x1b78] sm:$0xff] }
 0x885   :  { %6409 = vmatprep.subr.bf16.mxu1 %v3053_v22  ;;  %v1109_v22 = vld [vmem:[#allocation5 + $0x1d78] sm:$0xff] }
 0x887   :  { %6367 = vmatpush1.bf16.msra.mxu0 %v2924_v34  ;;  %v3013_v34 = vunpack.c.h.s8.bf16 %v1045_v8 }
 0x888   :  { %6410 = vmatpush1.bf16.msra.mxu1 %v3052_v49  ;;  %6368 = vmatprep.subr.bf16.mxu0 %v3045_v20  ;;  %v3141_v49 = vunpack.c.h.s8.bf16 %v1109_v22  ;;  %v1044_v20 = vld [vmem:[#allocation5 + $0x1b70] sm:$0xff] }
 0x889   :  { %6411 = vmatprep.subr.bf16.mxu1 %v3173_v60  ;;  %v1108_v60 = vld [vmem:[#allocation5 + $0x1d70] sm:$0xff]  ;;  %v3012_v31 = vunpack.c.h.s8.bf16 %v1044_v20  ;;  %v3004_v45 = vunpack.c.l.s8.bf16 %v1044_v20 }
 0x88a   :  { %v3140_v28 = vunpack.c.h.s8.bf16 %v1108_v60  ;;  %v3132_v55 = vunpack.c.l.s8.bf16 %v1108_v60 }
 0x88b   :  { %6369 = vmatpush2.bf16.msra.mxu0 %v3044_v25  ;;  %v3005_v25 = vunpack.c.l.s8.bf16 %v1045_v8 }
 0x88c   :  { %6412 = vmatpush2.bf16.msra.mxu1 %v3172_v19  ;;  %6370 = vmatprep.subr.bf16.mxu0 %v3037_v47  ;;  %v3133_v19 = vunpack.c.l.s8.bf16 %v1109_v22  ;;  %v1037_v47 = vld [vmem:[#allocation5 + $0x1b38] sm:$0xff] }
 0x88d   :  { %6413 = vmatprep.subr.bf16.mxu1 %v3165_v42  ;;  %v1101_v42 = vld [vmem:[#allocation5 + $0x1d38] sm:$0xff] }
 0x88f   :  { %6371 = vmatpush2.bf16.msra.mxu0 %v3036_v33  ;;  %v2997_v33 = vunpack.c.h.s8.bf16 %v1037_v47 }
 0x890   :  { %6414 = vmatpush2.bf16.msra.mxu1 %v3164_v26  ;;  %6372 = vmatprep.subr.bf16.mxu0 %v3029_v46  ;;  %v3125_v26 = vunpack.c.h.s8.bf16 %v1101_v42  ;;  %v1036_v46 = vld [vmem:[#allocation5 + $0x1b30] sm:$0xff] }
 0x891   :  { %6415 = vmatprep.subr.bf16.mxu1 %v3157_v36  ;;  %v1100_v36 = vld [vmem:[#allocation5 + $0x1d30] sm:$0xff]  ;;  %v2996_v59 = vunpack.c.h.s8.bf16 %v1036_v46  ;;  %v2988_v8 = vunpack.c.l.s8.bf16 %v1036_v46 }
 0x892   :  { %v3124_v56 = vunpack.c.h.s8.bf16 %v1100_v36  ;;  %v3116_v22 = vunpack.c.l.s8.bf16 %v1100_v36  ;;  %v1148_v46 = vld [vmem:[#allocation5 + $0x1eb0] sm:$0xff] }
 0x893   :  { %6373 = vmatpush2.bf16.msra.mxu0 %v3028_v43  ;;  %v2989_v43 = vunpack.c.l.s8.bf16 %v1037_v47  ;;  %v7973_v47 = vld [vmem:[#allocation2 + $0x68] ss:$136 sps:$4 sm:$0xff]   ;;  %v1212_v36 = vld [vmem:[#allocation5 + $0x20b0] sm:$0xff] }
 0x894   :  { %6416 = vmatpush2.bf16.msra.mxu1 %v3156_v53  ;;  %6374 = vmatprep.subr.bf16.mxu0 %v3021_v32  ;;  %v3117_v53 = vunpack.c.l.s8.bf16 %v1101_v42  ;;  %v1157_v32 = vld [vmem:[#allocation5 + $0x1ef8] sm:$0xff]  ;;  %v7974_v42 = vld [vmem:[#allocation2 + $0x70] ss:$136 sps:$4 sm:$0xff]  }
 0x895   :  { %6417 = vmatprep.subr.bf16.mxu1 %v3149_v13  ;;  %v1221_v13 = vld [vmem:[#allocation5 + $0x20f8] sm:$0xff] }
 0x897   :  { %6375 = vmatpush2.bf16.msra.mxu0 %v3020_v29  ;;  %v3237_v29 = vunpack.c.h.s8.bf16 %v1157_v32 }
 0x898   :  { %6418 = vmatpush2.bf16.msra.mxu1 %v3148_v0  ;;  %6376 = vmatprep.subr.bf16.mxu0 %v3013_v34  ;;  %v3365_v0 = vunpack.c.h.s8.bf16 %v1221_v13  ;;  %v1156_v34 = vld [vmem:[#allocation5 + $0x1ef0] sm:$0xff] }
 0x899   :  { %6419 = vmatprep.subr.bf16.mxu1 %v3141_v49  ;;  %v1220_v49 = vld [vmem:[#allocation5 + $0x20f0] sm:$0xff]  ;;  %v3236_v20 = vunpack.c.h.s8.bf16 %v1156_v34 }
 0x89a   :  { %v3364_v60 = vunpack.c.h.s8.bf16 %v1220_v49 }
 0x89b   :  { %6377 = vmatpush2.bf16.msra.mxu0 %v3012_v31  ;;  %v3229_v31 = vunpack.c.l.s8.bf16 %v1157_v32 }
 0x89c   :  { %6420 = vmatpush2.bf16.msra.mxu1 %v3140_v28  ;;  %6378 = vmatprep.subr.bf16.mxu0 %v3005_v25  ;;  %v3357_v28 = vunpack.c.l.s8.bf16 %v1221_v13  ;;  %v1149_v25 = vld [vmem:[#allocation5 + $0x1eb8] sm:$0xff] }
 0x89d   :  { %6421 = vmatprep.subr.bf16.mxu1 %v3133_v19  ;;  %v1213_v19 = vld [vmem:[#allocation5 + $0x20b8] sm:$0xff]  ;;  %v3213_v32 = vunpack.c.l.s8.bf16 %v1149_v25 }
 0x89e   :  { %v3341_v13 = vunpack.c.l.s8.bf16 %v1213_v19 }
 0x89f   :  { %6379 = vmatpush2.bf16.msra.mxu0 %v3004_v45  ;;  %v3228_v45 = vunpack.c.l.s8.bf16 %v1156_v34 }
 0x8a0   :  { %6422 = vmatpush2.bf16.msra.mxu1 %v3132_v55  ;;  %6380 = vmatprep.subr.bf16.mxu0 %v2997_v33  ;;  %v3356_v55 = vunpack.c.l.s8.bf16 %v1220_v49  ;;  %v3221_v33 = vunpack.c.h.s8.bf16 %v1149_v25 }
 0x8a1   :  { %6423 = vmatprep.subr.bf16.mxu1 %v3125_v26  ;;  %v3349_v26 = vunpack.c.h.s8.bf16 %v1213_v19 }
 0x8a3   :  { %6381 = vmatpush2.bf16.msra.mxu0 %v2996_v59  ;;  %v7975_v59 = vld [vmem:[#allocation2 + $0x7c] ss:$136 sps:$4 sm:$0xff]  }
 0x8a4   :  { %6424 = vmatpush2.bf16.msra.mxu1 %v3124_v56  ;;  %6382 = vmatprep.subr.bf16.mxu0 %v2989_v43  ;;  %v7976_v56 = vld [vmem:[#allocation2 + $0x84] ss:$136 sps:$4 sm:$0xff]   ;;  %v3220_v43 = vunpack.c.h.s8.bf16 %v1148_v46 }
 0x8a5   :  { %6425 = vmatprep.subr.bf16.mxu1 %v3117_v53  ;;  %v3348_v53 = vunpack.c.h.s8.bf16 %v1212_v36 }
 0x8a7   :  { %6383 = vmatpush2.bf16.msra.mxu0 %v2988_v8  ;;  %v1141_v8 = vld [vmem:[#allocation5 + $0x1e78] sm:$0xff] }
 0x8a8   :  { %6426 = vmatpush2.bf16.msra.mxu1 %v3116_v22  ;;  %6438 = vmatprep.subr.bf16.mxu0 %v3237_v29  ;;  %v1205_v22 = vld [vmem:[#allocation5 + $0x2078] sm:$0xff]  ;;  %v3212_v29 = vunpack.c.l.s8.bf16 %v1148_v46  ;;  %v3205_v34 = vunpack.c.h.s8.bf16 %v1141_v8  ;;  %v3197_v25 = vunpack.c.l.s8.bf16 %v1141_v8  ;;  %v1132_v46 = vld [vmem:[#allocation5 + $0x1e30] sm:$0xff] }
 0x8a9   :  { %6481 = vmatprep.subr.bf16.mxu1 %v3365_v0  ;;  %v3340_v0 = vunpack.c.l.s8.bf16 %v1212_v36  ;;  %v3333_v49 = vunpack.c.h.s8.bf16 %v1205_v22  ;;  %v3325_v19 = vunpack.c.l.s8.bf16 %v1205_v22  ;;  %v1196_v36 = vld [vmem:[#allocation5 + $0x2030] sm:$0xff]  ;;  %v3180_v8 = vunpack.c.l.s8.bf16 %v1132_v46 }
 0x8aa   :  { %6385 = vmatmul.mubr.bf16.vlgmr.msra.gmra.mxu0 %v7973_v47  ;;  %v1133_v47 = vld [vmem:[#allocation5 + $0x1e38] sm:$0xff]  ;;  %v3308_v22 = vunpack.c.l.s8.bf16 %v1196_v36 }
 0x8ab   :  { %6428 = vmatmul.mubr.bf16.vlgmr.msra.gmra.mxu1 %v7974_v42  ;;  %6439 = vmatpush1.bf16.msra.mxu0 %v3236_v20  ;;  %v1140_v20 = vld [vmem:[#allocation5 + $0x1e70] sm:$0xff]  ;;  %v1197_v42 = vld [vmem:[#allocation5 + $0x2038] sm:$0xff] }
 0x8ac   :  { %6482 = vmatpush1.bf16.msra.mxu1 %v3364_v60  ;;  %6440 = vmatprep.subr.bf16.mxu0 %v3229_v31  ;;  %v1204_v60 = vld [vmem:[#allocation5 + $0x2070] sm:$0xff]  ;;  %v3204_v31 = vunpack.c.h.s8.bf16 %v1140_v20 }
 0x8ad   :  { %6483 = vmatprep.subr.bf16.mxu1 %v3357_v28  ;;  %6470 = vmatprep.mubr.bf16.mxu0 %v7975_v59  ;;  %v3332_v28 = vunpack.c.h.s8.bf16 %v1204_v60  ;;  %v3188_v59 = vunpack.c.h.s8.bf16 %v1132_v46  ;;  %v5146_v46 = vadd.f32 %v8535_v41, %v8524_v16 }
 0x8ae   :  { %6513 = vmatprep.mubr.bf16.mxu1 %v7976_v56  ;;  %v3316_v56 = vunpack.c.h.s8.bf16 %v1196_v36 }
 0x8af   :  { %6441 = vmatpush1.bf16.msra.mxu0 %v3228_v45  ;;  %v3196_v45 = vunpack.c.l.s8.bf16 %v1140_v20 }
 0x8b0   :  { %6484 = vmatpush1.bf16.msra.mxu1 %v3356_v55  ;;  %6442 = vmatprep.subr.bf16.mxu0 %v3221_v33  ;;  %v3324_v55 = vunpack.c.l.s8.bf16 %v1204_v60  ;;  %v3189_v33 = vunpack.c.h.s8.bf16 %v1133_v47 }
 0x8b1   :  { %6485 = vmatprep.subr.bf16.mxu1 %v3349_v26  ;;  %v3317_v26 = vunpack.c.h.s8.bf16 %v1197_v42 }
 0x8b3   :  { %6443 = vmatpush1.bf16.msra.mxu0 %v3220_v43  ;;  %v3181_v43 = vunpack.c.l.s8.bf16 %v1133_v47 }
 0x8b4   :  { %6486 = vmatpush1.bf16.msra.mxu1 %v3348_v53  ;;  %6444 = vmatprep.subr.bf16.mxu0 %v3213_v32  ;;  %v3309_v53 = vunpack.c.l.s8.bf16 %v1197_v42  ;;  %v1189_v32 = vld [vmem:[#allocation5 + $0x1ff8] sm:$0xff] }
 0x8b5   :  { %6487 = vmatprep.subr.bf16.mxu1 %v3341_v13  ;;  %v1253_v13 = vld [vmem:[#allocation5 + $0x21f8] sm:$0xff] }
 0x8b7   :  { %6445 = vmatpush1.bf16.msra.mxu0 %v3212_v29  ;;  %v3301_v29 = vunpack.c.h.s8.bf16 %v1189_v32 }
 0x8b8   :  { %6488 = vmatpush1.bf16.msra.mxu1 %v3340_v0  ;;  %6446 = vmatprep.subr.bf16.mxu0 %v3205_v34  ;;  %v3429_v0 = vunpack.c.h.s8.bf16 %v1253_v13  ;;  %v1188_v34 = vld [vmem:[#allocation5 + $0x1ff0] sm:$0xff] }
 0x8b9   :  { %6489 = vmatprep.subr.bf16.mxu1 %v3333_v49  ;;  %v1252_v49 = vld [vmem:[#allocation5 + $0x21f0] sm:$0xff]  ;;  %v3300_v20 = vunpack.c.h.s8.bf16 %v1188_v34  ;;  %v3292_v47 = vunpack.c.l.s8.bf16 %v1188_v34 }
 0x8ba   :  { %v3428_v60 = vunpack.c.h.s8.bf16 %v1252_v49  ;;  %v3420_v42 = vunpack.c.l.s8.bf16 %v1252_v49 }
 0x8bb   :  { %6447 = vmatpush1.bf16.msra.mxu0 %v3204_v31  ;;  %v3293_v31 = vunpack.c.l.s8.bf16 %v1189_v32 }
 0x8bc   :  { %6490 = vmatpush1.bf16.msra.mxu1 %v3332_v28  ;;  %6448 = vmatprep.subr.bf16.mxu0 %v3197_v25  ;;  %v3421_v28 = vunpack.c.l.s8.bf16 %v1253_v13  ;;  %v1181_v25 = vld [vmem:[#allocation5 + $0x1fb8] sm:$0xff] }
 0x8bd   :  { %6491 = vmatprep.subr.bf16.mxu1 %v3325_v19  ;;  %v1245_v19 = vld [vmem:[#allocation5 + $0x21b8] sm:$0xff] }
 0x8be   :  { %v3405_v32 = vunpack.c.l.s8.bf16 %v1245_v19  ;;  %v1173_v13 = vld [vmem:[#allocation5 + $0x1f78] sm:$0xff] }
 0x8bf   :  { %6449 = vmatpush1.bf16.msra.mxu0 %v3196_v45  ;;  %v3285_v45 = vunpack.c.h.s8.bf16 %v1181_v25 }
 0x8c0   :  { %6492 = vmatpush1.bf16.msra.mxu1 %v3324_v55  ;;  %6450 = vmatprep.subr.bf16.mxu0 %v3189_v33  ;;  %v3413_v55 = vunpack.c.h.s8.bf16 %v1245_v19  ;;  %v1180_v33 = vld [vmem:[#allocation5 + $0x1fb0] sm:$0xff] }
 0x8c1   :  { %6493 = vmatprep.subr.bf16.mxu1 %v3317_v26  ;;  %v1244_v26 = vld [vmem:[#allocation5 + $0x21b0] sm:$0xff]  ;;  %v3284_v36 = vunpack.c.h.s8.bf16 %v1180_v33  ;;  %v3276_v16 = vunpack.c.l.s8.bf16 %v1180_v33 }
 0x8c2   :  { %v3404_v41 = vunpack.c.l.s8.bf16 %v1244_v26  ;;  %v1228_v33 = vld [vmem:[#allocation5 + $0x2130] sm:$0xff] }
 0x8c3   :  { %6451 = vmatpush1.bf16.msra.mxu0 %v3188_v59  ;;  %v3412_v59 = vunpack.c.h.s8.bf16 %v1244_v26 }
 0x8c4   :  { %6494 = vmatpush1.bf16.msra.mxu1 %v3316_v56  ;;  %6452 = vmatprep.subr.bf16.mxu0 %v3181_v43  ;;  %v5142_v56 = vadd.f32 %v8529_v14, %v8520_v4  ;;  %v5189_v43 = vadd.f32 %v8543_v54, %v5146_v46  ;;  %v1172_v14 = vld [vmem:[#allocation5 + $0x1f70] sm:$0xff] }
 0x8c5   :  { %6495 = vmatprep.subr.bf16.mxu1 %v3309_v53  ;;  %v3277_v53 = vunpack.c.l.s8.bf16 %v1181_v25  ;;  %v1236_v54 = vld [vmem:[#allocation5 + $0x2170] sm:$0xff]  ;;  %v1229_v25 = vld [vmem:[#allocation5 + $0x2138] sm:$0xff] }
 0x8c7   :  { %6453 = vmatpush1.bf16.msra.mxu0 %v3180_v8  ;;  %v1237_v8 = vld [vmem:[#allocation5 + $0x2178] sm:$0xff] }
 0x8c8   :  { %6496 = vmatpush1.bf16.msra.mxu1 %v3308_v22  ;;  %6454 = vmatprep.subr.bf16.mxu0 %v3301_v29  ;;  %v5185_v22 = vadd.f32 %v8533_v30, %v5142_v56  ;;  %v5232_v29 = vadd.f32 %v8551_v63, %v5189_v43  ;;  %v3397_v4 = vunpack.c.h.s8.bf16 %v1237_v8  ;;  %v3396_v30 = vunpack.c.h.s8.bf16 %v1236_v54 }
 0x8c9   :  { %6497 = vmatprep.subr.bf16.mxu1 %v3429_v0  ;;  %v3269_v0 = vunpack.c.h.s8.bf16 %v1173_v13  ;;  %v3389_v63 = vunpack.c.l.s8.bf16 %v1237_v8  ;;  %v7803_v8 = vld [vmem:[#allocation10 + $0x38] sm:$0xff]  }
 0x8ca   :  { %v5228_v34 = vadd.f32 %v8541_v18, %v5185_v22  ;;  %v5275_v49 = vadd.f32 %v8559_v9, %v5232_v29  ;;  %v3388_v18 = vunpack.c.l.s8.bf16 %v1236_v54  ;;  %v7977_v29 = vld [vmem:[#allocation2 + $0x78] ss:$136 sps:$4 sm:$0xff]  }
 0x8cb   :  { %6455 = vmatpush2.bf16.msra.mxu0 %v3300_v20  ;;  %v3268_v20 = vunpack.c.h.s8.bf16 %v1172_v14 }
 0x8cc   :  { %6498 = vmatpush2.bf16.msra.mxu1 %v3428_v60  ;;  %6456 = vmatprep.subr.bf16.mxu0 %v3293_v31  ;;  %v5271_v60 = vadd.f32 %v8549_v17, %v5228_v34  ;;  %v3261_v31 = vunpack.c.l.s8.bf16 %v1173_v13  ;;  %v5318_v19 = vadd.f32 %v8567_v35, %v5275_v49  ;;  %v3381_v17 = vunpack.c.h.s8.bf16 %v1229_v25  ;;  %v7802_v13 = vld [vmem:[#allocation10 + $0xf8] sm:$0xff]   ;;  %v7811_v34 = vld [vmem:[#allocation10 + $0x28] sm:$0xff]  }
 0x8cd   :  { %6499 = vmatprep.subr.bf16.mxu1 %v3421_v28  ;;  %v1165_v28 = vld [vmem:[#allocation5 + $0x1f38] sm:$0xff]  ;;  %v3380_v35 = vunpack.c.h.s8.bf16 %v1228_v33 }
 0x8ce   :  { %v5314_v9 = vadd.f32 %v8557_v7, %v5271_v60  ;;  %v3373_v7 = vunpack.c.l.s8.bf16 %v1229_v25  ;;  %v5790_v25 = vpop.f32.mrf.mxu0 }
 0x8cf   :  { %6457 = vmatpush2.bf16.msra.mxu0 %v3292_v47  ;;  %v3260_v47 = vunpack.c.l.s8.bf16 %v1172_v14  ;;  %v7810_v14 = vld [vmem:[#allocation10 + $0xe8] sm:$0xff]  }
 0x8d0   :  { %6500 = vmatpush2.bf16.msra.mxu1 %v3420_v42  ;;  %6458 = vmatprep.subr.bf16.mxu0 %v3285_v45  ;;  %v5361_v42 = vadd.f32 %v8575_v58, %v5318_v19  ;;  %v3253_v45 = vunpack.c.h.s8.bf16 %v1165_v28  ;;  %v5357_v26 = vadd.f32 %v8565_v3, %v5314_v9  ;;  %v7819_v19 = vld [vmem:[#allocation10 + $0x18] sm:$0xff]  }
 0x8d1   :  { %6501 = vmatprep.subr.bf16.mxu1 %v3413_v55  ;;  %v1164_v55 = vld [vmem:[#allocation5 + $0x1f30] sm:$0xff] }
 0x8d2   :  { %v3252_v46 = vunpack.c.h.s8.bf16 %v1164_v55  ;;  %v5400_v58 = vadd.f32 %v8573_v21, %v5357_v26  ;;  %v3244_v43 = vunpack.c.l.s8.bf16 %v1164_v55  ;;  %v7825_v26 = vld [vmem:[#allocation10 + $0x48] sm:$0xff]  }
 0x8d3   :  { %6459 = vmatpush2.bf16.msra.mxu0 %v3284_v36  ;;  %v5404_v36 = vadd.f32 %v8583_v52, %v5361_v42 }
 0x8d4   :  { %6502 = vmatpush2.bf16.msra.mxu1 %v3412_v59  ;;  %6460 = vmatprep.subr.bf16.mxu0 %v3277_v53  ;;  %v3245_v59 = vunpack.c.l.s8.bf16 %v1165_v28  ;;  %v3372_v53 = vunpack.c.l.s8.bf16 %v1228_v33  ;;  %v5443_v3 = vadd.f32 %v8581_v48, %v5400_v58  ;;  %v5747_v28 = vpop.f32.mrf.mxu1  ;;  %v7824_v33 = vld [vmem:[#allocation10 + $0x90] sm:$0xff]   ;;  %v7829_v58 = vld [vmem:[#allocation10 + $0x40] sm:$0xff]  }
 0x8d5   :  { %6503 = vmatprep.subr.bf16.mxu1 %v3405_v32  ;;  %v5447_v56 = vadd.f32 %v8591_v23, %v5404_v36  ;;  %v7801_v32 = vld [vmem:[#allocation10 + $0x78] sm:$0xff]   ;;  %v7827_v36 = vld [vmem:[#allocation10 + $0x8] sm:$0xff]  }
 0x8d6   :  { %v5486_v22 = vadd.f32 %v8589_v57, %v5443_v3  ;;  %v7804_v23 = vld [vmem:[#allocation10 + $0xb8] sm:$0xff]   ;;  %v7808_v57 = vld [vmem:[#allocation10 + $0xb0] sm:$0xff]  }
 0x8d7   :  { %6461 = vmatpush2.bf16.msra.mxu0 %v3276_v16  ;;  %v5490_v52 = vadd.f32 %v8604_v10, %v5447_v56  ;;  %v7805_v16 = vld [vmem:[#allocation10 + $0x70] sm:$0xff]   ;;  %v7830_v56 = vld [vmem:[#allocation10 + $0xc0] sm:$0xff]  }
 0x8d8   :  { %6504 = vmatpush2.bf16.msra.mxu1 %v3404_v41  ;;  %6462 = vmatprep.subr.bf16.mxu0 %v3269_v0  ;;  %v7806_v41 = vld [vmem:[#allocation10 + $0xf0] sm:$0xff]   ;;  %v5529_v48 = vadd.f32 %v8599_v61, %v5486_v22  ;;  %v7978_v0 = vld [vmem:[#allocation2 + $0x80] ss:$136 sps:$4 sm:$0xff]   ;;  %v7834_v22 = vld [vmem:[#allocation10 + $0x138] sm:$0xff]  }
 0x8d9   :  { %6505 = vmatprep.subr.bf16.mxu1 %v3397_v4  ;;  %v5533_v21 = vadd.f32 %v8616_v12, %v5490_v52  ;;  %v7807_v10 = vld [vmem:[#allocation10 + $0x30] sm:$0xff]   ;;  %v7809_v12 = vld [vmem:[#allocation10 + $0x68] sm:$0xff]   ;;  %v7849_v52 = vld [vmem:[#allocation10 + $0x1f8] sm:$0xff]  }
 0x8da   :  { %v5572_v61 = vadd.f32 %v8614_v37, %v5529_v48  ;;  %v7851_v48 = vld [vmem:[#allocation10 + $0x1f0] sm:$0xff]  }
 0x8db   :  { %6463 = vmatpush2.bf16.msra.mxu0 %v3268_v20  ;;  %v5576_v4 = vadd.f32 %v8627_v38, %v5533_v21  ;;  %v7813_v38 = vld [vmem:[#allocation10 + $0x60] sm:$0xff]  }
 0x8dc   :  { %6506 = vmatpush2.bf16.msra.mxu1 %v3396_v30  ;;  %6464 = vmatprep.subr.bf16.mxu0 %v3261_v31  ;;  %v5615_v49 = vadd.f32 %v8624_v11, %v5572_v61  ;;  %v7814_v20 = vld [vmem:[#allocation10 + $0xe0] sm:$0xff]   ;;  %v7817_v31 = vld [vmem:[#allocation10 + $0x58] sm:$0xff]  }
 0x8dd   :  { %6507 = vmatprep.subr.bf16.mxu1 %v3389_v63  ;;  %v5619_v54 = vadd.f32 %v8635_v1, %v5576_v4  ;;  %v7815_v30 = vld [vmem:[#allocation10 + $0x20] sm:$0xff]   ;;  %v7818_v11 = vld [vmem:[#allocation10 + $0xd8] sm:$0xff]   ;;  %v7853_v4 = vld [vmem:[#allocation10 + $0x1e8] sm:$0xff]  }
 0x8de   :  { %v5658_v60 = vadd.f32 %v8633_v6, %v5615_v49  ;;  %v7816_v1 = vld [vmem:[#allocation10 + $0xa0] sm:$0xff]   ;;  %v7820_v6 = vld [vmem:[#allocation10 + $0x98] sm:$0xff]   ;;  %v7845_v49 = vld [vmem:[#allocation10 + $0x148] sm:$0xff]  }
 0x8df   :  { %6465 = vmatpush2.bf16.msra.mxu0 %v3260_v47  ;;  %v7842_v61 = vld [vmem:[#allocation10 + $0x118] sm:$0xff]  }
 0x8e0   :  { %6508 = vmatpush2.bf16.msra.mxu1 %v3388_v18  ;;  %6466 = vmatprep.subr.bf16.mxu0 %v3253_v45  ;;  %v5701_v63 = vadd.f32 %v8640_v44, %v5658_v60  ;;  %v7821_v18 = vld [vmem:[#allocation10 + $0x50] sm:$0xff]   ;;  %v7857_v60 = vld [vmem:[#allocation10 + $0x1d8] sm:$0xff]  }
 0x8e1   :  { %6509 = vmatprep.subr.bf16.mxu1 %v3381_v17  ;;  %v7823_v45 = vld [vmem:[#allocation10 + $0x10] sm:$0xff]  }
 0x8e2   :  { %v5744_v9 = vadd.f32 %v8646_v39, %v5701_v63  ;;  %v8689_v17 = vld [vmem:[#allocation7] sm:$0xff]  ;;  %v8692_v39 = vld [vmem:[#allocation8] sm:$0xff]  ;;  %v7862_v63 = vld [vmem:[#allocation10 + $0x188] sm:$0xff]  }
 0x8e3   :  { %6467 = vmatpush2.bf16.msra.mxu0 %v3252_v46  ;;  %v7826_v46 = vld [vmem:[#allocation10 + $0xc8] sm:$0xff]  }
 0x8e4   :  { %6510 = vmatpush2.bf16.msra.mxu1 %v3380_v35  ;;  %6468 = vmatprep.subr.bf16.mxu0 %v3245_v59  ;;  %v5787_v44 = vadd.f32 %v8650_v2, %v5744_v9  ;;  %v7828_v2 = vld [vmem:[#allocation10 + $0x88] sm:$0xff]  }
 0x8e5   :  { %6511 = vmatprep.subr.bf16.mxu1 %v3373_v7 }
 0x8e7   :  { %6469 = vmatpush2.bf16.msra.mxu0 %v3244_v43 }
 0x8e8   :  { %6512 = vmatpush2.bf16.msra.mxu1 %v3372_v53  ;;  %7593 = vmatprep.subr.bf16.mxu0 %v7801_v32  ;;  %v7831_v53 = vld [vmem:[#allocation10] sm:$0xff]  }
 0x8e9   :  { %7615 = vmatprep.subr.bf16.mxu1 %v7802_v13  ;;  %v7832_v32 = vld [vmem:[#allocation10 + $0x80] sm:$0xff]   ;;  %v7833_v13 = vld [vmem:[#allocation10 + $0x178] sm:$0xff]  }
 0x8ea   :  { %6471 = vmatmul.mubr.bf16.vlgmr.msra.gmra.mxu0 %v7977_v29  ;;  %v7836_v29 = vld [vmem:[#allocation10 + $0x130] sm:$0xff]  }
 0x8eb   :  { %6514 = vmatmul.mubr.bf16.vlgmr.msra.gmra.mxu1 %v7978_v0  ;;  %7594 = vmatpush3.bf16.msra.mxu0 %v7803_v8  ;;  %v7837_v0 = vld [vmem:[#allocation10 + $0x168] sm:$0xff]  }
 0x8ec   :  { %7215 = vmatprep.mubr.bf16.mxu0 %v8385_v51  ;;  %7616 = vmatpush3.bf16.msra.mxu1 %v7804_v23  ;;  %v7812_v51 = vld [vmem:[#allocation10 + $0xa8] sm:$0xff]   ;;  %v7835_v23 = vld [vmem:[#allocation10 + $0x170] sm:$0xff]  }
 0x8ed   :  { %7256 = vmatprep.mubr.bf16.mxu1 %v8516_v62  ;;  %7595 = vmatprep.subr.bf16.mxu0 %v7805_v16  ;;  %v5662_v62 = vadd.f32 %v8643_v40, %v5619_v54  ;;  %v6548_v40 = vsub.s32 5, %v8373_v24  ;;  %v7850_v16 = vld [vmem:[#allocation10 + $0x1b8] sm:$0xff]   ;;  %v7843_v54 = vld [vmem:[#allocation10 + $0x150] sm:$0xff]  }
 0x8ee   :  { %7617 = vmatprep.subr.bf16.mxu1 %v7806_v41 }
 0x8ef   :  { %7596 = vmatpush3.bf16.msra.mxu0 %v7807_v10  ;;  %v5705_v37 = vadd.f32 %v8648_v50, %v5662_v62  ;;  %v7822_v50 = vld [vmem:[#allocation10 + $0xd0] sm:$0xff]   ;;  %v6549_v55 = vrot.slane %v8689_v17, %v6548_v40  ;;  %v6607_v7 = vrot.slane %v8692_v39, %v6548_v40  ;;  %v7855_v62 = vld [vmem:[#allocation10 + $0x1e0] sm:$0xff]  }
 0x8f0   :  { %7618 = vmatpush3.bf16.msra.mxu1 %v7808_v57  ;;  %7597 = vmatprep.subr.bf16.mxu0 %v7809_v12  ;;  %v7852_v10 = vld [vmem:[#allocation10 + $0x1b0] sm:$0xff]   ;;  %v7838_v57 = vld [vmem:[#allocation10 + $0x128] sm:$0xff]   ;;  %v7839_v12 = vld [vmem:[#allocation10 + $0x160] sm:$0xff]  }
 0x8f1   :  { %7619 = vmatprep.subr.bf16.mxu1 %v7810_v14  ;;  %v5748_v47 = vadd.f32 %v5747_v28, %v5705_v37  ;;  %v6571_v59 = vmul.f32 %v6549_v55, %v5787_v44  ;;  %v7854_v14 = vld [vmem:[#allocation10 + $0x1a8] sm:$0xff]   ;;  %v7858_v37 = vld [vmem:[#allocation10 + $0x198] sm:$0xff]   ;;  %v7863_v28 = vld [vmem:[#allocation10 + $0x1c0] sm:$0xff]  }
 0x8f3   :  { %7598 = vmatpush3.bf16.msra.mxu0 %v7811_v34  ;;  %v5791_v42 = vadd.f32 %v5790_v25, %v5748_v47  ;;  %v6629_v3 = vadd.f32 %v6607_v7, %v6571_v59  ;;  %v7844_v34 = vld [vmem:[#allocation10 + $0x110] sm:$0xff]   ;;  %v7864_v25 = vld [vmem:[#allocation10 + $0x180] sm:$0xff]  }
 0x8f4   :  { %7620 = vmatpush3.bf16.msra.mxu1 %v7812_v51  ;;  %7599 = vmatprep.subr.bf16.mxu0 %v7813_v38  ;;  %v7846_v51 = vld [vmem:[#allocation10 + $0x108] sm:$0xff]   ;;  %v7847_v38 = vld [vmem:[#allocation10 + $0x140] sm:$0xff]  }
 0x8f5   :  { %7621 = vmatprep.subr.bf16.mxu1 %v7814_v20  ;;  %v6579_v35 = vmul.f32 %v6549_v55, %v5791_v42  ;;  %v6645_v21 = vmax.f32 %v6629_v3, 0.0  ;;  %v7848_v20 = vld [vmem:[#allocation10 + $0x100] sm:$0xff]  }
 0x8f7   :  { %7600 = vmatpush3.bf16.msra.mxu0 %v7815_v30  ;;  %v6637_v43 = vadd.f32 %v6607_v7, %v6579_v35  ;;  %v7856_v30 = vld [vmem:[#allocation10 + $0x1a0] sm:$0xff]  }
 0x8f8   :  { %7622 = vmatpush3.bf16.msra.mxu1 %v7816_v1  ;;  %7601 = vmatprep.subr.bf16.mxu0 %v7817_v31  ;;  %v7859_v1 = vld [vmem:[#allocation10 + $0x1d0] sm:$0xff]  }
 0x8f9   :  { %7623 = vmatprep.subr.bf16.mxu1 %v7818_v11  ;;  %v6653_v8 = vmax.f32 %v6637_v43, 0.0  ;;  %v7860_v31 = vld [vmem:[#allocation10 + $0x190] sm:$0xff]   ;;  %v7861_v11 = vld [vmem:[#allocation10 + $0x1c8] sm:$0xff]  }
 0x8fb   :  { %7602 = vmatpush3.bf16.msra.mxu0 %v7819_v19  ;;  %v6661_v41 = vpack.c.bf16 %v6653_v8, %v6645_v21  ;;  %v5827_v19 = vpop.f32.mrf.mxu1  ;;  %v7364_v21 = vld [vmem:[#allocation13 + $0x78] sm:$0xff] }
 0x8fc   :  { %7624 = vmatpush3.bf16.msra.mxu1 %v7820_v6  ;;  %7603 = vmatprep.subr.bf16.mxu0 %v7821_v18  ;;  %v5870_v6 = vpop.f32.mrf.mxu0 }
 0x8fd   :  { %7625 = vmatprep.subr.bf16.mxu1 %v7822_v50 }
 0x8fe   :  { %v5872_v50 = vpop.f32.mrf.mxu0 }
 0x8ff   :  { %7604 = vmatpush3.bf16.msra.mxu0 %v7823_v45 }
 0x900   :  { %7626 = vmatpush3.bf16.msra.mxu1 %v7824_v33  ;;  %7605 = vmatprep.subr.bf16.mxu0 %v7825_v26  ;;  %v5874_v42 = vpop.f32.mrf.mxu0 }
 0x901   :  { %7627 = vmatprep.subr.bf16.mxu1 %v7826_v46 }
 0x902   :  { %v8708_v44 = vpop.f32.mrf.mxu0 }
 0x903   :  { %7606 = vmatpush3.bf16.msra.mxu0 %v7827_v36 }
 0x904   :  { %7628 = vmatpush3.bf16.msra.mxu1 %v7828_v2  ;;  %7607 = vmatprep.subr.bf16.mxu0 %v7829_v58  ;;  %v8712_v33 = vpop.f32.mrf.mxu0 }
 0x905   :  { %7629 = vmatprep.subr.bf16.mxu1 %v7830_v56 }
 0x906   :  { %v8716_v46 = vpop.f32.mrf.mxu0 }
 0x907   :  { %7608 = vmatpush3.bf16.msra.mxu0 %v7831_v53 }
 0x908   :  { %7630 = vmatpush3.bf16.msra.mxu1 %v7832_v32  ;;  %7637 = vmatprep.subr.bf16.mxu0 %v7833_v13  ;;  %v8720_v36 = vpop.f32.mrf.mxu0 }
 0x909   :  { %7659 = vmatprep.subr.bf16.mxu1 %v7849_v52 }
 0x90a   :  { %7216 = vmatmul.mubr.bf16.vlgmr.msra.gmra.mxu0 %v8383_v27  ;;  %v7840_v27 = vld [vmem:[#allocation10 + $0x120] sm:$0xff]   ;;  %v8724_v7 = vpop.f32.mrf.mxu0 }
 0x90b   :  { %7257 = vmatmul.mubr.bf16.vlgmr.msra.gmra.mxu1 %v8514_v15  ;;  %7638 = vmatpush3.bf16.msra.mxu0 %v7834_v22  ;;  %v7841_v15 = vld [vmem:[#allocation10 + $0x158] sm:$0xff]  }
 0x90c   :  { %7297 = vmatprep.mubr.bf16.mxu0 %v6661_v41  ;;  %7639 = vmatprep.subr.bf16.mxu0 %v7835_v23  ;;  %v8728_v58 = vpop.f32.mrf.mxu0  ;;  %v7363_v23 = vld [vmem:[#allocation13 + $0x70] sm:$0xff] }
 0x90d   :  { %7660 = vmatpush3.bf16.msra.mxu1 %v7850_v16  ;;  %v7362_v16 = vld [vmem:[#allocation13 + $0x68] sm:$0xff] }
 0x90e   :  { %7661 = vmatprep.subr.bf16.mxu1 %v7851_v48  ;;  %v8732_v43 = vpop.f32.mrf.mxu0 }
 0x90f   :  { %7640 = vmatpush3.bf16.msra.mxu0 %v7836_v29  ;;  %v7361_v29 = vld [vmem:[#allocation13 + $0x60] sm:$0xff] }
 0x910   :  { %7641 = vmatprep.subr.bf16.mxu0 %v7837_v0  ;;  %v8736_v3 = vpop.f32.mrf.mxu0  ;;  %v7360_v0 = vld [vmem:[#allocation13 + $0x58] sm:$0xff] }
 0x911   :  { %7662 = vmatpush3.bf16.msra.mxu1 %v7852_v10 }
 0x912   :  { %7663 = vmatprep.subr.bf16.mxu1 %v7853_v4  ;;  %v8740_v13 = vpop.f32.mrf.mxu0 }
 0x913   :  { %7642 = vmatpush3.bf16.msra.mxu0 %v7838_v57  ;;  %v7359_v57 = vld [vmem:[#allocation13 + $0x50] sm:$0xff] }
 0x914   :  { %7643 = vmatprep.subr.bf16.mxu0 %v7839_v12  ;;  %v8744_v8 = vpop.f32.mrf.mxu0  ;;  %v7358_v12 = vld [vmem:[#allocation13 + $0x48] sm:$0xff] }
 0x915   :  { %7664 = vmatpush3.bf16.msra.mxu1 %v7854_v14 }
 0x916   :  { %7665 = vmatprep.subr.bf16.mxu1 %v7855_v62  ;;  %v8748_v41 = vpop.f32.mrf.mxu0 }
 0x917   :  { %7644 = vmatpush3.bf16.msra.mxu0 %v7840_v27 }
 0x918   :  { %7645 = vmatprep.subr.bf16.mxu0 %v7841_v15  ;;  %v8752_v10 = vpop.f32.mrf.mxu0  ;;  %v7357_v15 = vld [vmem:[#allocation13 + $0x40] sm:$0xff] }
 0x919   :  { %7666 = vmatpush3.bf16.msra.mxu1 %v7856_v30 }
 0x91a   :  { %7667 = vmatprep.subr.bf16.mxu1 %v7857_v60  ;;  %v6134_v14 = vpop.f32.mrf.mxu0 }
 0x91b   :  { %7646 = vmatpush3.bf16.msra.mxu0 %v7842_v61 }
 0x91c   :  { %7647 = vmatprep.subr.bf16.mxu0 %v7843_v54  ;;  %v6214_v61 = vpop.f32.mrf.mxu0 }
 0x91d   :  { %7668 = vmatpush3.bf16.msra.mxu1 %v7858_v37 }
 0x91e   :  { %7669 = vmatprep.subr.bf16.mxu1 %v7859_v1 }
 0x91f   :  { %7648 = vmatpush3.bf16.msra.mxu0 %v7844_v34  ;;  %v5871_v34 = vadd.f32 %v5870_v6, %v5827_v19 }
 0x920   :  { %7649 = vmatprep.subr.bf16.mxu0 %v7845_v49  ;;  %v7356_v49 = vld [vmem:[#allocation13 + $0x38] sm:$0xff] }
 0x921   :  { %7670 = vmatpush3.bf16.msra.mxu1 %v7860_v31 }
 0x922   :  { %7671 = vmatprep.subr.bf16.mxu1 %v7861_v11 }
 0x923   :  { %7650 = vmatpush3.bf16.msra.mxu0 %v7846_v51 }
 0x924   :  { %7651 = vmatprep.subr.bf16.mxu0 %v7847_v38  ;;  %v7355_v38 = vld [vmem:[#allocation13 + $0x30] sm:$0xff] }
 0x925   :  { %7672 = vmatpush3.bf16.msra.mxu1 %v7862_v63 }
 0x926   :  { %7673 = vmatprep.subr.bf16.mxu1 %v7863_v28 }
 0x927   :  { %7652 = vmatpush3.bf16.msra.mxu0 %v7848_v20  ;;  %v6216_v20 = vpop.f32.mrf.mxu0 }
 0x928   :  { %7699 = vmatprep.subr.mxu0 %v7364_v21 }
 0x929   :  { %7674 = vmatpush3.bf16.msra.mxu1 %v7864_v25  ;;  %v6218_v11 = vpop.f32.mrf.mxu0 }
 0x92a   :  { %7298 = vmatmul.mubr.bf16.vlgmr.msra.gmra.mxu0 %v8652_v5  ;;  %v5829_v5 = vpop.f32.mrf.mxu1 }
 0x92b   :  { %7700 = vmatpush3.msra.mxu0 %v7364_v21  ;;  %v5873_v51 = vadd.f32 %v5872_v50, %v5829_v5  ;;  %v6220_v6 = vpop.f32.mrf.mxu0 }
 0x92c   :  { %v8698_v47 = vpop.f32.mrf.mxu1  ;;  %7701 = vmatprep.subr.mxu0 %v7363_v23 }
 0x92d   :  { %7702 = vmatpush3.msra.mxu0 %v7363_v23  ;;  %v5875_v60 = vadd.f32 %v5874_v42, %v8698_v47  ;;  %v6300_v42 = vpop.f32.mrf.mxu0 }
 0x92e   :  { %v8700_v40 = vpop.f32.mrf.mxu1  ;;  %7703 = vmatprep.subr.mxu0 %v7362_v16 }
 0x92f   :  { %7704 = vmatpush3.msra.mxu0 %v7362_v16  ;;  %v5877_v1 = vadd.f32 %v8708_v44, %v8700_v40 }
 0x930   :  { %v8702_v18 = vpop.f32.mrf.mxu1  ;;  %7705 = vmatprep.subr.mxu0 %v7361_v29 }
 0x931   :  { %7706 = vmatpush3.msra.mxu0 %v7361_v29  ;;  %v5914_v30 = vadd.f32 %v8702_v18, %v5871_v34 }
 0x932   :  { %v8704_v9 = vpop.f32.mrf.mxu1  ;;  %7707 = vmatprep.subr.mxu0 %v7360_v0 }
 0x933   :  { %7708 = vmatpush3.msra.mxu0 %v7360_v0  ;;  %v5916_v37 = vadd.f32 %v8704_v9, %v5873_v51  ;;  %v5957_v31 = vadd.f32 %v8712_v33, %v5914_v30 }
 0x934   :  { %v8706_v45 = vpop.f32.mrf.mxu1  ;;  %7709 = vmatprep.subr.mxu0 %v7359_v57 }
 0x935   :  { %7710 = vmatpush3.msra.mxu0 %v7359_v57  ;;  %v5918_v28 = vadd.f32 %v8706_v45, %v5875_v60  ;;  %v5959_v25 = vadd.f32 %v8716_v46, %v5916_v37 }
 0x936   :  { %v8710_v55 = vpop.f32.mrf.mxu1  ;;  %7711 = vmatprep.subr.mxu0 %v7358_v12 }
 0x937   :  { %7712 = vmatpush3.msra.mxu0 %v7358_v12  ;;  %v5920_v19 = vadd.f32 %v8710_v55, %v5877_v1  ;;  %v5961_v47 = vadd.f32 %v8720_v36, %v5918_v28  ;;  %v6302_v36 = vpop.f32.mrf.mxu0 }
 0x938   :  { %v8714_v26 = vpop.f32.mrf.mxu1  ;;  %7713 = vmatprep.subr.mxu0 %v7357_v15 }
 0x939   :  { %7714 = vmatpush3.msra.mxu0 %v7357_v15  ;;  %v6000_v5 = vadd.f32 %v8714_v26, %v5957_v31  ;;  %v5963_v40 = vadd.f32 %v8724_v7, %v5920_v19  ;;  %v6304_v16 = vpop.f32.mrf.mxu0 }
 0x93a   :  { %v8718_v35 = vpop.f32.mrf.mxu1  ;;  %7715 = vmatprep.subr.mxu0 %v7356_v49 }
 0x93b   :  { %7716 = vmatpush3.msra.mxu0 %v7356_v49  ;;  %v6002_v50 = vadd.f32 %v8718_v35, %v5959_v25  ;;  %v6043_v9 = vadd.f32 %v8728_v58, %v6000_v5  ;;  %v6306_v57 = vpop.f32.mrf.mxu0  ;;  %v6556_v5 = vsub.s32 7, %v8373_v24 }
 0x93c   :  { %v8722_v59 = vpop.f32.mrf.mxu1  ;;  %7717 = vmatprep.subr.mxu0 %v7355_v38 }
 0x93d   :  { %7718 = vmatpush3.msra.mxu0 %v7355_v38  ;;  %v6004_v45 = vadd.f32 %v8722_v59, %v5961_v47  ;;  %v6045_v33 = vadd.f32 %v8732_v43, %v6002_v50 }
 0x93e   :  { %v8726_v2 = vpop.f32.mrf.mxu1 }
 0x93f   :  { %v6006_v55 = vadd.f32 %v8726_v2, %v5963_v40  ;;  %v6047_v46 = vadd.f32 %v8736_v3, %v6004_v45 }
 0x940   :  { %v8730_v56 = vpop.f32.mrf.mxu1 }
 0x941   :  { %v6086_v26 = vadd.f32 %v8730_v56, %v6043_v9  ;;  %v6049_v7 = vadd.f32 %v8740_v13, %v6006_v55 }
 0x942   :  { %v8734_v53 = vpop.f32.mrf.mxu1 }
 0x943   :  { %v6088_v35 = vadd.f32 %v8734_v53, %v6045_v33  ;;  %v6129_v58 = vadd.f32 %v8744_v8, %v6086_v26  ;;  %v6557_v33 = vrot.slane %v8689_v17, %v6556_v5 }
 0x944   :  { %v8738_v32 = vpop.f32.mrf.mxu1 }
 0x945   :  { %v6090_v23 = vadd.f32 %v8738_v32, %v6047_v46  ;;  %v6131_v59 = vadd.f32 %v8748_v41, %v6088_v35 }
 0x946   :  { %v8742_v52 = vpop.f32.mrf.mxu1 }
 0x947   :  { %v6092_v2 = vadd.f32 %v8742_v52, %v6049_v7  ;;  %v6133_v3 = vadd.f32 %v8752_v10, %v6090_v23 }
 0x948   :  { %v8746_v22 = vpop.f32.mrf.mxu1 }
 0x949   :  { %v6172_v56 = vadd.f32 %v8746_v22, %v6129_v58  ;;  %v6135_v0 = vadd.f32 %v6134_v14, %v6092_v2 }
 0x94a   :  { %v8750_v48 = vpop.f32.mrf.mxu1 }
 0x94b   :  { %v6174_v29 = vadd.f32 %v8750_v48, %v6131_v59  ;;  %v6215_v53 = vadd.f32 %v6214_v61, %v6172_v56 }
 0x94c   :  { %v8754_v4 = vpop.f32.mrf.mxu1 }
 0x94d   :  { %v6176_v8 = vadd.f32 %v8754_v4, %v6133_v3  ;;  %v6217_v12 = vadd.f32 %v6216_v20, %v6174_v29 }
 0x94e   :  { %v8756_v27 = vpop.f32.mrf.mxu1 }
 0x94f   :  { %v6178_v41 = vadd.f32 %v8756_v27, %v6135_v0  ;;  %v6219_v49 = vadd.f32 %v6218_v11, %v6176_v8 }
 0x950   :  { %v6257_v54 = vpop.f32.mrf.mxu1 }
 0x951   :  { %v6258_v34 = vadd.f32 %v6257_v54, %v6215_v53  ;;  %v6221_v51 = vadd.f32 %v6220_v6, %v6178_v41  ;;  %v6552_v6 = vsub.s32 6, %v8373_v24  ;;  %v6615_v24 = vrot.slane %v8692_v39, %v6556_v5 }
 0x952   :  { %v6259_v62 = vpop.f32.mrf.mxu1 }
 0x953   :  { %v6260_v52 = vadd.f32 %v6259_v62, %v6217_v12  ;;  %v6301_v22 = vadd.f32 %v6300_v42, %v6258_v34  ;;  %v6553_v26 = vrot.slane %v8689_v17, %v6552_v6  ;;  %v6611_v2 = vrot.slane %v8692_v39, %v6552_v6  ;;  %v7353_v39 = vld [vmem:[#allocation13 + $0x20] sm:$0xff] }
 0x954   :  { %v6261_v63 = vpop.f32.mrf.mxu1 }
 0x955   :  { %v6262_v30 = vadd.f32 %v6261_v63, %v6219_v49  ;;  %v6303_v48 = vadd.f32 %v6302_v36, %v6260_v52  ;;  %v7354_v49 = vld [vmem:[#allocation13 + $0x28] sm:$0xff]  ;;  %v7352_v52 = vld [vmem:[#allocation13 + $0x18] sm:$0xff] }
 0x956   :  { %v6263_v18 = vpop.f32.mrf.mxu1  ;;  %7719 = vmatprep.subr.mxu0 %v7354_v49 }
 0x957   :  { %v6264_v14 = vadd.f32 %v6263_v18, %v6221_v51  ;;  %v6305_v60 = vadd.f32 %v6304_v16, %v6262_v30  ;;  %7720 = vmatpush3.msra.mxu0 %v7354_v49  ;;  %v7351_v51 = vld [vmem:[#allocation13 + $0x10] sm:$0xff] }
 0x958   :  { %v6343_v44 = vpop.f32.mrf.mxu1  ;;  %7721 = vmatprep.subr.mxu0 %v7353_v39 }
 0x959   :  { %v6344_v61 = vadd.f32 %v6343_v44, %v6301_v22  ;;  %v6307_v20 = vadd.f32 %v6306_v57, %v6264_v14  ;;  %7722 = vmatpush3.msra.mxu0 %v7353_v39  ;;  %v7350_v22 = vld [vmem:[#allocation13 + $0x8] sm:$0xff] }
 0x95a   :  { %v6345_v21 = vpop.f32.mrf.mxu1  ;;  %7723 = vmatprep.subr.mxu0 %v7352_v52 }
 0x95b   :  { %v6346_v4 = vadd.f32 %v6345_v21, %v6303_v48  ;;  %7724 = vmatpush3.msra.mxu0 %v7352_v52 }
 0x95c   :  { %v6347_v43 = vpop.f32.mrf.mxu1  ;;  %7725 = vmatprep.subr.mxu0 %v7351_v51 }
 0x95d   :  { %v6348_v28 = vadd.f32 %v6347_v43, %v6305_v60  ;;  %7726 = vmatpush3.msra.mxu0 %v7351_v51 }
 0x95e   :  { %v6349_v13 = vpop.f32.mrf.mxu1  ;;  %7727 = vmatprep.subr.mxu0 %v7350_v22 }
 0x95f   :  { %v6350_v11 = vadd.f32 %v6349_v13, %v6307_v20  ;;  %7728 = vmatpush3.msra.mxu0 %v7350_v22  ;;  %v7527_v20 = vld [vmem:[#allocation11] ss:$0 sm:$0xff] }
 0x96a   :  { %v6386_v32 = vpop.f32.mrf.mxu0 }
 0x96b   :  { %v6429_v15 = vpop.f32.mrf.mxu1  ;;  %v6387_v31 = vadd.f32 %v6386_v32, %v6344_v61 }
 0x96c   :  { %v6388_v38 = vpop.f32.mrf.mxu0 }
 0x96d   :  { %v6431_v10 = vpop.f32.mrf.mxu1  ;;  %v6389_v25 = vadd.f32 %v6388_v38, %v6346_v4  ;;  %v6430_v62 = vadd.f32 %v6429_v15, %v6387_v31  ;;  %v7349_v38 = vld [vmem:[#allocation13] sm:$0xff] }
 0x96e   :  { %v6390_v37 = vpop.f32.mrf.mxu0  ;;  %7729 = vmatprep.subr.mxu0 %v7349_v38 }
 0x96f   :  { %v6433_v1 = vpop.f32.mrf.mxu1  ;;  %v6391_v19 = vadd.f32 %v6390_v37, %v6348_v28  ;;  %v6432_v18 = vadd.f32 %v6431_v10, %v6389_v25  ;;  %7730 = vmatpush3.msra.mxu0 %v7349_v38 }
 0x970   :  { %v6392_v27 = vpop.f32.mrf.mxu0 }
 0x971   :  { %v6435_v54 = vpop.f32.mrf.mxu1  ;;  %v6393_v50 = vadd.f32 %v6392_v27, %v6350_v11  ;;  %v6434_v44 = vadd.f32 %v6433_v1, %v6391_v19 }
 0x973   :  { %v6436_v21 = vadd.f32 %v6435_v54, %v6393_v50 }
 0x9aa   :  { %v6472_v47 = vpop.f32.mrf.mxu0 }
 0x9ab   :  { %v6515_v63 = vpop.f32.mrf.mxu1  ;;  %v6473_v40 = vadd.f32 %v6472_v47, %v6430_v62 }
 0x9ac   :  { %v6474_v9 = vpop.f32.mrf.mxu0 }
 0x9ad   :  { %v6517_v42 = vpop.f32.mrf.mxu1  ;;  %v6475_v45 = vadd.f32 %v6474_v9, %v6432_v18  ;;  %v6516_v55 = vadd.f32 %v6515_v63, %v6473_v40 }
 0x9ae   :  { %v6476_v46 = vpop.f32.mrf.mxu0 }
 0x9af   :  { %v6519_v36 = vpop.f32.mrf.mxu1  ;;  %v6518_v35 = vadd.f32 %v6517_v42, %v6475_v45  ;;  %v6477_v7 = vadd.f32 %v6476_v46, %v6434_v44  ;;  %v6572_v43 = vmul.f32 %v6553_v26, %v6516_v55 }
 0x9b0   :  { %v6478_v58 = vpop.f32.mrf.mxu0 }
 0x9b1   :  { %v6573_v23 = vmul.f32 %v6557_v33, %v6518_v35  ;;  %v6520_v59 = vadd.f32 %v6519_v36, %v6477_v7  ;;  %v6479_v16 = vadd.f32 %v6478_v58, %v6436_v21  ;;  %v6521_v56 = vpop.f32.mrf.mxu1  ;;  %v6630_v57 = vadd.f32 %v6611_v2, %v6572_v43 }
 0x9b2   :  { %v8811_v7 = vlaneseq }
 0x9b3   :  { %v6580_v3 = vmul.f32 %v6553_v26, %v6520_v59  ;;  %v6522_v29 = vadd.f32 %v6521_v56, %v6479_v16  ;;  %v6631_v0 = vadd.f32 %v6615_v24, %v6573_v23  ;;  %v6646_v15 = vmax.f32 %v6630_v57, 0.0  ;;  %v7592_v23 = vld [vmem:[#allocation14] ss:$0 sm:$0xff] }
 0x9b4   :  { %v7448_v58 = vand.u32 127, %v8811_v7 }
 0x9b5   :  { %v6638_v53 = vadd.f32 %v6611_v2, %v6580_v3  ;;  %v6581_v17 = vmul.f32 %v6557_v33, %v6522_v29  ;;  %v6647_v12 = vmax.f32 %v6631_v0, 0.0 }
 0x9b6   :  { %vm7449_vm0 = vcmp.lt.s32.totalorder %v7448_v58, 10 }
 0x9b7   :  { %v6639_v13 = vadd.f32 %v6615_v24, %v6581_v17  ;;  %v6654_v8 = vmax.f32 %v6638_v53, 0.0 }
 0x9b9   :  { %v6655_v32 = vmax.f32 %v6639_v13, 0.0  ;;  %v6662_v34 = vpack.c.bf16 %v6654_v8, %v6646_v15 }
 0x9bb   :  { %v6663_v41 = vpack.c.bf16 %v6655_v32, %v6647_v12 }
 0x9bd   :  { %7338 = vmatprep.mubr.bf16.mxu1 %v6663_v41 }
 0x9be   :  { %7339 = vmatmul.mubr.bf16.vlgmr.msra.gmra.mxu1 %v6662_v34 }
 0x9ca   :  { %v7609_v10 = vpop.f32.mrf.mxu0 }
 0x9cb   :  { %v7631_v14 = vpop.f32.mrf.mxu1 }
 0x9cc   :  { %v7610_v30 = vpop.f32.mrf.mxu0 }
 0x9cd   :  { %v7632_v37 = vpop.f32.mrf.mxu1  ;;  %v7611_v4 = vadd.f32 %v7610_v30, %v7609_v10 }
 0x9ce   :  { %v7612_v48 = vpop.f32.mrf.mxu0  ;;  %v7633_v11 = vadd.f32 %v7632_v37, %v7631_v14 }
 0x9cf   :  { %v7634_v31 = vpop.f32.mrf.mxu1  ;;  %v7218_v25 = vadd.f32 %v7611_v4, %v7527_v20 }
 0x9d0   :  { %v7613_v61 = vpop.f32.mrf.mxu0 }
 0x9d1   :  { %v7614_v27 = vadd.f32 %v7613_v61, %v7612_v48  ;;  %v7635_v54 = vpop.f32.mrf.mxu1  ;;  %v7259_v47 = vadd.f32 %v7633_v11, %v7218_v25 }
 0x9d2   :  { %v7636_v18 = vadd.f32 %v7635_v54, %v7634_v31 }
 0x9d3   :  { %v7221_v63 = vadd.f32 %v7614_v27, %v7527_v20 }
 0x9d5   :  { %v7262_v44 = vadd.f32 %v7636_v18, %v7221_v63 }
 0x9ea   :  { %v7653_v60 = vpop.f32.mrf.mxu0 }
 0x9ec   :  { %v7654_v1 = vpop.f32.mrf.mxu0 }
 0x9ed   :  { %v7655_v62 = vadd.f32 %v7654_v1, %v7653_v60 }
 0x9ee   :  { %v7656_v28 = vpop.f32.mrf.mxu0 }
 0x9ef   :  { %v7300_v50 = vadd.f32 %v7655_v62, %v7259_v47 }
 0x9f0   :  { %v7657_v19 = vpop.f32.mrf.mxu0 }
 0x9f1   :  { %v7658_v40 = vadd.f32 %v7657_v19, %v7656_v28 }
 0x9f3   :  { %v7303_v55 = vadd.f32 %v7658_v40, %v7262_v44 }
 0xa7e   :  { %v7675_v5 = vpop.f32.mrf.mxu1 }
 0xa80   :  { %v7676_v6 = vpop.f32.mrf.mxu1 }
 0xa81   :  { %v7677_v9 = vadd.f32 %v7676_v6, %v7675_v5 }
 0xa82   :  { %v7678_v42 = vpop.f32.mrf.mxu1 }
 0xa83   :  { %v7341_v45 = vadd.f32 %v7677_v9, %v7300_v50 }
 0xa84   :  { %v7679_v33 = vpop.f32.mrf.mxu1 }
 0xa85   :  { %v7347_v26 = vmax.f32 %v7341_v45, 0.0  ;;  %v7680_v46 = vadd.f32 %v7679_v33, %v7678_v42 }
 0xa87   :  { %v7344_v36 = vadd.f32 %v7680_v46, %v7303_v55  ;;  %7731 = vmatprep.mubr.f32.mxu0 %v7347_v26 }
 0xa89   :  { %v7348_v21 = vmax.f32 %v7344_v36, 0.0 }
 0xa8b   :  { %7732 = vmatmul.mubr.f32.vlgmr.msra.gmra.mxu0 %v7348_v21 }
 0xb4b   :  { %v7733_v35 = vpop.f32.mrf.mxu0 }
 0xb4c   :  { %v7444_v16 = vadd.f32 %v7733_v35, %v7592_v23 }
 0xb4d   :  { %v7438_v24 = vpop.f32.mrf.mxu0 }
 0xb4e   :  { %v7439_v59 = vadd.f32 %v7592_v23, %v7438_v24  ;;  %v7451_v2 = vsel %vm7449_vm0, %v7444_v16, -3.4028235e+38 }
 0xb50   :  { %v7450_v43 = vsel %vm7449_vm0, %v7439_v59, -3.4028235e+38 }
 0xb51   :  { %7452 = vmax.xlane.f32.xlu0 %v7450_v43 }
 0xb55   :  { %7454 = vmax.xlane.f32.xlu0 %v7451_v2 }
 0xbda   :  { %v7453_v56 = vpop.xlane.xlu0 %7452 }
 0xbdb   :  { %v7456_v3 = vsub.f32 %v7450_v43, %v7453_v56 }
 0xbdd   :  { %v7458_v29 = vmul.f32 1.442695, %v7456_v3 }
 0xbde   :  { %v7455_v0 = vpop.xlane.xlu0 %7454 }
 0xbdf   :  { %7865 = vpow2.f32 %v7458_v29  ;;  %v7457_v53 = vsub.f32 %v7451_v2, %v7455_v0 }
 0xbe1   :  { %v7460_v17 = vmul.f32 1.442695, %v7457_v53 }
 0xbe3   :  { %7867 = vpow2.f32 %v7460_v17 }
 0xbec   :  { %v7866_v57 = vpop.eup %7865 }
 0xbed   :  { %7462 = vadd.xlane.f32.xlu1 %v7866_v57 }
 0xbf0   :  { %v7868_v13 = vpop.eup %7867 }
 0xbf1   :  { %7464 = vadd.xlane.f32.xlu1 %v7868_v13 }
 0xc76   :  { %v7463_v8 = vpop.xlane.xlu1 %7462 }
 0xc77   :  { %7869 = vrcp.f32 %v7463_v8 }
 0xc7a   :  { %v7465_v12 = vpop.xlane.xlu1 %7464 }
 0xc7b   :  { %7871 = vrcp.f32 %v7465_v12 }
 0xc84   :  { %v7870_v32 = vpop.eup %7869 }
 0xc85   :  { %v7467_v15 = vmul.f32 %v7870_v32, %v7866_v57 }
 0xc87   :  { %7470 = vst [vmem:[#allocation16] sm:$0xff] %v7467_v15 }
 0xc88   :  { %v7872_v41 = vpop.eup %7871 }
 0xc89   :  { %v7469_v34 = vmul.f32 %v7872_v41, %v7868_v13 }
 0xc8b   :  { %7471 = vst [vmem:[#allocation16 + $0x8] sm:$0xff] %v7469_v34 }
 0xc8c   :  { %8152 = shalt.err (!%p8149_p2)
}
 0xc8d   :  { %7483 = dma.vmem_to_hbm [thread:$0]  %s7478_s7, 256, %s8809_s8, [#allocation4], %s8185_s2, %s8185_s2, %s8186_s19  }
 0xc8e   :  { %8171 = dma.done.wait [#allocation4], 256  }
 0xc8f   :  { %8172 = vsyncadd [#allocation4], 4294967040 }
 0xc90   :  { %7487 = vsyncpa [#allocation3], 1 }
 0xc91   :  { %7488 = vsyncpa [#allocation6], 1 }
 0xc92   :  { %7489 = vsyncpa [#allocation9], 1 }
 0xc93   :  { %7490 = vsyncpa [#allocation12], 1 }
 0xc94   :  { %7491 = vsyncpa [#allocation15], 1 }
 0xc95   :  { %7492 = vsyncpa [#allocation4], 1 }

</bundles_post_ra>
